<compile_context>
chip_gen: v5e
topology: v5e:2x2
jax: 0.10.0
libtpu: 0.0.40
codegen_flags: <defaults>
</compile_context>

<pallas_src>
import functools

import numpy as np
import jax
import jax.numpy as jnp
from jax.experimental import pallas as pl
from jax.experimental.pallas import tpu as pltpu


# --------------------------- fused Pallas kernel ---------------------------

def _lenet_kernel(x_ref, w1t_ref, b1r_ref, se1_ref, so1_ref, te1_ref, to1_ref,
                  w2t_ref, b2r_ref, se2_ref, so2_ref, te2_ref, to2_ref,
                  wf1_ref, bf1_ref, wf2_ref, bf2_ref,
                  out_ref, p1_ref, p2_ref):
    f32 = jnp.float32
    k1 = w1t_ref.shape[0]          # conv1 kernel height (5)
    k2 = w2t_ref.shape[0]          # conv2 kernel height (5)
    h1 = se1_ref.shape[1]          # conv1 output rows (24)
    h2 = se2_ref.shape[1]          # conv2 output rows (8)

    # ---- conv1 + bias + ReLU: Toeplitz matmuls over W, H taps via shifted row slabs
    acc = jnp.dot(x_ref[0, 0:h1, :], w1t_ref[0], preferred_element_type=f32)
    for kh in range(1, k1):
        acc += jnp.dot(x_ref[0, kh:kh + h1, :], w1t_ref[kh],
                       preferred_element_type=f32)
    y1 = jnp.maximum(acc + b1r_ref[...], 0.0)                       # (24, 480)

    # ---- maxpool 2x2/2: exact 0/1 selection matmuls (rows then lane-groups)
    a1 = jnp.maximum(jnp.dot(se1_ref[...], y1, preferred_element_type=f32),
                     jnp.dot(so1_ref[...], y1, preferred_element_type=f32))
    p1_ref[...] = jnp.maximum(
        jnp.dot(a1, te1_ref[...], preferred_element_type=f32),
        jnp.dot(a1, to1_ref[...], preferred_element_type=f32))      # (12, 240)

    # ---- conv2 + bias + ReLU
    acc = jnp.dot(p1_ref[0:h2, :], w2t_ref[0], preferred_element_type=f32)
    for kh in range(1, k2):
        acc += jnp.dot(p1_ref[kh:kh + h2, :], w2t_ref[kh],
                       preferred_element_type=f32)
    y2 = jnp.maximum(acc + b2r_ref[...], 0.0)                       # (8, 400)

    # ---- maxpool 2x2/2
    a2 = jnp.maximum(jnp.dot(se2_ref[...], y2, preferred_element_type=f32),
                     jnp.dot(so2_ref[...], y2, preferred_element_type=f32))
    p2_ref[...] = jnp.maximum(
        jnp.dot(a2, te2_ref[...], preferred_element_type=f32),
        jnp.dot(a2, to2_ref[...], preferred_element_type=f32))      # (4, 200)

    # ---- flatten (free: fc1 rows are pre-permuted to (h, w, c) order) + fc1 + ReLU
    hp2 = wf1_ref.shape[0]
    fc_h = jnp.dot(p2_ref[0:1, :], wf1_ref[0], preferred_element_type=f32)
    for r in range(1, hp2):
        fc_h += jnp.dot(p2_ref[r:r + 1, :], wf1_ref[r],
                        preferred_element_type=f32)
    fc_h = jnp.maximum(fc_h + bf1_ref[...], 0.0)                    # (1, 500)

    # ---- fc2 (classes lane-padded to 128, padded lanes have bias -1e30) + log-softmax
    logits = jnp.dot(fc_h, wf2_ref[...], preferred_element_type=f32) + bf2_ref[...]
    m = jnp.max(logits, axis=1, keepdims=True)
    lse = jnp.log(jnp.sum(jnp.exp(logits - m), axis=1, keepdims=True))
    out_ref[0] = (logits - m - lse).astype(out_ref.dtype)


def _const_spec(a):
    nd = a.ndim
    return pl.BlockSpec(a.shape, lambda i, _nd=nd: (0,) * _nd)


@functools.partial(jax.jit, static_argnames=("classes",))
def lenet_forward(kparams, x_nchw, *, classes):
    b, cin, hh, ww = x_nchw.shape
    # NCHW -> per-image (H, W*C): lanes = (w, c)
    x = jnp.transpose(x_nchw, (0, 2, 3, 1)).astype(jnp.float32).reshape(b, hh, ww * cin)

    args = (x, kparams["w1t"], kparams["b1r"], kparams["se1"], kparams["so1"],
            kparams["te1"], kparams["to1"], kparams["w2t"], kparams["b2r"],
            kparams["se2"], kparams["so2"], kparams["te2"], kparams["to2"],
            kparams["wf1"], kparams["bf1"], kparams["wf2"], kparams["bf2"])

    cpad = kparams["wf2"].shape[1]
    hp1, wp1c = kparams["se1"].shape[0], kparams["te1"].shape[1]    # (12, 240)
    hp2, wp2c = kparams["se2"].shape[0], kparams["te2"].shape[1]    # (4, 200)

    in_specs = [pl.BlockSpec((1, hh, ww * cin), lambda i: (i, 0, 0))]
    in_specs += [_const_spec(a) for a in args[1:]]

    out = pl.pallas_call(
        _lenet_kernel,
        out_shape=jax.ShapeDtypeStruct((b, 1, cpad), jnp.float32),
        grid_spec=pltpu.PrefetchScalarGridSpec(
            num_scalar_prefetch=0,
            grid=(b,),
            in_specs=in_specs,
            out_specs=pl.BlockSpec((1, 1, cpad), lambda i: (i, 0, 0)),
            scratch_shapes=[pltpu.VMEM((hp1, wp1c), jnp.float32),
                            pltpu.VMEM((hp2, wp2c), jnp.float32)]),
        compiler_params=pltpu.CompilerParams(
            dimension_semantics=("parallel",),
            vmem_limit_bytes=40 * 1024 * 1024),
    )(*args)
    return out.reshape(b, cpad)[:, :classes]


# --------------------- parameter preparation (one-time) ---------------------

def _toeplitz_conv_weight(w, w_in):
    """w: (cout, cin, K, K) PyTorch conv weight -> (K, w_in*cin, w_out*cout)
    banded block-Toeplitz slabs so that conv = sum_kh x[h+kh, :] @ t[kh]."""
    cout, cin, k, _ = w.shape
    w_out = w_in - k + 1
    t = np.zeros((k, w_in * cin, w_out * cout), np.float32)
    for kh in range(k):
        for kw in range(k):
            blk = w[:, :, kh, kw].astype(np.float32).T        # (cin, cout)
            for wo in range(w_out):
                wi = wo + kw
                t[kh, wi * cin:(wi + 1) * cin, wo * cout:(wo + 1) * cout] = blk
    return t


def _row_select(h_pool, parity):
    s = np.zeros((h_pool, 2 * h_pool), np.float32)
    s[np.arange(h_pool), 2 * np.arange(h_pool) + parity] = 1.0
    return s


def _col_select(w_pool, c, parity):
    t = np.zeros((2 * w_pool * c, w_pool * c), np.float32)
    for wp in range(w_pool):
        for cc in range(c):
            t[(2 * wp + parity) * c + cc, wp * c + cc] = 1.0
    return t


def init_lenet_params(key, num_channels, classes):
    """PyTorch-layout parameters: conv (cout,cin,kh,kw), linear (out,in)."""
    ks = jax.random.split(key, 8)
    s = 0.05
    return {
        "conv1_w": s * jax.random.normal(ks[0], (20, num_channels, 5, 5), jnp.float32),
        "conv1_b": s * jax.random.normal(ks[1], (20,), jnp.float32),
        "conv2_w": s * jax.random.normal(ks[2], (50, 20, 5, 5), jnp.float32),
        "conv2_b": s * jax.random.normal(ks[3], (50,), jnp.float32),
        "fc1_w": s * jax.random.normal(ks[4], (500, 800), jnp.float32),
        "fc1_b": s * jax.random.normal(ks[5], (500,), jnp.float32),
        "fc2_w": s * jax.random.normal(ks[6], (classes, 500), jnp.float32),
        "fc2_b": s * jax.random.normal(ks[7], (classes,), jnp.float32),
    }


def prepare_kernel_params(params, image_hw=28):
    """One-time conversion of PyTorch-layout weights into kernel layouts."""
    w1 = np.asarray(params["conv1_w"], np.float32)
    b1 = np.asarray(params["conv1_b"], np.float32)
    w2 = np.asarray(params["conv2_w"], np.float32)
    b2 = np.asarray(params["conv2_b"], np.float32)
    wf1 = np.asarray(params["fc1_w"], np.float32)
    bf1 = np.asarray(params["fc1_b"], np.float32)
    wf2 = np.asarray(params["fc2_w"], np.float32)
    bf2 = np.asarray(params["fc2_b"], np.float32)

    c1, _, k, _ = w1.shape                      # 20, cin, 5
    c2 = w2.shape[0]                            # 50
    classes, hidden = wf2.shape                 # e.g. 10, 500

    h1 = image_hw - k + 1                       # 24
    hp1 = h1 // 2                               # 12
    h2 = hp1 - k + 1                            # 8
    hp2 = h2 // 2                               # 4
    assert wf1.shape[1] == hp2 * hp2 * c2, "fc1 in_features inconsistent with input size"

    cpad = ((classes + 127) // 128) * 128       # lane-dense logits

    # Convs as banded block-Toeplitz matmul slabs (im2col folded into weights).
    w1t = _toeplitz_conv_weight(w1, image_hw)   # (5, 28*cin, 24*20)
    w2t = _toeplitz_conv_weight(w2, hp1)        # (5, 12*20, 8*50)
    b1r = np.tile(b1, h1)[None, :]              # (1, 480)
    b2r = np.tile(b2, h2)[None, :]              # (1, 400)

    # Exact 0/1 selection matrices implementing the 2x2/2 maxpool as matmuls.
    se1, so1 = _row_select(hp1, 0), _row_select(hp1, 1)             # (12, 24)
    te1, to1 = _col_select(hp1, c1, 0), _col_select(hp1, c1, 1)     # (480, 240)
    se2, so2 = _row_select(hp2, 0), _row_select(hp2, 1)             # (4, 8)
    te2, to2 = _col_select(hp2, c2, 0), _col_select(hp2, c2, 1)     # (400, 200)

    # fc1 rows permuted from torch (c, h, w) flatten order to kernel (h, w, c).
    perm = np.zeros(hp2 * hp2 * c2, np.int64)
    for hh in range(hp2):
        for ww in range(hp2):
            for cc in range(c2):
                perm[hh * hp2 * c2 + ww * c2 + cc] = cc * hp2 * hp2 + hh * hp2 + ww
    wf1_k = wf1.T[perm, :].reshape(hp2, hp2 * c2, hidden)           # (4, 200, 500)
    bf1_r = bf1[None, :]

    # fc2 lane-padded to cpad; padded lanes get bias -1e30 (ignored by softmax).
    wf2_k = np.zeros((hidden, cpad), np.float32)
    wf2_k[:, :classes] = wf2.T
    bf2_r = np.full((1, cpad), -1e30, np.float32)
    bf2_r[0, :classes] = bf2

    kp = {"w1t": w1t, "b1r": b1r, "se1": se1, "so1": so1, "te1": te1, "to1": to1,
          "w2t": w2t, "b2r": b2r, "se2": se2, "so2": so2, "te2": te2, "to2": to2,
          "wf1": wf1_k, "bf1": bf1_r, "wf2": wf2_k, "bf2": bf2_r}
    return {name: jnp.asarray(v) for name, v in kp.items()}


# --------------------------- pure-JAX reference -----------------------------

def lenet_reference(params, x_nchw):
    hp = jax.lax.Precision.HIGHEST
    y = jax.lax.conv_general_dilated(
        x_nchw.astype(jnp.float32), params["conv1_w"], (1, 1), "VALID",
        dimension_numbers=("NCHW", "OIHW", "NCHW"), precision=hp)
    y = jnp.maximum(y + params["conv1_b"][None, :, None, None], 0.0)
    b, c, h, w = y.shape
    y = y.reshape(b, c, h // 2, 2, w // 2, 2).max(axis=(3, 5))
    y = jax.lax.conv_general_dilated(
        y, params["conv2_w"], (1, 1), "VALID",
        dimension_numbers=("NCHW", "OIHW", "NCHW"), precision=hp)
    y = jnp.maximum(y + params["conv2_b"][None, :, None, None], 0.0)
    b, c, h, w = y.shape
    y = y.reshape(b, c, h // 2, 2, w // 2, 2).max(axis=(3, 5))
    y = y.reshape(b, -1)
    y = jnp.maximum(jnp.dot(y, params["fc1_w"].T, precision=hp) + params["fc1_b"], 0.0)
    logits = jnp.dot(y, params["fc2_w"].T, precision=hp) + params["fc2_b"]
    return jax.nn.log_softmax(logits, axis=1)


# ---------------------------------- main ------------------------------------

if __name__ == "__main__":
    key = jax.random.PRNGKey(0)
    k_param, k_data = jax.random.split(key)

    num_channels, classes, batch = 1, 10, 2
    # 28x28 input is implied by fc1 in_features=800 (= 50 * 4 * 4).
    x = jax.random.normal(k_data, (batch, num_channels, 28, 28), jnp.float32)

    params = init_lenet_params(k_param, num_channels, classes)
    kparams = prepare_kernel_params(params, image_hw=28)

    out = lenet_forward(kparams, x, classes=classes)
    out = jax.block_until_ready(out)

    assert out.shape == (batch, classes)
    # log-softmax sanity: rows of exp(out) sum to 1
    row_sums = jnp.sum(jnp.exp(out), axis=1)
    assert jnp.allclose(row_sums, jnp.ones_like(row_sums), atol=1e-4)
    # numerical check against a pure-JAX reference forward
    ref = lenet_reference(params, x)
    max_err = jnp.max(jnp.abs(out - ref))
    assert max_err < 5e-2, max_err

    print("KERNEL_OK")
</pallas_src>

<mosaic_0001>
module attributes {stable_mosaic.version = 11 : i64} {
  func.func @_lenet_kernel(%arg0: i32, %arg1: memref<1x28x28xf32, #tpu.memory_space<vmem>>, %arg2: memref<5x28x480xf32, #tpu.memory_space<vmem>>, %arg3: memref<1x480xf32, #tpu.memory_space<vmem>>, %arg4: memref<12x24xf32, #tpu.memory_space<vmem>>, %arg5: memref<12x24xf32, #tpu.memory_space<vmem>>, %arg6: memref<480x240xf32, #tpu.memory_space<vmem>>, %arg7: memref<480x240xf32, #tpu.memory_space<vmem>>, %arg8: memref<5x240x400xf32, #tpu.memory_space<vmem>>, %arg9: memref<1x400xf32, #tpu.memory_space<vmem>>, %arg10: memref<4x8xf32, #tpu.memory_space<vmem>>, %arg11: memref<4x8xf32, #tpu.memory_space<vmem>>, %arg12: memref<400x200xf32, #tpu.memory_space<vmem>>, %arg13: memref<400x200xf32, #tpu.memory_space<vmem>>, %arg14: memref<4x200x500xf32, #tpu.memory_space<vmem>>, %arg15: memref<1x500xf32, #tpu.memory_space<vmem>>, %arg16: memref<500x128xf32, #tpu.memory_space<vmem>>, %arg17: memref<1x128xf32, #tpu.memory_space<vmem>>, %arg18: memref<1x1x128xf32, #tpu.memory_space<vmem>>, %arg19: memref<12x240xf32, #tpu.memory_space<vmem>>, %arg20: memref<4x200xf32, #tpu.memory_space<vmem>>) attributes {dimension_semantics = [#tpu.dimension_semantics<parallel>], iteration_bounds = array<i64: 2>, scalar_prefetch = 0 : i64, scratch_operands = 2 : i64, tpu.core_type = #tpu.core_type<tc>, window_params = [{transform_indices = @transform_0, window_bounds = array<i64: 1, 28, 28>}, {pipeline_mode = #tpu.pipeline_mode<synchronous>, transform_indices = @transform_1, window_bounds = array<i64: 5, 28, 480>}, {pipeline_mode = #tpu.pipeline_mode<synchronous>, transform_indices = @transform_2, window_bounds = array<i64: 1, 480>}, {pipeline_mode = #tpu.pipeline_mode<synchronous>, transform_indices = @transform_3, window_bounds = array<i64: 12, 24>}, {pipeline_mode = #tpu.pipeline_mode<synchronous>, transform_indices = @transform_4, window_bounds = array<i64: 12, 24>}, {pipeline_mode = #tpu.pipeline_mode<synchronous>, transform_indices = @transform_5, window_bounds = array<i64: 480, 240>}, {pipeline_mode = #tpu.pipeline_mode<synchronous>, transform_indices = @transform_6, window_bounds = array<i64: 480, 240>}, {pipeline_mode = #tpu.pipeline_mode<synchronous>, transform_indices = @transform_7, window_bounds = array<i64: 5, 240, 400>}, {pipeline_mode = #tpu.pipeline_mode<synchronous>, transform_indices = @transform_8, window_bounds = array<i64: 1, 400>}, {pipeline_mode = #tpu.pipeline_mode<synchronous>, transform_indices = @transform_9, window_bounds = array<i64: 4, 8>}, {pipeline_mode = #tpu.pipeline_mode<synchronous>, transform_indices = @transform_10, window_bounds = array<i64: 4, 8>}, {pipeline_mode = #tpu.pipeline_mode<synchronous>, transform_indices = @transform_11, window_bounds = array<i64: 400, 200>}, {pipeline_mode = #tpu.pipeline_mode<synchronous>, transform_indices = @transform_12, window_bounds = array<i64: 400, 200>}, {pipeline_mode = #tpu.pipeline_mode<synchronous>, transform_indices = @transform_13, window_bounds = array<i64: 4, 200, 500>}, {pipeline_mode = #tpu.pipeline_mode<synchronous>, transform_indices = @transform_14, window_bounds = array<i64: 1, 500>}, {pipeline_mode = #tpu.pipeline_mode<synchronous>, transform_indices = @transform_15, window_bounds = array<i64: 500, 128>}, {pipeline_mode = #tpu.pipeline_mode<synchronous>, transform_indices = @transform_16, window_bounds = array<i64: 1, 128>}, {transform_indices = @transform_17, window_bounds = array<i64: 1, 1, 128>}]} {
    %c0 = arith.constant 0 : index
    %c0_0 = arith.constant 0 : index
    %c0_1 = arith.constant 0 : index
    %0 = vector.load %arg1[%c0, %c0_0, %c0_1] : memref<1x28x28xf32, #tpu.memory_space<vmem>>, vector<1x24x28xf32>
    %1 = vector.shape_cast %0 : vector<1x24x28xf32> to vector<24x28xf32>
    %c0_2 = arith.constant 0 : index
    %c0_3 = arith.constant 0 : index
    %c0_4 = arith.constant 0 : index
    %2 = vector.load %arg2[%c0_2, %c0_3, %c0_4] : memref<5x28x480xf32, #tpu.memory_space<vmem>>, vector<1x28x480xf32>
    %3 = vector.shape_cast %2 : vector<1x28x480xf32> to vector<28x480xf32>
    %cst = arith.constant dense<0.000000e+00> : vector<24x480xf32>
    %4 = tpu.matmul %1, %3, %cst {dimension_numbers = #tpu.dot_dimension_numbers<[1], [0], [0], [1], [0, 0, 1, 1], [], []>} : vector<24x28xf32>, vector<28x480xf32>, vector<24x480xf32> -> vector<24x480xf32>
    %c0_5 = arith.constant 0 : index
    %c1 = arith.constant 1 : index
    %c0_6 = arith.constant 0 : index
    %5 = vector.load %arg1[%c0_5, %c1, %c0_6] : memref<1x28x28xf32, #tpu.memory_space<vmem>>, vector<1x24x28xf32>
    %6 = vector.shape_cast %5 : vector<1x24x28xf32> to vector<24x28xf32>
    %c1_7 = arith.constant 1 : index
    %c0_8 = arith.constant 0 : index
    %c0_9 = arith.constant 0 : index
    %7 = vector.load %arg2[%c1_7, %c0_8, %c0_9] : memref<5x28x480xf32, #tpu.memory_space<vmem>>, vector<1x28x480xf32>
    %8 = vector.shape_cast %7 : vector<1x28x480xf32> to vector<28x480xf32>
    %cst_10 = arith.constant dense<0.000000e+00> : vector<24x480xf32>
    %9 = tpu.matmul %6, %8, %cst_10 {dimension_numbers = #tpu.dot_dimension_numbers<[1], [0], [0], [1], [0, 0, 1, 1], [], []>} : vector<24x28xf32>, vector<28x480xf32>, vector<24x480xf32> -> vector<24x480xf32>
    %10 = arith.addf %4, %9 : vector<24x480xf32>
    %c0_11 = arith.constant 0 : index
    %c2 = arith.constant 2 : index
    %c0_12 = arith.constant 0 : index
    %11 = vector.load %arg1[%c0_11, %c2, %c0_12] : memref<1x28x28xf32, #tpu.memory_space<vmem>>, vector<1x24x28xf32>
    %12 = vector.shape_cast %11 : vector<1x24x28xf32> to vector<24x28xf32>
    %c2_13 = arith.constant 2 : index
    %c0_14 = arith.constant 0 : index
    %c0_15 = arith.constant 0 : index
    %13 = vector.load %arg2[%c2_13, %c0_14, %c0_15] : memref<5x28x480xf32, #tpu.memory_space<vmem>>, vector<1x28x480xf32>
    %14 = vector.shape_cast %13 : vector<1x28x480xf32> to vector<28x480xf32>
    %cst_16 = arith.constant dense<0.000000e+00> : vector<24x480xf32>
    %15 = tpu.matmul %12, %14, %cst_16 {dimension_numbers = #tpu.dot_dimension_numbers<[1], [0], [0], [1], [0, 0, 1, 1], [], []>} : vector<24x28xf32>, vector<28x480xf32>, vector<24x480xf32> -> vector<24x480xf32>
    %16 = arith.addf %10, %15 : vector<24x480xf32>
    %c0_17 = arith.constant 0 : index
    %c3 = arith.constant 3 : index
    %c0_18 = arith.constant 0 : index
    %17 = vector.load %arg1[%c0_17, %c3, %c0_18] : memref<1x28x28xf32, #tpu.memory_space<vmem>>, vector<1x24x28xf32>
    %18 = vector.shape_cast %17 : vector<1x24x28xf32> to vector<24x28xf32>
    %c3_19 = arith.constant 3 : index
    %c0_20 = arith.constant 0 : index
    %c0_21 = arith.constant 0 : index
    %19 = vector.load %arg2[%c3_19, %c0_20, %c0_21] : memref<5x28x480xf32, #tpu.memory_space<vmem>>, vector<1x28x480xf32>
    %20 = vector.shape_cast %19 : vector<1x28x480xf32> to vector<28x480xf32>
    %cst_22 = arith.constant dense<0.000000e+00> : vector<24x480xf32>
    %21 = tpu.matmul %18, %20, %cst_22 {dimension_numbers = #tpu.dot_dimension_numbers<[1], [0], [0], [1], [0, 0, 1, 1], [], []>} : vector<24x28xf32>, vector<28x480xf32>, vector<24x480xf32> -> vector<24x480xf32>
    %22 = arith.addf %16, %21 : vector<24x480xf32>
    %c0_23 = arith.constant 0 : index
    %c4 = arith.constant 4 : index
    %c0_24 = arith.constant 0 : index
    %23 = vector.load %arg1[%c0_23, %c4, %c0_24] : memref<1x28x28xf32, #tpu.memory_space<vmem>>, vector<1x24x28xf32>
    %24 = vector.shape_cast %23 : vector<1x24x28xf32> to vector<24x28xf32>
    %c4_25 = arith.constant 4 : index
    %c0_26 = arith.constant 0 : index
    %c0_27 = arith.constant 0 : index
    %25 = vector.load %arg2[%c4_25, %c0_26, %c0_27] : memref<5x28x480xf32, #tpu.memory_space<vmem>>, vector<1x28x480xf32>
    %26 = vector.shape_cast %25 : vector<1x28x480xf32> to vector<28x480xf32>
    %cst_28 = arith.constant dense<0.000000e+00> : vector<24x480xf32>
    %27 = tpu.matmul %24, %26, %cst_28 {dimension_numbers = #tpu.dot_dimension_numbers<[1], [0], [0], [1], [0, 0, 1, 1], [], []>} : vector<24x28xf32>, vector<28x480xf32>, vector<24x480xf32> -> vector<24x480xf32>
    %28 = arith.addf %22, %27 : vector<24x480xf32>
    %c0_29 = arith.constant 0 : index
    %c0_30 = arith.constant 0 : index
    %29 = vector.load %arg3[%c0_29, %c0_30] : memref<1x480xf32, #tpu.memory_space<vmem>>, vector<1x480xf32>
    %30 = vector.broadcast %29 : vector<1x480xf32> to vector<24x480xf32>
    %31 = arith.addf %28, %30 : vector<24x480xf32>
    %cst_31 = arith.constant 0.000000e+00 : f32
    %32 = vector.broadcast %cst_31 : f32 to vector<24x480xf32>
    %33 = arith.maximumf %31, %32 : vector<24x480xf32>
    %c0_32 = arith.constant 0 : index
    %c0_33 = arith.constant 0 : index
    %34 = vector.load %arg4[%c0_32, %c0_33] : memref<12x24xf32, #tpu.memory_space<vmem>>, vector<12x24xf32>
    %cst_34 = arith.constant dense<0.000000e+00> : vector<12x480xf32>
    %35 = tpu.matmul %34, %33, %cst_34 {dimension_numbers = #tpu.dot_dimension_numbers<[1], [0], [0], [1], [0, 0, 1, 1], [], []>} : vector<12x24xf32>, vector<24x480xf32>, vector<12x480xf32> -> vector<12x480xf32>
    %c0_35 = arith.constant 0 : index
    %c0_36 = arith.constant 0 : index
    %36 = vector.load %arg5[%c0_35, %c0_36] : memref<12x24xf32, #tpu.memory_space<vmem>>, vector<12x24xf32>
    %cst_37 = arith.constant dense<0.000000e+00> : vector<12x480xf32>
    %37 = tpu.matmul %36, %33, %cst_37 {dimension_numbers = #tpu.dot_dimension_numbers<[1], [0], [0], [1], [0, 0, 1, 1], [], []>} : vector<12x24xf32>, vector<24x480xf32>, vector<12x480xf32> -> vector<12x480xf32>
    %38 = arith.maximumf %35, %37 : vector<12x480xf32>
    %c0_38 = arith.constant 0 : index
    %c0_39 = arith.constant 0 : index
    %39 = vector.load %arg6[%c0_38, %c0_39] : memref<480x240xf32, #tpu.memory_space<vmem>>, vector<480x240xf32>
    %cst_40 = arith.constant dense<0.000000e+00> : vector<12x240xf32>
    %40 = tpu.matmul %38, %39, %cst_40 {dimension_numbers = #tpu.dot_dimension_numbers<[1], [0], [0], [1], [0, 0, 1, 1], [], []>} : vector<12x480xf32>, vector<480x240xf32>, vector<12x240xf32> -> vector<12x240xf32>
    %c0_41 = arith.constant 0 : index
    %c0_42 = arith.constant 0 : index
    %41 = vector.load %arg7[%c0_41, %c0_42] : memref<480x240xf32, #tpu.memory_space<vmem>>, vector<480x240xf32>
    %cst_43 = arith.constant dense<0.000000e+00> : vector<12x240xf32>
    %42 = tpu.matmul %38, %41, %cst_43 {dimension_numbers = #tpu.dot_dimension_numbers<[1], [0], [0], [1], [0, 0, 1, 1], [], []>} : vector<12x480xf32>, vector<480x240xf32>, vector<12x240xf32> -> vector<12x240xf32>
    %43 = arith.maximumf %40, %42 : vector<12x240xf32>
    %c0_44 = arith.constant 0 : index
    %c0_45 = arith.constant 0 : index
    %44 = vector.load %arg19[%c0_44, %c0_45] : memref<12x240xf32, #tpu.memory_space<vmem>>, vector<12x240xf32>
    tpu.vector_store %arg19[%c0_44, %c0_45], %43 {strides = array<i32>} : memref<12x240xf32, #tpu.memory_space<vmem>>, vector<12x240xf32>,
    %c0_46 = arith.constant 0 : index
    %c0_47 = arith.constant 0 : index
    %45 = vector.load %arg19[%c0_46, %c0_47] : memref<12x240xf32, #tpu.memory_space<vmem>>, vector<8x240xf32>
    %c0_48 = arith.constant 0 : index
    %c0_49 = arith.constant 0 : index
    %c0_50 = arith.constant 0 : index
    %46 = vector.load %arg8[%c0_48, %c0_49, %c0_50] : memref<5x240x400xf32, #tpu.memory_space<vmem>>, vector<1x240x400xf32>
    %47 = vector.shape_cast %46 : vector<1x240x400xf32> to vector<240x400xf32>
    %cst_51 = arith.constant dense<0.000000e+00> : vector<8x400xf32>
    %48 = tpu.matmul %45, %47, %cst_51 {dimension_numbers = #tpu.dot_dimension_numbers<[1], [0], [0], [1], [0, 0, 1, 1], [], []>} : vector<8x240xf32>, vector<240x400xf32>, vector<8x400xf32> -> vector<8x400xf32>
    %c1_52 = arith.constant 1 : index
    %c0_53 = arith.constant 0 : index
    %49 = vector.load %arg19[%c1_52, %c0_53] : memref<12x240xf32, #tpu.memory_space<vmem>>, vector<8x240xf32>
    %c1_54 = arith.constant 1 : index
    %c0_55 = arith.constant 0 : index
    %c0_56 = arith.constant 0 : index
    %50 = vector.load %arg8[%c1_54, %c0_55, %c0_56] : memref<5x240x400xf32, #tpu.memory_space<vmem>>, vector<1x240x400xf32>
    %51 = vector.shape_cast %50 : vector<1x240x400xf32> to vector<240x400xf32>
    %cst_57 = arith.constant dense<0.000000e+00> : vector<8x400xf32>
    %52 = tpu.matmul %49, %51, %cst_57 {dimension_numbers = #tpu.dot_dimension_numbers<[1], [0], [0], [1], [0, 0, 1, 1], [], []>} : vector<8x240xf32>, vector<240x400xf32>, vector<8x400xf32> -> vector<8x400xf32>
    %53 = arith.addf %48, %52 : vector<8x400xf32>
    %c2_58 = arith.constant 2 : index
    %c0_59 = arith.constant 0 : index
    %54 = vector.load %arg19[%c2_58, %c0_59] : memref<12x240xf32, #tpu.memory_space<vmem>>, vector<8x240xf32>
    %c2_60 = arith.constant 2 : index
    %c0_61 = arith.constant 0 : index
    %c0_62 = arith.constant 0 : index
    %55 = vector.load %arg8[%c2_60, %c0_61, %c0_62] : memref<5x240x400xf32, #tpu.memory_space<vmem>>, vector<1x240x400xf32>
    %56 = vector.shape_cast %55 : vector<1x240x400xf32> to vector<240x400xf32>
    %cst_63 = arith.constant dense<0.000000e+00> : vector<8x400xf32>
    %57 = tpu.matmul %54, %56, %cst_63 {dimension_numbers = #tpu.dot_dimension_numbers<[1], [0], [0], [1], [0, 0, 1, 1], [], []>} : vector<8x240xf32>, vector<240x400xf32>, vector<8x400xf32> -> vector<8x400xf32>
    %58 = arith.addf %53, %57 : vector<8x400xf32>
    %c3_64 = arith.constant 3 : index
    %c0_65 = arith.constant 0 : index
    %59 = vector.load %arg19[%c3_64, %c0_65] : memref<12x240xf32, #tpu.memory_space<vmem>>, vector<8x240xf32>
    %c3_66 = arith.constant 3 : index
    %c0_67 = arith.constant 0 : index
    %c0_68 = arith.constant 0 : index
    %60 = vector.load %arg8[%c3_66, %c0_67, %c0_68] : memref<5x240x400xf32, #tpu.memory_space<vmem>>, vector<1x240x400xf32>
    %61 = vector.shape_cast %60 : vector<1x240x400xf32> to vector<240x400xf32>
    %cst_69 = arith.constant dense<0.000000e+00> : vector<8x400xf32>
    %62 = tpu.matmul %59, %61, %cst_69 {dimension_numbers = #tpu.dot_dimension_numbers<[1], [0], [0], [1], [0, 0, 1, 1], [], []>} : vector<8x240xf32>, vector<240x400xf32>, vector<8x400xf32> -> vector<8x400xf32>
    %63 = arith.addf %58, %62 : vector<8x400xf32>
    %c4_70 = arith.constant 4 : index
    %c0_71 = arith.constant 0 : index
    %64 = vector.load %arg19[%c4_70, %c0_71] : memref<12x240xf32, #tpu.memory_space<vmem>>, vector<8x240xf32>
    %c4_72 = arith.constant 4 : index
    %c0_73 = arith.constant 0 : index
    %c0_74 = arith.constant 0 : index
    %65 = vector.load %arg8[%c4_72, %c0_73, %c0_74] : memref<5x240x400xf32, #tpu.memory_space<vmem>>, vector<1x240x400xf32>
    %66 = vector.shape_cast %65 : vector<1x240x400xf32> to vector<240x400xf32>
    %cst_75 = arith.constant dense<0.000000e+00> : vector<8x400xf32>
    %67 = tpu.matmul %64, %66, %cst_75 {dimension_numbers = #tpu.dot_dimension_numbers<[1], [0], [0], [1], [0, 0, 1, 1], [], []>} : vector<8x240xf32>, vector<240x400xf32>, vector<8x400xf32> -> vector<8x400xf32>
    %68 = arith.addf %63, %67 : vector<8x400xf32>
    %c0_76 = arith.constant 0 : index
    %c0_77 = arith.constant 0 : index
    %69 = vector.load %arg9[%c0_76, %c0_77] : memref<1x400xf32, #tpu.memory_space<vmem>>, vector<1x400xf32>
    %70 = vector.broadcast %69 : vector<1x400xf32> to vector<8x400xf32>
    %71 = arith.addf %68, %70 : vector<8x400xf32>
    %cst_78 = arith.constant 0.000000e+00 : f32
    %72 = vector.broadcast %cst_78 : f32 to vector<8x400xf32>
    %73 = arith.maximumf %71, %72 : vector<8x400xf32>
    %c0_79 = arith.constant 0 : index
    %c0_80 = arith.constant 0 : index
    %74 = vector.load %arg10[%c0_79, %c0_80] : memref<4x8xf32, #tpu.memory_space<vmem>>, vector<4x8xf32>
    %cst_81 = arith.constant dense<0.000000e+00> : vector<4x400xf32>
    %75 = tpu.matmul %74, %73, %cst_81 {dimension_numbers = #tpu.dot_dimension_numbers<[1], [0], [0], [1], [0, 0, 1, 1], [], []>} : vector<4x8xf32>, vector<8x400xf32>, vector<4x400xf32> -> vector<4x400xf32>
    %c0_82 = arith.constant 0 : index
    %c0_83 = arith.constant 0 : index
    %76 = vector.load %arg11[%c0_82, %c0_83] : memref<4x8xf32, #tpu.memory_space<vmem>>, vector<4x8xf32>
    %cst_84 = arith.constant dense<0.000000e+00> : vector<4x400xf32>
    %77 = tpu.matmul %76, %73, %cst_84 {dimension_numbers = #tpu.dot_dimension_numbers<[1], [0], [0], [1], [0, 0, 1, 1], [], []>} : vector<4x8xf32>, vector<8x400xf32>, vector<4x400xf32> -> vector<4x400xf32>
    %78 = arith.maximumf %75, %77 : vector<4x400xf32>
    %c0_85 = arith.constant 0 : index
    %c0_86 = arith.constant 0 : index
    %79 = vector.load %arg12[%c0_85, %c0_86] : memref<400x200xf32, #tpu.memory_space<vmem>>, vector<400x200xf32>
    %cst_87 = arith.constant dense<0.000000e+00> : vector<4x200xf32>
    %80 = tpu.matmul %78, %79, %cst_87 {dimension_numbers = #tpu.dot_dimension_numbers<[1], [0], [0], [1], [0, 0, 1, 1], [], []>} : vector<4x400xf32>, vector<400x200xf32>, vector<4x200xf32> -> vector<4x200xf32>
    %c0_88 = arith.constant 0 : index
    %c0_89 = arith.constant 0 : index
    %81 = vector.load %arg13[%c0_88, %c0_89] : memref<400x200xf32, #tpu.memory_space<vmem>>, vector<400x200xf32>
    %cst_90 = arith.constant dense<0.000000e+00> : vector<4x200xf32>
    %82 = tpu.matmul %78, %81, %cst_90 {dimension_numbers = #tpu.dot_dimension_numbers<[1], [0], [0], [1], [0, 0, 1, 1], [], []>} : vector<4x400xf32>, vector<400x200xf32>, vector<4x200xf32> -> vector<4x200xf32>
    %83 = arith.maximumf %80, %82 : vector<4x200xf32>
    %c0_91 = arith.constant 0 : index
    %c0_92 = arith.constant 0 : index
    %84 = vector.load %arg20[%c0_91, %c0_92] : memref<4x200xf32, #tpu.memory_space<vmem>>, vector<4x200xf32>
    tpu.vector_store %arg20[%c0_91, %c0_92], %83 {strides = array<i32>} : memref<4x200xf32, #tpu.memory_space<vmem>>, vector<4x200xf32>,
    %c0_93 = arith.constant 0 : index
    %c0_94 = arith.constant 0 : index
    %85 = vector.load %arg20[%c0_93, %c0_94] : memref<4x200xf32, #tpu.memory_space<vmem>>, vector<1x200xf32>
    %c0_95 = arith.constant 0 : index
    %c0_96 = arith.constant 0 : index
    %c0_97 = arith.constant 0 : index
    %86 = vector.load %arg14[%c0_95, %c0_96, %c0_97] : memref<4x200x500xf32, #tpu.memory_space<vmem>>, vector<1x200x500xf32>
    %87 = vector.shape_cast %86 : vector<1x200x500xf32> to vector<200x500xf32>
    %cst_98 = arith.constant dense<0.000000e+00> : vector<1x500xf32>
    %88 = tpu.matmul %85, %87, %cst_98 {dimension_numbers = #tpu.dot_dimension_numbers<[1], [0], [0], [1], [0, 0, 1, 1], [], []>} : vector<1x200xf32>, vector<200x500xf32>, vector<1x500xf32> -> vector<1x500xf32>
    %c1_99 = arith.constant 1 : index
    %c0_100 = arith.constant 0 : index
    %89 = vector.load %arg20[%c1_99, %c0_100] : memref<4x200xf32, #tpu.memory_space<vmem>>, vector<1x200xf32>
    %c1_101 = arith.constant 1 : index
    %c0_102 = arith.constant 0 : index
    %c0_103 = arith.constant 0 : index
    %90 = vector.load %arg14[%c1_101, %c0_102, %c0_103] : memref<4x200x500xf32, #tpu.memory_space<vmem>>, vector<1x200x500xf32>
    %91 = vector.shape_cast %90 : vector<1x200x500xf32> to vector<200x500xf32>
    %cst_104 = arith.constant dense<0.000000e+00> : vector<1x500xf32>
    %92 = tpu.matmul %89, %91, %cst_104 {dimension_numbers = #tpu.dot_dimension_numbers<[1], [0], [0], [1], [0, 0, 1, 1], [], []>} : vector<1x200xf32>, vector<200x500xf32>, vector<1x500xf32> -> vector<1x500xf32>
    %93 = arith.addf %88, %92 : vector<1x500xf32>
    %c2_105 = arith.constant 2 : index
    %c0_106 = arith.constant 0 : index
    %94 = vector.load %arg20[%c2_105, %c0_106] : memref<4x200xf32, #tpu.memory_space<vmem>>, vector<1x200xf32>
    %c2_107 = arith.constant 2 : index
    %c0_108 = arith.constant 0 : index
    %c0_109 = arith.constant 0 : index
    %95 = vector.load %arg14[%c2_107, %c0_108, %c0_109] : memref<4x200x500xf32, #tpu.memory_space<vmem>>, vector<1x200x500xf32>
    %96 = vector.shape_cast %95 : vector<1x200x500xf32> to vector<200x500xf32>
    %cst_110 = arith.constant dense<0.000000e+00> : vector<1x500xf32>
    %97 = tpu.matmul %94, %96, %cst_110 {dimension_numbers = #tpu.dot_dimension_numbers<[1], [0], [0], [1], [0, 0, 1, 1], [], []>} : vector<1x200xf32>, vector<200x500xf32>, vector<1x500xf32> -> vector<1x500xf32>
    %98 = arith.addf %93, %97 : vector<1x500xf32>
    %c3_111 = arith.constant 3 : index
    %c0_112 = arith.constant 0 : index
    %99 = vector.load %arg20[%c3_111, %c0_112] : memref<4x200xf32, #tpu.memory_space<vmem>>, vector<1x200xf32>
    %c3_113 = arith.constant 3 : index
    %c0_114 = arith.constant 0 : index
    %c0_115 = arith.constant 0 : index
    %100 = vector.load %arg14[%c3_113, %c0_114, %c0_115] : memref<4x200x500xf32, #tpu.memory_space<vmem>>, vector<1x200x500xf32>
    %101 = vector.shape_cast %100 : vector<1x200x500xf32> to vector<200x500xf32>
    %cst_116 = arith.constant dense<0.000000e+00> : vector<1x500xf32>
    %102 = tpu.matmul %99, %101, %cst_116 {dimension_numbers = #tpu.dot_dimension_numbers<[1], [0], [0], [1], [0, 0, 1, 1], [], []>} : vector<1x200xf32>, vector<200x500xf32>, vector<1x500xf32> -> vector<1x500xf32>
    %103 = arith.addf %98, %102 : vector<1x500xf32>
    %c0_117 = arith.constant 0 : index
    %c0_118 = arith.constant 0 : index
    %104 = vector.load %arg15[%c0_117, %c0_118] : memref<1x500xf32, #tpu.memory_space<vmem>>, vector<1x500xf32>
    %105 = arith.addf %103, %104 : vector<1x500xf32>
    %cst_119 = arith.constant 0.000000e+00 : f32
    %106 = vector.broadcast %cst_119 : f32 to vector<1x500xf32>
    %107 = arith.maximumf %105, %106 : vector<1x500xf32>
    %c0_120 = arith.constant 0 : index
    %c0_121 = arith.constant 0 : index
    %108 = vector.load %arg16[%c0_120, %c0_121] : memref<500x128xf32, #tpu.memory_space<vmem>>, vector<500x128xf32>
    %cst_122 = arith.constant dense<0.000000e+00> : vector<1x128xf32>
    %109 = tpu.matmul %107, %108, %cst_122 {dimension_numbers = #tpu.dot_dimension_numbers<[1], [0], [0], [1], [0, 0, 1, 1], [], []>} : vector<1x500xf32>, vector<500x128xf32>, vector<1x128xf32> -> vector<1x128xf32>
    %c0_123 = arith.constant 0 : index
    %c0_124 = arith.constant 0 : index
    %110 = vector.load %arg17[%c0_123, %c0_124] : memref<1x128xf32, #tpu.memory_space<vmem>>, vector<1x128xf32>
    %111 = arith.addf %109, %110 : vector<1x128xf32>
    %cst_125 = arith.constant dense<0xFF800000> : vector<1xf32>
    %112 = vector.multi_reduction <maximumf>, %111, %cst_125 [1] : vector<1x128xf32> to vector<1xf32>
    %113 = vector.shape_cast %112 : vector<1xf32> to vector<1x1xf32>
    %114 = vector.broadcast %113 : vector<1x1xf32> to vector<1x128xf32>
    %115 = arith.subf %111, %114 : vector<1x128xf32>
    %116 = math.exp %115 : vector<1x128xf32>
    %cst_126 = arith.constant dense<0.000000e+00> : vector<1xf32>
    %117 = vector.multi_reduction <add>, %116, %cst_126 [1] : vector<1x128xf32> to vector<1xf32>
    %118 = vector.shape_cast %117 : vector<1xf32> to vector<1x1xf32>
    %119 = math.log %118 : vector<1x1xf32>
    %120 = vector.broadcast %113 : vector<1x1xf32> to vector<1x128xf32>
    %121 = arith.subf %111, %120 : vector<1x128xf32>
    %122 = vector.broadcast %119 : vector<1x1xf32> to vector<1x128xf32>
    %123 = arith.subf %121, %122 : vector<1x128xf32>
    %c0_127 = arith.constant 0 : index
    %c0_128 = arith.constant 0 : index
    %c0_129 = arith.constant 0 : index
    %124 = vector.load %arg18[%c0_127, %c0_128, %c0_129] : memref<1x1x128xf32, #tpu.memory_space<vmem>>, vector<1x1x128xf32>
    %125 = vector.shape_cast %124 : vector<1x1x128xf32> to vector<1x128xf32>
    %126 = vector.shape_cast %123 : vector<1x128xf32> to vector<1x1x128xf32>
    tpu.vector_store %arg18[%c0_127, %c0_128, %c0_129], %126 {strides = array<i32>} : memref<1x1x128xf32, #tpu.memory_space<vmem>>, vector<1x1x128xf32>,
    return
  }
  func.func @transform_0(%arg0: i32) -> (i32, i32, i32) {
    %c0_i32 = arith.constant 0 : i32
    %c0_i32_0 = arith.constant 0 : i32
    %c0_i32_1 = arith.constant 0 : i32
    return %arg0, %c0_i32, %c0_i32_0 : i32, i32, i32
  }
  func.func @transform_1(%arg0: i32) -> (i32, i32, i32) {
    %c0_i32 = arith.constant 0 : i32
    %c0_i32_0 = arith.constant 0 : i32
    %c0_i32_1 = arith.constant 0 : i32
    %c0_i32_2 = arith.constant 0 : i32
    return %c0_i32, %c0_i32_0, %c0_i32_1 : i32, i32, i32
  }
  func.func @transform_2(%arg0: i32) -> (i32, i32) {
    %c0_i32 = arith.constant 0 : i32
    %c0_i32_0 = arith.constant 0 : i32
    %c0_i32_1 = arith.constant 0 : i32
    return %c0_i32, %c0_i32_0 : i32, i32
  }
  func.func @transform_3(%arg0: i32) -> (i32, i32) {
    %c0_i32 = arith.constant 0 : i32
    %c0_i32_0 = arith.constant 0 : i32
    %c0_i32_1 = arith.constant 0 : i32
    return %c0_i32, %c0_i32_0 : i32, i32
  }
  func.func @transform_4(%arg0: i32) -> (i32, i32) {
    %c0_i32 = arith.constant 0 : i32
    %c0_i32_0 = arith.constant 0 : i32
    %c0_i32_1 = arith.constant 0 : i32
    return %c0_i32, %c0_i32_0 : i32, i32
  }
  func.func @transform_5(%arg0: i32) -> (i32, i32) {
    %c0_i32 = arith.constant 0 : i32
    %c0_i32_0 = arith.constant 0 : i32
    %c0_i32_1 = arith.constant 0 : i32
    return %c0_i32, %c0_i32_0 : i32, i32
  }
  func.func @transform_6(%arg0: i32) -> (i32, i32) {
    %c0_i32 = arith.constant 0 : i32
    %c0_i32_0 = arith.constant 0 : i32
    %c0_i32_1 = arith.constant 0 : i32
    return %c0_i32, %c0_i32_0 : i32, i32
  }
  func.func @transform_7(%arg0: i32) -> (i32, i32, i32) {
    %c0_i32 = arith.constant 0 : i32
    %c0_i32_0 = arith.constant 0 : i32
    %c0_i32_1 = arith.constant 0 : i32
    %c0_i32_2 = arith.constant 0 : i32
    return %c0_i32, %c0_i32_0, %c0_i32_1 : i32, i32, i32
  }
  func.func @transform_8(%arg0: i32) -> (i32, i32) {
    %c0_i32 = arith.constant 0 : i32
    %c0_i32_0 = arith.constant 0 : i32
    %c0_i32_1 = arith.constant 0 : i32
    return %c0_i32, %c0_i32_0 : i32, i32
  }
  func.func @transform_9(%arg0: i32) -> (i32, i32) {
    %c0_i32 = arith.constant 0 : i32
    %c0_i32_0 = arith.constant 0 : i32
    %c0_i32_1 = arith.constant 0 : i32
    return %c0_i32, %c0_i32_0 : i32, i32
  }
  func.func @transform_10(%arg0: i32) -> (i32, i32) {
    %c0_i32 = arith.constant 0 : i32
    %c0_i32_0 = arith.constant 0 : i32
    %c0_i32_1 = arith.constant 0 : i32
    return %c0_i32, %c0_i32_0 : i32, i32
  }
  func.func @transform_11(%arg0: i32) -> (i32, i32) {
    %c0_i32 = arith.constant 0 : i32
    %c0_i32_0 = arith.constant 0 : i32
    %c0_i32_1 = arith.constant 0 : i32
    return %c0_i32, %c0_i32_0 : i32, i32
  }
  func.func @transform_12(%arg0: i32) -> (i32, i32) {
    %c0_i32 = arith.constant 0 : i32
    %c0_i32_0 = arith.constant 0 : i32
    %c0_i32_1 = arith.constant 0 : i32
    return %c0_i32, %c0_i32_0 : i32, i32
  }
  func.func @transform_13(%arg0: i32) -> (i32, i32, i32) {
    %c0_i32 = arith.constant 0 : i32
    %c0_i32_0 = arith.constant 0 : i32
    %c0_i32_1 = arith.constant 0 : i32
    %c0_i32_2 = arith.constant 0 : i32
    return %c0_i32, %c0_i32_0, %c0_i32_1 : i32, i32, i32
  }
  func.func @transform_14(%arg0: i32) -> (i32, i32) {
    %c0_i32 = arith.constant 0 : i32
    %c0_i32_0 = arith.constant 0 : i32
    %c0_i32_1 = arith.constant 0 : i32
    return %c0_i32, %c0_i32_0 : i32, i32
  }
  func.func @transform_15(%arg0: i32) -> (i32, i32) {
    %c0_i32 = arith.constant 0 : i32
    %c0_i32_0 = arith.constant 0 : i32
    %c0_i32_1 = arith.constant 0 : i32
    return %c0_i32, %c0_i32_0 : i32, i32
  }
  func.func @transform_16(%arg0: i32) -> (i32, i32) {
    %c0_i32 = arith.constant 0 : i32
    %c0_i32_0 = arith.constant 0 : i32
    %c0_i32_1 = arith.constant 0 : i32
    return %c0_i32, %c0_i32_0 : i32, i32
  }
  func.func @transform_17(%arg0: i32) -> (i32, i32, i32) {
    %c0_i32 = arith.constant 0 : i32
    %c0_i32_0 = arith.constant 0 : i32
    %c0_i32_1 = arith.constant 0 : i32
    return %arg0, %c0_i32, %c0_i32_0 : i32, i32, i32
  }
}

</mosaic_0001>

<bundles_post_ra>
// kernel: lenet_forward.1
= control target key start
LH: loop header
LB: loop body
LE: loop exit
PB: predicated region body
PF: predicated region fallthrough
CT: control target
= control target key end

     0   :  { %s12384_s0 = inlined_call_operand.vmem [shape: f32[2,28,28], index: 0, kind: input, shape index: {}]   ;;  %s12385_s1 = inlined_call_operand.vmem [shape: f32[5,28,480], index: 1, kind: input, shape index: {}]   ;;  %s12386_s2 = inlined_call_operand.vmem [shape: f32[1,480], index: 2, kind: input, shape index: {}]   ;;  %s12387_s3 = inlined_call_operand.vmem [shape: f32[12,24], index: 3, kind: input, shape index: {}]   ;;  %s12388_s4 = inlined_call_operand.vmem [shape: f32[12,24], index: 4, kind: input, shape index: {}]   ;;  %s12389_s5 = inlined_call_operand.vmem [shape: f32[480,240], index: 5, kind: input, shape index: {}]   ;;  %s12390_s6 = inlined_call_operand.vmem [shape: f32[480,240], index: 6, kind: input, shape index: {}]   ;;  %s12391_s7 = inlined_call_operand.vmem [shape: f32[5,240,400], index: 7, kind: input, shape index: {}]   ;;  %s12392_s8 = inlined_call_operand.vmem [shape: f32[1,400], index: 8, kind: input, shape index: {}]   ;;  %s12393_s9 = inlined_call_operand.vmem [shape: f32[4,8], index: 9, kind: input, shape index: {}]   ;;  %s12394_s10 = inlined_call_operand.vmem [shape: f32[4,8], index: 10, kind: input, shape index: {}]   ;;  %s12395_s11 = inlined_call_operand.vmem [shape: f32[400,200], index: 11, kind: input, shape index: {}]   ;;  %s12396_s12 = inlined_call_operand.vmem [shape: f32[400,200], index: 12, kind: input, shape index: {}]   ;;  %s12397_s13 = inlined_call_operand.vmem [shape: f32[4,200,500], index: 13, kind: input, shape index: {}]   ;;  %s12398_s14 = inlined_call_operand.vmem [shape: f32[1,500], index: 14, kind: input, shape index: {}]   ;;  %s12399_s15 = inlined_call_operand.vmem [shape: f32[500,128], index: 15, kind: input, shape index: {}]   ;;  %s12400_s16 = inlined_call_operand.vmem [shape: f32[1,128], index: 16, kind: input, shape index: {}]   ;;  %s12401_s17 = inlined_call_operand.hbm [shape: f32[2,1,128], index: 17, kind: output, shape index: {}]  }
   0x1   :  { %12411 = sst [smem:[#allocation20_spill]] %s12384_s0 }
   0x2   :  { %12412 = sst [smem:[#allocation21_spill]] %s12385_s1 }
   0x3   :  { %12413 = sst [smem:[#allocation22_spill]] %s12386_s2 }
   0x4   :  { %12414 = sst [smem:[#allocation23_spill]] %s12387_s3 }
   0x5   :  { %22 = vsyncpa [#allocation5], 0 }
   0x6   :  { %24 = vsyncpa [#allocation5 + $0x1], 0  ;;  %s6935_s24 = smov 0   ;;  %s6937_s25 = smov 0  }
   0x7   :  { %s6939_s26 = smov 0   ;;  %s6941_s27 = smov 0  }
   0x8 LB: > { %12415 = sst [smem:[#allocation7_spill]] %s6831_s24  ;;  %s6956_s28 = sadd.s32 4294967295, %s6843_s27   ;;  %s6843_s27 = sphi %s6941_s27, %s12444_s27   ;;  %s6839_s26 = sphi %s6939_s26, %s12446_s26   ;;  %s6835_s25 = sphi %s6937_s25, %s12448_s25   ;;  %s6831_s24 = sphi %s6935_s24, %s12447_s24  }
   0x9   : > { %12416 = sst [smem:[#allocation8_spill]] %s6839_s26  ;;  %s5727_s29 = sadd.s32 4294967294, %s6843_s27  }
   0xa   : > { %12417 = sst [smem:[#allocation9_spill]] %s6843_s27  ;;  %s6960_s0 = sadd.s32 1, %s6843_s27  }
   0xb   : > { %12418 = sst [smem:[#allocation10_spill]] %s6960_s0  ;;  %s399_s30 = sadd.s32 1, %s6839_s26 }
   0xc   : > { %s396_s18 = ssub.s32 %s6843_s27, %s6960_s0  ;;  %p409_p0 = scmp.ne.s32.totalorder %s6839_s26, %s6835_s25 }
   0xd   : > { %p397_p1 = scmp.eq.s32.totalorder %s396_s18, 0  ;;  %p410_p2 = scmp.eq.s32.totalorder %s6956_s28, 1 }
   0xe   : > { %p415_p3 = scmp.ne.s32.totalorder %s6835_s25, %s6831_s24  ;;  %p416_p4 = scmp.eq.s32.totalorder %s5727_s29, 1 }
   0xf   : > { %s6971_s19 = scalar_select %p397_p1, %s6839_s26, %s399_s30  }
  0x10   : > { %p6973_p5 = por %p410_p2, %p409_p0  ;;  %p6977_p6 = por %p416_p4, %p415_p3 }
  0x11   : > { %12419 = sst [smem:[#allocation11_spill]] %s6971_s19  ;;  %p5730_p7 = scmp.ge.s32.totalorder %s6843_s27, 1 }
  0x12   : > { %s12420_s1 = scalar_select %p6973_p5, 1, 0 }
  0x13   : > { %s12422_s20 = scalar_select %p6977_p6, 1, 0 }
  0x14   : > { %12421 = sst [smem:[#allocation12_spill]] %s12420_s1  ;;  %p490_p8 = scmp.lt.s32.totalorder %s6843_s27, 3 }
  0x15   : > { %12423 = sst [smem:[#allocation13_spill]] %s12422_s20 }
  0x16   : > { %p491_p9 = pnand %p5730_p7, %p490_p8 }
  0x18   : > { %494 = sbr.rel (%p491_p9) target bundleno = 2139 (0x85b), region = 88 }
  0x1d   : > { %s12424_s23 = sld [smem:[#allocation21_spill]]  ;;  %vm595_vm0 = vcmask 1043456   ;;  %p541_p10 = scmp.lt.s32.totalorder %s6956_s28, 1  ;;  %vm585_vm1 = vcmask 228352   ;;  %vm1344_vm2 = vcmask 195584   ;;  %vm1671_vm3 = vcmask 785408  }
  0x1e   : > { %s12425_s0 = sld [smem:[#allocation20_spill]]  ;;  %vm2427_vm4 = vcmask 1046528   ;;  %vm2171_vm5 = vcmask 916480   ;;  %vm2174_vm6 = vcmask 912384   ;;  %vm2889_vm7 = vcmask 1045504   ;;  %s539_s30 = sand.u32 1, %s6835_s25  }
  0x1f   : > { %s542_s18 = scalar_select %p541_p10, %s6956_s28, 1  ;;  %vm3192_vm8 = vcmask 1044480   ;;  %vm3687_vm9 = vcmask 64512   ;;  %vm3959_vm10 = vcmask 130048   ;;  %vm4390_vm11 = vcmask 588804  }
  0x20   : > { %s12432_s2 = sld [smem:[#allocation22_spill]]  ;;  %vm4391_vm12 = vmor %vm4390_vm11, %vm595_vm0  ;;  %vm4601_vm13 = vcmask 588800   ;;  %vm5558_vm14 = vcmask 949248   ;;  %vm5645_vm15 = vcmask 1040384   ;;  %s5668_s21 = scalar_lea.hbm %s12401_s17, %s6956_s28 }
  0x21   : > { %s6733_s19 = sshll.u32 %s542_s18, 5  ;;  %s12439_s3 = sld [smem:[#allocation23_spill]] }
  0x22   : > { %s540_s18 = scalar_lea.vmem [#allocation4], %s539_s30  ;;  %s5672_s24 = sshll.u32 %s5668_s21, 4  ;;  %s5673_s24 = int_to_ptr.hbm [resolvable:$true] %s5672_s24 }
  0x23   : > { %v5745_v0 = vld [vmem:[%s12424_s23 + $0xe0] sm:$0xf]  ;;  %v5746_v1 = vld [vmem:[%s12424_s23 + $0xe8] sm:$0xf]  ;;  %v5747_v3 = vld [vmem:[%s12424_s23 + $0xf0] sm:$0xf] }
  0x24   : > { %v5741_v2 = vld [vmem:[%s12424_s23 + $0xc0] sm:$0xff]  ;;  %5749 = vmatpush.msk.msra.mxu0 %vm595_vm0, %v5745_v0  ;;  %5753 = vmatpush.msk.msra.mxu1 %vm595_vm0, %v5746_v1  ;;  %v5748_v4 = vld [vmem:[%s12424_s23 + $0xf8] sm:$0xf]  ;;  %v5742_v5 = vld [vmem:[%s12424_s23 + $0xc8] sm:$0xff]  ;;  %s7040_s1 = scalar_lea.vmem %s12425_s0, %s6733_s19  ;;  %s5670_s20 = sshll.u32 %s540_s18, 4  ;;  %s5671_s20 = int_to_ptr.vmem [resolvable:$true] %s5670_s20 }
  0x25   : > { %5757 = vmatpush.msk.msra.mxu2 %vm595_vm0, %v5747_v3  ;;  %6734 = vmatpush.msk.msra.mxu3 %vm595_vm0, %v5748_v4  ;;  %v5743_v6 = vld [vmem:[%s12424_s23 + $0xd0] sm:$0xff]  ;;  %v5744_v7 = vld [vmem:[%s12424_s23 + $0xd8] sm:$0xff]  ;;  %v5737_v8 = vld [vmem:[%s12424_s23 + $0xa0] sm:$0xff]  ;;  %s5660_s22 = scalar_lea.sflag [#allocation5], %s539_s30  ;;  %s6795_s29 = sshra.s32 %s5673_s24, 4  ;;  %s6796_s29 = int_to_ptr.hbm [resolvable:$true] %s6795_s29 }
  0x26   : > { %621 = vmatpush.msra.mxu0 %v5741_v2  ;;  %647 = vmatpush.msra.mxu1 %v5742_v5  ;;  %v5738_v9 = vld [vmem:[%s12424_s23 + $0xa8] sm:$0xff]  ;;  %v5739_v10 = vld [vmem:[%s12424_s23 + $0xb0] sm:$0xff]  ;;  %v5740_v11 = vld [vmem:[%s12424_s23 + $0xb8] sm:$0xff]  ;;  %s6801_s28 = scalar_lea.hbm %s12401_s17, 2  ;;  %p6802_p0 = scmp.lt.s32.totalorder %s6796_s29, %s12401_s17 }
  0x27   : > { %673 = vmatpush.msra.mxu2 %v5743_v6  ;;  %6735 = vmatpush.msra.mxu3 %v5744_v7  ;;  %v5733_v12 = vld [vmem:[%s12424_s23 + $0x80] sm:$0xff]  ;;  %v5734_v13 = vld [vmem:[%s12424_s23 + $0x88] sm:$0xff]  ;;  %v5735_v14 = vld [vmem:[%s12424_s23 + $0x90] sm:$0xff] }
  0x28   : > { %622 = vmatpush.msra.mxu0 %v5737_v8  ;;  %648 = vmatpush.msra.mxu1 %v5738_v9  ;;  %v5736_v15 = vld [vmem:[%s12424_s23 + $0x98] sm:$0xff]  ;;  %v7043_v16 = vld [vmem:[%s7040_s1 + $0x1] sm:$0xff]  ;;  %v566_v17 = vld [vmem:[%s7040_s1 + $0x9] sm:$0xff] }
  0x29   : > { %674 = vmatpush.msra.mxu2 %v5739_v10  ;;  %6736 = vmatpush.msra.mxu3 %v5740_v11  ;;  %v564_v18 = vld [vmem:[%s12424_s23 + $0x78] sm:$0xf]  ;;  %v562_v19 = vld [vmem:[%s12424_s23 + $0x68] sm:$0xf]  ;;  %v563_v20 = vld [vmem:[%s12424_s23 + $0x70] sm:$0xf] }
  0x2a   : > { %623 = vmatpush.msra.mxu0 %v5733_v12  ;;  %649 = vmatpush.msra.mxu1 %v5734_v13  ;;  %v560_v21 = vld [vmem:[%s12424_s23 + $0x58] sm:$0xff]  ;;  %v558_v22 = vld [vmem:[%s12424_s23 + $0x48] sm:$0xff]  ;;  %v559_v23 = vld [vmem:[%s12424_s23 + $0x50] sm:$0xff] }
  0x2b   : > { %675 = vmatpush.msra.mxu2 %v5735_v14  ;;  %6737 = vmatpush.msra.mxu3 %v5736_v15  ;;  %v556_v24 = vld [vmem:[%s12424_s23 + $0x38] sm:$0xff]  ;;  %v554_v25 = vld [vmem:[%s12424_s23 + $0x28] sm:$0xff]  ;;  %v555_v26 = vld [vmem:[%s12424_s23 + $0x30] sm:$0xff] }
  0x2c   : > { %5750 = vmatmul.msk.f32.vlgmr.msra.gmra.mxu0 %vm585_vm1, %v7043_v16  ;;  %5754 = vmatmul.msk.f32.vlgmr.msra.gmra.mxu1 %vm585_vm1, %v7043_v16  ;;  %v567_v27 = vld [vmem:[%s7040_s1 + $0x11] sm:$0xff]  ;;  %v550_v29 = vld [vmem:[%s12424_s23 + $0x8] sm:$0xff]  ;;  %v561_v31 = vld [vmem:[%s12424_s23 + $0x60] sm:$0xf] }
  0x2d   : > { %5758 = vmatmul.msk.f32.vlgmr.msra.gmra.mxu2 %vm585_vm1, %v7043_v16  ;;  %5763 = vmatmul.msk.f32.vlgmr.msra.gmra.mxu3 %vm585_vm1, %v566_v17  ;;  %v552_v28 = vld [vmem:[%s12424_s23 + $0x18] sm:$0xff]  ;;  %v551_v30 = vld [vmem:[%s12424_s23 + $0x10] sm:$0xff]  ;;  %v5794_v33 = vld [vmem:[%s12424_s23 + $0x168] sm:$0xf] }
  0x2e   : > { %5777 = vmatpush.msk.msrb.mxu3 %vm595_vm0, %v564_v18  ;;  %5761 = vmatpush.msk.msrb.mxu0 %vm595_vm0, %v5748_v4  ;;  %v5796_v32 = vld [vmem:[%s12424_s23 + $0x178] sm:$0xf]  ;;  %v5795_v34 = vld [vmem:[%s12424_s23 + $0x170] sm:$0xf]  ;;  %v557_v35 = vld [vmem:[%s12424_s23 + $0x40] sm:$0xff] }
  0x2f   : > { %5769 = vmatpush.msk.msrb.mxu1 %vm595_vm0, %v562_v19  ;;  %5773 = vmatpush.msk.msrb.mxu2 %vm595_vm0, %v563_v20  ;;  %v5792_v36 = vld [vmem:[%s12424_s23 + $0x158] sm:$0xff]  ;;  %v5790_v37 = vld [vmem:[%s12424_s23 + $0x148] sm:$0xff]  ;;  %v5791_v38 = vld [vmem:[%s12424_s23 + $0x150] sm:$0xff] }
  0x30   : > { %824 = vmatpush.msrb.mxu3 %v560_v21  ;;  %699 = vmatpush.msrb.mxu0 %v5744_v7  ;;  %v546_v39 = vld [vmem:[%s7040_s1] sm:$0xff]  ;;  %v5788_v41 = vld [vmem:[%s12424_s23 + $0x138] sm:$0xff]  ;;  %v5786_v42 = vld [vmem:[%s12424_s23 + $0x128] sm:$0xff] }
  0x31   : > { %772 = vmatpush.msrb.mxu1 %v558_v22  ;;  %798 = vmatpush.msrb.mxu2 %v559_v23  ;;  %v553_v40 = vld [vmem:[%s12424_s23 + $0x20] sm:$0xff]  ;;  %v5787_v43 = vld [vmem:[%s12424_s23 + $0x130] sm:$0xff]  ;;  %v5784_v45 = vld [vmem:[%s12424_s23 + $0x118] sm:$0xff] }
  0x32   : > { %825 = vmatpush.msrb.mxu3 %v556_v24  ;;  %700 = vmatpush.msrb.mxu0 %v5740_v11  ;;  %v549_v44 = vld [vmem:[%s12424_s23] sm:$0xff]  ;;  %v5782_v46 = vld [vmem:[%s12424_s23 + $0x108] sm:$0xff]  ;;  %v5783_v47 = vld [vmem:[%s12424_s23 + $0x110] sm:$0xff] }
  0x33   : > { %773 = vmatpush.msrb.mxu1 %v554_v25  ;;  %799 = vmatpush.msrb.mxu2 %v555_v26  ;;  %v547_v48 = vld [vmem:[%s7040_s1 + $0x8] sm:$0xff]  ;;  %v5793_v49 = vld [vmem:[%s12424_s23 + $0x160] sm:$0xf]  ;;  %v5828_v51 = vld [vmem:[%s12424_s23 + $0x1f8] sm:$0xf] }
  0x34   : > { %5751 = vmatmul.msk.f32.gmra.mxu0 %vm585_vm1, %v566_v17  ;;  %5755 = vmatmul.msk.f32.gmra.mxu1 %vm585_vm1, %v566_v17  ;;  %v5789_v50 = vld [vmem:[%s12424_s23 + $0x140] sm:$0xff]  ;;  %v5824_v52 = vld [vmem:[%s12424_s23 + $0x1d8] sm:$0xff]  ;;  %v548_v55 = vld [vmem:[%s7040_s1 + $0x10] sm:$0xff] }
  0x35   : > { %5759 = vmatmul.msk.f32.gmra.mxu2 %vm585_vm1, %v566_v17  ;;  %5764 = vmatmul.msk.f32.gmra.mxu3 %vm585_vm1, %v567_v27  ;;  %v5785_v53 = vld [vmem:[%s12424_s23 + $0x120] sm:$0xff]  ;;  %v5820_v54 = vld [vmem:[%s12424_s23 + $0x1b8] sm:$0xff]  ;;  %v5826_v58 = vld [vmem:[%s12424_s23 + $0x1e8] sm:$0xf] }
  0x36   : > { %826 = vmatpush.msrb.mxu3 %v552_v28  ;;  %701 = vmatpush.msrb.mxu0 %v5736_v15  ;;  %v5781_v56 = vld [vmem:[%s12424_s23 + $0x100] sm:$0xff]  ;;  %v5816_v57 = vld [vmem:[%s12424_s23 + $0x198] sm:$0xff]  ;;  %v5827_v59 = vld [vmem:[%s12424_s23 + $0x1f0] sm:$0xf] }
  0x37   : > { %774 = vmatpush.msrb.mxu1 %v550_v29  ;;  %800 = vmatpush.msrb.mxu2 %v551_v30  ;;  %v5822_v60 = vld [vmem:[%s12424_s23 + $0x1c8] sm:$0xff]  ;;  %v5823_v61 = vld [vmem:[%s12424_s23 + $0x1d0] sm:$0xff]  ;;  %v5825_v3 = vld [vmem:[%s12424_s23 + $0x1e0] sm:$0xf] }
  0x38   : > { %5765 = vmatpush.msk.msra.mxu0 %vm595_vm0, %v561_v31  ;;  %5809 = vmatpush.msk.msra.mxu3 %vm595_vm0, %v5796_v32  ;;  %v5818_v62 = vld [vmem:[%s12424_s23 + $0x1a8] sm:$0xff]  ;;  %v5819_v63 = vld [vmem:[%s12424_s23 + $0x1b0] sm:$0xff]  ;;  %v5821_v4 = vld [vmem:[%s12424_s23 + $0x1c0] sm:$0xff] }
  0x39   : > { %5801 = vmatpush.msk.msra.mxu1 %vm595_vm0, %v5794_v33  ;;  %5805 = vmatpush.msk.msra.mxu2 %vm595_vm0, %v5795_v34  ;;  %v837_v0 = vld [vmem:[%s7040_s1 + $0x2] sm:$0xff]  ;;  %v5815_v2 = vld [vmem:[%s12424_s23 + $0x190] sm:$0xff]  ;;  %v5860_v8 = vld [vmem:[%s12424_s23 + $0x278] sm:$0xf] }
  0x3a   : > { %746 = vmatpush.msra.mxu0 %v557_v35  ;;  %969 = vmatpush.msra.mxu3 %v5792_v36  ;;  %v5814_v1 = vld [vmem:[%s12424_s23 + $0x188] sm:$0xff]  ;;  %v5817_v5 = vld [vmem:[%s12424_s23 + $0x1a0] sm:$0xff]  ;;  %v5856_v9 = vld [vmem:[%s12424_s23 + $0x258] sm:$0xff] }
  0x3b   : > { %917 = vmatpush.msra.mxu1 %v5790_v37  ;;  %943 = vmatpush.msra.mxu2 %v5791_v38  ;;  %v838_v6 = vld [vmem:[%s7040_s1 + $0xa] sm:$0xff]  ;;  %v5813_v7 = vld [vmem:[%s12424_s23 + $0x180] sm:$0xff]  ;;  %v5852_v10 = vld [vmem:[%s12424_s23 + $0x238] sm:$0xff] }
  0x3c   : > { %5752 = vmatmul.msk.f32.gmra.mxu0 %vm585_vm1, %v567_v27  ;;  %5756 = vmatmul.msk.f32.gmra.mxu1 %vm585_vm1, %v567_v27  ;;  %v839_v11 = vld [vmem:[%s7040_s1 + $0x12] sm:$0xff]  ;;  %v5858_v13 = vld [vmem:[%s12424_s23 + $0x268] sm:$0xf]  ;;  %v5857_v22 = vld [vmem:[%s12424_s23 + $0x260] sm:$0xf] }
  0x3d   : > { %5760 = vmatmul.msk.f32.gmra.mxu2 %vm585_vm1, %v567_v27  ;;  %5778 = vmatmul.msk.f32.vlgmr.msrb.gmra.mxu3 %vm585_vm1, %v546_v39  ;;  %v5848_v12 = vld [vmem:[%s12424_s23 + $0x218] sm:$0xff]  ;;  %v5859_v14 = vld [vmem:[%s12424_s23 + $0x270] sm:$0xf]  ;;  %v5854_v15 = vld [vmem:[%s12424_s23 + $0x248] sm:$0xff] }
  0x3e   : > { %747 = vmatpush.msra.mxu0 %v553_v40  ;;  %970 = vmatpush.msra.mxu3 %v5788_v41  ;;  %v5850_v17 = vld [vmem:[%s12424_s23 + $0x228] sm:$0xff]  ;;  %v5851_v18 = vld [vmem:[%s12424_s23 + $0x230] sm:$0xff]  ;;  %v5853_v23 = vld [vmem:[%s12424_s23 + $0x240] sm:$0xff] }
  0x3f   : > { %918 = vmatpush.msra.mxu1 %v5786_v42  ;;  %944 = vmatpush.msra.mxu2 %v5787_v43  ;;  %v994_v19 = vld [vmem:[%s7040_s1 + $0x3] sm:$0xff]  ;;  %v5847_v21 = vld [vmem:[%s12424_s23 + $0x210] sm:$0xff] }
  0x40   : > { %748 = vmatpush.msra.mxu0 %v549_v44  ;;  %971 = vmatpush.msra.mxu3 %v5784_v45  ;;  %v5846_v20 = vld [vmem:[%s12424_s23 + $0x208] sm:$0xff]  ;;  %v5849_v24 = vld [vmem:[%s12424_s23 + $0x220] sm:$0xff]  ;;  %v996_v27 = vld [vmem:[%s7040_s1 + $0x13] sm:$0xff] }
  0x41   : > { %919 = vmatpush.msra.mxu1 %v5782_v46  ;;  %945 = vmatpush.msra.mxu2 %v5783_v47  ;;  %v995_v25 = vld [vmem:[%s7040_s1 + $0xb] sm:$0xff]  ;;  %v5845_v26 = vld [vmem:[%s12424_s23 + $0x200] sm:$0xff]  ;;  %v1153_v30 = vld [vmem:[%s7040_s1 + $0x14] sm:$0xff] }
  0x42   : > { %5841 = vmatpush.msk.msrb.mxu3 %vm595_vm0, %v5828_v51  ;;  %v1151_v28 = vld [vmem:[%s7040_s1 + $0x4] sm:$0xff]  ;;  %v1152_v29 = vld [vmem:[%s7040_s1 + $0xc] sm:$0xff]  ;;  %s6797_s1 = scalar_lea.hbm %s6796_s29, 1 }
  0x43   : > { %p6798_p11 = scmp.ne.s32.totalorder %s6796_s29, %s6797_s1  ;;  %p6803_p1 = scmp.lt.s32.totalorder %s6801_s28, %s6797_s1 }
  0x44   : > { %5762 = vmatmul.msk.f32.vlgmr.msrb.gmra.mxu0 %vm585_vm1, %v7043_v16  ;;  %5770 = vmatmul.msk.f32.vlgmr.msrb.gmra.mxu1 %vm585_vm1, %v546_v39  ;;  %v5855_v16 = vld [vmem:[%s12424_s23 + $0x250] sm:$0xff] }
  0x45   : > { %5774 = vmatmul.msk.f32.vlgmr.msrb.gmra.mxu2 %vm585_vm1, %v546_v39  ;;  %5779 = vmatmul.msk.f32.gmra.mxu3 %vm585_vm1, %v547_v48  ;;  %p6799_p12 = pnand %p6798_p11, %p6973_p5  ;;  %p6804_p2 = por %p6803_p1, %p6802_p0 }
  0x46   : > { %5797 = vmatpush.msk.msrb.mxu0 %vm595_vm0, %v5793_v49  ;;  %1126 = vmatpush.msrb.mxu3 %v5824_v52 }
  0x47   : > { %5833 = vmatpush.msk.msrb.mxu1 %vm595_vm0, %v5826_v58  ;;  %5837 = vmatpush.msk.msrb.mxu2 %vm595_vm0, %v5827_v59  ;;  %p6800_p13 = pneg %p6799_p12 }
  0x48   : > { %891 = vmatpush.msrb.mxu0 %v5789_v50  ;;  %1127 = vmatpush.msrb.mxu3 %v5820_v54 }
  0x49   : > { %1074 = vmatpush.msrb.mxu1 %v5822_v60  ;;  %1100 = vmatpush.msrb.mxu2 %v5823_v61  ;;  %p6805_p3 = pnand %p6804_p2, %p6800_p13 }
  0x4a   : > { %892 = vmatpush.msrb.mxu0 %v5785_v53  ;;  %1128 = vmatpush.msrb.mxu3 %v5816_v57 }
  0x4b   : > { %1075 = vmatpush.msrb.mxu1 %v5818_v62  ;;  %1101 = vmatpush.msrb.mxu2 %v5819_v63 }
  0x4c   : > { %5766 = vmatmul.msk.f32.vlgmr.msra.gmra.mxu0 %vm585_vm1, %v546_v39  ;;  %5771 = vmatmul.msk.f32.gmra.mxu1 %vm585_vm1, %v547_v48 }
  0x4d   : > { %5775 = vmatmul.msk.f32.gmra.mxu2 %vm585_vm1, %v547_v48  ;;  %5780 = vmatmul.msk.f32.gmra.mxu3 %vm585_vm1, %v548_v55 }
  0x4e   : > { %893 = vmatpush.msrb.mxu0 %v5781_v56  ;;  %1076 = vmatpush.msrb.mxu1 %v5814_v1 }
  0x4f   : > { %1102 = vmatpush.msrb.mxu2 %v5815_v2 }
  0x50   : > { %5829 = vmatpush.msk.msra.mxu0 %vm595_vm0, %v5825_v3 }
  0x52   : > { %1048 = vmatpush.msra.mxu0 %v5821_v4 }
  0x54   : > { %5767 = vmatmul.msk.f32.gmra.mxu0 %vm585_vm1, %v547_v48  ;;  %5772 = vmatmul.msk.f32.gmra.mxu1 %vm585_vm1, %v548_v55 }
  0x55   : > { %5776 = vmatmul.msk.f32.gmra.mxu2 %vm585_vm1, %v548_v55  ;;  %5810 = vmatmul.msk.f32.vlgmr.msra.gmra.mxu3 %vm585_vm1, %v837_v0 }
  0x56   : > { %1049 = vmatpush.msra.mxu0 %v5817_v5  ;;  %5873 = vmatpush.msk.msra.mxu3 %vm595_vm0, %v5860_v8 }
  0x58   : > { %1050 = vmatpush.msra.mxu0 %v5813_v7  ;;  %1283 = vmatpush.msra.mxu3 %v5856_v9 }
  0x5a   : > { %1284 = vmatpush.msra.mxu3 %v5852_v10 }
  0x5c   : > { %5768 = vmatmul.msk.f32.gmra.mxu0 %vm585_vm1, %v548_v55  ;;  %5802 = vmatmul.msk.f32.vlgmr.msra.gmra.mxu1 %vm585_vm1, %v837_v0 }
  0x5d   : > { %5806 = vmatmul.msk.f32.vlgmr.msra.gmra.mxu2 %vm585_vm1, %v837_v0  ;;  %5811 = vmatmul.msk.f32.gmra.mxu3 %vm585_vm1, %v838_v6 }
  0x5e   : > { %1285 = vmatpush.msra.mxu3 %v5848_v12  ;;  %5865 = vmatpush.msk.msra.mxu1 %vm595_vm0, %v5858_v13 }
  0x5f   : > { %5869 = vmatpush.msk.msra.mxu2 %vm595_vm0, %v5859_v14 }
  0x60   : > { %1231 = vmatpush.msra.mxu1 %v5854_v15 }
  0x61   : > { %1257 = vmatpush.msra.mxu2 %v5855_v16 }
  0x62   : > { %1232 = vmatpush.msra.mxu1 %v5850_v17 }
  0x63   : > { %1258 = vmatpush.msra.mxu2 %v5851_v18 }
  0x64   : > { %5798 = vmatmul.msk.f32.vlgmr.msrb.gmra.mxu0 %vm585_vm1, %v837_v0  ;;  %5803 = vmatmul.msk.f32.gmra.mxu1 %vm585_vm1, %v838_v6 }
  0x65   : > { %5807 = vmatmul.msk.f32.gmra.mxu2 %vm585_vm1, %v838_v6  ;;  %5812 = vmatmul.msk.f32.gmra.mxu3 %vm585_vm1, %v839_v11 }
  0x66   : > { %1233 = vmatpush.msra.mxu1 %v5846_v20  ;;  %1259 = vmatpush.msra.mxu2 %v5847_v21 }
  0x67   : > { %5861 = vmatpush.msk.msrb.mxu0 %vm595_vm0, %v5857_v22 }
  0x69   : > { %1205 = vmatpush.msrb.mxu0 %v5853_v23 }
  0x6b   : > { %1206 = vmatpush.msrb.mxu0 %v5849_v24 }
  0x6c   : > { %5799 = vmatmul.msk.f32.gmra.mxu0 %vm585_vm1, %v838_v6  ;;  %5804 = vmatmul.msk.f32.gmra.mxu1 %vm585_vm1, %v839_v11 }
  0x6d   : > { %5808 = vmatmul.msk.f32.gmra.mxu2 %vm585_vm1, %v839_v11  ;;  %5842 = vmatmul.msk.f32.vlgmr.msrb.gmra.mxu3 %vm585_vm1, %v994_v19 }
  0x6e   : > { %1207 = vmatpush.msrb.mxu0 %v5845_v26 }
  0x74   : > { %5800 = vmatmul.msk.f32.gmra.mxu0 %vm585_vm1, %v839_v11  ;;  %5834 = vmatmul.msk.f32.vlgmr.msrb.gmra.mxu1 %vm585_vm1, %v994_v19 }
  0x75   : > { %5838 = vmatmul.msk.f32.vlgmr.msrb.gmra.mxu2 %vm585_vm1, %v994_v19  ;;  %5843 = vmatmul.msk.f32.gmra.mxu3 %vm585_vm1, %v995_v25 }
  0x7c   : > { %5830 = vmatmul.msk.f32.vlgmr.msra.gmra.mxu0 %vm585_vm1, %v994_v19  ;;  %5835 = vmatmul.msk.f32.gmra.mxu1 %vm585_vm1, %v995_v25 }
  0x7d   : > { %5839 = vmatmul.msk.f32.gmra.mxu2 %vm585_vm1, %v995_v25  ;;  %5844 = vmatmul.msk.f32.gmra.mxu3 %vm585_vm1, %v996_v27 }
  0x84   : > { %5831 = vmatmul.msk.f32.gmra.mxu0 %vm585_vm1, %v995_v25  ;;  %5836 = vmatmul.msk.f32.gmra.mxu1 %vm585_vm1, %v996_v27 }
  0x85   : > { %5840 = vmatmul.msk.f32.gmra.mxu2 %vm585_vm1, %v996_v27  ;;  %5874 = vmatmul.msk.f32.vlgmr.msra.gmra.mxu3 %vm585_vm1, %v1151_v28 }
  0x8c   : > { %5832 = vmatmul.msk.f32.gmra.mxu0 %vm585_vm1, %v996_v27  ;;  %5866 = vmatmul.msk.f32.vlgmr.msra.gmra.mxu1 %vm585_vm1, %v1151_v28 }
  0x8d   : > { %5870 = vmatmul.msk.f32.vlgmr.msra.gmra.mxu2 %vm585_vm1, %v1151_v28  ;;  %5875 = vmatmul.msk.f32.gmra.mxu3 %vm585_vm1, %v1152_v29 }
  0x94   : > { %5862 = vmatmul.msk.f32.vlgmr.msrb.gmra.mxu0 %vm585_vm1, %v1151_v28  ;;  %5867 = vmatmul.msk.f32.gmra.mxu1 %vm585_vm1, %v1152_v29 }
  0x95   : > { %5871 = vmatmul.msk.f32.gmra.mxu2 %vm585_vm1, %v1152_v29  ;;  %5876 = vmatmul.msk.f32.gmra.mxu3 %vm585_vm1, %v1153_v30 }
  0x9c   : > { %5863 = vmatmul.msk.f32.gmra.mxu0 %vm585_vm1, %v1152_v29  ;;  %5868 = vmatmul.msk.f32.gmra.mxu1 %vm585_vm1, %v1153_v30 }
  0x9d   : > { %5872 = vmatmul.msk.f32.gmra.mxu2 %vm585_vm1, %v1153_v30 }
  0xa4   : > { %5864 = vmatmul.msk.f32.gmra.mxu0 %vm585_vm1, %v1153_v30 }
  0xa9   : > { %v7332_v31 = vpop.f32.mrf.mxu0  ;;  %v651_v32 = vpop.f32.mrf.mxu1 }
  0xb0   : > { %v677_v33 = vpop.f32.mrf.mxu2  ;;  %v706_v34 = vpop.f32.mrf.mxu3 }
  0xb1   : > { %v7334_v35 = vpop.f32.mrf.mxu0  ;;  %v654_v36 = vpop.f32.mrf.mxu1 }
  0xb8   : > { %v680_v37 = vpop.f32.mrf.mxu2  ;;  %v709_v38 = vpop.f32.mrf.mxu3 }
  0xb9   : > { %v7336_v39 = vpop.f32.mrf.mxu0  ;;  %v657_v40 = vpop.f32.mrf.mxu1 }
  0xc0   : > { %v7338_v41 = vpop.f32.mrf.mxu2  ;;  %v828_v42 = vpop.f32.mrf.mxu3 }
  0xc1   : > { %v703_v43 = vpop.f32.mrf.mxu0  ;;  %v776_v44 = vpop.f32.mrf.mxu1 }
  0xc2   : > { %v829_v23 = vadd.f32 %v828_v42, %v703_v43  ;;  %v777_v26 = vadd.f32 %v776_v44, %v651_v32 }
  0xc8   : > { %v802_v45 = vpop.f32.mrf.mxu2  ;;  %v831_v46 = vpop.f32.mrf.mxu3 }
  0xc9   : > { %v750_v47 = vpop.f32.mrf.mxu0  ;;  %v779_v48 = vpop.f32.mrf.mxu1  ;;  %v832_v19 = vadd.f32 %v831_v46, %v706_v34  ;;  %v803_v27 = vadd.f32 %v802_v45, %v677_v33 }
  0xca   : > { %v780_v22 = vadd.f32 %v779_v48, %v654_v36  ;;  %v751_v30 = vadd.f32 %v750_v47, %v7332_v31  ;;  %v1308_v36 = vld [vmem:[%s12432_s2] sm:$0xf] }
  0xcb   : > { %v1313_v48 = vperm.slane %v1308_v36, 3 }
  0xd0   : > { %v805_v49 = vpop.f32.mrf.mxu2  ;;  %v834_v50 = vpop.f32.mrf.mxu3 }
  0xd1   : > { %v753_v51 = vpop.f32.mrf.mxu0  ;;  %v782_v52 = vpop.f32.mrf.mxu1  ;;  %v835_v24 = vadd.f32 %v834_v50, %v709_v38 }
  0xd2   : > { %v783_v28 = vadd.f32 %v782_v52, %v657_v40  ;;  %v754_v38 = vadd.f32 %v753_v51, %v7334_v35  ;;  %v1311_v35 = vperm.slane %v1308_v36, 1 }
  0xd8   : > { %v808_v53 = vpop.f32.mrf.mxu2  ;;  %v973_v54 = vpop.f32.mrf.mxu3 }
  0xd9   : > { %v756_v55 = vpop.f32.mrf.mxu0  ;;  %v921_v56 = vpop.f32.mrf.mxu1  ;;  %v809_v40 = vadd.f32 %v808_v53, %v7338_v41 }
  0xe0   : > { %v947_v57 = vpop.f32.mrf.mxu2  ;;  %v976_v58 = vpop.f32.mrf.mxu3 }
  0xe1   : > { %v7340_v59 = vpop.f32.mrf.mxu0  ;;  %v924_v60 = vpop.f32.mrf.mxu1  ;;  %v989_v25 = vadd.f32 %v976_v58, %v832_v19 }
  0xe2   : > { %v987_v29 = vadd.f32 %v924_v60, %v780_v22  ;;  %v982_v58 = vadd.f32 %v7340_v59, %v751_v30 }
  0xe8   : > { %v7342_v61 = vpop.f32.mrf.mxu2  ;;  %v979_v62 = vpop.f32.mrf.mxu3 }
  0xe9   : > { %v7344_v63 = vpop.f32.mrf.mxu0  ;;  %v927_v0 = vpop.f32.mrf.mxu1 }
  0xf0   : > { %v7346_v1 = vpop.f32.mrf.mxu2  ;;  %v1130_v2 = vpop.f32.mrf.mxu3 }
  0xf1   : > { %v7348_v3 = vpop.f32.mrf.mxu0  ;;  %v1078_v4 = vpop.f32.mrf.mxu1 }
  0xf2   : > { %12426 = vst [vmem:[#allocation14_spill] sm:$0xff] %v7348_v3  ;;  %v991_v3 = vadd.f32 %v927_v0, %v783_v28  ;;  %v992_v0 = vadd.f32 %v7346_v1, %v809_v40 }
  0xf8   : > { %v7350_v5 = vpop.f32.mrf.mxu2  ;;  %v1133_v6 = vpop.f32.mrf.mxu3 }
  0xf9   : > { %12427 = vst [vmem:[#allocation15_spill] sm:$0xff] %v7350_v5  ;;  %v7352_v7 = vpop.f32.mrf.mxu0  ;;  %v1081_v8 = vpop.f32.mrf.mxu1  ;;  %v806_v5 = vadd.f32 %v805_v49, %v680_v37  ;;  %v757_v37 = vadd.f32 %v756_v55, %v7336_v39 }
  0xfa   : > { %12428 = vst [vmem:[#allocation16_spill] sm:$0xff] %v7352_v7  ;;  %v985_v7 = vadd.f32 %v973_v54, %v829_v23  ;;  %v1144_v34 = vadd.f32 %v1081_v8, %v987_v29  ;;  %v984_v54 = vadd.f32 %v947_v57, %v803_v27  ;;  %v12433_v57 = vld [vmem:[#allocation14_spill] sm:$0xff] }
  0xfb   : > { %v988_v41 = vadd.f32 %v7342_v61, %v806_v5 }
  0xfc   : > { %v1142_v42 = vadd.f32 %v1130_v2, %v985_v7  ;;  %v990_v7 = vadd.f32 %v12433_v57, %v757_v37  ;;  %v1611_v37 = vld [vmem:[%s12389_s5 + $0x1e0] sm:$0xff] }
  0xfd   : > { %v1571_v57 = vld [vmem:[%s12389_s5 + $0xa0] sm:$0xff] }
 0x100   : > { %v1107_v9 = vpop.f32.mrf.mxu2  ;;  %v1136_v10 = vpop.f32.mrf.mxu3  ;;  %v12434_v59 = vld [vmem:[#allocation15_spill] sm:$0xff] }
 0x101   : > { %v1055_v11 = vpop.f32.mrf.mxu0  ;;  %v1084_v12 = vpop.f32.mrf.mxu1  ;;  %v1145_v2 = vadd.f32 %v1107_v9, %v988_v41  ;;  %v1643_v41 = vld [vmem:[%s12389_s5 + $0x2e0] sm:$0xff] }
 0x102   : > { %v1148_v31 = vadd.f32 %v1084_v12, %v991_v3 }
 0x108   : > { %v7354_v13 = vpop.f32.mrf.mxu2  ;;  %v1287_v14 = vpop.f32.mrf.mxu3 }
 0x109   : > { %12429 = vst [vmem:[#allocation17_spill] sm:$0xff] %v7354_v13  ;;  %v7356_v15 = vpop.f32.mrf.mxu0  ;;  %v1235_v16 = vpop.f32.mrf.mxu1  ;;  %v1146_v13 = vadd.f32 %v1133_v6, %v989_v25  ;;  %v1299_v47 = vadd.f32 %v1287_v14, %v1142_v42  ;;  %v1342_v25 = vld [vmem:[%s12439_s3] sm:$0xff] }
 0x10a   : > { %12430 = vst [vmem:[#allocation18_spill] sm:$0xff] %v7356_v15  ;;  %v993_v15 = vadd.f32 %v979_v62, %v835_v24  ;;  %v986_v62 = vadd.f32 %v7344_v63, %v754_v38 }
 0x10b   : > { %v1321_v3 = vadd.f32 %v1313_v48, %v1299_v47  ;;  %v1669_v47 = vld [vmem:[%s12389_s5 + $0x3b0] sm:$0xff] }
 0x10c   : > { %v1150_v32 = vadd.f32 %v1136_v10, %v993_v15  ;;  %v1143_v8 = vadd.f32 %v1055_v11, %v986_v62  ;;  %v12436_v15 = vld [vmem:[#allocation16_spill] sm:$0xff] }
 0x10d   : > { %v1139_v1 = vadd.f32 %v12436_v15, %v982_v58  ;;  %v1333_v24 = vmax.f32 %v1321_v3, 0.0  ;;  %v1665_v58 = vld [vmem:[%s12389_s5 + $0x390] sm:$0xff]  ;;  %v1663_v62 = vld [vmem:[%s12389_s5 + $0x380] sm:$0xff] }
 0x10e   : > { %v1599_v3 = vld [vmem:[%s12389_s5 + $0x180] sm:$0xff]  ;;  %v1565_v15 = vld [vmem:[%s12389_s5 + $0x70] sm:$0xff] }
 0x110   : > { %v7358_v17 = vpop.f32.mrf.mxu2  ;;  %v1290_v18 = vpop.f32.mrf.mxu3  ;;  %v12435_v61 = vld [vmem:[#allocation17_spill] sm:$0xff] }
 0x111   : > { %12431 = vst [vmem:[#allocation19_spill] sm:$0xff] %v7358_v17  ;;  %v7360_v20 = vpop.f32.mrf.mxu0  ;;  %v1238_v21 = vpop.f32.mrf.mxu1  ;;  %v983_v17 = vadd.f32 %v921_v56, %v777_v26  ;;  %v1303_v33 = vadd.f32 %v1290_v18, %v1146_v13  ;;  %v1141_v13 = vadd.f32 %v12434_v59, %v984_v54  ;;  %v1149_v5 = vadd.f32 %v12435_v61, %v992_v0  ;;  %v1607_v54 = vld [vmem:[%s12389_s5 + $0x1c0] sm:$0xff]  ;;  %v1641_v0 = vld [vmem:[%s12389_s5 + $0x2d0] sm:$0xff] }
 0x112   : > { %v1301_v44 = vadd.f32 %v1238_v21, %v1144_v34  ;;  %v1310_v26 = vperm.slane %v1308_v36, 0  ;;  %v1296_v29 = vadd.f32 %v7360_v20, %v1139_v1  ;;  %v1659_v59 = vld [vmem:[%s12389_s5 + $0x360] sm:$0xff]  ;;  %v1593_v61 = vld [vmem:[%s12389_s5 + $0x150] sm:$0xff] }
 0x113   : > { %v1140_v43 = vadd.f32 %v1078_v4, %v983_v17  ;;  %v1325_v53 = vadd.f32 %v1313_v48, %v1303_v33  ;;  %v1312_v4 = vperm.slane %v1308_v36, 2  ;;  %v1655_v1 = vld [vmem:[%s12389_s5 + $0x340] sm:$0xff] }
 0x114   : > { %v1323_v39 = vadd.f32 %v1311_v35, %v1301_v44  ;;  %v1318_v36 = vadd.f32 %v1310_v26, %v1296_v29  ;;  %v1646_v29 = vld [vmem:[%s12389_s5 + $0x2f8] sm:$0xff] }
 0x115   : > { %v1297_v56 = vadd.f32 %v1235_v16, %v1140_v43  ;;  %v1337_v63 = vmax.f32 %v1325_v53, 0.0  ;;  %v12437_v16 = vld [vmem:[#allocation18_spill] sm:$0xff]  ;;  %v1603_v53 = vld [vmem:[%s12389_s5 + $0x1a0] sm:$0xff] }
 0x116   : > { %v1147_v17 = vadd.f32 %v12437_v16, %v990_v7  ;;  %v1335_v19 = vmax.f32 %v1323_v39, 0.0  ;;  %v1601_v39 = vld [vmem:[%s12389_s5 + $0x190] sm:$0xff] }
 0x117   : > { %v1319_v10 = vadd.f32 %v1311_v35, %v1297_v56  ;;  %v1581_v56 = vld [vmem:[%s12389_s5 + $0xf0] sm:$0xff] }
 0x118   : > { %v1264_v45 = vpop.f32.mrf.mxu2  ;;  %v1293_v46 = vpop.f32.mrf.mxu3  ;;  %v12438_v21 = vld [vmem:[#allocation19_spill] sm:$0xff] }
 0x119   : > { %v1307_v49 = vadd.f32 %v1293_v46, %v1150_v32  ;;  %v1212_v50 = vpop.f32.mrf.mxu0  ;;  %v1241_v52 = vpop.f32.mrf.mxu1  ;;  %v1302_v14 = vadd.f32 %v1264_v45, %v1145_v2  ;;  %v1298_v22 = vadd.f32 %v12438_v21, %v1141_v13  ;;  %v1331_v28 = vmax.f32 %v1319_v10, 0.0  ;;  %v1343_v45 = vld [vmem:[%s12439_s3 + $0x8] sm:$0xf]  ;;  %v1661_v7 = vld [vmem:[%s12389_s5 + $0x370] sm:$0xff]  ;;  %v1595_v10 = vld [vmem:[%s12389_s5 + $0x160] sm:$0xff] }
 0x11a   : > { %v1305_v51 = vadd.f32 %v1241_v52, %v1148_v31  ;;  %v1300_v9 = vadd.f32 %v1212_v50, %v1143_v8  ;;  %v1613_v31 = vld [vmem:[%s12389_s5 + $0x1f0] sm:$0xff]  ;;  %v1330_v46 = vmax.f32 %v1318_v36, 0.0  ;;  %v1443_v52 = vld [vmem:[%s12388_s4] sm:$0xff]  ;;  %v1444_v2 = vld [vmem:[%s12388_s4 + $0x8] sm:$0xf] }
 0x11b   : > { %v1329_v60 = vadd.f32 %v1313_v48, %v1307_v49  ;;  %v1324_v30 = vadd.f32 %v1312_v4, %v1302_v14  ;;  %v1320_v32 = vadd.f32 %v1312_v4, %v1298_v22  ;;  %v1609_v48 = vld [vmem:[%s12389_s5 + $0x1d0] sm:$0xff]  ;;  %v1667_v49 = vld [vmem:[%s12389_s5 + $0x3a0] sm:$0xff]  ;;  %v1642_v36 = vld [vmem:[%s12389_s5 + $0x2d8] sm:$0xff] }
 0x11c   : > { %v1327_v55 = vadd.f32 %v1311_v35, %v1305_v51  ;;  %v1322_v38 = vadd.f32 %v1310_v26, %v1300_v9  ;;  %v1645_v50 = vld [vmem:[%s12389_s5 + $0x2f0] sm:$0xff]  ;;  %v1579_v51 = vld [vmem:[%s12389_s5 + $0xe0] sm:$0xff] }
 0x11d   : > { %v1341_v6 = vmax.f32 %v1329_v60, 0.0  ;;  %v1336_v43 = vmax.f32 %v1324_v30, 0.0  ;;  %v1332_v44 = vmax.f32 %v1320_v32, 0.0  ;;  %v1605_v35 = vld [vmem:[%s12389_s5 + $0x1b0] sm:$0xff]  ;;  %v1639_v8 = vld [vmem:[%s12389_s5 + $0x2c0] sm:$0xff] }
 0x11e   : > { %v1339_v12 = vmax.f32 %v1327_v55, 0.0  ;;  %v1334_v20 = vmax.f32 %v1322_v38, 0.0  ;;  %v1577_v60 = vld [vmem:[%s12389_s5 + $0xd0] sm:$0xff]  ;;  %v1575_v55 = vld [vmem:[%s12389_s5 + $0xc0] sm:$0xff]  ;;  %v1582_v38 = vld [vmem:[%s12389_s5 + $0xf8] sm:$0xff] }
 0x11f   : > { %1433 = vmatpush.msrb.mxu3 %v1341_v6  ;;  %v1637_v13 = vld [vmem:[%s12389_s5 + $0x2b0] sm:$0xff]  ;;  %v1651_v22 = vld [vmem:[%s12389_s5 + $0x320] sm:$0xff] }
 0x120   : > { %v1267_v18 = vpop.f32.mrf.mxu2  ;;  %1387 = vmatpush.msrb.mxu1 %v1339_v12  ;;  %v1657_v14 = vld [vmem:[%s12389_s5 + $0x350] sm:$0xff]  ;;  %v1647_v30 = vld [vmem:[%s12389_s5 + $0x300] sm:$0xff] }
 0x121   : > { %v1306_v11 = vadd.f32 %v1267_v18, %v1149_v5  ;;  %1434 = vmatpush.msrb.mxu3 %v1337_v63  ;;  %v1215_v23 = vpop.f32.mrf.mxu0  ;;  %v1567_v5 = vld [vmem:[%s12389_s5 + $0x80] sm:$0xff]  ;;  %v1589_v16 = vld [vmem:[%s12389_s5 + $0x130] sm:$0xff] }
 0x122   : > { %v1304_v27 = vadd.f32 %v1215_v23, %v1147_v17  ;;  %1388 = vmatpush.msrb.mxu1 %v1335_v19  ;;  %v1563_v17 = vld [vmem:[%s12389_s5 + $0x60] sm:$0xff]  ;;  %v1653_v9 = vld [vmem:[%s12389_s5 + $0x330] sm:$0xff] }
 0x123   : > { %v1328_v34 = vadd.f32 %v1312_v4, %v1306_v11  ;;  %1435 = vmatpush.msrb.mxu3 %v1333_v24  ;;  %v1573_v4 = vld [vmem:[%s12389_s5 + $0xb0] sm:$0xff]  ;;  %v1635_v18 = vld [vmem:[%s12389_s5 + $0x2a0] sm:$0xff] }
 0x124   : > { %v1326_v42 = vadd.f32 %v1310_v26, %v1304_v27  ;;  %5883 = vmatmul.msk.f32.vlgmr.msrb.gmra.mxu3 %vm1344_vm2, %v1342_v25  ;;  %1389 = vmatpush.msrb.mxu1 %v1331_v28  ;;  %v1561_v21 = vld [vmem:[%s12389_s5 + $0x50] sm:$0xff]  ;;  %v1631_v26 = vld [vmem:[%s12389_s5 + $0x280] sm:$0xff] }
 0x125   : > { %v1340_v33 = vmax.f32 %v1328_v34, 0.0  ;;  %1533 = vmatpush.msra.mxu3 %v1341_v6  ;;  %5879 = vmatmul.msk.f32.vlgmr.msrb.gmra.mxu1 %vm1344_vm2, %v1342_v25  ;;  %v1597_v6 = vld [vmem:[%s12389_s5 + $0x170] sm:$0xff]  ;;  %v1583_v27 = vld [vmem:[%s12389_s5 + $0x100] sm:$0xff] }
 0x126   : > { %v1338_v40 = vmax.f32 %v1326_v42, 0.0  ;;  %1487 = vmatpush.msra.mxu1 %v1339_v12  ;;  %v1569_v12 = vld [vmem:[%s12389_s5 + $0x90] sm:$0xff]  ;;  %v1555_v34 = vld [vmem:[%s12389_s5 + $0x20] sm:$0xff]  ;;  %v1644_v42 = vld [vmem:[%s12389_s5 + $0x2e8] sm:$0xff] }
 0x127   : > { %1534 = vmatpush.msra.mxu3 %v1337_v63  ;;  %1410 = vmatpush.msrb.mxu2 %v1340_v33  ;;  %v1591_v63 = vld [vmem:[%s12389_s5 + $0x140] sm:$0xff]  ;;  %v1633_v11 = vld [vmem:[%s12389_s5 + $0x290] sm:$0xff] }
 0x128   : > { %1488 = vmatpush.msra.mxu1 %v1335_v19  ;;  %1364 = vmatpush.msra.mxu0 %v1338_v40  ;;  %v1587_v19 = vld [vmem:[%s12389_s5 + $0x120] sm:$0xff]  ;;  %v1585_v23 = vld [vmem:[%s12389_s5 + $0x110] sm:$0xff] }
 0x129   : > { %1535 = vmatpush.msra.mxu3 %v1333_v24  ;;  %1411 = vmatpush.msrb.mxu2 %v1336_v43  ;;  %v1559_v24 = vld [vmem:[%s12389_s5 + $0x40] sm:$0xff]  ;;  %v1629_v32 = vld [vmem:[%s12389_s5 + $0x270] sm:$0xff] }
 0x12a   : > { %1489 = vmatpush.msra.mxu1 %v1331_v28  ;;  %1365 = vmatpush.msra.mxu0 %v1334_v20  ;;  %v1557_v28 = vld [vmem:[%s12389_s5 + $0x30] sm:$0xff] }
 0x12b   : > { %1412 = vmatpush.msrb.mxu2 %v1332_v44  ;;  %1751 = vmatpush.msrb.mxu3 %v1669_v47  ;;  %v1638_v47 = vld [vmem:[%s12389_s5 + $0x2b8] sm:$0xff] }
 0x12c   : > { %1701 = vmatpush.msrb.mxu1 %v1613_v31  ;;  %5881 = vmatmul.msk.f32.vlgmr.msrb.gmra.mxu2 %vm1344_vm2, %v1342_v25  ;;  %v1578_v31 = vld [vmem:[%s12389_s5 + $0xd8] sm:$0xff] }
 0x12d   : > { %5884 = vmatmul.msk.f32.gmra.mxu3 %vm1344_vm2, %v1343_v45  ;;  %1510 = vmatpush.msra.mxu2 %v1340_v33  ;;  %v1553_v33 = vld [vmem:[%s12389_s5 + $0x10] sm:$0xff] }
 0x12e   : > { %1366 = vmatpush.msra.mxu0 %v1330_v46  ;;  %5880 = vmatmul.msk.f32.gmra.mxu1 %vm1344_vm2, %v1343_v45 }
 0x12f   : > { %5877 = vmatmul.msk.f32.vlgmr.msra.gmra.mxu0 %vm1344_vm2, %v1342_v25  ;;  %1511 = vmatpush.msra.mxu2 %v1336_v43  ;;  %v1649_v25 = vld [vmem:[%s12389_s5 + $0x310] sm:$0xff]  ;;  %v1627_v43 = vld [vmem:[%s12389_s5 + $0x260] sm:$0xff] }
 0x130   : > { %1464 = vmatpush.msrb.mxu0 %v1338_v40  ;;  %1702 = vmatpush.msrb.mxu1 %v1611_v37  ;;  %v1580_v40 = vld [vmem:[%s12389_s5 + $0xe8] sm:$0xff] }
 0x131   : > { %1512 = vmatpush.msra.mxu2 %v1332_v44  ;;  %1752 = vmatpush.msrb.mxu3 %v1667_v49  ;;  %v1640_v44 = vld [vmem:[%s12389_s5 + $0x2c8] sm:$0xff]  ;;  %v1623_v49 = vld [vmem:[%s12389_s5 + $0x240] sm:$0xff] }
 0x132   : > { %1465 = vmatpush.msrb.mxu0 %v1334_v20  ;;  %1703 = vmatpush.msrb.mxu1 %v1609_v48  ;;  %v1551_v20 = vld [vmem:[%s12389_s5] sm:$0xff]  ;;  %v1576_v37 = vld [vmem:[%s12389_s5 + $0xc8] sm:$0xff] }
 0x133   : > { %1724 = vmatpush.msrb.mxu2 %v1645_v50  ;;  %1753 = vmatpush.msrb.mxu3 %v1665_v58  ;;  %v1612_v48 = vld [vmem:[%s12389_s5 + $0x1e8] sm:$0xff] }
 0x134   : > { %1466 = vmatpush.msrb.mxu0 %v1330_v46  ;;  %5882 = vmatmul.msk.f32.gmra.mxu2 %vm1344_vm2, %v1343_v45  ;;  %v1625_v46 = vld [vmem:[%s12389_s5 + $0x250] sm:$0xff]  ;;  %v1636_v50 = vld [vmem:[%s12389_s5 + $0x2a8] sm:$0xff] }
 0x135   : > { %5891 = vmatmul.msk.f32.vlgmr.msra.gmra.mxu3 %vm1344_vm2, %v1443_v52  ;;  %1704 = vmatpush.msrb.mxu1 %v1607_v54  ;;  %v1610_v54 = vld [vmem:[%s12389_s5 + $0x1d8] sm:$0xff]  ;;  %v1608_v58 = vld [vmem:[%s12389_s5 + $0x1c8] sm:$0xff] }
 0x136   : > { %1678 = vmatpush.msra.mxu0 %v1581_v56  ;;  %5887 = vmatmul.msk.f32.vlgmr.msra.gmra.mxu1 %vm1344_vm2, %v1443_v52  ;;  %v1634_v56 = vld [vmem:[%s12389_s5 + $0x298] sm:$0xff] }
 0x137   : > { %5878 = vmatmul.msk.f32.gmra.mxu0 %vm1344_vm2, %v1343_v45  ;;  %1705 = vmatpush.msrb.mxu1 %v1605_v35  ;;  %v1614_v45 = vld [vmem:[%s12389_s5 + $0x1f8] sm:$0xff]  ;;  %v1621_v35 = vld [vmem:[%s12389_s5 + $0x230] sm:$0xff] }
 0x138   : > { %1679 = vmatpush.msra.mxu0 %v1579_v51  ;;  %1725 = vmatpush.msrb.mxu2 %v1643_v41  ;;  %v1572_v51 = vld [vmem:[%s12389_s5 + $0xa8] sm:$0xff] }
 0x139   : > { %1706 = vmatpush.msrb.mxu1 %v1603_v53  ;;  %1754 = vmatpush.msrb.mxu3 %v1663_v62  ;;  %v1632_v41 = vld [vmem:[%s12389_s5 + $0x288] sm:$0xff]  ;;  %v1619_v53 = vld [vmem:[%s12389_s5 + $0x220] sm:$0xff]  ;;  %v1606_v62 = vld [vmem:[%s12389_s5 + $0x1b8] sm:$0xff] }
 0x13a   : > { %1680 = vmatpush.msra.mxu0 %v1577_v60  ;;  %1726 = vmatpush.msrb.mxu2 %v1641_v0  ;;  %v1570_v60 = vld [vmem:[%s12389_s5 + $0x98] sm:$0xff] }
 0x13b   : > { %1707 = vmatpush.msrb.mxu1 %v1601_v39  ;;  %1755 = vmatpush.msrb.mxu3 %v1661_v7  ;;  %v1630_v0 = vld [vmem:[%s12389_s5 + $0x278] sm:$0xff]  ;;  %v1617_v39 = vld [vmem:[%s12389_s5 + $0x210] sm:$0xff] }
 0x13c   : > { %1681 = vmatpush.msra.mxu0 %v1575_v55  ;;  %5889 = vmatmul.msk.f32.vlgmr.msra.gmra.mxu2 %vm1344_vm2, %v1443_v52  ;;  %v1568_v55 = vld [vmem:[%s12389_s5 + $0x88] sm:$0xff]  ;;  %v1626_v7 = vld [vmem:[%s12389_s5 + $0x258] sm:$0xff] }
 0x13d   : > { %5892 = vmatmul.msk.f32.gmra.mxu3 %vm1344_vm2, %v1444_v2  ;;  %1708 = vmatpush.msrb.mxu1 %v1599_v3  ;;  %v1628_v3 = vld [vmem:[%s12389_s5 + $0x268] sm:$0xff] }
 0x13e   : > { %1682 = vmatpush.msra.mxu0 %v1573_v4  ;;  %5888 = vmatmul.msk.f32.gmra.mxu1 %vm1344_vm2, %v1444_v2  ;;  %v1615_v4 = vld [vmem:[%s12389_s5 + $0x200] sm:$0xff] }
 0x13f   : > { %5885 = vmatmul.msk.f32.vlgmr.msrb.gmra.mxu0 %vm1344_vm2, %v1443_v52  ;;  %1709 = vmatpush.msrb.mxu1 %v1597_v6  ;;  %v1574_v52 = vld [vmem:[%s12389_s5 + $0xb8] sm:$0xff] }
 0x140   : > { %1683 = vmatpush.msra.mxu0 %v1571_v57  ;;  %1727 = vmatpush.msrb.mxu2 %v1639_v8  ;;  %v1566_v6 = vld [vmem:[%s12389_s5 + $0x78] sm:$0xff] }
 0x141   : > { %1710 = vmatpush.msrb.mxu1 %v1595_v10  ;;  %1756 = vmatpush.msrb.mxu3 %v1659_v59  ;;  %v1602_v57 = vld [vmem:[%s12389_s5 + $0x198] sm:$0xff]  ;;  %v1564_v10 = vld [vmem:[%s12389_s5 + $0x68] sm:$0xff] }
 0x142   : > { %1684 = vmatpush.msra.mxu0 %v1569_v12  ;;  %1728 = vmatpush.msrb.mxu2 %v1637_v13  ;;  %v1670_v8 = vld [vmem:[%s12389_s5 + $0x3b8] sm:$0xff]  ;;  %v1600_v12 = vld [vmem:[%s12389_s5 + $0x188] sm:$0xff] }
 0x143   : > { %1711 = vmatpush.msrb.mxu1 %v1593_v61  ;;  %1757 = vmatpush.msrb.mxu3 %v1657_v14  ;;  %v1624_v59 = vld [vmem:[%s12389_s5 + $0x248] sm:$0xff]  ;;  %v1562_v61 = vld [vmem:[%s12389_s5 + $0x58] sm:$0xff] }
 0x144   : > { %1685 = vmatpush.msra.mxu0 %v1567_v5  ;;  %5890 = vmatmul.msk.f32.gmra.mxu2 %vm1344_vm2, %v1444_v2  ;;  %v1668_v13 = vld [vmem:[%s12389_s5 + $0x3a8] sm:$0xff]  ;;  %v1598_v5 = vld [vmem:[%s12389_s5 + $0x178] sm:$0xff] }
 0x145   : > { %1712 = vmatpush.msrb.mxu1 %v1591_v63  ;;  %1758 = vmatpush.msrb.mxu3 %v1655_v1  ;;  %v1622_v14 = vld [vmem:[%s12389_s5 + $0x238] sm:$0xff]  ;;  %v1596_v1 = vld [vmem:[%s12389_s5 + $0x168] sm:$0xff] }
 0x146   : > { %1686 = vmatpush.msra.mxu0 %v1565_v15  ;;  %1729 = vmatpush.msrb.mxu2 %v1635_v18  ;;  %v1666_v63 = vld [vmem:[%s12389_s5 + $0x398] sm:$0xff]  ;;  %v1560_v15 = vld [vmem:[%s12389_s5 + $0x48] sm:$0xff] }
 0x147   : > { %5886 = vmatmul.msk.f32.gmra.mxu0 %vm1344_vm2, %v1444_v2  ;;  %1713 = vmatpush.msrb.mxu1 %v1589_v16  ;;  %v1604_v2 = vld [vmem:[%s12389_s5 + $0x1a8] sm:$0xff]  ;;  %v1594_v18 = vld [vmem:[%s12389_s5 + $0x158] sm:$0xff] }
 0x148   : > { %1687 = vmatpush.msra.mxu0 %v1563_v17  ;;  %1759 = vmatpush.msrb.mxu3 %v1653_v9  ;;  %v1620_v16 = vld [vmem:[%s12389_s5 + $0x228] sm:$0xff]  ;;  %v1558_v9 = vld [vmem:[%s12389_s5 + $0x38] sm:$0xff] }
 0x149   : > { %1714 = vmatpush.msrb.mxu1 %v1587_v19  ;;  %1730 = vmatpush.msrb.mxu2 %v1633_v11  ;;  %v1664_v17 = vld [vmem:[%s12389_s5 + $0x388] sm:$0xff]  ;;  %v1618_v19 = vld [vmem:[%s12389_s5 + $0x218] sm:$0xff] }
 0x14a   : > { %1688 = vmatpush.msra.mxu0 %v1561_v21  ;;  %1760 = vmatpush.msrb.mxu3 %v1651_v22  ;;  %v1662_v21 = vld [vmem:[%s12389_s5 + $0x378] sm:$0xff]  ;;  %v1556_v22 = vld [vmem:[%s12389_s5 + $0x28] sm:$0xff] }
 0x14b   : > { %1715 = vmatpush.msrb.mxu1 %v1585_v23  ;;  %1731 = vmatpush.msrb.mxu2 %v1631_v26  ;;  %v1592_v11 = vld [vmem:[%s12389_s5 + $0x148] sm:$0xff]  ;;  %v1590_v26 = vld [vmem:[%s12389_s5 + $0x138] sm:$0xff] }
 0x14c   : > { %1689 = vmatpush.msra.mxu0 %v1559_v24  ;;  %1761 = vmatpush.msrb.mxu3 %v1649_v25  ;;  %v1616_v23 = vld [vmem:[%s12389_s5 + $0x208] sm:$0xff]  ;;  %v1554_v25 = vld [vmem:[%s12389_s5 + $0x18] sm:$0xff] }
 0x14d   : > { %1716 = vmatpush.msrb.mxu1 %v1583_v27  ;;  %1732 = vmatpush.msrb.mxu2 %v1629_v32  ;;  %v1660_v24 = vld [vmem:[%s12389_s5 + $0x368] sm:$0xff]  ;;  %v1658_v27 = vld [vmem:[%s12389_s5 + $0x358] sm:$0xff] }
 0x14e   : > { %1690 = vmatpush.msra.mxu0 %v1557_v28  ;;  %1762 = vmatpush.msrb.mxu3 %v1647_v30  ;;  %v1552_v28 = vld [vmem:[%s12389_s5 + $0x8] sm:$0xff] }
 0x14f   : > { %1816 = vmatpush.msra.mxu1 %v1646_v29  ;;  %1733 = vmatpush.msrb.mxu2 %v1627_v43  ;;  %v1588_v29 = vld [vmem:[%s12389_s5 + $0x128] sm:$0xff] }
 0x150   : > { %1691 = vmatpush.msra.mxu0 %v1555_v34  ;;  %1770 = vmatpush.msra.mxu3 %v1582_v38  ;;  %v1656_v30 = vld [vmem:[%s12389_s5 + $0x348] sm:$0xff]  ;;  %v1586_v34 = vld [vmem:[%s12389_s5 + $0x118] sm:$0xff] }
 0x151   : > { %1817 = vmatpush.msra.mxu1 %v1644_v42  ;;  %1734 = vmatpush.msrb.mxu2 %v1625_v46  ;;  %v1654_v38 = vld [vmem:[%s12389_s5 + $0x338] sm:$0xff]  ;;  %v1584_v42 = vld [vmem:[%s12389_s5 + $0x108] sm:$0xff] }
 0x152   : > { %1692 = vmatpush.msra.mxu0 %v1553_v33  ;;  %1771 = vmatpush.msra.mxu3 %v1580_v40  ;;  %v1652_v32 = vld [vmem:[%s12389_s5 + $0x328] sm:$0xff]  ;;  %v1650_v33 = vld [vmem:[%s12389_s5 + $0x318] sm:$0xff] }
 0x153   : > { %1818 = vmatpush.msra.mxu1 %v1642_v36  ;;  %1735 = vmatpush.msrb.mxu2 %v1623_v49  ;;  %v1648_v36 = vld [vmem:[%s12389_s5 + $0x308] sm:$0xff]  ;;  %v1978_v49 = vld [vmem:[%s12390_s6 + $0x3a0] sm:$0xff] }
 0x154   : > { %1693 = vmatpush.msra.mxu0 %v1551_v20  ;;  %1772 = vmatpush.msra.mxu3 %v1578_v31 }
 0x155   : > { %1819 = vmatpush.msra.mxu1 %v1640_v44  ;;  %1736 = vmatpush.msrb.mxu2 %v1621_v35  ;;  %v1976_v35 = vld [vmem:[%s12390_s6 + $0x390] sm:$0xff] }
 0x156   : > { %1793 = vmatpush.msrb.mxu0 %v1614_v45  ;;  %1773 = vmatpush.msra.mxu3 %v1576_v37 }
 0x157   : > { %1820 = vmatpush.msra.mxu1 %v1638_v47  ;;  %1737 = vmatpush.msrb.mxu2 %v1619_v53 }
 0x158   : > { %1794 = vmatpush.msrb.mxu0 %v1612_v48  ;;  %1774 = vmatpush.msra.mxu3 %v1574_v52  ;;  %v1980_v48 = vld [vmem:[%s12390_s6 + $0x3b0] sm:$0xff] }
 0x159   : > { %1821 = vmatpush.msra.mxu1 %v1636_v50  ;;  %1738 = vmatpush.msrb.mxu2 %v1617_v39  ;;  %v1956_v39 = vld [vmem:[%s12390_s6 + $0x2f0] sm:$0xff] }
 0x15a   : > { %1795 = vmatpush.msrb.mxu0 %v1610_v54  ;;  %1775 = vmatpush.msra.mxu3 %v1572_v51  ;;  %v1922_v51 = vld [vmem:[%s12390_s6 + $0x1e0] sm:$0xff] }
 0x15b   : > { %1822 = vmatpush.msra.mxu1 %v1634_v56  ;;  %1739 = vmatpush.msrb.mxu2 %v1615_v4  ;;  %v1924_v56 = vld [vmem:[%s12390_s6 + $0x1f0] sm:$0xff] }
 0x15c   : > { %1796 = vmatpush.msrb.mxu0 %v1608_v58  ;;  %1776 = vmatpush.msra.mxu3 %v1570_v60  ;;  %v1974_v58 = vld [vmem:[%s12390_s6 + $0x380] sm:$0xff] }
 0x15d   : > { %1823 = vmatpush.msra.mxu1 %v1632_v41  ;;  %1843 = vmatpush.msra.mxu2 %v1670_v8 }
 0x15e   : > { %1797 = vmatpush.msrb.mxu0 %v1606_v62  ;;  %1777 = vmatpush.msra.mxu3 %v1568_v55  ;;  %v1972_v55 = vld [vmem:[%s12390_s6 + $0x370] sm:$0xff] }
 0x15f   : > { %1824 = vmatpush.msra.mxu1 %v1630_v0  ;;  %1844 = vmatpush.msra.mxu2 %v1668_v13  ;;  %v1920_v0 = vld [vmem:[%s12390_s6 + $0x1d0] sm:$0xff] }
 0x160   : > { %1798 = vmatpush.msrb.mxu0 %v1604_v2  ;;  %1778 = vmatpush.msra.mxu3 %v1566_v6  ;;  %v1918_v2 = vld [vmem:[%s12390_s6 + $0x1c0] sm:$0xff]  ;;  %v1968_v13 = vld [vmem:[%s12390_s6 + $0x350] sm:$0xff] }
 0x161   : > { %1825 = vmatpush.msra.mxu1 %v1628_v3  ;;  %1845 = vmatpush.msra.mxu2 %v1666_v63  ;;  %v1954_v3 = vld [vmem:[%s12390_s6 + $0x2e0] sm:$0xff] }
 0x162   : > { %1799 = vmatpush.msrb.mxu0 %v1602_v57  ;;  %1779 = vmatpush.msra.mxu3 %v1564_v10  ;;  %v1970_v57 = vld [vmem:[%s12390_s6 + $0x360] sm:$0xff]  ;;  %v1892_v10 = vld [vmem:[%s12390_s6 + $0xf0] sm:$0xff] }
 0x163   : > { %1826 = vmatpush.msra.mxu1 %v1626_v7  ;;  %1846 = vmatpush.msra.mxu2 %v1664_v17  ;;  %v1950_v63 = vld [vmem:[%s12390_s6 + $0x2c0] sm:$0xff]  ;;  %v1912_v17 = vld [vmem:[%s12390_s6 + $0x190] sm:$0xff] }
 0x164   : > { %1800 = vmatpush.msrb.mxu0 %v1600_v12  ;;  %1780 = vmatpush.msra.mxu3 %v1562_v61  ;;  %v1916_v12 = vld [vmem:[%s12390_s6 + $0x1b0] sm:$0xff]  ;;  %v1890_v61 = vld [vmem:[%s12390_s6 + $0xe0] sm:$0xff] }
 0x165   : > { %1827 = vmatpush.msra.mxu1 %v1624_v59  ;;  %1847 = vmatpush.msra.mxu2 %v1662_v21  ;;  %v1952_v59 = vld [vmem:[%s12390_s6 + $0x2d0] sm:$0xff]  ;;  %v1886_v21 = vld [vmem:[%s12390_s6 + $0xc0] sm:$0xff] }
 0x166   : > { %1801 = vmatpush.msrb.mxu0 %v1598_v5  ;;  %1781 = vmatpush.msra.mxu3 %v1560_v15 }
 0x167   : > { %1828 = vmatpush.msra.mxu1 %v1622_v14  ;;  %1848 = vmatpush.msra.mxu2 %v1660_v24  ;;  %v1914_v14 = vld [vmem:[%s12390_s6 + $0x1a0] sm:$0xff] }
 0x168   : > { %1802 = vmatpush.msrb.mxu0 %v1596_v1  ;;  %1782 = vmatpush.msra.mxu3 %v1558_v9  ;;  %v1966_v1 = vld [vmem:[%s12390_s6 + $0x340] sm:$0xff]  ;;  %v1948_v9 = vld [vmem:[%s12390_s6 + $0x2b0] sm:$0xff] }
 0x169   : > { %1829 = vmatpush.msra.mxu1 %v1620_v16  ;;  %1849 = vmatpush.msra.mxu2 %v1658_v27  ;;  %v1888_v16 = vld [vmem:[%s12390_s6 + $0xd0] sm:$0xff]  ;;  %v1962_v24 = vld [vmem:[%s12390_s6 + $0x320] sm:$0xff] }
 0x16a   : > { %1803 = vmatpush.msrb.mxu0 %v1594_v18  ;;  %1783 = vmatpush.msra.mxu3 %v1556_v22  ;;  %v1964_v18 = vld [vmem:[%s12390_s6 + $0x330] sm:$0xff] }
 0x16b   : > { %1830 = vmatpush.msra.mxu1 %v1618_v19  ;;  %1850 = vmatpush.msra.mxu2 %v1656_v30  ;;  %v1944_v27 = vld [vmem:[%s12390_s6 + $0x290] sm:$0xff]  ;;  %v1906_v30 = vld [vmem:[%s12390_s6 + $0x160] sm:$0xff] }
 0x16c   : > { %1804 = vmatpush.msrb.mxu0 %v1592_v11  ;;  %1784 = vmatpush.msra.mxu3 %v1554_v25  ;;  %v1910_v11 = vld [vmem:[%s12390_s6 + $0x180] sm:$0xff]  ;;  %v1884_v25 = vld [vmem:[%s12390_s6 + $0xb0] sm:$0xff] }
 0x16d   : > { %1831 = vmatpush.msra.mxu1 %v1616_v23  ;;  %1851 = vmatpush.msra.mxu2 %v1654_v38  ;;  %v1946_v23 = vld [vmem:[%s12390_s6 + $0x2a0] sm:$0xff] }
 0x16e   : > { %1805 = vmatpush.msrb.mxu0 %v1590_v26  ;;  %1785 = vmatpush.msra.mxu3 %v1552_v28  ;;  %v1908_v26 = vld [vmem:[%s12390_s6 + $0x170] sm:$0xff]  ;;  %v1958_v38 = vld [vmem:[%s12390_s6 + $0x300] sm:$0xff] }
 0x16f   : > { %1852 = vmatpush.msra.mxu2 %v1652_v32  ;;  %v1960_v28 = vld [vmem:[%s12390_s6 + $0x310] sm:$0xff] }
 0x170   : > { %1806 = vmatpush.msrb.mxu0 %v1588_v29  ;;  %v1882_v29 = vld [vmem:[%s12390_s6 + $0xa0] sm:$0xff]  ;;  %v1880_v32 = vld [vmem:[%s12390_s6 + $0x90] sm:$0xff] }
 0x171   : > { %1853 = vmatpush.msra.mxu2 %v1650_v33  ;;  %v1904_v33 = vld [vmem:[%s12390_s6 + $0x150] sm:$0xff] }
 0x172   : > { %1807 = vmatpush.msrb.mxu0 %v1586_v34  ;;  %v1942_v34 = vld [vmem:[%s12390_s6 + $0x280] sm:$0xff] }
 0x173   : > { %1854 = vmatpush.msra.mxu2 %v1648_v36  ;;  %v1891_v36 = vld [vmem:[%s12390_s6 + $0xe8] sm:$0xff] }
 0x174   : > { %1808 = vmatpush.msrb.mxu0 %v1584_v42  ;;  %v1893_v42 = vld [vmem:[%s12390_s6 + $0xf8] sm:$0xff] }
 0x1a2   : > { %v1391_v40 = vpop.f32.mrf.mxu1 }
 0x1a7   : > { %v1437_v43 = vpop.f32.mrf.mxu3 }
 0x1ab   : > { %v1394_v31 = vpop.f32.mrf.mxu1 }
 0x1ac   : > { %v1368_v20 = vpop.f32.mrf.mxu0 }
 0x1af   : > { %v1414_v44 = vpop.f32.mrf.mxu2 }
 0x1b0   : > { %v1440_v45 = vpop.f32.mrf.mxu3 }
 0x1b3   : > { %v1491_v37 = vpop.f32.mrf.mxu1 }
 0x1b4   : > { %v1371_v46 = vpop.f32.mrf.mxu0  ;;  %v7768_v47 = vmax.f32 %v1391_v40, %v1491_v37  ;;  %v1940_v40 = vld [vmem:[%s12390_s6 + $0x270] sm:$0xff] }
 0x1b5   : > { %v1936_v37 = vld [vmem:[%s12390_s6 + $0x250] sm:$0xff] }
 0x1b6   : > { %1717 = vmatmul.f32.vlgmr.msrb.gmra.mxu1 %v7768_v47 }
 0x1b7   : > { %2055 = vmatpush.msrb.mxu1 %v1980_v48  ;;  %v7777_v50 = vpop.f32.mrf.mxu2  ;;  %v1887_v48 = vld [vmem:[%s12390_s6 + $0xc8] sm:$0xff] }
 0x1b8   : > { %v1537_v52 = vpop.f32.mrf.mxu3 }
 0x1b9   : > { %v7779_v54 = vmax.f32 %v1437_v43, %v1537_v52  ;;  %2056 = vmatpush.msrb.mxu1 %v1978_v49  ;;  %v1878_v43 = vld [vmem:[%s12390_s6 + $0x80] sm:$0xff] }
 0x1ba   : > { %v1874_v49 = vld [vmem:[%s12390_s6 + $0x60] sm:$0xff] }
 0x1bb   : > { %5893 = vmatmul.msk.f32.vlgmr.msrb.gmra.mxu3 %vm1671_vm3, %v7779_v54  ;;  %2057 = vmatpush.msrb.mxu1 %v1976_v35  ;;  %v1494_v53 = vpop.f32.mrf.mxu1  ;;  %v1934_v52 = vld [vmem:[%s12390_s6 + $0x240] sm:$0xff]  ;;  %v1872_v35 = vld [vmem:[%s12390_s6 + $0x50] sm:$0xff] }
 0x1bc   : > { %2005 = vmatpush.msrb.mxu3 %v1924_v56  ;;  %v1468_v41 = vpop.f32.mrf.mxu0  ;;  %v7797_v62 = vmax.f32 %v1394_v31, %v1494_v53  ;;  %v1938_v31 = vld [vmem:[%s12390_s6 + $0x260] sm:$0xff]  ;;  %v1885_v56 = vld [vmem:[%s12390_s6 + $0xb8] sm:$0xff]  ;;  %v1883_v53 = vld [vmem:[%s12390_s6 + $0xa8] sm:$0xff] }
 0x1bd   : > { %v7795_v60 = vmax.f32 %v1368_v20, %v1468_v41  ;;  %2058 = vmatpush.msrb.mxu1 %v1974_v58  ;;  %v1902_v20 = vld [vmem:[%s12390_s6 + $0x140] sm:$0xff]  ;;  %v1932_v58 = vld [vmem:[%s12390_s6 + $0x230] sm:$0xff] }
 0x1be   : > { %2006 = vmatpush.msrb.mxu3 %v1922_v51  ;;  %1720 = vmatmul.f32.gmra.mxu1 %v7797_v62  ;;  %v1896_v51 = vld [vmem:[%s12390_s6 + $0x110] sm:$0xff]  ;;  %v1870_v41 = vld [vmem:[%s12390_s6 + $0x40] sm:$0xff] }
 0x1bf   : > { %1694 = vmatmul.f32.vlgmr.msra.gmra.mxu0 %v7795_v60  ;;  %v1514_v4 = vpop.f32.mrf.mxu2  ;;  %2059 = vmatpush.msrb.mxu1 %v1972_v55  ;;  %v1957_v55 = vld [vmem:[%s12390_s6 + $0x2f8] sm:$0xff] }
 0x1c0   : > { %2007 = vmatpush.msrb.mxu3 %v1920_v0  ;;  %2028 = vmatpush.msra.mxu0 %v1956_v39  ;;  %v1540_v6 = vpop.f32.mrf.mxu3  ;;  %v7819_v7 = vmax.f32 %v1414_v44, %v1514_v4  ;;  %v1889_v44 = vld [vmem:[%s12390_s6 + $0xd8] sm:$0xff]  ;;  %v1894_v0 = vld [vmem:[%s12390_s6 + $0x100] sm:$0xff]  ;;  %v1928_v4 = vld [vmem:[%s12390_s6 + $0x210] sm:$0xff] }
 0x1c1   : > { %v7821_v8 = vmax.f32 %v1440_v45, %v1540_v6  ;;  %2060 = vmatpush.msrb.mxu1 %v1970_v57  ;;  %v1876_v45 = vld [vmem:[%s12390_s6 + $0x70] sm:$0xff]  ;;  %v1930_v39 = vld [vmem:[%s12390_s6 + $0x220] sm:$0xff]  ;;  %v1879_v6 = vld [vmem:[%s12390_s6 + $0x88] sm:$0xff] }
 0x1c2   : > { %2008 = vmatpush.msrb.mxu3 %v1918_v2  ;;  %2029 = vmatpush.msra.mxu0 %v1954_v3  ;;  %v1881_v2 = vld [vmem:[%s12390_s6 + $0x98] sm:$0xff]  ;;  %v1868_v3 = vld [vmem:[%s12390_s6 + $0x30] sm:$0xff]  ;;  %v1955_v57 = vld [vmem:[%s12390_s6 + $0x2e8] sm:$0xff] }
 0x1c3   : > { %1740 = vmatmul.f32.vlgmr.msrb.gmra.mxu2 %v7819_v7  ;;  %5894 = vmatmul.msk.f32.gmra.mxu3 %vm1671_vm3, %v7821_v8 }
 0x1c4   : > { %1982 = vmatpush.msrb.mxu2 %v1892_v10  ;;  %v1471_v5 = vpop.f32.mrf.mxu0  ;;  %2009 = vmatpush.msrb.mxu3 %v1916_v12  ;;  %v1866_v10 = vld [vmem:[%s12390_s6 + $0x20] sm:$0xff] }
 0x1c5   : > { %2030 = vmatpush.msra.mxu0 %v1952_v59  ;;  %v7847_v15 = vmax.f32 %v1371_v46, %v1471_v5  ;;  %2061 = vmatpush.msrb.mxu1 %v1968_v13  ;;  %v1900_v46 = vld [vmem:[%s12390_s6 + $0x130] sm:$0xff]  ;;  %v1926_v12 = vld [vmem:[%s12390_s6 + $0x200] sm:$0xff]  ;;  %v1877_v59 = vld [vmem:[%s12390_s6 + $0x78] sm:$0xff] }
 0x1c6   : > { %1983 = vmatpush.msrb.mxu2 %v1890_v61  ;;  %2010 = vmatpush.msrb.mxu3 %v1914_v14  ;;  %v1953_v13 = vld [vmem:[%s12390_s6 + $0x2d8] sm:$0xff]  ;;  %v1864_v5 = vld [vmem:[%s12390_s6 + $0x10] sm:$0xff]  ;;  %v1951_v14 = vld [vmem:[%s12390_s6 + $0x2c8] sm:$0xff] }
 0x1c7   : > { %2031 = vmatpush.msra.mxu0 %v1950_v63  ;;  %2062 = vmatpush.msrb.mxu1 %v1966_v1  ;;  %v1517_v19 = vpop.f32.mrf.mxu2  ;;  %v1981_v61 = vld [vmem:[%s12390_s6 + $0x3b8] sm:$0xff]  ;;  %v1875_v63 = vld [vmem:[%s12390_s6 + $0x68] sm:$0xff] }
 0x1c8   : > { %1697 = vmatmul.f32.gmra.mxu0 %v7847_v15  ;;  %1832 = vmatmul.f32.vlgmr.msra.gmra.mxu1 %v7819_v7  ;;  %v7870_v22 = vmax.f32 %v7777_v50, %v1517_v19  ;;  %v1898_v50 = vld [vmem:[%s12390_s6 + $0x120] sm:$0xff]  ;;  %v1979_v1 = vld [vmem:[%s12390_s6 + $0x3a8] sm:$0xff]  ;;  %v1977_v19 = vld [vmem:[%s12390_s6 + $0x398] sm:$0xff] }
 0x1c9   : > { %1984 = vmatpush.msrb.mxu2 %v1888_v16  ;;  %2011 = vmatpush.msrb.mxu3 %v1912_v17  ;;  %v1862_v16 = vld [vmem:[%s12390_s6] sm:$0xff]  ;;  %v1949_v17 = vld [vmem:[%s12390_s6 + $0x2b8] sm:$0xff] }
 0x1ca   : > { %2032 = vmatpush.msra.mxu0 %v1948_v9  ;;  %2063 = vmatpush.msrb.mxu1 %v1964_v18  ;;  %v1873_v9 = vld [vmem:[%s12390_s6 + $0x58] sm:$0xff] }
 0x1cb   : > { %1985 = vmatpush.msrb.mxu2 %v1886_v21  ;;  %2012 = vmatpush.msrb.mxu3 %v1910_v11  ;;  %v1925_v18 = vld [vmem:[%s12390_s6 + $0x1f8] sm:$0xff]  ;;  %v1871_v21 = vld [vmem:[%s12390_s6 + $0x48] sm:$0xff] }
 0x1cc   : > { %2033 = vmatpush.msra.mxu0 %v1946_v23  ;;  %2064 = vmatpush.msrb.mxu1 %v1962_v24  ;;  %v1923_v11 = vld [vmem:[%s12390_s6 + $0x1e8] sm:$0xff] }
 0x1cd   : > { %1743 = vmatmul.f32.gmra.mxu2 %v7870_v22  ;;  %1786 = vmatmul.f32.vlgmr.msra.gmra.mxu3 %v7795_v60  ;;  %v1947_v23 = vld [vmem:[%s12390_s6 + $0x2a8] sm:$0xff] }
 0x1ce   : > { %1986 = vmatpush.msrb.mxu2 %v1884_v25  ;;  %2013 = vmatpush.msrb.mxu3 %v1908_v26  ;;  %v1975_v24 = vld [vmem:[%s12390_s6 + $0x388] sm:$0xff]  ;;  %v1869_v25 = vld [vmem:[%s12390_s6 + $0x38] sm:$0xff] }
 0x1cf   : > { %2034 = vmatpush.msra.mxu0 %v1944_v27  ;;  %2065 = vmatpush.msrb.mxu1 %v1960_v28  ;;  %v1921_v26 = vld [vmem:[%s12390_s6 + $0x1d8] sm:$0xff] }
 0x1d0   : > { %1987 = vmatpush.msrb.mxu2 %v1882_v29  ;;  %2014 = vmatpush.msrb.mxu3 %v1906_v30  ;;  %v1945_v27 = vld [vmem:[%s12390_s6 + $0x298] sm:$0xff]  ;;  %v1867_v29 = vld [vmem:[%s12390_s6 + $0x28] sm:$0xff] }
 0x1d1   : > { %2035 = vmatpush.msra.mxu0 %v1942_v34  ;;  %2066 = vmatpush.msrb.mxu1 %v1958_v38  ;;  %v1973_v28 = vld [vmem:[%s12390_s6 + $0x378] sm:$0xff]  ;;  %v1919_v30 = vld [vmem:[%s12390_s6 + $0x1c8] sm:$0xff] }
 0x1d2   : > { %1809 = vmatmul.f32.vlgmr.msrb.gmra.mxu0 %v7768_v47  ;;  %1988 = vmatpush.msrb.mxu2 %v1880_v32  ;;  %v1943_v34 = vld [vmem:[%s12390_s6 + $0x288] sm:$0xff]  ;;  %v1917_v32 = vld [vmem:[%s12390_s6 + $0x1b8] sm:$0xff] }
 0x1d3   : > { %2074 = vmatpush.msra.mxu1 %v1893_v42  ;;  %2015 = vmatpush.msrb.mxu3 %v1904_v33  ;;  %v1971_v38 = vld [vmem:[%s12390_s6 + $0x368] sm:$0xff]  ;;  %v1865_v42 = vld [vmem:[%s12390_s6 + $0x18] sm:$0xff] }
 0x1d4   : > { %1835 = vmatmul.f32.gmra.mxu1 %v7870_v22  ;;  %2036 = vmatpush.msra.mxu0 %v1940_v40  ;;  %v1941_v33 = vld [vmem:[%s12390_s6 + $0x278] sm:$0xff] }
 0x1d5   : > { %2075 = vmatpush.msra.mxu1 %v1891_v36  ;;  %1989 = vmatpush.msrb.mxu2 %v1878_v43  ;;  %v1969_v40 = vld [vmem:[%s12390_s6 + $0x358] sm:$0xff]  ;;  %v1863_v36 = vld [vmem:[%s12390_s6 + $0x8] sm:$0xff] }
 0x1d6   : > { %2016 = vmatpush.msrb.mxu3 %v1902_v20  ;;  %2037 = vmatpush.msra.mxu0 %v1938_v31  ;;  %v1915_v43 = vld [vmem:[%s12390_s6 + $0x1a8] sm:$0xff] }
 0x1d7   : > { %2076 = vmatpush.msra.mxu1 %v1889_v44  ;;  %1789 = vmatmul.f32.gmra.mxu3 %v7847_v15  ;;  %v1939_v20 = vld [vmem:[%s12390_s6 + $0x268] sm:$0xff]  ;;  %v1913_v44 = vld [vmem:[%s12390_s6 + $0x198] sm:$0xff] }
 0x1d8   : > { %5895 = vmatmul.msk.f32.vlgmr.msra.gmra.mxu2 %vm1671_vm3, %v7779_v54  ;;  %2017 = vmatpush.msrb.mxu3 %v1900_v46  ;;  %v1967_v31 = vld [vmem:[%s12390_s6 + $0x348] sm:$0xff]  ;;  %v1965_v46 = vld [vmem:[%s12390_s6 + $0x338] sm:$0xff] }
 0x1d9   : > { %1990 = vmatpush.msrb.mxu2 %v1876_v45  ;;  %2038 = vmatpush.msra.mxu0 %v1936_v37  ;;  %v1937_v45 = vld [vmem:[%s12390_s6 + $0x258] sm:$0xff]  ;;  %v1911_v37 = vld [vmem:[%s12390_s6 + $0x188] sm:$0xff] }
 0x1da   : > { %2077 = vmatpush.msra.mxu1 %v1887_v48  ;;  %2018 = vmatpush.msrb.mxu3 %v1898_v50  ;;  %v1935_v48 = vld [vmem:[%s12390_s6 + $0x248] sm:$0xff]  ;;  %v1909_v50 = vld [vmem:[%s12390_s6 + $0x178] sm:$0xff] }
 0x1db   : > { %1991 = vmatpush.msrb.mxu2 %v1874_v49  ;;  %2039 = vmatpush.msra.mxu0 %v1934_v52  ;;  %v1963_v49 = vld [vmem:[%s12390_s6 + $0x328] sm:$0xff]  ;;  %v1961_v52 = vld [vmem:[%s12390_s6 + $0x318] sm:$0xff] }
 0x1dc   : > { %2078 = vmatpush.msra.mxu1 %v1885_v56  ;;  %1812 = vmatmul.f32.gmra.mxu0 %v7797_v62  ;;  %v1907_v56 = vld [vmem:[%s12390_s6 + $0x168] sm:$0xff] }
 0x1dd   : > { %1992 = vmatpush.msrb.mxu2 %v1872_v35  ;;  %2019 = vmatpush.msrb.mxu3 %v1896_v51  ;;  %v1931_v35 = vld [vmem:[%s12390_s6 + $0x228] sm:$0xff] }
 0x1de   : > { %2040 = vmatpush.msra.mxu0 %v1932_v58  ;;  %5897 = vmatmul.msk.f32.vlgmr.msrb.gmra.mxu1 %vm1671_vm3, %v7779_v54  ;;  %v1959_v51 = vld [vmem:[%s12390_s6 + $0x308] sm:$0xff]  ;;  %v1905_v58 = vld [vmem:[%s12390_s6 + $0x158] sm:$0xff] }
 0x1df   : > { %1993 = vmatpush.msrb.mxu2 %v1870_v41  ;;  %2079 = vmatpush.msra.mxu1 %v1883_v53  ;;  %v1929_v41 = vld [vmem:[%s12390_s6 + $0x218] sm:$0xff]  ;;  %v1903_v53 = vld [vmem:[%s12390_s6 + $0x148] sm:$0xff] }
 0x1e0   : > { %2020 = vmatpush.msrb.mxu3 %v1894_v0  ;;  %2041 = vmatpush.msra.mxu0 %v1930_v39  ;;  %v1927_v0 = vld [vmem:[%s12390_s6 + $0x208] sm:$0xff]  ;;  %v1901_v39 = vld [vmem:[%s12390_s6 + $0x138] sm:$0xff] }
 0x1e1   : > { %2080 = vmatpush.msra.mxu1 %v1881_v2  ;;  %5896 = vmatmul.msk.f32.gmra.mxu2 %vm1671_vm3, %v7821_v8  ;;  %v5957_v2 = vld [vmem:[%s12391_s7 + $0x580] sm:$0xff] }
 0x1e2   : > { %2120 = vmatpush.msra.mxu3 %v1957_v55  ;;  %1994 = vmatpush.msrb.mxu2 %v1868_v3  ;;  %v1895_v55 = vld [vmem:[%s12390_s6 + $0x108] sm:$0xff]  ;;  %v5945_v3 = vld [vmem:[%s12391_s7 + $0x520] sm:$0xff] }
 0x1e3   : > { %2021 = vmatmul.f32.vlgmr.msrb.gmra.mxu3 %v7768_v47  ;;  %2042 = vmatpush.msra.mxu0 %v1928_v4  ;;  %v5954_v4 = vld [vmem:[%s12391_s7 + $0x568] sm:$0xff] }
 0x1e4   : > { %2081 = vmatpush.msra.mxu1 %v1879_v6  ;;  %2121 = vmatpush.msra.mxu3 %v1955_v57  ;;  %v5941_v6 = vld [vmem:[%s12391_s7 + $0x500] sm:$0xff]  ;;  %v5950_v57 = vld [vmem:[%s12391_s7 + $0x548] sm:$0xff] }
 0x1e5   : > { %1995 = vmatpush.msrb.mxu2 %v1866_v10  ;;  %2043 = vmatpush.msra.mxu0 %v1926_v12  ;;  %v5937_v10 = vld [vmem:[%s12391_s7 + $0x4e0] sm:$0xff]  ;;  %v5946_v12 = vld [vmem:[%s12391_s7 + $0x528] sm:$0xff] }
 0x1e6   : > { %2082 = vmatpush.msra.mxu1 %v1877_v59  ;;  %2122 = vmatpush.msra.mxu3 %v1953_v13  ;;  %v5933_v59 = vld [vmem:[%s12391_s7 + $0x4c0] sm:$0xff]  ;;  %v5942_v13 = vld [vmem:[%s12391_s7 + $0x508] sm:$0xff] }
 0x1e7   : > { %2147 = vmatpush.msrb.mxu0 %v1981_v61  ;;  %1996 = vmatpush.msrb.mxu2 %v1864_v5  ;;  %v5929_v61 = vld [vmem:[%s12391_s7 + $0x4a0] sm:$0xff]  ;;  %v5938_v5 = vld [vmem:[%s12391_s7 + $0x4e8] sm:$0xff] }
 0x1e8   : > { %2044 = vmatmul.f32.vlgmr.msra.gmra.mxu0 %v7819_v7  ;;  %5898 = vmatmul.msk.f32.gmra.mxu1 %vm1671_vm3, %v7821_v8 }
 0x1e9   : > { %2123 = vmatpush.msra.mxu3 %v1951_v14  ;;  %2083 = vmatpush.msra.mxu1 %v1875_v63  ;;  %v5925_v14 = vld [vmem:[%s12391_s7 + $0x480] sm:$0xff]  ;;  %v5934_v63 = vld [vmem:[%s12391_s7 + $0x4c8] sm:$0xff] }
 0x1ea   : > { %2148 = vmatpush.msrb.mxu0 %v1979_v1  ;;  %1997 = vmatpush.msrb.mxu2 %v1862_v16  ;;  %v5921_v1 = vld [vmem:[%s12391_s7 + $0x460] sm:$0xff]  ;;  %v5930_v16 = vld [vmem:[%s12391_s7 + $0x4a8] sm:$0xff] }
 0x1eb   : > { %2124 = vmatpush.msra.mxu3 %v1949_v17  ;;  %2084 = vmatpush.msra.mxu1 %v1873_v9  ;;  %v5917_v17 = vld [vmem:[%s12391_s7 + $0x440] sm:$0xff]  ;;  %v5926_v9 = vld [vmem:[%s12391_s7 + $0x488] sm:$0xff] }
 0x1ec   : > { %2097 = vmatpush.msra.mxu2 %v1925_v18  ;;  %2149 = vmatpush.msrb.mxu0 %v1977_v19  ;;  %v5913_v18 = vld [vmem:[%s12391_s7 + $0x420] sm:$0xff]  ;;  %v5922_v19 = vld [vmem:[%s12391_s7 + $0x468] sm:$0xff] }
 0x1ed   : > { %1998 = vmatmul.f32.vlgmr.msrb.gmra.mxu2 %v7795_v60  ;;  %2024 = vmatmul.f32.gmra.mxu3 %v7797_v62 }
 0x1ee   : > { %2085 = vmatpush.msra.mxu1 %v1871_v21  ;;  %2098 = vmatpush.msra.mxu2 %v1923_v11  ;;  %v5909_v21 = vld [vmem:[%s12391_s7 + $0x400] sm:$0xff]  ;;  %v5918_v11 = vld [vmem:[%s12391_s7 + $0x448] sm:$0xff] }
 0x1ef   : > { %2125 = vmatpush.msra.mxu3 %v1947_v23  ;;  %2150 = vmatpush.msrb.mxu0 %v1975_v24 }
 0x1f0   : > { %2086 = vmatpush.msra.mxu1 %v1869_v25  ;;  %2099 = vmatpush.msra.mxu2 %v1921_v26  ;;  %v5905_v25 = vld [vmem:[%s12391_s7 + $0x3e0] sm:$0xff]  ;;  %v5914_v26 = vld [vmem:[%s12391_s7 + $0x428] sm:$0xff] }
 0x1f1   : > { %2126 = vmatpush.msra.mxu3 %v1945_v27  ;;  %2151 = vmatpush.msrb.mxu0 %v1973_v28  ;;  %v5901_v28 = vld [vmem:[%s12391_s7 + $0x3c0] sm:$0xff] }
 0x1f2   : > { %2087 = vmatpush.msra.mxu1 %v1867_v29  ;;  %2047 = vmatmul.f32.gmra.mxu0 %v7870_v22  ;;  %v5910_v29 = vld [vmem:[%s12391_s7 + $0x408] sm:$0xff] }
 0x1f3   : > { %2100 = vmatpush.msra.mxu2 %v1919_v30  ;;  %2127 = vmatpush.msra.mxu3 %v1943_v34  ;;  %v5964_v30 = vld [vmem:[%s12391_s7 + $0x5b8] sm:$0xff] }
 0x1f4   : > { %2152 = vmatpush.msrb.mxu0 %v1971_v38  ;;  %2088 = vmatpush.msra.mxu1 %v1865_v42  ;;  %v5906_v38 = vld [vmem:[%s12391_s7 + $0x3e8] sm:$0xff]  ;;  %v5960_v42 = vld [vmem:[%s12391_s7 + $0x598] sm:$0xff] }
 0x1f5   : > { %2101 = vmatpush.msra.mxu2 %v1917_v32  ;;  %2128 = vmatpush.msra.mxu3 %v1941_v33 }
 0x1f6   : > { %2153 = vmatpush.msrb.mxu0 %v1969_v40  ;;  %2001 = vmatmul.f32.gmra.mxu2 %v7847_v15  ;;  %v6017_v40 = vld [vmem:[%s12391_s7 + $0x760] sm:$0xff] }
 0x1f7   : > { %2089 = vmatpush.msra.mxu1 %v1863_v36  ;;  %2102 = vmatpush.msra.mxu2 %v1915_v43  ;;  %v5902_v36 = vld [vmem:[%s12391_s7 + $0x3c8] sm:$0xff]  ;;  %v5956_v43 = vld [vmem:[%s12391_s7 + $0x578] sm:$0xff] }
 0x1f8   : > { %2129 = vmatpush.msra.mxu3 %v1939_v20  ;;  %2154 = vmatpush.msrb.mxu0 %v1967_v31  ;;  %v6020_v20 = vld [vmem:[%s12391_s7 + $0x778] sm:$0xff] }
 0x1f9   : > { %2090 = vmatmul.f32.vlgmr.msra.gmra.mxu1 %v7795_v60  ;;  %2103 = vmatpush.msra.mxu2 %v1913_v44  ;;  %v1933_v60 = vld [vmem:[%s12390_s6 + $0x238] sm:$0xff]  ;;  %v6013_v44 = vld [vmem:[%s12391_s7 + $0x740] sm:$0xff] }
 0x1fa   : > { %2130 = vmatpush.msra.mxu3 %v1937_v45  ;;  %2155 = vmatpush.msrb.mxu0 %v1965_v46  ;;  %v5952_v45 = vld [vmem:[%s12391_s7 + $0x558] sm:$0xff] }
 0x1fb   : > { %2104 = vmatpush.msra.mxu2 %v1911_v37  ;;  %2459 = vmatpush.msrb.mxu1 %v6017_v40  ;;  %v6016_v46 = vld [vmem:[%s12391_s7 + $0x758] sm:$0xff]  ;;  %v5978_v40 = vld [vmem:[%s12391_s7 + $0x628] sm:$0xff] }
 0x1fc   : > { %2131 = vmatpush.msra.mxu3 %v1935_v48  ;;  %2156 = vmatpush.msrb.mxu0 %v1963_v49  ;;  %v6009_v48 = vld [vmem:[%s12391_s7 + $0x720] sm:$0xff]  ;;  %v6018_v49 = vld [vmem:[%s12391_s7 + $0x768] sm:$0xff] }
 0x1fd   : > { %2105 = vmatpush.msra.mxu2 %v1909_v50  ;;  %2460 = vmatpush.msrb.mxu1 %v6013_v44  ;;  %v5948_v50 = vld [vmem:[%s12391_s7 + $0x538] sm:$0xff]  ;;  %v5974_v44 = vld [vmem:[%s12391_s7 + $0x608] sm:$0xff] }
 0x1fe   : > { %2132 = vmatpush.msra.mxu3 %v1933_v60  ;;  %2157 = vmatpush.msrb.mxu0 %v1961_v52  ;;  %v6012_v60 = vld [vmem:[%s12391_s7 + $0x738] sm:$0xff]  ;;  %v6005_v52 = vld [vmem:[%s12391_s7 + $0x700] sm:$0xff] }
 0x1ff   : > { %2106 = vmatpush.msra.mxu2 %v1907_v56  ;;  %2461 = vmatpush.msrb.mxu1 %v6009_v48  ;;  %v6014_v56 = vld [vmem:[%s12391_s7 + $0x748] sm:$0xff]  ;;  %v5968_v48 = vld [vmem:[%s12391_s7 + $0x5d8] sm:$0xff] }
 0x200   : > { %2133 = vmatpush.msra.mxu3 %v1931_v35  ;;  %2158 = vmatpush.msrb.mxu0 %v1959_v51  ;;  %v5944_v35 = vld [vmem:[%s12391_s7 + $0x518] sm:$0xff] }
 0x201   : > { %2093 = vmatmul.f32.gmra.mxu1 %v7847_v15  ;;  %5899 = vmatmul.msk.f32.vlgmr.msrb.gmra.mxu0 %vm1671_vm3, %v7779_v54  ;;  %v1899_v15 = vld [vmem:[%s12390_s6 + $0x128] sm:$0xff]  ;;  %v1897_v54 = vld [vmem:[%s12390_s6 + $0x118] sm:$0xff] }
 0x202   : > { %2107 = vmatpush.msra.mxu2 %v1905_v58  ;;  %2134 = vmatpush.msra.mxu3 %v1929_v41  ;;  %v6008_v51 = vld [vmem:[%s12391_s7 + $0x718] sm:$0xff]  ;;  %v6001_v58 = vld [vmem:[%s12391_s7 + $0x6e0] sm:$0xff]  ;;  %v6010_v41 = vld [vmem:[%s12391_s7 + $0x728] sm:$0xff] }
 0x203   : > { %2462 = vmatpush.msrb.mxu1 %v6005_v52 }
 0x204   : > { %2108 = vmatpush.msra.mxu2 %v1903_v53  ;;  %2135 = vmatpush.msra.mxu3 %v1927_v0  ;;  %v5940_v53 = vld [vmem:[%s12391_s7 + $0x4f8] sm:$0xff] }
 0x205   : > { %2136 = vmatmul.f32.vlgmr.msra.gmra.mxu3 %v7819_v7  ;;  %v5961_v7 = vld [vmem:[%s12391_s7 + $0x5a0] sm:$0xff]  ;;  %2463 = vmatpush.msrb.mxu1 %v6001_v58  ;;  %v6004_v0 = vld [vmem:[%s12391_s7 + $0x6f8] sm:$0xff] }
 0x206   : > { %2109 = vmatpush.msra.mxu2 %v1901_v39  ;;  %2437 = vmatpush.msra.mxu0 %v5961_v7  ;;  %v5936_v7 = vld [vmem:[%s12391_s7 + $0x4d8] sm:$0xff] }
 0x207   : > { %2499 = vmatpush.msrb.mxu3 %v6018_v49  ;;  %v5970_v49 = vld [vmem:[%s12391_s7 + $0x5e8] sm:$0xff] }
 0x208   : > { %2110 = vmatpush.msra.mxu2 %v1899_v15  ;;  %2438 = vmatpush.msra.mxu0 %v5957_v2  ;;  %v6000_v2 = vld [vmem:[%s12391_s7 + $0x6d8] sm:$0xff] }
 0x209   : > { %5900 = vmatmul.msk.f32.gmra.mxu0 %vm1671_vm3, %v7821_v8  ;;  %v5953_v8 = vld [vmem:[%s12391_s7 + $0x560] sm:$0xff]  ;;  %2500 = vmatpush.msrb.mxu3 %v6014_v56 }
 0x20a   : > { %2111 = vmatpush.msra.mxu2 %v1897_v54  ;;  %2439 = vmatpush.msra.mxu0 %v5953_v8  ;;  %v5997_v54 = vld [vmem:[%s12391_s7 + $0x6c0] sm:$0xff] }
 0x20b   : > { %2501 = vmatpush.msrb.mxu3 %v6010_v41  ;;  %2464 = vmatpush.msrb.mxu1 %v5997_v54 }
 0x20c   : > { %2112 = vmatpush.msra.mxu2 %v1895_v55  ;;  %v6006_v55 = vld [vmem:[%s12391_s7 + $0x708] sm:$0xff] }
 0x20d   : > { %2113 = vmatmul.f32.vlgmr.msra.gmra.mxu2 %v7768_v47  ;;  %2139 = vmatmul.f32.gmra.mxu3 %v7870_v22  ;;  %v5962_v47 = vld [vmem:[%s12391_s7 + $0x5a8] sm:$0xff]  ;;  %v5949_v22 = vld [vmem:[%s12391_s7 + $0x540] sm:$0xff] }
 0x20e   : > { %2477 = vmatpush.msrb.mxu2 %v5962_v47  ;;  %2440 = vmatpush.msra.mxu0 %v5949_v22  ;;  %v5993_v47 = vld [vmem:[%s12391_s7 + $0x6a0] sm:$0xff]  ;;  %v5932_v22 = vld [vmem:[%s12391_s7 + $0x4b8] sm:$0xff] }
 0x20f   : > { %2502 = vmatpush.msrb.mxu3 %v6006_v55  ;;  %2465 = vmatpush.msrb.mxu1 %v5993_v47  ;;  %v6011_v47 = vld [vmem:[%s12391_s7 + $0x730] sm:$0xff] }
 0x210   : > { %2441 = vmatpush.msra.mxu0 %v5945_v3  ;;  %v5996_v3 = vld [vmem:[%s12391_s7 + $0x6b8] sm:$0xff] }
 0x212   : > { %2442 = vmatpush.msra.mxu0 %v5941_v6  ;;  %v5989_v6 = vld [vmem:[%s12391_s7 + $0x680] sm:$0xff] }
 0x213   : > { %2466 = vmatpush.msrb.mxu1 %v5989_v6  ;;  %v5939_v6 = vld [vmem:[%s12391_s7 + $0x4f0] sm:$0xff] }
 0x214   : > { %2443 = vmatpush.msra.mxu0 %v5937_v10  ;;  %v5928_v10 = vld [vmem:[%s12391_s7 + $0x498] sm:$0xff] }
 0x215   : > { %2116 = vmatmul.f32.gmra.mxu2 %v7797_v62  ;;  %v5958_v62 = vld [vmem:[%s12391_s7 + $0x588] sm:$0xff] }
 0x216   : > { %2478 = vmatpush.msrb.mxu2 %v5958_v62  ;;  %2444 = vmatpush.msra.mxu0 %v5933_v59  ;;  %v6002_v62 = vld [vmem:[%s12391_s7 + $0x6e8] sm:$0xff]  ;;  %v5985_v59 = vld [vmem:[%s12391_s7 + $0x660] sm:$0xff] }
 0x217   : > { %2503 = vmatpush.msrb.mxu3 %v6002_v62  ;;  %2467 = vmatpush.msrb.mxu1 %v5985_v59 }
 0x218   : > { %2479 = vmatpush.msrb.mxu2 %v5954_v4  ;;  %2445 = vmatpush.msra.mxu0 %v5929_v61  ;;  %v5924_v61 = vld [vmem:[%s12391_s7 + $0x478] sm:$0xff] }
 0x21a   : > { %2480 = vmatpush.msrb.mxu2 %v5950_v57  ;;  %2446 = vmatpush.msra.mxu0 %v5925_v14  ;;  %v5998_v57 = vld [vmem:[%s12391_s7 + $0x6c8] sm:$0xff]  ;;  %v5981_v14 = vld [vmem:[%s12391_s7 + $0x640] sm:$0xff] }
 0x21b   : > { %2504 = vmatpush.msrb.mxu3 %v5998_v57  ;;  %2468 = vmatpush.msrb.mxu1 %v5981_v14  ;;  %v6003_v57 = vld [vmem:[%s12391_s7 + $0x6f0] sm:$0xff] }
 0x21c   : > { %2481 = vmatpush.msrb.mxu2 %v5946_v12  ;;  %2447 = vmatpush.msra.mxu0 %v5921_v1  ;;  %v5992_v12 = vld [vmem:[%s12391_s7 + $0x698] sm:$0xff]  ;;  %v5931_v14 = vld [vmem:[%s12391_s7 + $0x4b0] sm:$0xff] }
 0x21d   : > { %v5920_v1 = vld [vmem:[%s12391_s7 + $0x458] sm:$0xff] }
 0x21e   : > { %2482 = vmatpush.msrb.mxu2 %v5942_v13  ;;  %2448 = vmatpush.msra.mxu0 %v5917_v17  ;;  %v5994_v13 = vld [vmem:[%s12391_s7 + $0x6a8] sm:$0xff] }
 0x21f   : > { %2505 = vmatpush.msrb.mxu3 %v5994_v13 }
 0x220   : > { %2483 = vmatpush.msrb.mxu2 %v5938_v5  ;;  %2449 = vmatpush.msra.mxu0 %v5913_v18  ;;  %v5988_v5 = vld [vmem:[%s12391_s7 + $0x678] sm:$0xff]  ;;  %v5977_v18 = vld [vmem:[%s12391_s7 + $0x620] sm:$0xff] }
 0x221   : > { %2469 = vmatpush.msrb.mxu1 %v5977_v18  ;;  %v5927_v18 = vld [vmem:[%s12391_s7 + $0x490] sm:$0xff] }
 0x222   : > { %2484 = vmatpush.msrb.mxu2 %v5934_v63  ;;  %2450 = vmatpush.msra.mxu0 %v5909_v21  ;;  %v5990_v63 = vld [vmem:[%s12391_s7 + $0x688] sm:$0xff]  ;;  %v5916_v21 = vld [vmem:[%s12391_s7 + $0x438] sm:$0xff] }
 0x223   : > { %2506 = vmatpush.msrb.mxu3 %v5990_v63 }
 0x224   : > { %2485 = vmatpush.msrb.mxu2 %v5930_v16  ;;  %2451 = vmatpush.msra.mxu0 %v5905_v25  ;;  %v5984_v16 = vld [vmem:[%s12391_s7 + $0x658] sm:$0xff] }
 0x226   : > { %2486 = vmatpush.msrb.mxu2 %v5926_v9  ;;  %2452 = vmatpush.msra.mxu0 %v5901_v28  ;;  %v5982_v28 = vld [vmem:[%s12391_s7 + $0x648] sm:$0xff] }
 0x228   : > { %2487 = vmatpush.msrb.mxu2 %v5922_v19  ;;  %2557 = vmatpush.msrb.mxu0 %v5964_v30  ;;  %v5986_v19 = vld [vmem:[%s12391_s7 + $0x668] sm:$0xff]  ;;  %v5976_v30 = vld [vmem:[%s12391_s7 + $0x618] sm:$0xff] }
 0x229   : > { %2507 = vmatpush.msrb.mxu3 %v5986_v19  ;;  %v5991_v19 = vld [vmem:[%s12391_s7 + $0x690] sm:$0xff] }
 0x22a   : > { %2488 = vmatpush.msrb.mxu2 %v5918_v11  ;;  %2558 = vmatpush.msrb.mxu0 %v5960_v42  ;;  %v5980_v11 = vld [vmem:[%s12391_s7 + $0x638] sm:$0xff] }
 0x22b   : > { %2508 = vmatpush.msrb.mxu3 %v5982_v28  ;;  %v5983_v28 = vld [vmem:[%s12391_s7 + $0x650] sm:$0xff] }
 0x22c   : > { %2489 = vmatpush.msrb.mxu2 %v5914_v26  ;;  %2559 = vmatpush.msrb.mxu0 %v5956_v43  ;;  %v5973_v26 = vld [vmem:[%s12391_s7 + $0x600] sm:$0xff]  ;;  %v5972_v43 = vld [vmem:[%s12391_s7 + $0x5f8] sm:$0xff] }
 0x22d   : > { %2470 = vmatpush.msrb.mxu1 %v5973_v26  ;;  %2509 = vmatpush.msrb.mxu3 %v5978_v40  ;;  %v5919_v26 = vld [vmem:[%s12391_s7 + $0x450] sm:$0xff] }
 0x22e   : > { %2490 = vmatpush.msrb.mxu2 %v5910_v29  ;;  %2560 = vmatpush.msrb.mxu0 %v5952_v45  ;;  %v5912_v29 = vld [vmem:[%s12391_s7 + $0x418] sm:$0xff]  ;;  %v5963_v45 = vld [vmem:[%s12391_s7 + $0x5b0] sm:$0xff] }
 0x22f   : > { %2510 = vmatpush.msrb.mxu3 %v5974_v44  ;;  %v5975_v40 = vld [vmem:[%s12391_s7 + $0x610] sm:$0xff] }
 0x230   : > { %2491 = vmatpush.msrb.mxu2 %v5906_v38  ;;  %2561 = vmatpush.msrb.mxu0 %v5948_v50  ;;  %v5969_v38 = vld [vmem:[%s12391_s7 + $0x5e0] sm:$0xff] }
 0x231   : > { %2471 = vmatpush.msrb.mxu1 %v5969_v38  ;;  %2511 = vmatpush.msrb.mxu3 %v5970_v49  ;;  %v5911_v38 = vld [vmem:[%s12391_s7 + $0x410] sm:$0xff] }
 0x232   : > { %2492 = vmatpush.msrb.mxu2 %v5902_v36  ;;  %2562 = vmatpush.msrb.mxu0 %v5944_v35  ;;  %v5908_v36 = vld [vmem:[%s12391_s7 + $0x3f8] sm:$0xff]  ;;  %v5966_v35 = vld [vmem:[%s12391_s7 + $0x5c8] sm:$0xff]  ;;  %v5967_v49 = vld [vmem:[%s12391_s7 + $0x5d0] sm:$0xff] }
 0x233   : > { %v8286_v34 = vpop.f32.mrf.mxu1  ;;  %2512 = vmatpush.msrb.mxu3 %v5966_v35  ;;  %v2235_v35 = vld [vmem:[%s12391_s7 + $0x1c8] sm:$0xff] }
 0x234   : > { %2579 = vmatpush.msra.mxu2 %v6020_v20  ;;  %2563 = vmatpush.msrb.mxu0 %v5940_v53  ;;  %v5965_v20 = vld [vmem:[%s12391_s7 + $0x5c0] sm:$0xff] }
 0x235   : > { %2472 = vmatpush.msrb.mxu1 %v5965_v20  ;;  %v5971_v20 = vld [vmem:[%s12391_s7 + $0x5f0] sm:$0xff] }
 0x236   : > { %2580 = vmatpush.msra.mxu2 %v6016_v46  ;;  %2564 = vmatpush.msrb.mxu0 %v5936_v7  ;;  %v5904_v46 = vld [vmem:[%s12391_s7 + $0x3d8] sm:$0xff] }
 0x237   : > { %2517 = vmatpush.msra.mxu1 %v5963_v45 }
 0x238   : > { %2581 = vmatpush.msra.mxu2 %v6012_v60  ;;  %2565 = vmatpush.msrb.mxu0 %v5932_v22  ;;  %v5959_v60 = vld [vmem:[%s12391_s7 + $0x590] sm:$0xff] }
 0x239   : > { %2518 = vmatpush.msra.mxu1 %v5959_v60  ;;  %v5943_v22 = vld [vmem:[%s12391_s7 + $0x510] sm:$0xff]  ;;  %v2295_v60 = vld [vmem:[%s12391_s7 + $0x3a8] sm:$0xff] }
 0x23a   : > { %2582 = vmatpush.msra.mxu2 %v6008_v51  ;;  %2566 = vmatpush.msrb.mxu0 %v5928_v10 }
 0x23b   : > { %v8321_v37 = vpop.f32.mrf.mxu1 }
 0x23c   : > { %v8275_v27 = vpop.f32.mrf.mxu0  ;;  %2583 = vmatpush.msra.mxu2 %v6004_v0  ;;  %2567 = vmatpush.msrb.mxu0 %v5924_v61  ;;  %v5951_v0 = vld [vmem:[%s12391_s7 + $0x550] sm:$0xff] }
 0x23d   : > { %v1719_v50 = vadd.f32 %v8286_v34, %v8275_v27  ;;  %v5955_v27 = vld [vmem:[%s12391_s7 + $0x570] sm:$0xff] }
 0x23e   : > { %v8265_v23 = vpop.f32.mrf.mxu3  ;;  %2584 = vmatpush.msra.mxu2 %v6000_v2  ;;  %2568 = vmatpush.msrb.mxu0 %v5920_v1  ;;  %v6019_v34 = vld [vmem:[%s12391_s7 + $0x770] sm:$0xff] }
 0x23f   : > { %2519 = vmatpush.msra.mxu1 %v5955_v27  ;;  %2539 = vmatpush.msra.mxu3 %v6019_v34  ;;  %v5947_v2 = vld [vmem:[%s12391_s7 + $0x530] sm:$0xff] }
 0x240   : > { %2585 = vmatpush.msra.mxu2 %v5996_v3  ;;  %2569 = vmatpush.msrb.mxu0 %v5916_v21 }
 0x241   : > { %2520 = vmatpush.msra.mxu1 %v5951_v0 }
 0x242   : > { %2586 = vmatpush.msra.mxu2 %v5992_v12  ;;  %2570 = vmatpush.msrb.mxu0 %v5912_v29  ;;  %v5915_v29 = vld [vmem:[%s12391_s7 + $0x430] sm:$0xff] }
 0x243   : > { %2521 = vmatpush.msra.mxu1 %v5947_v2  ;;  %v2279_v2 = vld [vmem:[%s12391_s7 + $0x328] sm:$0xff] }
 0x244   : > { %2587 = vmatpush.msra.mxu2 %v5988_v5  ;;  %2571 = vmatpush.msrb.mxu0 %v5908_v36 }
 0x245   : > { %v8310_v31 = vpop.f32.mrf.mxu0  ;;  %v8389_v4 = vpop.f32.mrf.mxu1  ;;  %2522 = vmatpush.msra.mxu1 %v5943_v22 }
 0x246   : > { %v8267_v24 = vpop.f32.mrf.mxu2  ;;  %v8294_v32 = vpop.f32.mrf.mxu3  ;;  %2588 = vmatpush.msra.mxu2 %v5984_v16  ;;  %2572 = vmatpush.msrb.mxu0 %v5904_v46  ;;  %v1722_v3 = vadd.f32 %v8321_v37, %v8310_v31  ;;  %v5935_v31 = vld [vmem:[%s12391_s7 + $0x4d0] sm:$0xff] }
 0x247   : > { %v1742_v51 = vadd.f32 %v8267_v24, %v1719_v50  ;;  %v6015_v24 = vld [vmem:[%s12391_s7 + $0x750] sm:$0xff]  ;;  %2523 = vmatpush.msra.mxu1 %v5939_v6  ;;  %v2239_v50 = vld [vmem:[%s12391_s7 + $0x1e8] sm:$0xff] }
 0x248   : > { %2589 = vmatpush.msra.mxu2 %v5980_v11  ;;  %2540 = vmatpush.msra.mxu3 %v6015_v24  ;;  %v5999_v37 = vld [vmem:[%s12391_s7 + $0x6d0] sm:$0xff] }
 0x249   : > { %v1765_v55 = vadd.f32 %v8265_v23, %v1742_v51  ;;  %v6007_v23 = vld [vmem:[%s12391_s7 + $0x710] sm:$0xff]  ;;  %2524 = vmatpush.msra.mxu1 %v5935_v31  ;;  %v2291_v51 = vld [vmem:[%s12391_s7 + $0x388] sm:$0xff] }
 0x24a   : > { %2590 = vmatpush.msra.mxu2 %v5976_v30  ;;  %2541 = vmatpush.msra.mxu3 %v6011_v47  ;;  %v5923_v11 = vld [vmem:[%s12391_s7 + $0x470] sm:$0xff] }
 0x24b   : > { %2525 = vmatpush.msra.mxu1 %v5931_v14  ;;  %v5979_v30 = vld [vmem:[%s12391_s7 + $0x630] sm:$0xff]  ;;  %v2263_v14 = vld [vmem:[%s12391_s7 + $0x2a8] sm:$0xff] }
 0x24c   : > { %2591 = vmatpush.msra.mxu2 %v5972_v43  ;;  %2542 = vmatpush.msra.mxu3 %v6007_v23  ;;  %v5907_v43 = vld [vmem:[%s12391_s7 + $0x3f0] sm:$0xff]  ;;  %v2275_v23 = vld [vmem:[%s12391_s7 + $0x308] sm:$0xff] }
 0x24d   : > { %2526 = vmatpush.msra.mxu1 %v5927_v18  ;;  %v2199_v18 = vld [vmem:[%s12391_s7 + $0xa8] sm:$0xff] }
 0x24e   : > { %2592 = vmatpush.msra.mxu2 %v5968_v48  ;;  %2543 = vmatpush.msra.mxu3 %v6003_v57  ;;  %v5903_v48 = vld [vmem:[%s12391_s7 + $0x3d0] sm:$0xff] }
 0x24f   : > { %v8375_v8 = vpop.f32.mrf.mxu0  ;;  %2527 = vmatpush.msra.mxu1 %v5923_v11  ;;  %v2191_v11 = vld [vmem:[%s12391_s7 + $0x68] sm:$0xff] }
 0x250   : > { %v8296_v33 = vpop.f32.mrf.mxu2  ;;  %v8359_v39 = vpop.f32.mrf.mxu3  ;;  %2544 = vmatpush.msra.mxu3 %v5999_v37 }
 0x251   : > { %v8460_v42 = vpop.f32.mrf.mxu1  ;;  %v1745_v59 = vadd.f32 %v8296_v33, %v1722_v3  ;;  %v5995_v33 = vld [vmem:[%s12391_s7 + $0x6b0] sm:$0xff]  ;;  %2528 = vmatpush.msra.mxu1 %v5919_v26  ;;  %v2187_v26 = vld [vmem:[%s12391_s7 + $0x48] sm:$0xff] }
 0x252   : > { %2545 = vmatpush.msra.mxu3 %v5995_v33 }
 0x253   : > { %v1768_v1 = vadd.f32 %v8294_v32, %v1745_v59  ;;  %v5987_v32 = vld [vmem:[%s12391_s7 + $0x670] sm:$0xff]  ;;  %2529 = vmatpush.msra.mxu1 %v5915_v29 }
 0x254   : > { %2546 = vmatpush.msra.mxu3 %v5991_v19  ;;  %v2195_v19 = vld [vmem:[%s12391_s7 + $0x88] sm:$0xff] }
 0x255   : > { %2530 = vmatpush.msra.mxu1 %v5911_v38  ;;  %v2183_v38 = vld [vmem:[%s12391_s7 + $0x28] sm:$0xff] }
 0x256   : > { %2547 = vmatpush.msra.mxu3 %v5987_v32  ;;  %v2247_v32 = vld [vmem:[%s12391_s7 + $0x228] sm:$0xff] }
 0x257   : > { %2531 = vmatpush.msra.mxu1 %v5907_v43 }
 0x258   : > { %2548 = vmatpush.msra.mxu3 %v5983_v28  ;;  %v2243_v28 = vld [vmem:[%s12391_s7 + $0x208] sm:$0xff] }
 0x259   : > { %v8443_v25 = vpop.f32.mrf.mxu0  ;;  %2532 = vmatpush.msra.mxu1 %v5903_v48  ;;  %v2294_v48 = vld [vmem:[%s12391_s7 + $0x3a0] sm:$0xff] }
 0x25a   : > { %v8427_v17 = vpop.f32.mrf.mxu3  ;;  %2549 = vmatpush.msra.mxu3 %v5979_v30  ;;  %v2241_v30 = vld [vmem:[%s12391_s7 + $0x1f8] sm:$0xff] }
 0x25b   : > { %v8361_v15 = vpop.f32.mrf.mxu2  ;;  %v2068_v54 = vpop.f32.mrf.mxu1  ;;  %v1814_v3 = vadd.f32 %v8443_v25, %v8427_v17  ;;  %v2211_v17 = vld [vmem:[%s12391_s7 + $0x108] sm:$0xff] }
 0x25c   : > { %2550 = vmatpush.msra.mxu3 %v5975_v40  ;;  %v2267_v25 = vld [vmem:[%s12391_s7 + $0x2c8] sm:$0xff] }
 0x25d   : > { %v1837_v31 = vadd.f32 %v8460_v42, %v1814_v3  ;;  %v2203_v42 = vld [vmem:[%s12391_s7 + $0xc8] sm:$0xff]  ;;  %v2270_v3 = vld [vmem:[%s12391_s7 + $0x2e0] sm:$0xff] }
 0x25e   : > { %2551 = vmatpush.msra.mxu3 %v5971_v20 }
 0x260   : > { %2552 = vmatpush.msra.mxu3 %v5967_v49  ;;  %v2179_v49 = vld [vmem:[%s12391_s7 + $0x8] sm:$0xff] }
 0x264   : > { %v8429_v9 = vpop.f32.mrf.mxu2 }
 0x265   : > { %v2045_v41 = vpop.f32.mrf.mxu0  ;;  %v2071_v63 = vpop.f32.mrf.mxu1  ;;  %v1860_v33 = vadd.f32 %v8429_v9, %v1837_v31  ;;  %v2255_v9 = vld [vmem:[%s12391_s7 + $0x268] sm:$0xff]  ;;  %v2265_v31 = vld [vmem:[%s12391_s7 + $0x2b8] sm:$0xff] }
 0x266   : > { %v2022_v52 = vpop.f32.mrf.mxu3 }
 0x26f   : > { %v2048_v61 = vpop.f32.mrf.mxu0 }
 0x270   : > { %v1999_v56 = vpop.f32.mrf.mxu2  ;;  %v2025_v10 = vpop.f32.mrf.mxu3 }
 0x271   : > { %v2023_v58 = vadd.f32 %v2022_v52, %v1999_v56 }
 0x273   : > { %v2046_v53 = vadd.f32 %v2045_v41, %v2023_v58  ;;  %v1811_v58 = vadd.f32 %v8375_v8, %v8359_v39  ;;  %v2231_v41 = vld [vmem:[%s12391_s7 + $0x1a8] sm:$0xff] }
 0x274   : > { %v2227_v39 = vld [vmem:[%s12391_s7 + $0x188] sm:$0xff] }
 0x275   : > { %v2069_v7 = vadd.f32 %v2068_v54, %v2046_v53  ;;  %v2287_v53 = vld [vmem:[%s12391_s7 + $0x368] sm:$0xff]  ;;  %v1834_v54 = vadd.f32 %v8389_v4, %v1811_v58  ;;  %v2293_v58 = vld [vmem:[%s12391_s7 + $0x398] sm:$0xff] }
 0x276   : > { %v2091_v56 = vpop.f32.mrf.mxu1  ;;  %v2283_v8 = vld [vmem:[%s12391_s7 + $0x348] sm:$0xff] }
 0x277   : > { %v8517_v62 = vmax.f32 %v1765_v55, %v2069_v7  ;;  %v2223_v7 = vld [vmem:[%s12391_s7 + $0x168] sm:$0xff]  ;;  %v1857_v47 = vadd.f32 %v8361_v15, %v1834_v54  ;;  %v2278_v54 = vld [vmem:[%s12391_s7 + $0x320] sm:$0xff] }
 0x278   : > { %v2219_v4 = vld [vmem:[%s12391_s7 + $0x148] sm:$0xff] }
 0x279   : > { %2170 = vst [vmem:[#allocation2] sm:$0xff] %v8517_v62  ;;  %v2002_v12 = vpop.f32.mrf.mxu2 }
 0x27a   : > { %v2026_v13 = vadd.f32 %v2025_v10, %v2002_v12  ;;  %v2215_v10 = vld [vmem:[%s12391_s7 + $0x128] sm:$0xff] }
 0x27b   : > { %v2271_v12 = vld [vmem:[%s12391_s7 + $0x2e8] sm:$0xff] }
 0x27c   : > { %v2049_v5 = vadd.f32 %v2048_v61, %v2026_v13 }
 0x27e   : > { %v2072_v16 = vadd.f32 %v2071_v63, %v2049_v5  ;;  %v2160_v24 = vpop.f32.mrf.mxu0  ;;  %v2094_v15 = vpop.f32.mrf.mxu1  ;;  %v2207_v5 = vld [vmem:[%s12391_s7 + $0xe8] sm:$0xff] }
 0x280   : > { %v2168_v21 = vmax.f32 %v1768_v1, %v2072_v16  ;;  %v2298_v36 = vld [vmem:[#allocation2] sm:$0xfe]  ;;  %v2259_v1 = vld [vmem:[%s12391_s7 + $0x288] sm:$0xff] }
 0x281   : > { %v2428_v45 = vrot.slane %v2298_v36, 1 }
 0x282   : > { %2173 = vst [vmem:[#allocation2 + $0x10] sm:$0xf] %v2168_v21  ;;  %v2251_v21 = vld [vmem:[%s12391_s7 + $0x248] sm:$0xff] }
 0x286   : > { %v2163_v61 = vpop.f32.mrf.mxu0 }
 0x288   : > { %v2137_v27 = vpop.f32.mrf.mxu3 }
 0x289   : > { %v2300_v44 = vld [vmem:[#allocation2 + $0x10] sm:$0x1] }
 0x28a   : > { %v2429_v46 = vrot.slane %v2300_v44, 1  ;;  %v2237_v44 = vld [vmem:[%s12391_s7 + $0x1d8] sm:$0xff] }
 0x28c   : > { %v8597_v52 = vsel %vm2427_vm4, %v2428_v45, %v2429_v46  ;;  %v2238_v46 = vld [vmem:[%s12391_s7 + $0x1e0] sm:$0xff] }
 0x28d   : > { %2453 = vmatmul.f32.vlgmr.msra.gmra.mxu0 %v8597_v52  ;;  %2493 = vmatmul.f32.vlgmr.msrb.gmra.mxu2 %v8597_v52 }
 0x28e   : > { %2640 = vmatpush.msrb.mxu2 %v2239_v50  ;;  %2662 = vmatpush.msra.mxu0 %v2295_v60  ;;  %v2233_v50 = vld [vmem:[%s12391_s7 + $0x1b8] sm:$0xff] }
 0x28f   : > { %v2297_v60 = vld [vmem:[%s12391_s7 + $0x3b8] sm:$0xff] }
 0x290   : > { %v2114_v34 = vpop.f32.mrf.mxu2  ;;  %2641 = vmatpush.msrb.mxu2 %v2235_v35  ;;  %2663 = vmatpush.msra.mxu0 %v2291_v51  ;;  %v2140_v13 = vpop.f32.mrf.mxu3  ;;  %v2290_v35 = vld [vmem:[%s12391_s7 + $0x380] sm:$0xff]  ;;  %v2229_v51 = vld [vmem:[%s12391_s7 + $0x198] sm:$0xff] }
 0x291   : > { %v2115_v0 = vadd.f32 %v2114_v34, %v2091_v56  ;;  %v2234_v56 = vld [vmem:[%s12391_s7 + $0x1c0] sm:$0xff] }
 0x292   : > { %2642 = vmatpush.msrb.mxu2 %v2231_v41  ;;  %2664 = vmatpush.msra.mxu0 %v2287_v53  ;;  %v2286_v34 = vld [vmem:[%s12391_s7 + $0x360] sm:$0xff]  ;;  %v2225_v41 = vld [vmem:[%s12391_s7 + $0x178] sm:$0xff] }
 0x293   : > { %v2138_v55 = vadd.f32 %v2137_v27, %v2115_v0  ;;  %v2230_v27 = vld [vmem:[%s12391_s7 + $0x1a0] sm:$0xff]  ;;  %v2289_v53 = vld [vmem:[%s12391_s7 + $0x378] sm:$0xff] }
 0x294   : > { %2643 = vmatpush.msrb.mxu2 %v2227_v39  ;;  %2665 = vmatpush.msra.mxu0 %v2283_v8  ;;  %v2226_v0 = vld [vmem:[%s12391_s7 + $0x180] sm:$0xff]  ;;  %v2221_v39 = vld [vmem:[%s12391_s7 + $0x158] sm:$0xff] }
 0x295   : > { %v2161_v22 = vadd.f32 %v2160_v24, %v2138_v55  ;;  %2573 = vmatmul.f32.vlgmr.msrb.gmra.mxu0 %v8597_v52  ;;  %v2282_v24 = vld [vmem:[%s12391_s7 + $0x340] sm:$0xff]  ;;  %v2285_v8 = vld [vmem:[%s12391_s7 + $0x358] sm:$0xff] }
 0x296   : > { %2644 = vmatpush.msrb.mxu2 %v2223_v7  ;;  %2666 = vmatpush.msra.mxu0 %v2279_v2  ;;  %v2222_v55 = vld [vmem:[%s12391_s7 + $0x160] sm:$0xff]  ;;  %v2217_v7 = vld [vmem:[%s12391_s7 + $0x138] sm:$0xff] }
 0x297   : > { %v2167_v6 = vmax.f32 %v1857_v47, %v2161_v22  ;;  %v2281_v2 = vld [vmem:[%s12391_s7 + $0x338] sm:$0xff]  ;;  %v2218_v47 = vld [vmem:[%s12391_s7 + $0x140] sm:$0xff] }
 0x298   : > { %v2117_v57 = vpop.f32.mrf.mxu2  ;;  %2645 = vmatpush.msrb.mxu2 %v2219_v4  ;;  %2667 = vmatpush.msra.mxu0 %v2275_v23  ;;  %v2274_v22 = vld [vmem:[%s12391_s7 + $0x300] sm:$0xff]  ;;  %v2277_v4 = vld [vmem:[%s12391_s7 + $0x318] sm:$0xff] }
 0x299   : > { %2172 = vst.msk [vmem:[#allocation2 + $0x8] sm:$0xff] %vm2171_vm5, %v2167_v6  ;;  %v2118_v59 = vadd.f32 %v2117_v57, %v2094_v15  ;;  %v2214_v23 = vld [vmem:[%s12391_s7 + $0x120] sm:$0xff]  ;;  %v2209_v6 = vld [vmem:[%s12391_s7 + $0xf8] sm:$0xff] }
 0x29a   : > { %2646 = vmatpush.msrb.mxu2 %v2215_v10  ;;  %2668 = vmatpush.msra.mxu0 %v2271_v12  ;;  %v2273_v15 = vld [vmem:[%s12391_s7 + $0x2f8] sm:$0xff]  ;;  %v2210_v57 = vld [vmem:[%s12391_s7 + $0x100] sm:$0xff] }
 0x29b   : > { %v2141_v37 = vadd.f32 %v2140_v13, %v2118_v59  ;;  %v2266_v10 = vld [vmem:[%s12391_s7 + $0x2c0] sm:$0xff]  ;;  %v2205_v12 = vld [vmem:[%s12391_s7 + $0xd8] sm:$0xff] }
 0x29c   : > { %2647 = vmatpush.msrb.mxu2 %v2211_v17  ;;  %2669 = vmatpush.msra.mxu0 %v2267_v25  ;;  %v2269_v59 = vld [vmem:[%s12391_s7 + $0x2d8] sm:$0xff]  ;;  %v2206_v13 = vld [vmem:[%s12391_s7 + $0xe0] sm:$0xff] }
 0x29d   : > { %v2164_v63 = vadd.f32 %v2163_v61, %v2141_v37  ;;  %v2262_v17 = vld [vmem:[%s12391_s7 + $0x2a0] sm:$0xff]  ;;  %v2201_v25 = vld [vmem:[%s12391_s7 + $0xb8] sm:$0xff] }
 0x29e   : > { %2648 = vmatpush.msrb.mxu2 %v2207_v5  ;;  %2670 = vmatpush.msra.mxu0 %v2263_v14  ;;  %v2202_v37 = vld [vmem:[%s12391_s7 + $0xc0] sm:$0xff]  ;;  %v2197_v5 = vld [vmem:[%s12391_s7 + $0x98] sm:$0xff] }
 0x29f   : > { %v2169_v16 = vmax.f32 %v1860_v33, %v2164_v63  ;;  %v2258_v61 = vld [vmem:[%s12391_s7 + $0x280] sm:$0xff]  ;;  %v2261_v14 = vld [vmem:[%s12391_s7 + $0x298] sm:$0xff] }
 0x2a0   : > { %2649 = vmatpush.msrb.mxu2 %v2203_v42  ;;  %2671 = vmatpush.msra.mxu0 %v2259_v1  ;;  %v2299_v29 = vld [vmem:[#allocation2 + $0x8] sm:$0xfe]  ;;  %v2198_v33 = vld [vmem:[%s12391_s7 + $0xa0] sm:$0xff]  ;;  %v2193_v42 = vld [vmem:[%s12391_s7 + $0x78] sm:$0xff] }
 0x2a1   : > { %2175 = vst.msk [vmem:[#allocation2 + $0x18] sm:$0xf] %vm2174_vm6, %v2169_v16  ;;  %v8695_v36 = vld [vmem:[#allocation2 + $0x8] sm:$0xff]  ;;  %v2431_v43 = vrot.slane %v2299_v29, 1  ;;  %v2254_v63 = vld [vmem:[%s12391_s7 + $0x260] sm:$0xff]  ;;  %v2257_v1 = vld [vmem:[%s12391_s7 + $0x278] sm:$0xff] }
 0x2a2   : > { %2650 = vmatpush.msrb.mxu2 %v2199_v18  ;;  %2672 = vmatpush.msra.mxu0 %v2255_v9  ;;  %v2194_v16 = vld [vmem:[%s12391_s7 + $0x80] sm:$0xff]  ;;  %v2189_v9 = vld [vmem:[%s12391_s7 + $0x58] sm:$0xff] }
 0x2a3   : > { %v2250_v18 = vld [vmem:[%s12391_s7 + $0x240] sm:$0xff] }
 0x2a4   : > { %2651 = vmatpush.msrb.mxu2 %v2195_v19  ;;  %2673 = vmatpush.msra.mxu0 %v2251_v21  ;;  %v2253_v19 = vld [vmem:[%s12391_s7 + $0x258] sm:$0xff]  ;;  %v2190_v21 = vld [vmem:[%s12391_s7 + $0x60] sm:$0xff] }
 0x2a5   : > { %v2242_v29 = vld [vmem:[%s12391_s7 + $0x200] sm:$0xff] }
 0x2a6   : > { %2652 = vmatpush.msrb.mxu2 %v2191_v11  ;;  %2674 = vmatpush.msra.mxu0 %v2247_v32  ;;  %v2246_v11 = vld [vmem:[%s12391_s7 + $0x220] sm:$0xff]  ;;  %v2185_v32 = vld [vmem:[%s12391_s7 + $0x38] sm:$0xff] }
 0x2a8   : > { %v2301_v40 = vld [vmem:[#allocation2 + $0x18] sm:$0x1]  ;;  %2653 = vmatpush.msrb.mxu2 %v2187_v26  ;;  %2675 = vmatpush.msra.mxu0 %v2243_v28  ;;  %v2186_v28 = vld [vmem:[%s12391_s7 + $0x40] sm:$0xff] }
 0x2a9   : > { %v2432_v20 = vrot.slane %v2301_v40, 1  ;;  %6026 = vmatmul.msk.f32.vlgmr.msra.gmra.mxu0 %vm2171_vm5, %v8695_v36  ;;  %v2249_v26 = vld [vmem:[%s12391_s7 + $0x238] sm:$0xff] }
 0x2aa   : > { %2720 = vmatpush.msrb.mxu0 %v2241_v30  ;;  %2654 = vmatpush.msrb.mxu2 %v2183_v38  ;;  %v2181_v30 = vld [vmem:[%s12391_s7 + $0x18] sm:$0xff]  ;;  %v2240_v38 = vld [vmem:[%s12391_s7 + $0x1f0] sm:$0xff] }
 0x2ab   : > { %v2433_v45 = vsel %vm2427_vm4, %v2431_v43, %v2432_v20  ;;  %v2245_v40 = vld [vmem:[%s12391_s7 + $0x218] sm:$0xff]  ;;  %v2182_v43 = vld [vmem:[%s12391_s7 + $0x20] sm:$0xff]  ;;  %v6146_v20 = vld [vmem:[%s12391_s7 + $0xb28] sm:$0xff] }
 0x2ac   : > { %6021 = vmatmul.msk.f32.vlgmr.msrb.gmra.mxu1 %vm2171_vm5, %v2433_v45  ;;  %6022 = vmatmul.msk.f32.vlgmr.msrb.gmra.mxu3 %vm2171_vm5, %v2433_v45 }
 0x2ad   : > { %2721 = vmatpush.msrb.mxu0 %v2237_v44  ;;  %6024 = vmatmul.msk.f32.vlgmr.msra.gmra.mxu2 %vm2171_vm5, %v2433_v45  ;;  %v6090_v44 = vld [vmem:[%s12391_s7 + $0x968] sm:$0xff] }
 0x2ae   : > { %2600 = vmatpush.msrb.mxu3 %v2238_v46  ;;  %2622 = vmatpush.msrb.mxu1 %v2294_v48  ;;  %v2178_v46 = vld [vmem:[%s12391_s7] sm:$0xff]  ;;  %v6142_v48 = vld [vmem:[%s12391_s7 + $0xb08] sm:$0xff] }
 0x2af   : > { %2655 = vmatpush.msrb.mxu2 %v2179_v49  ;;  %2722 = vmatpush.msrb.mxu0 %v2233_v50  ;;  %v6086_v49 = vld [vmem:[%s12391_s7 + $0x948] sm:$0xff]  ;;  %v2232_v50 = vld [vmem:[%s12391_s7 + $0x1b0] sm:$0xff] }
 0x2b0   : > { %2601 = vmatpush.msrb.mxu3 %v2234_v56  ;;  %2623 = vmatpush.msrb.mxu1 %v2290_v35  ;;  %v6082_v56 = vld [vmem:[%s12391_s7 + $0x928] sm:$0xff] }
 0x2b1   : > { %2742 = vmatpush.msra.mxu2 %v2297_v60  ;;  %2723 = vmatpush.msrb.mxu0 %v2229_v51  ;;  %v2296_v60 = vld [vmem:[%s12391_s7 + $0x3b0] sm:$0xff]  ;;  %v6138_v35 = vld [vmem:[%s12391_s7 + $0xae8] sm:$0xff] }
 0x2b2   : > { %2602 = vmatpush.msrb.mxu3 %v2230_v27  ;;  %2624 = vmatpush.msrb.mxu1 %v2286_v34  ;;  %v2228_v51 = vld [vmem:[%s12391_s7 + $0x190] sm:$0xff]  ;;  %v6078_v27 = vld [vmem:[%s12391_s7 + $0x908] sm:$0xff] }
 0x2b3   : > { %2743 = vmatpush.msra.mxu2 %v2293_v58  ;;  %2724 = vmatpush.msrb.mxu0 %v2225_v41  ;;  %v2292_v58 = vld [vmem:[%s12391_s7 + $0x390] sm:$0xff]  ;;  %v6134_v34 = vld [vmem:[%s12391_s7 + $0xac8] sm:$0xff] }
 0x2b4   : > { %2603 = vmatpush.msrb.mxu3 %v2226_v0  ;;  %2625 = vmatpush.msrb.mxu1 %v2282_v24  ;;  %v2224_v41 = vld [vmem:[%s12391_s7 + $0x170] sm:$0xff]  ;;  %v6074_v0 = vld [vmem:[%s12391_s7 + $0x8e8] sm:$0xff] }
 0x2b5   : > { %2744 = vmatpush.msra.mxu2 %v2289_v53  ;;  %2725 = vmatpush.msrb.mxu0 %v2221_v39  ;;  %v2288_v53 = vld [vmem:[%s12391_s7 + $0x370] sm:$0xff]  ;;  %v6130_v24 = vld [vmem:[%s12391_s7 + $0xaa8] sm:$0xff] }
 0x2b6   : > { %2533 = vmatmul.f32.vlgmr.msra.gmra.mxu1 %v8597_v52  ;;  %6023 = vmatmul.msk.f32.vlgmr.msra.gmra.mxu3 %vm2171_vm5, %v2433_v45  ;;  %v2213_v52 = vld [vmem:[%s12391_s7 + $0x118] sm:$0xff]  ;;  %v2236_v45 = vld [vmem:[%s12391_s7 + $0x1d0] sm:$0xff] }
 0x2b7   : > { %2745 = vmatpush.msra.mxu2 %v2285_v8  ;;  %2626 = vmatpush.msrb.mxu1 %v2278_v54  ;;  %v2220_v39 = vld [vmem:[%s12391_s7 + $0x150] sm:$0xff]  ;;  %v6070_v54 = vld [vmem:[%s12391_s7 + $0x8c8] sm:$0xff] }
 0x2b8   : > { %2604 = vmatpush.msrb.mxu3 %v2222_v55  ;;  %2656 = vmatmul.f32.vlgmr.msrb.gmra.mxu2 %v8517_v62  ;;  %v2284_v8 = vld [vmem:[%s12391_s7 + $0x350] sm:$0xff]  ;;  %v6126_v55 = vld [vmem:[%s12391_s7 + $0xa88] sm:$0xff] }
 0x2b9   : > { %2726 = vmatpush.msrb.mxu0 %v2217_v7  ;;  %2746 = vmatpush.msra.mxu2 %v2281_v2  ;;  %v2216_v7 = vld [vmem:[%s12391_s7 + $0x130] sm:$0xff] }
 0x2ba   : > { %2605 = vmatpush.msrb.mxu3 %v2218_v47  ;;  %2627 = vmatpush.msrb.mxu1 %v2274_v22  ;;  %v2280_v2 = vld [vmem:[%s12391_s7 + $0x330] sm:$0xff]  ;;  %v6066_v47 = vld [vmem:[%s12391_s7 + $0x8a8] sm:$0xff] }
 0x2bb   : > { %2727 = vmatpush.msrb.mxu0 %v2213_v52  ;;  %2747 = vmatpush.msra.mxu2 %v2277_v4  ;;  %v6122_v22 = vld [vmem:[%s12391_s7 + $0xa68] sm:$0xff]  ;;  %v2212_v52 = vld [vmem:[%s12391_s7 + $0x110] sm:$0xff] }
 0x2bc   : > { %2606 = vmatpush.msrb.mxu3 %v2214_v23  ;;  %2628 = vmatpush.msrb.mxu1 %v2270_v3  ;;  %v2276_v4 = vld [vmem:[%s12391_s7 + $0x310] sm:$0xff]  ;;  %v6062_v23 = vld [vmem:[%s12391_s7 + $0x888] sm:$0xff] }
 0x2bd   : > { %2728 = vmatpush.msrb.mxu0 %v2209_v6  ;;  %2748 = vmatpush.msra.mxu2 %v2273_v15  ;;  %v6118_v3 = vld [vmem:[%s12391_s7 + $0xa48] sm:$0xff]  ;;  %v2208_v6 = vld [vmem:[%s12391_s7 + $0xf0] sm:$0xff] }
 0x2be   : > { %2607 = vmatpush.msrb.mxu3 %v2210_v57  ;;  %2629 = vmatpush.msrb.mxu1 %v2266_v10  ;;  %v2272_v15 = vld [vmem:[%s12391_s7 + $0x2f0] sm:$0xff]  ;;  %v6058_v57 = vld [vmem:[%s12391_s7 + $0x868] sm:$0xff] }
 0x2bf   : > { %2729 = vmatpush.msrb.mxu0 %v2205_v12  ;;  %2749 = vmatpush.msra.mxu2 %v2269_v59  ;;  %v6114_v10 = vld [vmem:[%s12391_s7 + $0xa28] sm:$0xff]  ;;  %v2204_v12 = vld [vmem:[%s12391_s7 + $0xd0] sm:$0xff] }
 0x2c0   : > { %2608 = vmatpush.msrb.mxu3 %v2206_v13  ;;  %2630 = vmatpush.msrb.mxu1 %v2262_v17  ;;  %v2268_v59 = vld [vmem:[%s12391_s7 + $0x2d0] sm:$0xff]  ;;  %v6054_v13 = vld [vmem:[%s12391_s7 + $0x848] sm:$0xff] }
 0x2c1   : > { %2730 = vmatpush.msrb.mxu0 %v2201_v25  ;;  %2750 = vmatpush.msra.mxu2 %v2265_v31  ;;  %v6110_v17 = vld [vmem:[%s12391_s7 + $0xa08] sm:$0xff]  ;;  %v2200_v25 = vld [vmem:[%s12391_s7 + $0xb0] sm:$0xff] }
 0x2c2   : > { %2609 = vmatpush.msrb.mxu3 %v2202_v37  ;;  %2631 = vmatpush.msrb.mxu1 %v2258_v61  ;;  %v2264_v31 = vld [vmem:[%s12391_s7 + $0x2b0] sm:$0xff]  ;;  %v6050_v37 = vld [vmem:[%s12391_s7 + $0x828] sm:$0xff] }
 0x2c3   : > { %2731 = vmatpush.msrb.mxu0 %v2197_v5  ;;  %2751 = vmatpush.msra.mxu2 %v2261_v14  ;;  %v6106_v61 = vld [vmem:[%s12391_s7 + $0x9e8] sm:$0xff]  ;;  %v2196_v5 = vld [vmem:[%s12391_s7 + $0x90] sm:$0xff] }
 0x2c4   : > { %2610 = vmatpush.msrb.mxu3 %v2198_v33  ;;  %2632 = vmatpush.msrb.mxu1 %v2254_v63  ;;  %v2260_v14 = vld [vmem:[%s12391_s7 + $0x290] sm:$0xff]  ;;  %v6046_v33 = vld [vmem:[%s12391_s7 + $0x808] sm:$0xff] }
 0x2c5   : > { %2732 = vmatpush.msrb.mxu0 %v2193_v42  ;;  %2752 = vmatpush.msra.mxu2 %v2257_v1  ;;  %v6102_v63 = vld [vmem:[%s12391_s7 + $0x9c8] sm:$0xff]  ;;  %v2192_v42 = vld [vmem:[%s12391_s7 + $0x70] sm:$0xff] }
 0x2c6   : > { %2611 = vmatpush.msrb.mxu3 %v2194_v16  ;;  %2633 = vmatpush.msrb.mxu1 %v2250_v18  ;;  %v2256_v1 = vld [vmem:[%s12391_s7 + $0x270] sm:$0xff]  ;;  %v2763_v16 = vld [vmem:[#allocation2 + $0x18] sm:$0x3]  ;;  %v6042_v18 = vld [vmem:[%s12391_s7 + $0x7e8] sm:$0xff] }
 0x2c7   : > { %2733 = vmatpush.msrb.mxu0 %v2189_v9  ;;  %2753 = vmatpush.msra.mxu2 %v2253_v19  ;;  %v6098_v9 = vld [vmem:[%s12391_s7 + $0x9a8] sm:$0xff]  ;;  %v2188_v19 = vld [vmem:[%s12391_s7 + $0x50] sm:$0xff] }
 0x2c8   : > { %2612 = vmatpush.msrb.mxu3 %v2190_v21  ;;  %2634 = vmatpush.msrb.mxu1 %v2246_v11  ;;  %v2252_v21 = vld [vmem:[%s12391_s7 + $0x250] sm:$0xff]  ;;  %v2761_v11 = vld [vmem:[#allocation2 + $0x8] sm:$0xfc] }
 0x2c9   : > { %2734 = vmatpush.msrb.mxu0 %v2185_v32  ;;  %2754 = vmatpush.msra.mxu2 %v2249_v26  ;;  %v6038_v32 = vld [vmem:[%s12391_s7 + $0x7c8] sm:$0xff] }
 0x2ca   : > { %2613 = vmatpush.msrb.mxu3 %v2186_v28  ;;  %2635 = vmatpush.msrb.mxu1 %v2242_v29  ;;  %v6094_v26 = vld [vmem:[%s12391_s7 + $0x988] sm:$0xff]  ;;  %v2894_v28 = vrot.slane %v2763_v16, 2  ;;  %v2184_v29 = vld [vmem:[%s12391_s7 + $0x30] sm:$0xff]  ;;  %v6112_v16 = vld [vmem:[%s12391_s7 + $0xa18] sm:$0xff] }
 0x2cb   : > { %6025 = vmatmul.msk.f32.vlgmr.msrb.gmra.mxu1 %vm2171_vm5, %v8695_v36  ;;  %2735 = vmatpush.msrb.mxu0 %v2181_v30  ;;  %v2248_v30 = vld [vmem:[%s12391_s7 + $0x230] sm:$0xff] }
 0x2cc   : > { %2680 = vmatpush.msra.mxu1 %v2240_v38  ;;  %2755 = vmatpush.msra.mxu2 %v2245_v40  ;;  %v2893_v38 = vrot.slane %v2761_v11, 2  ;;  %v6034_v40 = vld [vmem:[%s12391_s7 + $0x7a8] sm:$0xff]  ;;  %v6101_v11 = vld [vmem:[%s12391_s7 + $0x9c0] sm:$0xff] }
 0x2cd   : > { %2614 = vmatpush.msrb.mxu3 %v2182_v43  ;;  %2736 = vmatmul.f32.vlgmr.msrb.gmra.mxu0 %v8517_v62  ;;  %v6092_v43 = vld [vmem:[%s12391_s7 + $0x978] sm:$0xff] }
 0x2ce   : > { %6028 = vmatmul.msk.f32.vlgmr.msra.gmra.mxu2 %vm2171_vm5, %v8695_v36  ;;  %2961 = vmatpush.msra.mxu0 %v6146_v20  ;;  %v2180_v20 = vld [vmem:[%s12391_s7 + $0x10] sm:$0xff] }
 0x2cf   : > { %2939 = vmatpush.msrb.mxu2 %v6090_v44  ;;  %2681 = vmatpush.msra.mxu1 %v2236_v45  ;;  %v2762_v44 = vld [vmem:[#allocation2 + $0x10] sm:$0x3]  ;;  %v9070_v45 = vsel %vm2889_vm7, %v2893_v38, %v2894_v28  ;;  %v6104_v28 = vld [vmem:[%s12391_s7 + $0x9d8] sm:$0xff]  ;;  %v6037_v38 = vld [vmem:[%s12391_s7 + $0x7c0] sm:$0xff] }
 0x2d0   : > { %2615 = vmatpush.msrb.mxu3 %v2178_v46  ;;  %2962 = vmatpush.msra.mxu0 %v6142_v48  ;;  %v2244_v46 = vld [vmem:[%s12391_s7 + $0x210] sm:$0xff]  ;;  %v6088_v48 = vld [vmem:[%s12391_s7 + $0x958] sm:$0xff] }
 0x2d1   : > { %2940 = vmatpush.msrb.mxu2 %v6086_v49  ;;  %2616 = vmatmul.f32.vlgmr.msrb.gmra.mxu3 %v8517_v62  ;;  %v2760_v49 = vld [vmem:[#allocation2] sm:$0xfc] }
 0x2d2   : > { %2682 = vmatpush.msra.mxu1 %v2232_v50  ;;  %2702 = vmatpush.msra.mxu3 %v2296_v60  ;;  %v6089_v50 = vld [vmem:[%s12391_s7 + $0x960] sm:$0xff] }
 0x2d3   : > { %2941 = vmatpush.msrb.mxu2 %v6082_v56  ;;  %2963 = vmatpush.msra.mxu0 %v6138_v35  ;;  %v6145_v60 = vld [vmem:[%s12391_s7 + $0xb20] sm:$0xff]  ;;  %v2891_v56 = vrot.slane %v2762_v44, 2  ;;  %v6030_v35 = vld [vmem:[%s12391_s7 + $0x788] sm:$0xff]  ;;  %v6091_v44 = vld [vmem:[%s12391_s7 + $0x970] sm:$0xff] }
 0x2d4   : > { %2683 = vmatpush.msra.mxu1 %v2228_v51  ;;  %2703 = vmatpush.msra.mxu3 %v2292_v58  ;;  %v6084_v51 = vld [vmem:[%s12391_s7 + $0x938] sm:$0xff]  ;;  %v2890_v58 = vrot.slane %v2760_v49, 2  ;;  %v6270_v49 = vld [vmem:[%s12391_s7 + $0xee8] sm:$0xff] }
 0x2d5   : > { %2942 = vmatpush.msrb.mxu2 %v6078_v27  ;;  %2964 = vmatpush.msra.mxu0 %v6134_v34  ;;  %v6085_v27 = vld [vmem:[%s12391_s7 + $0x940] sm:$0xff] }
 0x2d6   : > { %2684 = vmatpush.msra.mxu1 %v2224_v41  ;;  %2704 = vmatpush.msra.mxu3 %v2288_v53  ;;  %v6141_v34 = vld [vmem:[%s12391_s7 + $0xb00] sm:$0xff]  ;;  %v9105_v41 = vsel %vm2889_vm7, %v2890_v58, %v2891_v56  ;;  %v6083_v58 = vld [vmem:[%s12391_s7 + $0x930] sm:$0xff] }
 0x2d7   : > { %2943 = vmatpush.msrb.mxu2 %v6074_v0  ;;  %2965 = vmatpush.msra.mxu0 %v6130_v24  ;;  %v6081_v53 = vld [vmem:[%s12391_s7 + $0x920] sm:$0xff]  ;;  %v6144_v0 = vld [vmem:[%s12391_s7 + $0xb18] sm:$0xff] }
 0x2d8   : > { %2685 = vmatpush.msra.mxu1 %v2220_v39  ;;  %2705 = vmatpush.msra.mxu3 %v2284_v8  ;;  %v6137_v24 = vld [vmem:[%s12391_s7 + $0xae0] sm:$0xff]  ;;  %v6076_v39 = vld [vmem:[%s12391_s7 + $0x8f8] sm:$0xff] }
 0x2d9   : > { %2944 = vmatpush.msrb.mxu2 %v6070_v54  ;;  %2966 = vmatpush.msra.mxu0 %v6126_v55  ;;  %v6077_v8 = vld [vmem:[%s12391_s7 + $0x900] sm:$0xff]  ;;  %v6140_v54 = vld [vmem:[%s12391_s7 + $0xaf8] sm:$0xff] }
 0x2da   : > { %2686 = vmatpush.msra.mxu1 %v2216_v7  ;;  %2706 = vmatpush.msra.mxu3 %v2280_v2  ;;  %v6133_v55 = vld [vmem:[%s12391_s7 + $0xac0] sm:$0xff]  ;;  %v6072_v7 = vld [vmem:[%s12391_s7 + $0x8d8] sm:$0xff] }
 0x2db   : > { %2945 = vmatpush.msrb.mxu2 %v6066_v47  ;;  %2967 = vmatpush.msra.mxu0 %v6122_v22  ;;  %v6073_v2 = vld [vmem:[%s12391_s7 + $0x8e0] sm:$0xff]  ;;  %v6136_v47 = vld [vmem:[%s12391_s7 + $0xad8] sm:$0xff] }
 0x2dc   : > { %2687 = vmatpush.msra.mxu1 %v2212_v52  ;;  %2707 = vmatpush.msra.mxu3 %v2276_v4  ;;  %v6129_v22 = vld [vmem:[%s12391_s7 + $0xaa0] sm:$0xff]  ;;  %v6068_v52 = vld [vmem:[%s12391_s7 + $0x8b8] sm:$0xff] }
 0x2dd   : > { %2946 = vmatpush.msrb.mxu2 %v6062_v23  ;;  %2968 = vmatpush.msra.mxu0 %v6118_v3  ;;  %v6069_v4 = vld [vmem:[%s12391_s7 + $0x8c0] sm:$0xff]  ;;  %v6132_v23 = vld [vmem:[%s12391_s7 + $0xab8] sm:$0xff] }
 0x2de   : > { %2688 = vmatpush.msra.mxu1 %v2208_v6  ;;  %2708 = vmatpush.msra.mxu3 %v2272_v15  ;;  %v6125_v3 = vld [vmem:[%s12391_s7 + $0xa80] sm:$0xff]  ;;  %v6064_v6 = vld [vmem:[%s12391_s7 + $0x898] sm:$0xff] }
 0x2df   : > { %2947 = vmatpush.msrb.mxu2 %v6058_v57  ;;  %2969 = vmatpush.msra.mxu0 %v6114_v10  ;;  %v6065_v15 = vld [vmem:[%s12391_s7 + $0x8a0] sm:$0xff]  ;;  %v6128_v57 = vld [vmem:[%s12391_s7 + $0xa98] sm:$0xff] }
 0x2e0   : > { %2689 = vmatpush.msra.mxu1 %v2204_v12  ;;  %2709 = vmatpush.msra.mxu3 %v2268_v59  ;;  %v6121_v10 = vld [vmem:[%s12391_s7 + $0xa60] sm:$0xff]  ;;  %v6060_v12 = vld [vmem:[%s12391_s7 + $0x878] sm:$0xff] }
 0x2e1   : > { %2948 = vmatpush.msrb.mxu2 %v6054_v13  ;;  %2970 = vmatpush.msra.mxu0 %v6110_v17  ;;  %v6061_v59 = vld [vmem:[%s12391_s7 + $0x880] sm:$0xff]  ;;  %v6124_v13 = vld [vmem:[%s12391_s7 + $0xa78] sm:$0xff] }
 0x2e2   : > { %2690 = vmatpush.msra.mxu1 %v2200_v25  ;;  %2710 = vmatpush.msra.mxu3 %v2264_v31  ;;  %v6117_v17 = vld [vmem:[%s12391_s7 + $0xa40] sm:$0xff]  ;;  %v6056_v25 = vld [vmem:[%s12391_s7 + $0x858] sm:$0xff] }
 0x2e3   : > { %2949 = vmatpush.msrb.mxu2 %v6050_v37  ;;  %2971 = vmatpush.msra.mxu0 %v6106_v61  ;;  %v6057_v31 = vld [vmem:[%s12391_s7 + $0x860] sm:$0xff]  ;;  %v6120_v37 = vld [vmem:[%s12391_s7 + $0xa58] sm:$0xff] }
 0x2e4   : > { %2691 = vmatpush.msra.mxu1 %v2196_v5  ;;  %2711 = vmatpush.msra.mxu3 %v2260_v14  ;;  %v6113_v61 = vld [vmem:[%s12391_s7 + $0xa20] sm:$0xff]  ;;  %v6052_v5 = vld [vmem:[%s12391_s7 + $0x838] sm:$0xff] }
 0x2e5   : > { %2950 = vmatpush.msrb.mxu2 %v6046_v33  ;;  %2972 = vmatpush.msra.mxu0 %v6102_v63  ;;  %v6053_v14 = vld [vmem:[%s12391_s7 + $0x840] sm:$0xff]  ;;  %v6116_v33 = vld [vmem:[%s12391_s7 + $0xa38] sm:$0xff] }
 0x2e6   : > { %2692 = vmatpush.msra.mxu1 %v2192_v42  ;;  %2712 = vmatpush.msra.mxu3 %v2256_v1  ;;  %v6109_v63 = vld [vmem:[%s12391_s7 + $0xa00] sm:$0xff]  ;;  %v6048_v42 = vld [vmem:[%s12391_s7 + $0x818] sm:$0xff] }
 0x2e7   : > { %2951 = vmatpush.msrb.mxu2 %v6042_v18  ;;  %2973 = vmatpush.msra.mxu0 %v6098_v9  ;;  %v6049_v1 = vld [vmem:[%s12391_s7 + $0x820] sm:$0xff]  ;;  %v6044_v9 = vld [vmem:[%s12391_s7 + $0x7f8] sm:$0xff] }
 0x2e8   : > { %2693 = vmatpush.msra.mxu1 %v2188_v19  ;;  %2713 = vmatpush.msra.mxu3 %v2252_v21  ;;  %v6105_v18 = vld [vmem:[%s12391_s7 + $0x9e0] sm:$0xff]  ;;  %v6108_v21 = vld [vmem:[%s12391_s7 + $0x9f8] sm:$0xff] }
 0x2e9   : > { %2952 = vmatpush.msrb.mxu2 %v6038_v32  ;;  %2974 = vmatpush.msra.mxu0 %v6094_v26  ;;  %v6045_v19 = vld [vmem:[%s12391_s7 + $0x800] sm:$0xff]  ;;  %v6040_v32 = vld [vmem:[%s12391_s7 + $0x7d8] sm:$0xff] }
 0x2ea   : > { %2694 = vmatpush.msra.mxu1 %v2184_v29  ;;  %2714 = vmatpush.msra.mxu3 %v2248_v30  ;;  %v6041_v26 = vld [vmem:[%s12391_s7 + $0x7e0] sm:$0xff]  ;;  %v6036_v30 = vld [vmem:[%s12391_s7 + $0x7b8] sm:$0xff] }
 0x2eb   : > { %6150 = vmatmul.msk.f32.vlgmr.msra.gmra.mxu0 %vm2171_vm5, %v9070_v45  ;;  %2953 = vmatpush.msrb.mxu2 %v6034_v40  ;;  %v6097_v29 = vld [vmem:[%s12391_s7 + $0x9a0] sm:$0xff]  ;;  %v6100_v40 = vld [vmem:[%s12391_s7 + $0x9b8] sm:$0xff] }
 0x2ec   : > { %3019 = vmatpush.msrb.mxu0 %v6092_v43  ;;  %2695 = vmatpush.msra.mxu1 %v2180_v20  ;;  %v6093_v43 = vld [vmem:[%s12391_s7 + $0x980] sm:$0xff]  ;;  %v6032_v20 = vld [vmem:[%s12391_s7 + $0x798] sm:$0xff] }
 0x2ed   : > { %2715 = vmatpush.msra.mxu3 %v2244_v46  ;;  %2696 = vmatmul.f32.vlgmr.msra.gmra.mxu1 %v8517_v62  ;;  %v6148_v62 = vld [vmem:[%s12391_s7 + $0xb38] sm:$0xff]  ;;  %v6029_v56 = vld [vmem:[%s12391_s7 + $0x780] sm:$0xff] }
 0x2ee   : > { %3020 = vmatpush.msrb.mxu0 %v6088_v48  ;;  %6027 = vmatmul.msk.f32.vlgmr.msra.gmra.mxu3 %vm2171_vm5, %v8695_v36  ;;  %v6080_v36 = vld [vmem:[%s12391_s7 + $0x918] sm:$0xff]  ;;  %v6033_v48 = vld [vmem:[%s12391_s7 + $0x7a0] sm:$0xff] }
 0x2ef   : > { %2899 = vmatpush.msrb.mxu3 %v6089_v50  ;;  %2921 = vmatpush.msrb.mxu1 %v6145_v60  ;;  %v6096_v46 = vld [vmem:[%s12391_s7 + $0x998] sm:$0xff]  ;;  %v6214_v50 = vld [vmem:[%s12391_s7 + $0xd28] sm:$0xff]  ;;  %v6087_v60 = vld [vmem:[%s12391_s7 + $0x950] sm:$0xff] }
 0x2f0   : > { %2954 = vmatpush.msrb.mxu2 %v6030_v35  ;;  %3021 = vmatpush.msrb.mxu0 %v6084_v51  ;;  %v6266_v35 = vld [vmem:[%s12391_s7 + $0xec8] sm:$0xff] }
 0x2f1   : > { %2955 = vmatmul.f32.vlgmr.msrb.gmra.mxu2 %v9105_v41  ;;  %2900 = vmatpush.msrb.mxu3 %v6085_v27  ;;  %v6210_v51 = vld [vmem:[%s12391_s7 + $0xd08] sm:$0xff]  ;;  %v6147_v27 = vld [vmem:[%s12391_s7 + $0xb30] sm:$0xff] }
 0x2f2   : > { %3041 = vmatpush.msra.mxu2 %v6148_v62  ;;  %2922 = vmatpush.msrb.mxu1 %v6141_v34  ;;  %v6206_v62 = vld [vmem:[%s12391_s7 + $0xce8] sm:$0xff] }
 0x2f3   : > { %3022 = vmatpush.msrb.mxu0 %v6080_v36  ;;  %2901 = vmatpush.msrb.mxu3 %v6081_v53  ;;  %v6262_v34 = vld [vmem:[%s12391_s7 + $0xea8] sm:$0xff]  ;;  %v6079_v36 = vld [vmem:[%s12391_s7 + $0x910] sm:$0xff] }
 0x2f4   : > { %3042 = vmatpush.msra.mxu2 %v6144_v0  ;;  %2923 = vmatpush.msrb.mxu1 %v6137_v24  ;;  %v6143_v53 = vld [vmem:[%s12391_s7 + $0xb10] sm:$0xff]  ;;  %v6202_v0 = vld [vmem:[%s12391_s7 + $0xcc8] sm:$0xff] }
 0x2f5   : > { %3023 = vmatpush.msrb.mxu0 %v6076_v39  ;;  %2902 = vmatpush.msrb.mxu3 %v6077_v8  ;;  %v6258_v24 = vld [vmem:[%s12391_s7 + $0xe88] sm:$0xff]  ;;  %v6075_v39 = vld [vmem:[%s12391_s7 + $0x8f0] sm:$0xff] }
 0x2f6   : > { %3043 = vmatpush.msra.mxu2 %v6140_v54  ;;  %2924 = vmatpush.msrb.mxu1 %v6133_v55  ;;  %v6139_v8 = vld [vmem:[%s12391_s7 + $0xaf0] sm:$0xff]  ;;  %v6198_v54 = vld [vmem:[%s12391_s7 + $0xca8] sm:$0xff] }
 0x2f7   : > { %3024 = vmatpush.msrb.mxu0 %v6072_v7  ;;  %2903 = vmatpush.msrb.mxu3 %v6073_v2  ;;  %v6254_v55 = vld [vmem:[%s12391_s7 + $0xe68] sm:$0xff]  ;;  %v6071_v7 = vld [vmem:[%s12391_s7 + $0x8d0] sm:$0xff] }
 0x2f8   : > { %3044 = vmatpush.msra.mxu2 %v6136_v47  ;;  %2925 = vmatpush.msrb.mxu1 %v6129_v22  ;;  %v6135_v2 = vld [vmem:[%s12391_s7 + $0xad0] sm:$0xff]  ;;  %v6194_v47 = vld [vmem:[%s12391_s7 + $0xc88] sm:$0xff] }
 0x2f9   : > { %3025 = vmatpush.msrb.mxu0 %v6068_v52  ;;  %2904 = vmatpush.msrb.mxu3 %v6069_v4  ;;  %v6250_v22 = vld [vmem:[%s12391_s7 + $0xe48] sm:$0xff]  ;;  %v6067_v52 = vld [vmem:[%s12391_s7 + $0x8b0] sm:$0xff] }
 0x2fa   : > { %3045 = vmatpush.msra.mxu2 %v6132_v23  ;;  %2926 = vmatpush.msrb.mxu1 %v6125_v3  ;;  %v6131_v4 = vld [vmem:[%s12391_s7 + $0xab0] sm:$0xff]  ;;  %v6190_v23 = vld [vmem:[%s12391_s7 + $0xc68] sm:$0xff] }
 0x2fb   : > { %3026 = vmatpush.msrb.mxu0 %v6064_v6  ;;  %2905 = vmatpush.msrb.mxu3 %v6065_v15  ;;  %v6246_v3 = vld [vmem:[%s12391_s7 + $0xe28] sm:$0xff]  ;;  %v6063_v6 = vld [vmem:[%s12391_s7 + $0x890] sm:$0xff] }
 0x2fc   : > { %3046 = vmatpush.msra.mxu2 %v6128_v57  ;;  %2927 = vmatpush.msrb.mxu1 %v6121_v10  ;;  %v6127_v15 = vld [vmem:[%s12391_s7 + $0xa90] sm:$0xff]  ;;  %v6186_v57 = vld [vmem:[%s12391_s7 + $0xc48] sm:$0xff] }
 0x2fd   : > { %3027 = vmatpush.msrb.mxu0 %v6060_v12  ;;  %2906 = vmatpush.msrb.mxu3 %v6061_v59  ;;  %v6242_v10 = vld [vmem:[%s12391_s7 + $0xe08] sm:$0xff]  ;;  %v6059_v12 = vld [vmem:[%s12391_s7 + $0x870] sm:$0xff] }
 0x2fe   : > { %3047 = vmatpush.msra.mxu2 %v6124_v13  ;;  %2928 = vmatpush.msrb.mxu1 %v6117_v17  ;;  %v6123_v59 = vld [vmem:[%s12391_s7 + $0xa70] sm:$0xff]  ;;  %v6182_v13 = vld [vmem:[%s12391_s7 + $0xc28] sm:$0xff] }
 0x2ff   : > { %3028 = vmatpush.msrb.mxu0 %v6056_v25  ;;  %2907 = vmatpush.msrb.mxu3 %v6057_v31  ;;  %v6238_v17 = vld [vmem:[%s12391_s7 + $0xde8] sm:$0xff]  ;;  %v6055_v25 = vld [vmem:[%s12391_s7 + $0x850] sm:$0xff] }
 0x300   : > { %3048 = vmatpush.msra.mxu2 %v6120_v37  ;;  %2929 = vmatpush.msrb.mxu1 %v6113_v61  ;;  %v6119_v31 = vld [vmem:[%s12391_s7 + $0xa50] sm:$0xff]  ;;  %v6178_v37 = vld [vmem:[%s12391_s7 + $0xc08] sm:$0xff] }
 0x301   : > { %3029 = vmatpush.msrb.mxu0 %v6052_v5  ;;  %2908 = vmatpush.msrb.mxu3 %v6053_v14  ;;  %v6234_v61 = vld [vmem:[%s12391_s7 + $0xdc8] sm:$0xff]  ;;  %v6051_v5 = vld [vmem:[%s12391_s7 + $0x830] sm:$0xff] }
 0x302   : > { %3049 = vmatpush.msra.mxu2 %v6116_v33  ;;  %2930 = vmatpush.msrb.mxu1 %v6109_v63  ;;  %v6115_v14 = vld [vmem:[%s12391_s7 + $0xa30] sm:$0xff]  ;;  %v6174_v33 = vld [vmem:[%s12391_s7 + $0xbe8] sm:$0xff] }
 0x303   : > { %3030 = vmatpush.msrb.mxu0 %v6048_v42  ;;  %2909 = vmatpush.msrb.mxu3 %v6049_v1  ;;  %v6230_v63 = vld [vmem:[%s12391_s7 + $0xda8] sm:$0xff]  ;;  %v6047_v42 = vld [vmem:[%s12391_s7 + $0x810] sm:$0xff] }
 0x304   : > { %3050 = vmatpush.msra.mxu2 %v6112_v16  ;;  %2931 = vmatpush.msrb.mxu1 %v6105_v18  ;;  %v6111_v1 = vld [vmem:[%s12391_s7 + $0xa10] sm:$0xff]  ;;  %v6170_v16 = vld [vmem:[%s12391_s7 + $0xbc8] sm:$0xff] }
 0x305   : > { %3031 = vmatpush.msrb.mxu0 %v6044_v9  ;;  %2910 = vmatpush.msrb.mxu3 %v6045_v19  ;;  %v6226_v18 = vld [vmem:[%s12391_s7 + $0xd88] sm:$0xff]  ;;  %v6043_v9 = vld [vmem:[%s12391_s7 + $0x7f0] sm:$0xff] }
 0x306   : > { %3051 = vmatpush.msra.mxu2 %v6108_v21  ;;  %2932 = vmatpush.msrb.mxu1 %v6101_v11  ;;  %v6107_v19 = vld [vmem:[%s12391_s7 + $0x9f0] sm:$0xff]  ;;  %v3066_v21 = vld [vmem:[#allocation2 + $0x18] sm:$0x7]  ;;  %v6166_v11 = vld [vmem:[%s12391_s7 + $0xba8] sm:$0xff] }
 0x307   : > { %3032 = vmatpush.msrb.mxu0 %v6040_v32  ;;  %2911 = vmatpush.msrb.mxu3 %v6041_v26  ;;  %v6222_v32 = vld [vmem:[%s12391_s7 + $0xd68] sm:$0xff] }
 0x308   : > { %3052 = vmatpush.msra.mxu2 %v6104_v28  ;;  %2933 = vmatpush.msrb.mxu1 %v6097_v29  ;;  %v6039_v28 = vld [vmem:[%s12391_s7 + $0x7d0] sm:$0xff] }
 0x309   : > { %3033 = vmatpush.msrb.mxu0 %v6036_v30  ;;  %2912 = vmatpush.msrb.mxu3 %v6037_v38  ;;  %v6103_v29 = vld [vmem:[%s12391_s7 + $0x9d0] sm:$0xff]  ;;  %v3064_v30 = vld [vmem:[#allocation2 + $0x8] sm:$0xf8] }
 0x30a   : > { %3053 = vmatpush.msra.mxu2 %v6100_v40  ;;  %2934 = vmatpush.msrb.mxu1 %v6093_v43  ;;  %v9420_v26 = vpop.f32.mrf.mxu0  ;;  %v6162_v38 = vld [vmem:[%s12391_s7 + $0xb88] sm:$0xff]  ;;  %v3197_v43 = vrot.slane %v3066_v21, 3  ;;  %v6180_v21 = vld [vmem:[%s12391_s7 + $0xc18] sm:$0xff] }
 0x30b   : > { %6149 = vmatmul.msk.f32.vlgmr.msrb.gmra.mxu1 %vm2171_vm5, %v9070_v45  ;;  %3034 = vmatpush.msrb.mxu0 %v6032_v20  ;;  %v6218_v40 = vld [vmem:[%s12391_s7 + $0xd48] sm:$0xff]  ;;  %v6035_v20 = vld [vmem:[%s12391_s7 + $0x7b0] sm:$0xff] }
 0x30c   : > { %2979 = vmatpush.msra.mxu1 %v6091_v44  ;;  %3054 = vmatpush.msra.mxu2 %v6096_v46  ;;  %v6099_v44 = vld [vmem:[%s12391_s7 + $0x9b0] sm:$0xff] }
 0x30d   : > { %2913 = vmatpush.msrb.mxu3 %v6033_v48  ;;  %3035 = vmatmul.f32.vlgmr.msrb.gmra.mxu0 %v9105_v41  ;;  %v3196_v48 = vrot.slane %v3064_v30, 3  ;;  %v6177_v30 = vld [vmem:[%s12391_s7 + $0xc00] sm:$0xff] }
 0x30e   : > { %6152 = vmatmul.msk.f32.vlgmr.msra.gmra.mxu2 %vm2171_vm5, %v9070_v45  ;;  %3264 = vmatpush.msra.mxu0 %v6270_v49  ;;  %v6158_v49 = vld [vmem:[%s12391_s7 + $0xb68] sm:$0xff] }
 0x30f   : > { %3242 = vmatpush.msrb.mxu2 %v6214_v50  ;;  %2980 = vmatpush.msra.mxu1 %v6087_v60  ;;  %v6216_v50 = vld [vmem:[%s12391_s7 + $0xd38] sm:$0xff]  ;;  %v6031_v60 = vld [vmem:[%s12391_s7 + $0x790] sm:$0xff] }
 0x310   : > { %2914 = vmatpush.msrb.mxu3 %v6029_v56  ;;  %3265 = vmatpush.msra.mxu0 %v6266_v35  ;;  %v9440_v46 = vpop.f32.mrf.mxu2  ;;  %v3065_v56 = vld [vmem:[#allocation2 + $0x10] sm:$0x7]  ;;  %v9452_v35 = vsel %vm3192_vm8, %v3196_v48, %v3197_v43  ;;  %v6172_v43 = vld [vmem:[%s12391_s7 + $0xbd8] sm:$0xff]  ;;  %v6229_v48 = vld [vmem:[%s12391_s7 + $0xda0] sm:$0xff] }
 0x311   : > { %3243 = vmatpush.msrb.mxu2 %v6210_v51  ;;  %2915 = vmatmul.f32.vlgmr.msrb.gmra.mxu3 %v9105_v41  ;;  %v6095_v51 = vld [vmem:[%s12391_s7 + $0x990] sm:$0xff] }
 0x312   : > { %2981 = vmatpush.msra.mxu1 %v6083_v58  ;;  %3001 = vmatpush.msra.mxu3 %v6147_v27  ;;  %v6212_v58 = vld [vmem:[%s12391_s7 + $0xd18] sm:$0xff]  ;;  %v3063_v27 = vld [vmem:[#allocation2] sm:$0xf8] }
 0x313   : > { %3244 = vmatpush.msrb.mxu2 %v6206_v62  ;;  %3266 = vmatpush.msra.mxu0 %v6262_v34  ;;  %v6213_v62 = vld [vmem:[%s12391_s7 + $0xd20] sm:$0xff] }
 0x314   : > { %2982 = vmatpush.msra.mxu1 %v6079_v36  ;;  %3002 = vmatpush.msra.mxu3 %v6143_v53  ;;  %v6269_v34 = vld [vmem:[%s12391_s7 + $0xee0] sm:$0xff]  ;;  %v3194_v36 = vrot.slane %v3065_v56, 3  ;;  %v6154_v53 = vld [vmem:[%s12391_s7 + $0xb48] sm:$0xff] }
 0x315   : > { %3245 = vmatpush.msrb.mxu2 %v6202_v0  ;;  %3267 = vmatpush.msra.mxu0 %v6258_v24  ;;  %v6208_v0 = vld [vmem:[%s12391_s7 + $0xcf8] sm:$0xff]  ;;  %v3193_v24 = vrot.slane %v3063_v27, 3  ;;  %v6225_v56 = vld [vmem:[%s12391_s7 + $0xd80] sm:$0xff] }
 0x316   : > { %2983 = vmatpush.msra.mxu1 %v6075_v39  ;;  %3003 = vmatpush.msra.mxu3 %v6139_v8  ;;  %v6209_v39 = vld [vmem:[%s12391_s7 + $0xd00] sm:$0xff]  ;;  %v2574_v8 = vpop.f32.mrf.mxu0 }
 0x317   : > { %3246 = vmatpush.msrb.mxu2 %v6198_v54  ;;  %3268 = vmatpush.msra.mxu0 %v6254_v55  ;;  %v6265_v54 = vld [vmem:[%s12391_s7 + $0xec0] sm:$0xff] }
 0x318   : > { %2984 = vmatpush.msra.mxu1 %v6071_v7  ;;  %3004 = vmatpush.msra.mxu3 %v6135_v2  ;;  %v6204_v7 = vld [vmem:[%s12391_s7 + $0xcd8] sm:$0xff]  ;;  %v6205_v2 = vld [vmem:[%s12391_s7 + $0xce0] sm:$0xff] }
 0x319   : > { %3247 = vmatpush.msrb.mxu2 %v6194_v47  ;;  %3269 = vmatpush.msra.mxu0 %v6250_v22 }
 0x31a   : > { %2985 = vmatpush.msra.mxu1 %v6067_v52  ;;  %3005 = vmatpush.msra.mxu3 %v6131_v4  ;;  %v6268_v52 = vld [vmem:[%s12391_s7 + $0xed8] sm:$0xff]  ;;  %v6261_v4 = vld [vmem:[%s12391_s7 + $0xea0] sm:$0xff] }
 0x31b   : > { %3248 = vmatpush.msrb.mxu2 %v6190_v23  ;;  %3270 = vmatpush.msra.mxu0 %v6246_v3  ;;  %v6200_v3 = vld [vmem:[%s12391_s7 + $0xcb8] sm:$0xff] }
 0x31c   : > { %2986 = vmatpush.msra.mxu1 %v6063_v6  ;;  %3006 = vmatpush.msra.mxu3 %v6127_v15  ;;  %v6201_v6 = vld [vmem:[%s12391_s7 + $0xcc0] sm:$0xff]  ;;  %v6264_v15 = vld [vmem:[%s12391_s7 + $0xeb8] sm:$0xff] }
 0x31d   : > { %3249 = vmatpush.msrb.mxu2 %v6186_v57  ;;  %3271 = vmatpush.msra.mxu0 %v6242_v10  ;;  %v6257_v57 = vld [vmem:[%s12391_s7 + $0xe80] sm:$0xff]  ;;  %v6196_v10 = vld [vmem:[%s12391_s7 + $0xc98] sm:$0xff] }
 0x31e   : > { %2987 = vmatpush.msra.mxu1 %v6059_v12  ;;  %3007 = vmatpush.msra.mxu3 %v6123_v59  ;;  %v6197_v12 = vld [vmem:[%s12391_s7 + $0xca0] sm:$0xff]  ;;  %v6260_v59 = vld [vmem:[%s12391_s7 + $0xe98] sm:$0xff] }
 0x31f   : > { %3250 = vmatpush.msrb.mxu2 %v6182_v13  ;;  %3272 = vmatpush.msra.mxu0 %v6238_v17  ;;  %v6253_v13 = vld [vmem:[%s12391_s7 + $0xe60] sm:$0xff]  ;;  %v6192_v17 = vld [vmem:[%s12391_s7 + $0xc78] sm:$0xff] }
 0x320   : > { %2988 = vmatpush.msra.mxu1 %v6055_v25  ;;  %3008 = vmatpush.msra.mxu3 %v6119_v31  ;;  %v6193_v25 = vld [vmem:[%s12391_s7 + $0xc80] sm:$0xff]  ;;  %v6256_v31 = vld [vmem:[%s12391_s7 + $0xe78] sm:$0xff] }
 0x321   : > { %3251 = vmatpush.msrb.mxu2 %v6178_v37  ;;  %3273 = vmatpush.msra.mxu0 %v6234_v61  ;;  %v6249_v37 = vld [vmem:[%s12391_s7 + $0xe40] sm:$0xff]  ;;  %v6188_v61 = vld [vmem:[%s12391_s7 + $0xc58] sm:$0xff] }
 0x322   : > { %2989 = vmatpush.msra.mxu1 %v6051_v5  ;;  %3009 = vmatpush.msra.mxu3 %v6115_v14  ;;  %v6189_v5 = vld [vmem:[%s12391_s7 + $0xc60] sm:$0xff]  ;;  %v6252_v14 = vld [vmem:[%s12391_s7 + $0xe58] sm:$0xff] }
 0x323   : > { %3252 = vmatpush.msrb.mxu2 %v6174_v33  ;;  %3274 = vmatpush.msra.mxu0 %v6230_v63  ;;  %v6245_v33 = vld [vmem:[%s12391_s7 + $0xe20] sm:$0xff]  ;;  %v6184_v63 = vld [vmem:[%s12391_s7 + $0xc38] sm:$0xff] }
 0x324   : > { %2990 = vmatpush.msra.mxu1 %v6047_v42  ;;  %3010 = vmatpush.msra.mxu3 %v6111_v1  ;;  %v6185_v42 = vld [vmem:[%s12391_s7 + $0xc40] sm:$0xff] }
 0x325   : > { %3253 = vmatpush.msrb.mxu2 %v6170_v16  ;;  %3275 = vmatpush.msra.mxu0 %v6226_v18  ;;  %v6248_v18 = vld [vmem:[%s12391_s7 + $0xe38] sm:$0xff] }
 0x326   : > { %2991 = vmatpush.msra.mxu1 %v6043_v9  ;;  %3011 = vmatpush.msra.mxu3 %v6107_v19  ;;  %v6241_v9 = vld [vmem:[%s12391_s7 + $0xe00] sm:$0xff]  ;;  %v9624_v27 = vpop.f32.mrf.mxu0 }
 0x327   : > { %3254 = vmatpush.msrb.mxu2 %v6166_v11  ;;  %3276 = vmatpush.msra.mxu0 %v6222_v32  ;;  %v6181_v11 = vld [vmem:[%s12391_s7 + $0xc20] sm:$0xff]  ;;  %v6244_v32 = vld [vmem:[%s12391_s7 + $0xe18] sm:$0xff] }
 0x328   : > { %2992 = vmatpush.msra.mxu1 %v6039_v28  ;;  %3012 = vmatpush.msra.mxu3 %v6103_v29  ;;  %v6237_v28 = vld [vmem:[%s12391_s7 + $0xde0] sm:$0xff]  ;;  %v6176_v29 = vld [vmem:[%s12391_s7 + $0xbf8] sm:$0xff] }
 0x329   : > { %3255 = vmatpush.msrb.mxu2 %v6162_v38  ;;  %3277 = vmatpush.msra.mxu0 %v6218_v40  ;;  %v9486_v55 = vpop.f32.mrf.mxu1  ;;  %v6240_v38 = vld [vmem:[%s12391_s7 + $0xdf8] sm:$0xff]  ;;  %v6233_v40 = vld [vmem:[%s12391_s7 + $0xdc0] sm:$0xff] }
 0x32a   : > { %2993 = vmatpush.msra.mxu1 %v6035_v20  ;;  %3013 = vmatpush.msra.mxu3 %v6099_v44  ;;  %v6173_v20 = vld [vmem:[%s12391_s7 + $0xbe0] sm:$0xff]  ;;  %v6236_v44 = vld [vmem:[%s12391_s7 + $0xdd8] sm:$0xff] }
 0x32b   : > { %6274 = vmatmul.msk.f32.vlgmr.msra.gmra.mxu0 %vm2171_vm5, %v9452_v35  ;;  %3256 = vmatpush.msrb.mxu2 %v6158_v49  ;;  %v6168_v49 = vld [vmem:[%s12391_s7 + $0xbb8] sm:$0xff] }
 0x32c   : > { %3322 = vmatpush.msrb.mxu0 %v6216_v50  ;;  %2994 = vmatpush.msra.mxu1 %v6031_v60  ;;  %v6169_v50 = vld [vmem:[%s12391_s7 + $0xbc0] sm:$0xff]  ;;  %v6232_v60 = vld [vmem:[%s12391_s7 + $0xdb8] sm:$0xff] }
 0x32d   : > { %3014 = vmatpush.msra.mxu3 %v6095_v51  ;;  %2995 = vmatmul.f32.vlgmr.msra.gmra.mxu1 %v9105_v41  ;;  %v6272_v41 = vld [vmem:[%s12391_s7 + $0xef8] sm:$0xff] }
 0x32e   : > { %3323 = vmatpush.msrb.mxu0 %v6212_v58  ;;  %6151 = vmatmul.msk.f32.vlgmr.msra.gmra.mxu3 %vm2171_vm5, %v9070_v45  ;;  %v9489_v45 = vsel %vm3192_vm8, %v3193_v24, %v3194_v36  ;;  %v6164_v51 = vld [vmem:[%s12391_s7 + $0xb98] sm:$0xff]  ;;  %v6165_v58 = vld [vmem:[%s12391_s7 + $0xba0] sm:$0xff] }
 0x32f   : > { %3202 = vmatpush.msrb.mxu3 %v6213_v62  ;;  %3224 = vmatpush.msrb.mxu1 %v6269_v34  ;;  %v9497_v47 = vpop.f32.mrf.mxu3  ;;  %v6228_v62 = vld [vmem:[%s12391_s7 + $0xd98] sm:$0xff]  ;;  %v6221_v34 = vld [vmem:[%s12391_s7 + $0xd60] sm:$0xff] }
 0x330   : > { %3257 = vmatpush.msrb.mxu2 %v6154_v53  ;;  %3324 = vmatpush.msrb.mxu0 %v6208_v0  ;;  %v2594_v22 = vpop.f32.mrf.mxu2  ;;  %v6160_v36 = vld [vmem:[%s12391_s7 + $0xb78] sm:$0xff]  ;;  %v6161_v53 = vld [vmem:[%s12391_s7 + $0xb80] sm:$0xff] }
 0x331   : > { %3258 = vmatmul.f32.vlgmr.msrb.gmra.mxu2 %v9489_v45  ;;  %3203 = vmatpush.msrb.mxu3 %v6209_v39  ;;  %v9506_v23 = vadd.f32 %v2594_v22, %v2574_v8  ;;  %v6224_v0 = vld [vmem:[%s12391_s7 + $0xd78] sm:$0xff]  ;;  %v6217_v24 = vld [vmem:[%s12391_s7 + $0xd40] sm:$0xff]  ;;  %v6338_v22 = vld [vmem:[%s12391_s7 + $0x10e8] sm:$0xff] }
 0x332   : > { %3344 = vmatpush.msra.mxu2 %v6272_v41  ;;  %3225 = vmatpush.msrb.mxu1 %v6265_v54  ;;  %v6156_v39 = vld [vmem:[%s12391_s7 + $0xb58] sm:$0xff]  ;;  %v6215_v41 = vld [vmem:[%s12391_s7 + $0xd30] sm:$0xff] }
 0x333   : > { %3325 = vmatpush.msrb.mxu0 %v6204_v7  ;;  %3204 = vmatpush.msrb.mxu3 %v6205_v2  ;;  %v2534_v1 = vpop.f32.mrf.mxu1  ;;  %v6220_v54 = vld [vmem:[%s12391_s7 + $0xd58] sm:$0xff]  ;;  %v6157_v7 = vld [vmem:[%s12391_s7 + $0xb60] sm:$0xff]  ;;  %v6394_v2 = vld [vmem:[%s12391_s7 + $0x12a8] sm:$0xff] }
 0x334   : > { %3345 = vmatpush.msra.mxu2 %v6268_v52  ;;  %3226 = vmatpush.msrb.mxu1 %v6261_v4  ;;  %v6211_v52 = vld [vmem:[%s12391_s7 + $0xd10] sm:$0xff]  ;;  %v6153_v4 = vld [vmem:[%s12391_s7 + $0xb40] sm:$0xff] }
 0x335   : > { %3326 = vmatpush.msrb.mxu0 %v6200_v3  ;;  %3205 = vmatpush.msrb.mxu3 %v6201_v6  ;;  %v6390_v3 = vld [vmem:[%s12391_s7 + $0x1288] sm:$0xff] }
 0x336   : > { %3346 = vmatpush.msra.mxu2 %v6264_v15  ;;  %3227 = vmatpush.msrb.mxu1 %v6257_v57  ;;  %v6334_v15 = vld [vmem:[%s12391_s7 + $0x10c8] sm:$0xff]  ;;  %v6207_v57 = vld [vmem:[%s12391_s7 + $0xcf0] sm:$0xff] }
 0x337   : > { %3327 = vmatpush.msrb.mxu0 %v6196_v10  ;;  %3206 = vmatpush.msrb.mxu3 %v6197_v12  ;;  %v6271_v10 = vld [vmem:[%s12391_s7 + $0xef0] sm:$0xff]  ;;  %v6330_v12 = vld [vmem:[%s12391_s7 + $0x10a8] sm:$0xff] }
 0x338   : > { %3347 = vmatpush.msra.mxu2 %v6260_v59  ;;  %3228 = vmatpush.msrb.mxu1 %v6253_v13  ;;  %v6386_v59 = vld [vmem:[%s12391_s7 + $0x1268] sm:$0xff] }
 0x339   : > { %3328 = vmatpush.msrb.mxu0 %v6192_v17  ;;  %3207 = vmatpush.msrb.mxu3 %v6193_v25  ;;  %v2554_v16 = vpop.f32.mrf.mxu3  ;;  %v6203_v17 = vld [vmem:[%s12391_s7 + $0xcd0] sm:$0xff] }
 0x33a   : > { %3348 = vmatpush.msra.mxu2 %v6256_v31  ;;  %3229 = vmatpush.msrb.mxu1 %v6249_v37  ;;  %v9568_v19 = vadd.f32 %v2554_v16, %v2534_v1  ;;  %v6267_v25 = vld [vmem:[%s12391_s7 + $0xed0] sm:$0xff]  ;;  %v6326_v37 = vld [vmem:[%s12391_s7 + $0x1088] sm:$0xff] }
 0x33b   : > { %3329 = vmatpush.msrb.mxu0 %v6188_v61  ;;  %3208 = vmatpush.msrb.mxu3 %v6189_v5  ;;  %v9647_v8 = vpop.f32.mrf.mxu2  ;;  %v6199_v5 = vld [vmem:[%s12391_s7 + $0xcb0] sm:$0xff]  ;;  %v6318_v16 = vld [vmem:[%s12391_s7 + $0x1048] sm:$0xff] }
 0x33c   : > { %3349 = vmatpush.msra.mxu2 %v6252_v14  ;;  %3230 = vmatpush.msrb.mxu1 %v6245_v33  ;;  %v6263_v14 = vld [vmem:[%s12391_s7 + $0xeb0] sm:$0xff]  ;;  %v6322_v33 = vld [vmem:[%s12391_s7 + $0x1068] sm:$0xff] }
 0x33d   : > { %3330 = vmatpush.msrb.mxu0 %v6184_v63  ;;  %3209 = vmatpush.msrb.mxu3 %v6185_v42  ;;  %v6378_v63 = vld [vmem:[%s12391_s7 + $0x1228] sm:$0xff]  ;;  %v6195_v42 = vld [vmem:[%s12391_s7 + $0xc90] sm:$0xff] }
 0x33e   : > { %3350 = vmatpush.msra.mxu2 %v6248_v18  ;;  %3231 = vmatpush.msrb.mxu1 %v6241_v9  ;;  %v6259_v1 = vld [vmem:[%s12391_s7 + $0xe90] sm:$0xff]  ;;  %v6374_v18 = vld [vmem:[%s12391_s7 + $0x1208] sm:$0xff] }
 0x33f   : > { %3331 = vmatpush.msrb.mxu0 %v6180_v21  ;;  %3210 = vmatpush.msrb.mxu3 %v6181_v11  ;;  %v6191_v9 = vld [vmem:[%s12391_s7 + $0xc70] sm:$0xff]  ;;  %v6314_v11 = vld [vmem:[%s12391_s7 + $0x1028] sm:$0xff] }
 0x340   : > { %3351 = vmatpush.msra.mxu2 %v6244_v32  ;;  %3232 = vmatpush.msrb.mxu1 %v6237_v28  ;;  %v6255_v21 = vld [vmem:[%s12391_s7 + $0xe70] sm:$0xff]  ;;  %v6370_v32 = vld [vmem:[%s12391_s7 + $0x11e8] sm:$0xff] }
 0x341   : > { %3332 = vmatpush.msrb.mxu0 %v6176_v29  ;;  %3211 = vmatpush.msrb.mxu3 %v6177_v30  ;;  %v6187_v28 = vld [vmem:[%s12391_s7 + $0xc50] sm:$0xff]  ;;  %v6310_v30 = vld [vmem:[%s12391_s7 + $0x1008] sm:$0xff] }
 0x342   : > { %3352 = vmatpush.msra.mxu2 %v6240_v38  ;;  %3233 = vmatpush.msrb.mxu1 %v6233_v40  ;;  %v6251_v29 = vld [vmem:[%s12391_s7 + $0xe50] sm:$0xff]  ;;  %v6366_v38 = vld [vmem:[%s12391_s7 + $0x11c8] sm:$0xff] }
 0x343   : > { %3333 = vmatpush.msrb.mxu0 %v6172_v43  ;;  %3212 = vmatpush.msrb.mxu3 %v6173_v20  ;;  %v6183_v40 = vld [vmem:[%s12391_s7 + $0xc30] sm:$0xff]  ;;  %v6306_v20 = vld [vmem:[%s12391_s7 + $0xfe8] sm:$0xff] }
 0x344   : > { %3353 = vmatpush.msra.mxu2 %v6236_v44  ;;  %3234 = vmatpush.msrb.mxu1 %v6229_v48  ;;  %v6247_v43 = vld [vmem:[%s12391_s7 + $0xe30] sm:$0xff]  ;;  %v6362_v44 = vld [vmem:[%s12391_s7 + $0x11a8] sm:$0xff] }
 0x345   : > { %3334 = vmatpush.msrb.mxu0 %v6168_v49  ;;  %3213 = vmatpush.msrb.mxu3 %v6169_v50  ;;  %v6179_v48 = vld [vmem:[%s12391_s7 + $0xc10] sm:$0xff]  ;;  %v6302_v50 = vld [vmem:[%s12391_s7 + $0xfc8] sm:$0xff] }
 0x346   : > { %3354 = vmatpush.msra.mxu2 %v6232_v60  ;;  %3235 = vmatpush.msrb.mxu1 %v6225_v56  ;;  %v6243_v49 = vld [vmem:[%s12391_s7 + $0xe10] sm:$0xff]  ;;  %v6358_v60 = vld [vmem:[%s12391_s7 + $0x1188] sm:$0xff] }
 0x347   : > { %3335 = vmatpush.msrb.mxu0 %v6164_v51  ;;  %3214 = vmatpush.msrb.mxu3 %v6165_v58  ;;  %v6175_v56 = vld [vmem:[%s12391_s7 + $0xbf0] sm:$0xff]  ;;  %v6298_v58 = vld [vmem:[%s12391_s7 + $0xfa8] sm:$0xff] }
 0x348   : > { %3355 = vmatpush.msra.mxu2 %v6228_v62  ;;  %3236 = vmatpush.msrb.mxu1 %v6221_v34  ;;  %v6239_v51 = vld [vmem:[%s12391_s7 + $0xdf0] sm:$0xff]  ;;  %v6354_v62 = vld [vmem:[%s12391_s7 + $0x1168] sm:$0xff] }
 0x349   : > { %3336 = vmatpush.msrb.mxu0 %v6160_v36  ;;  %3215 = vmatpush.msrb.mxu3 %v6161_v53  ;;  %v6171_v34 = vld [vmem:[%s12391_s7 + $0xbd0] sm:$0xff]  ;;  %v6294_v53 = vld [vmem:[%s12391_s7 + $0xf88] sm:$0xff] }
 0x34a   : > { %3356 = vmatpush.msra.mxu2 %v6224_v0  ;;  %3237 = vmatpush.msrb.mxu1 %v6217_v24  ;;  %v2737_v6 = vpop.f32.mrf.mxu0  ;;  %v6235_v36 = vld [vmem:[%s12391_s7 + $0xdd0] sm:$0xff]  ;;  %v6350_v0 = vld [vmem:[%s12391_s7 + $0x1148] sm:$0xff] }
 0x34b   : > { %6273 = vmatmul.msk.f32.vlgmr.msrb.gmra.mxu1 %vm2171_vm5, %v9452_v35  ;;  %3337 = vmatpush.msrb.mxu0 %v6156_v39  ;;  %v2738_v13 = vadd.f32 %v2737_v6, %v9506_v23  ;;  %v6382_v23 = vld [vmem:[%s12391_s7 + $0x1248] sm:$0xff]  ;;  %v6167_v24 = vld [vmem:[%s12391_s7 + $0xbb0] sm:$0xff] }
 0x34c   : > { %3282 = vmatpush.msra.mxu1 %v6215_v41  ;;  %3357 = vmatpush.msra.mxu2 %v6220_v54  ;;  %v6231_v39 = vld [vmem:[%s12391_s7 + $0xdb0] sm:$0xff]  ;;  %v3369_v41 = vld [vmem:[#allocation2 + $0x18] sm:$0xf]  ;;  %v6290_v54 = vld [vmem:[%s12391_s7 + $0xf68] sm:$0xff] }
 0x34d   : > { %3216 = vmatpush.msrb.mxu3 %v6157_v7  ;;  %3338 = vmatmul.f32.vlgmr.msrb.gmra.mxu0 %v9489_v45  ;;  %v6346_v7 = vld [vmem:[%s12391_s7 + $0x1128] sm:$0xff] }
 0x34e   : > { %6276 = vmatmul.msk.f32.vlgmr.msra.gmra.mxu2 %vm2171_vm5, %v9452_v35  ;;  %3566 = vmatpush.msra.mxu0 %v6394_v2  ;;  %v9817_v2 = vpop.f32.mrf.mxu1  ;;  %v6342_v6 = vld [vmem:[%s12391_s7 + $0x1108] sm:$0xff] }
 0x34f   : > { %3544 = vmatpush.msrb.mxu2 %v6338_v22  ;;  %3283 = vmatpush.msra.mxu1 %v6211_v52  ;;  %v6163_v22 = vld [vmem:[%s12391_s7 + $0xb90] sm:$0xff] }
 0x350   : > { %3217 = vmatpush.msrb.mxu3 %v6153_v4  ;;  %3567 = vmatpush.msra.mxu0 %v6390_v3  ;;  %v6227_v52 = vld [vmem:[%s12391_s7 + $0xd90] sm:$0xff]  ;;  %v3367_v4 = vld [vmem:[#allocation2 + $0x8] sm:$0xf0] }
 0x351   : > { %3545 = vmatpush.msrb.mxu2 %v6334_v15  ;;  %3218 = vmatmul.f32.vlgmr.msrb.gmra.mxu3 %v9489_v45  ;;  %v2757_v31 = vpop.f32.mrf.mxu2  ;;  %v6286_v3 = vld [vmem:[%s12391_s7 + $0xf48] sm:$0xff]  ;;  %v3499_v15 = vrot.slane %v3369_v41, 4  ;;  %v6309_v41 = vld [vmem:[%s12391_s7 + $0x1000] sm:$0xff] }
 0x352   : > { %3284 = vmatpush.msra.mxu1 %v6207_v57  ;;  %3304 = vmatpush.msra.mxu3 %v6271_v10  ;;  %v9707_v61 = vadd.f32 %v2757_v31, %v2738_v13  ;;  %v6159_v57 = vld [vmem:[%s12391_s7 + $0xb70] sm:$0xff] }
 0x353   : > { %3546 = vmatpush.msrb.mxu2 %v6330_v12  ;;  %3568 = vmatpush.msra.mxu0 %v6386_v59  ;;  %v6223_v10 = vld [vmem:[%s12391_s7 + $0xd70] sm:$0xff]  ;;  %v3498_v12 = vrot.slane %v3367_v4, 4  ;;  %v6282_v59 = vld [vmem:[%s12391_s7 + $0xf28] sm:$0xff]  ;;  %v6368_v4 = vld [vmem:[%s12391_s7 + $0x11d8] sm:$0xff] }
 0x354   : > { %3285 = vmatpush.msra.mxu1 %v6203_v17  ;;  %3305 = vmatpush.msra.mxu3 %v6267_v25  ;;  %v9840_v13 = vpop.f32.mrf.mxu3  ;;  %v6340_v17 = vld [vmem:[%s12391_s7 + $0x10f8] sm:$0xff]  ;;  %v6155_v25 = vld [vmem:[%s12391_s7 + $0xb50] sm:$0xff] }
 0x355   : > { %3547 = vmatpush.msrb.mxu2 %v6326_v37  ;;  %3569 = vmatpush.msra.mxu0 %v6382_v23  ;;  %v3368_v31 = vld [vmem:[#allocation2 + $0x10] sm:$0xf]  ;;  %v9849_v37 = vsel %vm595_vm0, %v3498_v12, %v3499_v15  ;;  %v6301_v15 = vld [vmem:[%s12391_s7 + $0xfc0] sm:$0xff]  ;;  %v6296_v12 = vld [vmem:[%s12391_s7 + $0xf98] sm:$0xff] }
 0x356   : > { %3286 = vmatpush.msra.mxu1 %v6199_v5  ;;  %3306 = vmatpush.msra.mxu3 %v6263_v14  ;;  %v6219_v23 = vld [vmem:[%s12391_s7 + $0xd50] sm:$0xff]  ;;  %v6336_v5 = vld [vmem:[%s12391_s7 + $0x10d8] sm:$0xff]  ;;  %v3366_v14 = vld [vmem:[#allocation2] sm:$0xf0] }
 0x357   : > { %3548 = vmatpush.msrb.mxu2 %v6322_v33  ;;  %3570 = vmatpush.msra.mxu0 %v6378_v63  ;;  %v6337_v33 = vld [vmem:[%s12391_s7 + $0x10e0] sm:$0xff] }
 0x358   : > { %3287 = vmatpush.msra.mxu1 %v6195_v42  ;;  %3307 = vmatpush.msra.mxu3 %v6259_v1  ;;  %v6393_v63 = vld [vmem:[%s12391_s7 + $0x12a0] sm:$0xff]  ;;  %v3496_v42 = vrot.slane %v3368_v31, 4  ;;  %v6278_v1 = vld [vmem:[%s12391_s7 + $0xf08] sm:$0xff]  ;;  %v6292_v31 = vld [vmem:[%s12391_s7 + $0xf78] sm:$0xff] }
 0x359   : > { %3549 = vmatpush.msrb.mxu2 %v6318_v16  ;;  %3571 = vmatpush.msra.mxu0 %v6374_v18  ;;  %v6332_v16 = vld [vmem:[%s12391_s7 + $0x10b8] sm:$0xff] }
 0x35a   : > { %3288 = vmatpush.msra.mxu1 %v6191_v9  ;;  %3308 = vmatpush.msra.mxu3 %v6255_v21  ;;  %v3495_v9 = vrot.slane %v3366_v14, 4  ;;  %v6333_v21 = vld [vmem:[%s12391_s7 + $0x10c0] sm:$0xff] }
 0x35b   : > { %3550 = vmatpush.msrb.mxu2 %v6314_v11  ;;  %3572 = vmatpush.msra.mxu0 %v6370_v32  ;;  %v6389_v11 = vld [vmem:[%s12391_s7 + $0x1280] sm:$0xff] }
 0x35c   : > { %3289 = vmatpush.msra.mxu1 %v6187_v28  ;;  %3309 = vmatpush.msra.mxu3 %v6251_v29  ;;  %v9884_v32 = vsel %vm595_vm0, %v3495_v9, %v3496_v42  ;;  %v6329_v28 = vld [vmem:[%s12391_s7 + $0x10a0] sm:$0xff]  ;;  %v6352_v42 = vld [vmem:[%s12391_s7 + $0x1158] sm:$0xff] }
 0x35d   : > { %3551 = vmatpush.msrb.mxu2 %v6310_v30  ;;  %3573 = vmatpush.msra.mxu0 %v6366_v38  ;;  %v6392_v30 = vld [vmem:[%s12391_s7 + $0x1298] sm:$0xff]  ;;  %v6385_v38 = vld [vmem:[%s12391_s7 + $0x1260] sm:$0xff] }
 0x35e   : > { %3290 = vmatpush.msra.mxu1 %v6183_v40  ;;  %3310 = vmatpush.msra.mxu3 %v6247_v43  ;;  %v6324_v43 = vld [vmem:[%s12391_s7 + $0x1078] sm:$0xff]  ;;  %v6349_v14 = vld [vmem:[%s12391_s7 + $0x1140] sm:$0xff] }
 0x35f   : > { %3552 = vmatpush.msrb.mxu2 %v6306_v20  ;;  %3574 = vmatpush.msra.mxu0 %v6362_v44  ;;  %v6388_v44 = vld [vmem:[%s12391_s7 + $0x1278] sm:$0xff] }
 0x360   : > { %3291 = vmatpush.msra.mxu1 %v6179_v48  ;;  %3311 = vmatpush.msra.mxu3 %v6243_v49  ;;  %v6381_v48 = vld [vmem:[%s12391_s7 + $0x1240] sm:$0xff]  ;;  %v6320_v49 = vld [vmem:[%s12391_s7 + $0x1058] sm:$0xff] }
 0x361   : > { %3553 = vmatpush.msrb.mxu2 %v6302_v50  ;;  %3575 = vmatpush.msra.mxu0 %v6358_v60  ;;  %v6321_v50 = vld [vmem:[%s12391_s7 + $0x1060] sm:$0xff]  ;;  %v6384_v60 = vld [vmem:[%s12391_s7 + $0x1258] sm:$0xff] }
 0x362   : > { %3292 = vmatpush.msra.mxu1 %v6175_v56  ;;  %3312 = vmatpush.msra.mxu3 %v6239_v51  ;;  %v6377_v56 = vld [vmem:[%s12391_s7 + $0x1220] sm:$0xff]  ;;  %v6316_v51 = vld [vmem:[%s12391_s7 + $0x1038] sm:$0xff] }
 0x363   : > { %3554 = vmatpush.msrb.mxu2 %v6298_v58  ;;  %3576 = vmatpush.msra.mxu0 %v6354_v62  ;;  %v6317_v58 = vld [vmem:[%s12391_s7 + $0x1040] sm:$0xff]  ;;  %v6380_v62 = vld [vmem:[%s12391_s7 + $0x1238] sm:$0xff] }
 0x364   : > { %3293 = vmatpush.msra.mxu1 %v6171_v34  ;;  %3313 = vmatpush.msra.mxu3 %v6235_v36  ;;  %v6373_v34 = vld [vmem:[%s12391_s7 + $0x1200] sm:$0xff]  ;;  %v6312_v36 = vld [vmem:[%s12391_s7 + $0x1018] sm:$0xff] }
 0x365   : > { %3555 = vmatpush.msrb.mxu2 %v6294_v53  ;;  %3577 = vmatpush.msra.mxu0 %v6350_v0  ;;  %v6313_v53 = vld [vmem:[%s12391_s7 + $0x1020] sm:$0xff]  ;;  %v6376_v0 = vld [vmem:[%s12391_s7 + $0x1218] sm:$0xff] }
 0x366   : > { %3294 = vmatpush.msra.mxu1 %v6167_v24  ;;  %3314 = vmatpush.msra.mxu3 %v6231_v39  ;;  %v6369_v24 = vld [vmem:[%s12391_s7 + $0x11e0] sm:$0xff]  ;;  %v6308_v39 = vld [vmem:[%s12391_s7 + $0xff8] sm:$0xff] }
 0x367   : > { %3556 = vmatpush.msrb.mxu2 %v6290_v54  ;;  %3578 = vmatpush.msra.mxu0 %v6346_v7  ;;  %v6372_v54 = vld [vmem:[%s12391_s7 + $0x11f8] sm:$0xff]  ;;  %v6365_v7 = vld [vmem:[%s12391_s7 + $0x11c0] sm:$0xff] }
 0x368   : > { %3295 = vmatpush.msra.mxu1 %v6163_v22  ;;  %3315 = vmatpush.msra.mxu3 %v6227_v52  ;;  %v6304_v22 = vld [vmem:[%s12391_s7 + $0xfd8] sm:$0xff]  ;;  %v6305_v52 = vld [vmem:[%s12391_s7 + $0xfe0] sm:$0xff] }
 0x369   : > { %3557 = vmatpush.msrb.mxu2 %v6286_v3  ;;  %3579 = vmatpush.msra.mxu0 %v6342_v6  ;;  %v6361_v3 = vld [vmem:[%s12391_s7 + $0x11a0] sm:$0xff]  ;;  %v6300_v6 = vld [vmem:[%s12391_s7 + $0xfb8] sm:$0xff] }
 0x36a   : > { %3296 = vmatpush.msra.mxu1 %v6159_v57  ;;  %3316 = vmatpush.msra.mxu3 %v6223_v10  ;;  %v2697_v18 = vpop.f32.mrf.mxu1  ;;  %v6364_v57 = vld [vmem:[%s12391_s7 + $0x11b8] sm:$0xff]  ;;  %v6357_v10 = vld [vmem:[%s12391_s7 + $0x1180] sm:$0xff] }
 0x36b   : > { %6398 = vmatmul.msk.f32.vlgmr.msra.gmra.mxu0 %vm2171_vm5, %v9849_v37  ;;  %3558 = vmatpush.msrb.mxu2 %v6282_v59  ;;  %v2698_v29 = vadd.f32 %v2697_v18, %v9568_v19  ;;  %v6325_v19 = vld [vmem:[%s12391_s7 + $0x1080] sm:$0xff]  ;;  %v6348_v9 = vld [vmem:[%s12391_s7 + $0x1138] sm:$0xff] }
 0x36c   : > { %3624 = vmatpush.msrb.mxu0 %v6340_v17  ;;  %3297 = vmatpush.msra.mxu1 %v6155_v25  ;;  %v6297_v59 = vld [vmem:[%s12391_s7 + $0xfa0] sm:$0xff]  ;;  %v6360_v17 = vld [vmem:[%s12391_s7 + $0x1198] sm:$0xff] }
 0x36d   : > { %3317 = vmatpush.msra.mxu3 %v6219_v23  ;;  %3298 = vmatmul.f32.vlgmr.msra.gmra.mxu1 %v9489_v45  ;;  %v6396_v45 = vld [vmem:[%s12391_s7 + $0x12b8] sm:$0xff]  ;;  %v6353_v25 = vld [vmem:[%s12391_s7 + $0x1160] sm:$0xff] }
 0x36e   : > { %3625 = vmatpush.msrb.mxu0 %v6336_v5  ;;  %6275 = vmatmul.msk.f32.vlgmr.msra.gmra.mxu3 %vm2171_vm5, %v9452_v35  ;;  %v6328_v35 = vld [vmem:[%s12391_s7 + $0x1098] sm:$0xff]  ;;  %v6293_v23 = vld [vmem:[%s12391_s7 + $0xf80] sm:$0xff] }
 0x36f   : > { %3504 = vmatpush.msrb.mxu3 %v6337_v33  ;;  %3526 = vmatpush.msrb.mxu1 %v6393_v63  ;;  %v6356_v5 = vld [vmem:[%s12391_s7 + $0x1178] sm:$0xff]  ;;  %v6289_v63 = vld [vmem:[%s12391_s7 + $0xf60] sm:$0xff] }
 0x370   : > { %3559 = vmatpush.msrb.mxu2 %v6278_v1  ;;  %3626 = vmatpush.msrb.mxu0 %v6332_v16  ;;  %v6288_v33 = vld [vmem:[%s12391_s7 + $0xf58] sm:$0xff]  ;;  %v6345_v1 = vld [vmem:[%s12391_s7 + $0x1120] sm:$0xff] }
 0x371   : > { %3560 = vmatmul.f32.vlgmr.msrb.gmra.mxu2 %v9884_v32  ;;  %3505 = vmatpush.msrb.mxu3 %v6333_v21  ;;  %v2717_v40 = vpop.f32.mrf.mxu3  ;;  %v6284_v16 = vld [vmem:[%s12391_s7 + $0xf38] sm:$0xff]  ;;  %v6285_v18 = vld [vmem:[%s12391_s7 + $0xf40] sm:$0xff] }
 0x372   : > { %3646 = vmatpush.msra.mxu2 %v6396_v45  ;;  %3527 = vmatpush.msrb.mxu1 %v6389_v11  ;;  %v9906_v20 = vadd.f32 %v2717_v40, %v2698_v29  ;;  %v6341_v21 = vld [vmem:[%s12391_s7 + $0x1100] sm:$0xff]  ;;  %v6280_v45 = vld [vmem:[%s12391_s7 + $0xf18] sm:$0xff]  ;;  %v6339_v11 = vld [vmem:[%s12391_s7 + $0x10f0] sm:$0xff] }
 0x373   : > { %3627 = vmatpush.msrb.mxu0 %v6328_v35  ;;  %3506 = vmatpush.msrb.mxu3 %v6329_v28  ;;  %v6344_v35 = vld [vmem:[%s12391_s7 + $0x1118] sm:$0xff]  ;;  %v6281_v28 = vld [vmem:[%s12391_s7 + $0xf20] sm:$0xff]  ;;  %v6335_v29 = vld [vmem:[%s12391_s7 + $0x10d0] sm:$0xff] }
 0x374   : > { %3647 = vmatpush.msra.mxu2 %v6392_v30  ;;  %3528 = vmatpush.msrb.mxu1 %v6385_v38  ;;  %v6277_v30 = vld [vmem:[%s12391_s7 + $0xf00] sm:$0xff]  ;;  %v6331_v38 = vld [vmem:[%s12391_s7 + $0x10b0] sm:$0xff] }
 0x375   : > { %3628 = vmatpush.msrb.mxu0 %v6324_v43  ;;  %3507 = vmatpush.msrb.mxu3 %v6325_v19  ;;  %v6395_v40 = vld [vmem:[%s12391_s7 + $0x12b0] sm:$0xff] }
 0x376   : > { %3648 = vmatpush.msra.mxu2 %v6388_v44  ;;  %3529 = vmatpush.msrb.mxu1 %v6381_v48  ;;  %v6327_v43 = vld [vmem:[%s12391_s7 + $0x1090] sm:$0xff] }
 0x377   : > { %3629 = vmatpush.msrb.mxu0 %v6320_v49  ;;  %3508 = vmatpush.msrb.mxu3 %v6321_v50  ;;  %v6391_v19 = vld [vmem:[%s12391_s7 + $0x1290] sm:$0xff] }
 0x378   : > { %3649 = vmatpush.msra.mxu2 %v6384_v60  ;;  %3530 = vmatpush.msrb.mxu1 %v6377_v56  ;;  %v6323_v44 = vld [vmem:[%s12391_s7 + $0x1070] sm:$0xff] }
 0x379   : > { %3630 = vmatpush.msrb.mxu0 %v6316_v51  ;;  %3509 = vmatpush.msrb.mxu3 %v6317_v58  ;;  %v6387_v48 = vld [vmem:[%s12391_s7 + $0x1270] sm:$0xff] }
 0x37a   : > { %3650 = vmatpush.msra.mxu2 %v6380_v62  ;;  %3531 = vmatpush.msrb.mxu1 %v6373_v34  ;;  %v6319_v49 = vld [vmem:[%s12391_s7 + $0x1050] sm:$0xff] }
 0x37b   : > { %3631 = vmatpush.msrb.mxu0 %v6312_v36  ;;  %3510 = vmatpush.msrb.mxu3 %v6313_v53  ;;  %v6383_v50 = vld [vmem:[%s12391_s7 + $0x1250] sm:$0xff] }
 0x37c   : > { %3651 = vmatpush.msra.mxu2 %v6376_v0  ;;  %3532 = vmatpush.msrb.mxu1 %v6369_v24  ;;  %v6315_v60 = vld [vmem:[%s12391_s7 + $0x1030] sm:$0xff] }
 0x37d   : > { %3632 = vmatpush.msrb.mxu0 %v6308_v39  ;;  %3511 = vmatpush.msrb.mxu3 %v6309_v41  ;;  %v6379_v56 = vld [vmem:[%s12391_s7 + $0x1230] sm:$0xff] }
 0x37e   : > { %3652 = vmatpush.msra.mxu2 %v6372_v54  ;;  %3533 = vmatpush.msrb.mxu1 %v6365_v7  ;;  %v6311_v51 = vld [vmem:[%s12391_s7 + $0x1010] sm:$0xff] }
 0x37f   : > { %3633 = vmatpush.msrb.mxu0 %v6304_v22  ;;  %3512 = vmatpush.msrb.mxu3 %v6305_v52  ;;  %v6375_v58 = vld [vmem:[%s12391_s7 + $0x1210] sm:$0xff] }
 0x380   : > { %3653 = vmatpush.msra.mxu2 %v6368_v4  ;;  %3534 = vmatpush.msrb.mxu1 %v6361_v3  ;;  %v6307_v62 = vld [vmem:[%s12391_s7 + $0xff0] sm:$0xff] }
 0x381   : > { %3634 = vmatpush.msrb.mxu0 %v6300_v6  ;;  %3513 = vmatpush.msrb.mxu3 %v6301_v15  ;;  %v6371_v34 = vld [vmem:[%s12391_s7 + $0x11f0] sm:$0xff] }
 0x382   : > { %3654 = vmatpush.msra.mxu2 %v6364_v57  ;;  %3535 = vmatpush.msrb.mxu1 %v6357_v10  ;;  %v6303_v36 = vld [vmem:[%s12391_s7 + $0xfd0] sm:$0xff]  ;;  %v2976_v57 = vpop.f32.mrf.mxu0  ;;  %v2956_v10 = vpop.f32.mrf.mxu2 }
 0x383   : > { %3635 = vmatpush.msrb.mxu0 %v6296_v12  ;;  %3514 = vmatpush.msrb.mxu3 %v6297_v59  ;;  %v6367_v53 = vld [vmem:[%s12391_s7 + $0x11d0] sm:$0xff] }
 0x384   : > { %3655 = vmatpush.msra.mxu2 %v6360_v17  ;;  %3536 = vmatpush.msrb.mxu1 %v6353_v25  ;;  %v6299_v0 = vld [vmem:[%s12391_s7 + $0xfb0] sm:$0xff] }
 0x385   : > { %3636 = vmatpush.msrb.mxu0 %v6292_v31  ;;  %3515 = vmatpush.msrb.mxu3 %v6293_v23  ;;  %v6363_v24 = vld [vmem:[%s12391_s7 + $0x11b0] sm:$0xff]  ;;  %v2515_v31 = vadd.f32 %v9497_v47, %v9440_v46 }
 0x386   : > { %3656 = vmatpush.msra.mxu2 %v6356_v5  ;;  %3537 = vmatpush.msrb.mxu1 %v6349_v14  ;;  %v6295_v39 = vld [vmem:[%s12391_s7 + $0xf90] sm:$0xff] }
 0x387   : > { %3637 = vmatpush.msrb.mxu0 %v6288_v33  ;;  %3516 = vmatpush.msrb.mxu3 %v6289_v63  ;;  %v6359_v41 = vld [vmem:[%s12391_s7 + $0x1190] sm:$0xff]  ;;  %v2658_v14 = vadd.f32 %v9647_v8, %v2515_v31  ;;  %v2977_v33 = vadd.f32 %v2976_v57, %v2956_v10  ;;  %v3955_v57 = vld [vmem:[%s12395_s11 + $0x300] sm:$0xff]  ;;  %v3890_v10 = vld [vmem:[%s12395_s11 + $0xf8] sm:$0xff] }
 0x388   : > { %3657 = vmatpush.msra.mxu2 %v6352_v42  ;;  %3538 = vmatpush.msrb.mxu1 %v6345_v1  ;;  %v6291_v54 = vld [vmem:[%s12391_s7 + $0xf70] sm:$0xff]  ;;  %v2936_v1 = vpop.f32.mrf.mxu1 }
 0x389   : > { %3638 = vmatpush.msrb.mxu0 %v6284_v16  ;;  %3517 = vmatpush.msrb.mxu3 %v6285_v18  ;;  %v6355_v7 = vld [vmem:[%s12391_s7 + $0x1170] sm:$0xff]  ;;  %v2678_v63 = vadd.f32 %v9624_v27, %v2658_v14 }
 0x38a   : > { %3658 = vmatpush.msra.mxu2 %v6348_v9  ;;  %3539 = vmatpush.msrb.mxu1 %v6341_v21  ;;  %v6287_v22 = vld [vmem:[%s12391_s7 + $0xf50] sm:$0xff]  ;;  %v3036_v12 = vpop.f32.mrf.mxu0 }
 0x38b   : > { %6397 = vmatmul.msk.f32.vlgmr.msrb.gmra.mxu1 %vm2171_vm5, %v9849_v37  ;;  %3639 = vmatpush.msrb.mxu0 %v6280_v45  ;;  %v6351_v52 = vld [vmem:[%s12391_s7 + $0x1150] sm:$0xff]  ;;  %v3060_v42 = vadd.f32 %v2977_v33, %v2678_v63  ;;  %v3915_v33 = vld [vmem:[%s12395_s11 + $0x1c0] sm:$0xff] }
 0x38c   : > { %3584 = vmatpush.msra.mxu1 %v6339_v11  ;;  %3659 = vmatpush.msra.mxu2 %v6344_v35  ;;  %v6283_v4 = vld [vmem:[%s12391_s7 + $0xf30] sm:$0xff] }
 0x38d   : > { %3518 = vmatpush.msrb.mxu3 %v6281_v28  ;;  %3640 = vmatmul.f32.vlgmr.msrb.gmra.mxu0 %v9884_v32  ;;  %v6347_v3 = vld [vmem:[%s12391_s7 + $0x1130] sm:$0xff]  ;;  %v10162_v28 = vld [vmem:[%s12393_s9] sm:$0xf] }
 0x38e   : > { %6400 = vmatmul.msk.f32.vlgmr.msra.gmra.mxu2 %vm2171_vm5, %v9849_v37  ;;  %3585 = vmatpush.msra.mxu1 %v6335_v29  ;;  %v6279_v6 = vld [vmem:[%s12391_s7 + $0xf10] sm:$0xff] }
 0x38f   : > { %3519 = vmatpush.msrb.mxu3 %v6277_v30  ;;  %v6343_v15 = vld [vmem:[%s12391_s7 + $0x1110] sm:$0xff] }
 0x390   : > { %3520 = vmatmul.f32.vlgmr.msrb.gmra.mxu3 %v9884_v32  ;;  %3586 = vmatpush.msra.mxu1 %v6331_v38  ;;  %v10169_v38 = vld [vmem:[%s12394_s10] sm:$0xf]  ;;  %v3917_v31 = vld [vmem:[%s12395_s11 + $0x1d0] sm:$0xff] }
 0x391   : > { %3606 = vmatpush.msra.mxu3 %v6395_v40  ;;  %v3056_v59 = vpop.f32.mrf.mxu2  ;;  %v2475_v40 = vadd.f32 %v9486_v55, %v9420_v26  ;;  %v3877_v63 = vld [vmem:[%s12395_s11 + $0x90] sm:$0xff] }
 0x392   : > { %3587 = vmatpush.msra.mxu1 %v6327_v43 }
 0x393   : > { %3607 = vmatpush.msra.mxu3 %v6391_v19 }
 0x394   : > { %3588 = vmatpush.msra.mxu1 %v6323_v44  ;;  %v2916_v16 = vpop.f32.mrf.mxu3  ;;  %v2618_v44 = vadd.f32 %v9840_v13, %v2475_v40 }
 0x395   : > { %3608 = vmatpush.msra.mxu3 %v6387_v48  ;;  %v3057_v48 = vadd.f32 %v3056_v59, %v3036_v12  ;;  %v3921_v12 = vld [vmem:[%s12395_s11 + $0x1f0] sm:$0xff] }
 0x396   : > { %3589 = vmatpush.msra.mxu1 %v6319_v49  ;;  %v2937_v49 = vadd.f32 %v2936_v1, %v2916_v16  ;;  %v3881_v59 = vld [vmem:[%s12395_s11 + $0xb0] sm:$0xff]  ;;  %v3875_v16 = vld [vmem:[%s12395_s11 + $0x80] sm:$0xff] }
 0x397   : > { %3609 = vmatpush.msra.mxu3 %v6383_v50  ;;  %v3913_v1 = vld [vmem:[%s12395_s11 + $0x1b0] sm:$0xff] }
 0x398   : > { %3590 = vmatpush.msra.mxu1 %v6315_v60  ;;  %v2638_v60 = vadd.f32 %v9817_v2, %v2618_v44 }
 0x399   : > { %3610 = vmatpush.msra.mxu3 %v6379_v56  ;;  %v3062_v56 = vadd.f32 %v3057_v48, %v9707_v61  ;;  %v3905_v48 = vld [vmem:[%s12395_s11 + $0x170] sm:$0xff] }
 0x39a   : > { %3591 = vmatpush.msra.mxu1 %v6311_v51 }
 0x39b   : > { %3611 = vmatpush.msra.mxu3 %v6375_v58 }
 0x39c   : > { %3592 = vmatpush.msra.mxu1 %v6307_v62 }
 0x39d   : > { %3612 = vmatpush.msra.mxu3 %v6371_v34  ;;  %v3059_v34 = vadd.f32 %v2937_v49, %v2638_v60  ;;  %v3867_v49 = vld [vmem:[%s12395_s11 + $0x40] sm:$0xff]  ;;  %v3874_v60 = vld [vmem:[%s12395_s11 + $0x78] sm:$0xff] }
 0x39e   : > { %3593 = vmatpush.msra.mxu1 %v6303_v36 }
 0x39f   : > { %3613 = vmatpush.msra.mxu3 %v6367_v53 }
 0x3a0   : > { %3594 = vmatpush.msra.mxu1 %v6299_v0 }
 0x3a1   : > { %3614 = vmatpush.msra.mxu3 %v6363_v24 }
 0x3a2   : > { %3595 = vmatpush.msra.mxu1 %v6295_v39 }
 0x3a3   : > { %3615 = vmatpush.msra.mxu3 %v6359_v41 }
 0x3a4   : > { %3596 = vmatpush.msra.mxu1 %v6291_v54 }
 0x3a5   : > { %3616 = vmatpush.msra.mxu3 %v6355_v7 }
 0x3a6   : > { %3597 = vmatpush.msra.mxu1 %v6287_v22 }
 0x3a7   : > { %3617 = vmatpush.msra.mxu3 %v6351_v52  ;;  %v3889_v52 = vld [vmem:[%s12395_s11 + $0xf0] sm:$0xff] }
 0x3a8   : > { %3598 = vmatpush.msra.mxu1 %v6283_v4  ;;  %v3279_v17 = vpop.f32.mrf.mxu0  ;;  %v3887_v4 = vld [vmem:[%s12395_s11 + $0xe0] sm:$0xff] }
 0x3a9   : > { %3618 = vmatpush.msra.mxu3 %v6347_v3  ;;  %v3885_v3 = vld [vmem:[%s12395_s11 + $0xd0] sm:$0xff] }
 0x3aa   : > { %3599 = vmatpush.msra.mxu1 %v6279_v6  ;;  %v10155_v11 = vpop.f32.mrf.mxu1  ;;  %v3957_v6 = vld [vmem:[%s12395_s11 + $0x310] sm:$0xff] }
 0x3ab   : > { %3619 = vmatpush.msra.mxu3 %v6343_v15  ;;  %3600 = vmatmul.f32.vlgmr.msra.gmra.mxu1 %v9884_v32  ;;  %v3883_v15 = vld [vmem:[%s12395_s11 + $0xc0] sm:$0xff] }
 0x3ac   : > { %6399 = vmatmul.msk.f32.vlgmr.msra.gmra.mxu3 %vm2171_vm5, %v9849_v37  ;;  %v10152_v37 = vld [vmem:[%s12392_s8] sm:$0xf] }
 0x3ad   : > { %v3671_v47 = vperm.slane %v10152_v37, 1  ;;  %v3673_v26 = vperm.slane %v10152_v37, 3  ;;  %v3670_v41 = vperm.slane %v10152_v37, 0 }
 0x3b1   : > { %v10157_v27 = vpop.f32.mrf.mxu3 }
 0x3b2   : > { %v3017_v14 = vadd.f32 %v10157_v27, %v10155_v11 }
 0x3b4   : > { %v3259_v25 = vpop.f32.mrf.mxu2 }
 0x3b5   : > { %v3280_v32 = vadd.f32 %v3279_v17, %v3259_v25  ;;  %v3888_v17 = vld [vmem:[%s12395_s11 + $0xe8] sm:$0xff]  ;;  %v3919_v25 = vld [vmem:[%s12395_s11 + $0x1e0] sm:$0xff] }
 0x3b7   : > { %v3363_v21 = vadd.f32 %v3280_v32, %v3060_v42  ;;  %v3884_v32 = vld [vmem:[%s12395_s11 + $0xc8] sm:$0xff] }
 0x3c8   : > { %v3239_v29 = vpop.f32.mrf.mxu1 }
 0x3ca   : > { %v3339_v23 = vpop.f32.mrf.mxu0 }
 0x3d1   : > { %v3359_v5 = vpop.f32.mrf.mxu2 }
 0x3d2   : > { %v3360_v50 = vadd.f32 %v3359_v5, %v3339_v23  ;;  %v3879_v23 = vld [vmem:[%s12395_s11 + $0xa0] sm:$0xff]  ;;  %v3886_v5 = vld [vmem:[%s12395_s11 + $0xd8] sm:$0xff] }
 0x3d4   : > { %v3219_v30 = vpop.f32.mrf.mxu3  ;;  %v3365_v36 = vadd.f32 %v3360_v50, %v3062_v56  ;;  %v3865_v56 = vld [vmem:[%s12395_s11 + $0x30] sm:$0xff] }
 0x3d5   : > { %v3240_v51 = vadd.f32 %v3239_v29, %v3219_v30  ;;  %v3871_v29 = vld [vmem:[%s12395_s11 + $0x60] sm:$0xff]  ;;  %v3878_v30 = vld [vmem:[%s12395_s11 + $0x98] sm:$0xff] }
 0x3d7   : > { %v3362_v24 = vadd.f32 %v3240_v51, %v3059_v34  ;;  %v3872_v51 = vld [vmem:[%s12395_s11 + $0x68] sm:$0xff]  ;;  %v3859_v34 = vld [vmem:[%s12395_s11] sm:$0xff] }
 0x3e8   : > { %v3581_v18 = vpop.f32.mrf.mxu0 }
 0x3ea   : > { %v10175_v43 = vpop.f32.mrf.mxu1 }
 0x3f1   : > { %v10177_v19 = vpop.f32.mrf.mxu3 }
 0x3f2   : > { %v3320_v42 = vadd.f32 %v10177_v19, %v10175_v43  ;;  %v3869_v43 = vld [vmem:[%s12395_s11 + $0x50] sm:$0xff]  ;;  %v3876_v19 = vld [vmem:[%s12395_s11 + $0x88] sm:$0xff] }
 0x3f4   : > { %v3561_v9 = vpop.f32.mrf.mxu2 }
 0x3f5   : > { %v3582_v46 = vadd.f32 %v3581_v18, %v3561_v9  ;;  %v3882_v18 = vld [vmem:[%s12395_s11 + $0xb8] sm:$0xff]  ;;  %v3061_v9 = vadd.f32 %v3017_v14, %v9906_v20  ;;  %v3672_v20 = vperm.slane %v10152_v37, 2  ;;  %v3907_v37 = vld [vmem:[%s12395_s11 + $0x180] sm:$0xff]  ;;  %v3952_v14 = vld [vmem:[%s12395_s11 + $0x2e8] sm:$0xff] }
 0x3f7   : > { %v3665_v45 = vadd.f32 %v3582_v46, %v3363_v21  ;;  %v3911_v21 = vld [vmem:[%s12395_s11 + $0x1a0] sm:$0xff]  ;;  %v3364_v11 = vadd.f32 %v3320_v42, %v3061_v9  ;;  %v3946_v9 = vld [vmem:[%s12395_s11 + $0x2b8] sm:$0xff] }
 0x3f8   : > { %v3947_v42 = vld [vmem:[%s12395_s11 + $0x2c0] sm:$0xff] }
 0x3f9   : > { %v3679_v8 = vadd.f32 %v3671_v47, %v3665_v45  ;;  %v3873_v45 = vld [vmem:[%s12395_s11 + $0x70] sm:$0xff] }
 0x3fb   : > { %v3683_v35 = vmax.f32 %v3679_v8, 0.0  ;;  %v3880_v8 = vld [vmem:[%s12395_s11 + $0xa8] sm:$0xff] }
 0x3fd   : > { %3726 = vmatpush.msrb.mxu1 %v3683_v35 }
 0x3fe   : > { %6402 = vmatmul.msk.f32.vlgmr.msrb.gmra.mxu1 %vm3687_vm9, %v10162_v28 }
 0x3ff   : > { %3810 = vmatpush.msra.mxu1 %v3683_v35  ;;  %v3909_v35 = vld [vmem:[%s12395_s11 + $0x190] sm:$0xff] }
 0x401   : > { %3983 = vmatpush.msrb.mxu1 %v3921_v12  ;;  %v3900_v12 = vld [vmem:[%s12395_s11 + $0x148] sm:$0xff] }
 0x403   : > { %3984 = vmatpush.msrb.mxu1 %v3919_v25  ;;  %v3898_v25 = vld [vmem:[%s12395_s11 + $0x138] sm:$0xff] }
 0x405   : > { %3985 = vmatpush.msrb.mxu1 %v3917_v31  ;;  %v3954_v31 = vld [vmem:[%s12395_s11 + $0x2f8] sm:$0xff] }
 0x406   : > { %6406 = vmatmul.msk.f32.vlgmr.msra.gmra.mxu1 %vm3687_vm9, %v10169_v38 }
 0x407   : > { %3986 = vmatpush.msrb.mxu1 %v3915_v33  ;;  %v3949_v33 = vld [vmem:[%s12395_s11 + $0x2d0] sm:$0xff] }
 0x408   : > { %v3541_v55 = vpop.f32.mrf.mxu1 }
 0x409   : > { %3987 = vmatpush.msrb.mxu1 %v3913_v1  ;;  %v3892_v1 = vld [vmem:[%s12395_s11 + $0x108] sm:$0xff] }
 0x40a   : > { %v3641_v58 = vpop.f32.mrf.mxu0 }
 0x40b   : > { %3988 = vmatpush.msrb.mxu1 %v3911_v21  ;;  %v3943_v21 = vld [vmem:[%s12395_s11 + $0x2a0] sm:$0xff] }
 0x40d   : > { %3989 = vmatpush.msrb.mxu1 %v3909_v35  ;;  %v3938_v35 = vld [vmem:[%s12395_s11 + $0x278] sm:$0xff] }
 0x40f   : > { %3990 = vmatpush.msrb.mxu1 %v3907_v37  ;;  %v3933_v37 = vld [vmem:[%s12395_s11 + $0x250] sm:$0xff] }
 0x411   : > { %v3661_v62 = vpop.f32.mrf.mxu2  ;;  %3991 = vmatpush.msrb.mxu1 %v3905_v48 }
 0x412   : > { %v3662_v53 = vadd.f32 %v3661_v62, %v3641_v58  ;;  %v3863_v58 = vld [vmem:[%s12395_s11 + $0x20] sm:$0xff]  ;;  %v3861_v62 = vld [vmem:[%s12395_s11 + $0x10] sm:$0xff] }
 0x413   : > { %v3521_v0 = vpop.f32.mrf.mxu3 }
 0x414   : > { %v3667_v39 = vadd.f32 %v3662_v53, %v3365_v36  ;;  %v3542_v13 = vadd.f32 %v3541_v55, %v3521_v0  ;;  %v3920_v36 = vld [vmem:[%s12395_s11 + $0x1e8] sm:$0xff]  ;;  %v3918_v53 = vld [vmem:[%s12395_s11 + $0x1d8] sm:$0xff]  ;;  %v3903_v0 = vld [vmem:[%s12395_s11 + $0x160] sm:$0xff] }
 0x415   : > { %v3914_v55 = vld [vmem:[%s12395_s11 + $0x1b8] sm:$0xff]  ;;  %3992 = vmatpush.msrb.mxu1 %v3903_v0 }
 0x416   : > { %v3681_v54 = vadd.f32 %v3673_v26, %v3667_v39  ;;  %v3664_v7 = vadd.f32 %v3542_v13, %v3362_v24  ;;  %v3916_v26 = vld [vmem:[%s12395_s11 + $0x1c8] sm:$0xff]  ;;  %v3870_v24 = vld [vmem:[%s12395_s11 + $0x58] sm:$0xff]  ;;  %v3901_v13 = vld [vmem:[%s12395_s11 + $0x150] sm:$0xff] }
 0x417   : > { %v3910_v39 = vld [vmem:[%s12395_s11 + $0x198] sm:$0xff]  ;;  %3993 = vmatpush.msrb.mxu1 %v3901_v13  ;;  %v3956_v13 = vld [vmem:[%s12395_s11 + $0x308] sm:$0xff] }
 0x418   : > { %v3685_v2 = vmax.f32 %v3681_v54, 0.0  ;;  %v3678_v22 = vadd.f32 %v3670_v41, %v3664_v7  ;;  %v3868_v41 = vld [vmem:[%s12395_s11 + $0x48] sm:$0xff]  ;;  %v3899_v7 = vld [vmem:[%s12395_s11 + $0x140] sm:$0xff]  ;;  %v3958_v0 = vld [vmem:[%s12395_s11 + $0x318] sm:$0xff] }
 0x419   : > { %v3908_v54 = vld [vmem:[%s12395_s11 + $0x188] sm:$0xff]  ;;  %3994 = vmatpush.msrb.mxu1 %v3899_v7 }
 0x41a   : > { %v3682_v61 = vmax.f32 %v3678_v22, 0.0  ;;  %3766 = vmatpush.msra.mxu0 %v3685_v2  ;;  %v3906_v22 = vld [vmem:[%s12395_s11 + $0x178] sm:$0xff] }
 0x41b   : > { %6404 = vmatmul.msk.f32.vlgmr.msra.gmra.mxu0 %vm3687_vm9, %v10162_v28 }
 0x41c   : > { %3850 = vmatpush.msrb.mxu0 %v3685_v2  ;;  %3706 = vmatpush.msrb.mxu3 %v3682_v61  ;;  %v3866_v2 = vld [vmem:[%s12395_s11 + $0x38] sm:$0xff] }
 0x41d   : > { %6401 = vmatmul.msk.f32.vlgmr.msrb.gmra.mxu3 %vm3687_vm9, %v10162_v28 }
 0x41e   : > { %3790 = vmatpush.msra.mxu3 %v3682_v61  ;;  %4037 = vmatpush.msra.mxu0 %v3957_v6  ;;  %v3897_v61 = vld [vmem:[%s12395_s11 + $0x130] sm:$0xff]  ;;  %v3862_v6 = vld [vmem:[%s12395_s11 + $0x18] sm:$0xff] }
 0x41f   : > { %3995 = vmatpush.msrb.mxu1 %v3897_v61  ;;  %v4217_v61 = vld [vmem:[%s12396_s12 + $0x2f0] sm:$0xff] }
 0x420   : > { %3963 = vmatpush.msrb.mxu3 %v3889_v52  ;;  %4038 = vmatpush.msra.mxu0 %v3955_v57  ;;  %v3864_v52 = vld [vmem:[%s12395_s11 + $0x28] sm:$0xff]  ;;  %v3893_v57 = vld [vmem:[%s12395_s11 + $0x110] sm:$0xff] }
 0x422   : > { %3964 = vmatpush.msrb.mxu3 %v3887_v4  ;;  %v3904_v4 = vld [vmem:[%s12395_s11 + $0x168] sm:$0xff] }
 0x423   : > { %6408 = vmatmul.msk.f32.vlgmr.msrb.gmra.mxu0 %vm3687_vm9, %v10169_v38 }
 0x424   : > { %3965 = vmatpush.msrb.mxu3 %v3885_v3  ;;  %4043 = vmatpush.msrb.mxu0 %v3890_v10  ;;  %v3895_v3 = vld [vmem:[%s12395_s11 + $0x120] sm:$0xff]  ;;  %v3860_v10 = vld [vmem:[%s12395_s11 + $0x8] sm:$0xff] }
 0x425   : > { %6405 = vmatmul.msk.f32.vlgmr.msra.gmra.mxu3 %vm3687_vm9, %v10169_v38  ;;  %3996 = vmatpush.msrb.mxu1 %v3895_v3  ;;  %v4173_v3 = vld [vmem:[%s12396_s12 + $0x190] sm:$0xff] }
 0x426   : > { %3966 = vmatpush.msrb.mxu3 %v3883_v15  ;;  %4044 = vmatpush.msrb.mxu0 %v3888_v17  ;;  %v3902_v15 = vld [vmem:[%s12395_s11 + $0x158] sm:$0xff]  ;;  %v3953_v17 = vld [vmem:[%s12395_s11 + $0x2f0] sm:$0xff] }
 0x427   : > { %3997 = vmatpush.msrb.mxu1 %v3893_v57  ;;  %v4211_v57 = vld [vmem:[%s12396_s12 + $0x2c0] sm:$0xff] }
 0x428   : > { %3967 = vmatpush.msrb.mxu3 %v3881_v59  ;;  %4045 = vmatpush.msrb.mxu0 %v3886_v5  ;;  %v3601_v46 = vpop.f32.mrf.mxu1  ;;  %v3891_v59 = vld [vmem:[%s12395_s11 + $0x100] sm:$0xff]  ;;  %v3896_v5 = vld [vmem:[%s12395_s11 + $0x128] sm:$0xff] }
 0x429   : > { %3998 = vmatpush.msrb.mxu1 %v3891_v59  ;;  %v4167_v59 = vld [vmem:[%s12396_s12 + $0x160] sm:$0xff] }
 0x42a   : > { %3968 = vmatpush.msrb.mxu3 %v3879_v23  ;;  %4046 = vmatpush.msrb.mxu0 %v3884_v32  ;;  %v3951_v23 = vld [vmem:[%s12395_s11 + $0x2e0] sm:$0xff]  ;;  %v3950_v32 = vld [vmem:[%s12395_s11 + $0x2d8] sm:$0xff] }
 0x42b   : > { %4083 = vmatpush.msra.mxu1 %v3954_v31  ;;  %v4205_v31 = vld [vmem:[%s12396_s12 + $0x290] sm:$0xff] }
 0x42c   : > { %3969 = vmatpush.msrb.mxu3 %v3877_v63  ;;  %4047 = vmatpush.msrb.mxu0 %v3882_v18  ;;  %v3894_v63 = vld [vmem:[%s12395_s11 + $0x118] sm:$0xff]  ;;  %v3945_v18 = vld [vmem:[%s12395_s11 + $0x2b0] sm:$0xff] }
 0x42d   : > { %4084 = vmatpush.msra.mxu1 %v3952_v14  ;;  %v4161_v14 = vld [vmem:[%s12396_s12 + $0x130] sm:$0xff] }
 0x42e   : > { %3970 = vmatpush.msrb.mxu3 %v3875_v16  ;;  %4048 = vmatpush.msrb.mxu0 %v3880_v8  ;;  %v3948_v16 = vld [vmem:[%s12395_s11 + $0x2c8] sm:$0xff]  ;;  %v3939_v8 = vld [vmem:[%s12395_s11 + $0x280] sm:$0xff] }
 0x42f   : > { %v3621_v47 = vpop.f32.mrf.mxu3  ;;  %4085 = vmatpush.msra.mxu1 %v3950_v32  ;;  %v4199_v32 = vld [vmem:[%s12396_s12 + $0x260] sm:$0xff] }
 0x430   : > { %v3622_v27 = vadd.f32 %v3621_v47, %v3601_v46  ;;  %3971 = vmatpush.msrb.mxu3 %v3873_v45  ;;  %4049 = vmatpush.msrb.mxu0 %v3878_v30  ;;  %v3944_v46 = vld [vmem:[%s12395_s11 + $0x2a8] sm:$0xff]  ;;  %v3941_v47 = vld [vmem:[%s12395_s11 + $0x290] sm:$0xff]  ;;  %v3942_v45 = vld [vmem:[%s12395_s11 + $0x298] sm:$0xff] }
 0x431   : > { %4086 = vmatpush.msra.mxu1 %v3948_v16  ;;  %v3936_v30 = vld [vmem:[%s12395_s11 + $0x268] sm:$0xff]  ;;  %v4197_v16 = vld [vmem:[%s12396_s12 + $0x250] sm:$0xff] }
 0x432   : > { %v3666_v40 = vadd.f32 %v3622_v27, %v3364_v11  ;;  %3972 = vmatpush.msrb.mxu3 %v3871_v29  ;;  %4050 = vmatpush.msrb.mxu0 %v3876_v19  ;;  %v3940_v11 = vld [vmem:[%s12395_s11 + $0x288] sm:$0xff]  ;;  %v3935_v29 = vld [vmem:[%s12395_s11 + $0x260] sm:$0xff] }
 0x433   : > { %4087 = vmatpush.msra.mxu1 %v3946_v9  ;;  %v3931_v19 = vld [vmem:[%s12395_s11 + $0x240] sm:$0xff] }
 0x434   : > { %v3680_v44 = vadd.f32 %v3672_v20, %v3666_v40  ;;  %3973 = vmatpush.msrb.mxu3 %v3869_v43  ;;  %4051 = vmatpush.msrb.mxu0 %v3874_v60  ;;  %v3937_v20 = vld [vmem:[%s12395_s11 + $0x270] sm:$0xff]  ;;  %v3934_v43 = vld [vmem:[%s12395_s11 + $0x258] sm:$0xff]  ;;  %v4195_v9 = vld [vmem:[%s12396_s12 + $0x240] sm:$0xff] }
 0x435   : > { %4088 = vmatpush.msra.mxu1 %v3944_v46  ;;  %v4193_v46 = vld [vmem:[%s12396_s12 + $0x230] sm:$0xff] }
 0x436   : > { %v3684_v50 = vmax.f32 %v3680_v44, 0.0  ;;  %3974 = vmatpush.msrb.mxu3 %v3867_v49  ;;  %4052 = vmatpush.msrb.mxu0 %v3872_v51  ;;  %v3932_v44 = vld [vmem:[%s12395_s11 + $0x248] sm:$0xff]  ;;  %v3929_v49 = vld [vmem:[%s12395_s11 + $0x230] sm:$0xff] }
 0x437   : > { %4089 = vmatpush.msra.mxu1 %v3942_v45  ;;  %v3928_v51 = vld [vmem:[%s12395_s11 + $0x228] sm:$0xff]  ;;  %v4191_v45 = vld [vmem:[%s12396_s12 + $0x220] sm:$0xff] }
 0x438   : > { %3746 = vmatpush.msrb.mxu2 %v3684_v50  ;;  %3975 = vmatpush.msrb.mxu3 %v3865_v56  ;;  %v3927_v56 = vld [vmem:[%s12395_s11 + $0x220] sm:$0xff] }
 0x439   : > { %6403 = vmatmul.msk.f32.vlgmr.msrb.gmra.mxu2 %vm3687_vm9, %v10162_v28  ;;  %v3922_v28 = vld [vmem:[%s12395_s11 + $0x1f8] sm:$0xff]  ;;  %4053 = vmatpush.msrb.mxu0 %v3870_v24  ;;  %v4221_v24 = vld [vmem:[%s12396_s12 + $0x310] sm:$0xff] }
 0x43a   : > { %3830 = vmatpush.msra.mxu2 %v3684_v50  ;;  %3976 = vmatpush.msrb.mxu3 %v3863_v58  ;;  %v3930_v50 = vld [vmem:[%s12395_s11 + $0x238] sm:$0xff] }
 0x43b   : > { %4054 = vmatpush.msrb.mxu0 %v3868_v41  ;;  %4090 = vmatpush.msra.mxu1 %v3940_v11  ;;  %v4219_v41 = vld [vmem:[%s12396_s12 + $0x300] sm:$0xff]  ;;  %v4214_v11 = vld [vmem:[%s12396_s12 + $0x2d8] sm:$0xff] }
 0x43c   : > { %3977 = vmatpush.msrb.mxu3 %v3861_v62  ;;  %4003 = vmatpush.msrb.mxu2 %v3953_v17  ;;  %v4207_v17 = vld [vmem:[%s12396_s12 + $0x2a0] sm:$0xff] }
 0x43d   : > { %4055 = vmatpush.msrb.mxu0 %v3866_v2  ;;  %4091 = vmatpush.msra.mxu1 %v3938_v35  ;;  %v4154_v35 = vld [vmem:[%s12396_s12 + $0xf8] sm:$0xff] }
 0x43e   : > { %3978 = vmatpush.msrb.mxu3 %v3859_v34  ;;  %4004 = vmatpush.msrb.mxu2 %v3951_v23  ;;  %v3925_v34 = vld [vmem:[%s12395_s11 + $0x210] sm:$0xff]  ;;  %v4163_v23 = vld [vmem:[%s12396_s12 + $0x140] sm:$0xff] }
 0x43f   : > { %4056 = vmatpush.msrb.mxu0 %v3864_v52  ;;  %4092 = vmatpush.msra.mxu1 %v3936_v30  ;;  %v4175_v52 = vld [vmem:[%s12396_s12 + $0x1a0] sm:$0xff]  ;;  %v4212_v30 = vld [vmem:[%s12396_s12 + $0x2c8] sm:$0xff] }
 0x440   : > { %4063 = vmatpush.msra.mxu3 %v3922_v28  ;;  %4005 = vmatpush.msrb.mxu2 %v3949_v33  ;;  %v3926_v28 = vld [vmem:[%s12395_s11 + $0x218] sm:$0xff]  ;;  %v4201_v33 = vld [vmem:[%s12396_s12 + $0x270] sm:$0xff] }
 0x441   : > { %6407 = vmatmul.msk.f32.vlgmr.msra.gmra.mxu2 %vm3687_vm9, %v10169_v38  ;;  %v3912_v38 = vld [vmem:[%s12395_s11 + $0x1a8] sm:$0xff]  ;;  %4057 = vmatpush.msrb.mxu0 %v3862_v6  ;;  %v4213_v6 = vld [vmem:[%s12396_s12 + $0x2d0] sm:$0xff] }
 0x442   : > { %4064 = vmatpush.msra.mxu3 %v3920_v36  ;;  %4006 = vmatpush.msrb.mxu2 %v3947_v42 }
 0x443   : > { %4058 = vmatpush.msrb.mxu0 %v3860_v10  ;;  %4093 = vmatpush.msra.mxu1 %v3934_v43  ;;  %v4169_v10 = vld [vmem:[%s12396_s12 + $0x170] sm:$0xff]  ;;  %v4187_v43 = vld [vmem:[%s12396_s12 + $0x200] sm:$0xff] }
 0x444   : > { %4065 = vmatpush.msra.mxu3 %v3918_v53  ;;  %4007 = vmatpush.msrb.mxu2 %v3945_v18  ;;  %v4185_v53 = vld [vmem:[%s12396_s12 + $0x1f0] sm:$0xff]  ;;  %v4155_v18 = vld [vmem:[%s12396_s12 + $0x100] sm:$0xff] }
 0x445   : > { %4094 = vmatpush.msra.mxu1 %v3932_v44  ;;  %v4149_v44 = vld [vmem:[%s12396_s12 + $0xd0] sm:$0xff] }
 0x446   : > { %4066 = vmatpush.msra.mxu3 %v3916_v26  ;;  %4008 = vmatpush.msrb.mxu2 %v3943_v21  ;;  %v4183_v26 = vld [vmem:[%s12396_s12 + $0x1e0] sm:$0xff]  ;;  %v4218_v21 = vld [vmem:[%s12396_s12 + $0x2f8] sm:$0xff] }
 0x447   : > { %4095 = vmatpush.msra.mxu1 %v3930_v50  ;;  %v4147_v50 = vld [vmem:[%s12396_s12 + $0xc0] sm:$0xff] }
 0x448   : > { %4067 = vmatpush.msra.mxu3 %v3914_v55  ;;  %4009 = vmatpush.msrb.mxu2 %v3941_v47  ;;  %v3923_v55 = vld [vmem:[%s12395_s11 + $0x200] sm:$0xff]  ;;  %v4216_v47 = vld [vmem:[%s12396_s12 + $0x2e8] sm:$0xff] }
 0x449   : > { %4096 = vmatpush.msra.mxu1 %v3928_v51  ;;  %v4206_v51 = vld [vmem:[%s12396_s12 + $0x298] sm:$0xff] }
 0x44a   : > { %4068 = vmatpush.msra.mxu3 %v3912_v38  ;;  %4010 = vmatpush.msrb.mxu2 %v3939_v8  ;;  %v3924_v38 = vld [vmem:[%s12395_s11 + $0x208] sm:$0xff] }
 0x44b   : > { %4097 = vmatpush.msra.mxu1 %v3926_v28  ;;  %v4204_v28 = vld [vmem:[%s12396_s12 + $0x288] sm:$0xff] }
 0x44c   : > { %4069 = vmatpush.msra.mxu3 %v3910_v39  ;;  %4011 = vmatpush.msrb.mxu2 %v3937_v20  ;;  %v4181_v39 = vld [vmem:[%s12396_s12 + $0x1d0] sm:$0xff] }
 0x44d   : > { %4098 = vmatpush.msra.mxu1 %v3924_v38  ;;  %v4153_v20 = vld [vmem:[%s12396_s12 + $0xf0] sm:$0xff]  ;;  %v4202_v38 = vld [vmem:[%s12396_s12 + $0x278] sm:$0xff] }
 0x44e   : > { %4070 = vmatpush.msra.mxu3 %v3908_v54  ;;  %4012 = vmatpush.msrb.mxu2 %v3935_v29  ;;  %v4179_v54 = vld [vmem:[%s12396_s12 + $0x1c0] sm:$0xff]  ;;  %v4189_v29 = vld [vmem:[%s12396_s12 + $0x210] sm:$0xff] }
 0x450   : > { %4071 = vmatpush.msra.mxu3 %v3906_v22  ;;  %4013 = vmatpush.msrb.mxu2 %v3933_v37  ;;  %v4177_v22 = vld [vmem:[%s12396_s12 + $0x1b0] sm:$0xff]  ;;  %v4152_v37 = vld [vmem:[%s12396_s12 + $0xe8] sm:$0xff] }
 0x452   : > { %4072 = vmatpush.msra.mxu3 %v3904_v4  ;;  %4014 = vmatpush.msrb.mxu2 %v3931_v19  ;;  %v4215_v4 = vld [vmem:[%s12396_s12 + $0x2e0] sm:$0xff]  ;;  %v4210_v19 = vld [vmem:[%s12396_s12 + $0x2b8] sm:$0xff] }
 0x454   : > { %4073 = vmatpush.msra.mxu3 %v3902_v15  ;;  %4015 = vmatpush.msrb.mxu2 %v3929_v49  ;;  %v4171_v15 = vld [vmem:[%s12396_s12 + $0x180] sm:$0xff]  ;;  %v4208_v49 = vld [vmem:[%s12396_s12 + $0x2a8] sm:$0xff] }
 0x456   : > { %4074 = vmatpush.msra.mxu3 %v3900_v12  ;;  %4016 = vmatpush.msrb.mxu2 %v3927_v56  ;;  %v4209_v12 = vld [vmem:[%s12396_s12 + $0x2b0] sm:$0xff]  ;;  %v4148_v56 = vld [vmem:[%s12396_s12 + $0xc8] sm:$0xff] }
 0x458   : > { %4075 = vmatpush.msra.mxu3 %v3898_v25  ;;  %4017 = vmatpush.msrb.mxu2 %v3925_v34  ;;  %v4165_v25 = vld [vmem:[%s12396_s12 + $0x150] sm:$0xff]  ;;  %v4146_v34 = vld [vmem:[%s12396_s12 + $0xb8] sm:$0xff] }
 0x45a   : > { %4076 = vmatpush.msra.mxu3 %v3896_v5  ;;  %4018 = vmatpush.msrb.mxu2 %v3923_v55  ;;  %v4203_v5 = vld [vmem:[%s12396_s12 + $0x280] sm:$0xff]  ;;  %v4144_v55 = vld [vmem:[%s12396_s12 + $0xa8] sm:$0xff] }
 0x45c   : > { %4077 = vmatpush.msra.mxu3 %v3894_v63  ;;  %4117 = vmatpush.msra.mxu2 %v3958_v0  ;;  %v4159_v63 = vld [vmem:[%s12396_s12 + $0x120] sm:$0xff]  ;;  %v4141_v0 = vld [vmem:[%s12396_s12 + $0x90] sm:$0xff] }
 0x45e   : > { %4078 = vmatpush.msra.mxu3 %v3892_v1  ;;  %4118 = vmatpush.msra.mxu2 %v3956_v13  ;;  %v4157_v1 = vld [vmem:[%s12396_s12 + $0x110] sm:$0xff]  ;;  %v4139_v13 = vld [vmem:[%s12396_s12 + $0x80] sm:$0xff] }
 0x47b   : > { %v3728_v27 = vpop.f32.mrf.mxu1 }
 0x483   : > { %v3812_v48 = vpop.f32.mrf.mxu1 }
 0x484   : > { %v10478_v60 = vmax.f32 %v3728_v27, %v3812_v48  ;;  %v4150_v48 = vld [vmem:[%s12396_s12 + $0xd8] sm:$0xff] }
 0x486   : > { %3999 = vmatmul.f32.vlgmr.msrb.gmra.mxu1 %v10478_v60 }
 0x487   : > { %4297 = vmatpush.msrb.mxu1 %v4221_v24  ;;  %v4142_v24 = vld [vmem:[%s12396_s12 + $0x98] sm:$0xff] }
 0x489   : > { %4298 = vmatpush.msrb.mxu1 %v4219_v41  ;;  %v4140_v41 = vld [vmem:[%s12396_s12 + $0x88] sm:$0xff] }
 0x498   : > { %v3768_v40 = vpop.f32.mrf.mxu0 }
 0x4a0   : > { %v3852_v58 = vpop.f32.mrf.mxu0  ;;  %v3708_v62 = vpop.f32.mrf.mxu3 }
 0x4a1   : > { %v10493_v36 = vmax.f32 %v3768_v40, %v3852_v58  ;;  %v4151_v40 = vld [vmem:[%s12396_s12 + $0xe0] sm:$0xff]  ;;  %v4145_v58 = vld [vmem:[%s12396_s12 + $0xb0] sm:$0xff] }
 0x4a3   : > { %6409 = vmatmul.msk.f32.vlgmr.msra.gmra.mxu0 %vm3959_vm10, %v10493_v36 }
 0x4a4   : > { %4243 = vmatpush.msra.mxu0 %v4185_v53  ;;  %v4143_v53 = vld [vmem:[%s12396_s12 + $0xa0] sm:$0xff] }
 0x4a6   : > { %4244 = vmatpush.msra.mxu0 %v4183_v26  ;;  %v4220_v26 = vld [vmem:[%s12396_s12 + $0x308] sm:$0xff] }
 0x4a8   : > { %4245 = vmatpush.msra.mxu0 %v4181_v39  ;;  %v3792_v7 = vpop.f32.mrf.mxu3  ;;  %v4200_v39 = vld [vmem:[%s12396_s12 + $0x268] sm:$0xff] }
 0x4a9   : > { %v10527_v2 = vmax.f32 %v3708_v62, %v3792_v7  ;;  %v4222_v62 = vld [vmem:[%s12396_s12 + $0x318] sm:$0xff]  ;;  %v4137_v7 = vld [vmem:[%s12396_s12 + $0x70] sm:$0xff] }
 0x4aa   : > { %4246 = vmatpush.msra.mxu0 %v4179_v54  ;;  %v4198_v54 = vld [vmem:[%s12396_s12 + $0x258] sm:$0xff] }
 0x4ab   : > { %3979 = vmatmul.f32.vlgmr.msrb.gmra.mxu3 %v10527_v2  ;;  %4059 = vmatmul.f32.vlgmr.msrb.gmra.mxu0 %v10527_v2 }
 0x4ac   : > { %4247 = vmatpush.msra.mxu0 %v4177_v22  ;;  %4263 = vmatpush.msrb.mxu3 %v4217_v61  ;;  %v4138_v22 = vld [vmem:[%s12396_s12 + $0x78] sm:$0xff]  ;;  %v4135_v61 = vld [vmem:[%s12396_s12 + $0x60] sm:$0xff] }
 0x4ae   : > { %4248 = vmatpush.msra.mxu0 %v4175_v52  ;;  %4264 = vmatpush.msrb.mxu3 %v4215_v4  ;;  %v4136_v52 = vld [vmem:[%s12396_s12 + $0x68] sm:$0xff]  ;;  %v4194_v4 = vld [vmem:[%s12396_s12 + $0x238] sm:$0xff] }
 0x4b0   : > { %4249 = vmatpush.msra.mxu0 %v4173_v3  ;;  %4265 = vmatpush.msrb.mxu3 %v4213_v6  ;;  %v4133_v3 = vld [vmem:[%s12396_s12 + $0x50] sm:$0xff]  ;;  %v4134_v6 = vld [vmem:[%s12396_s12 + $0x58] sm:$0xff] }
 0x4b2   : > { %4250 = vmatpush.msra.mxu0 %v4171_v15  ;;  %4266 = vmatpush.msrb.mxu3 %v4211_v57  ;;  %v4192_v15 = vld [vmem:[%s12396_s12 + $0x228] sm:$0xff]  ;;  %v4131_v57 = vld [vmem:[%s12396_s12 + $0x40] sm:$0xff] }
 0x4b3   : > { %4079 = vmatmul.f32.vlgmr.msra.gmra.mxu3 %v10478_v60 }
 0x4b4   : > { %4251 = vmatpush.msra.mxu0 %v4169_v10  ;;  %4267 = vmatpush.msrb.mxu3 %v4209_v12  ;;  %v4132_v10 = vld [vmem:[%s12396_s12 + $0x48] sm:$0xff]  ;;  %v4190_v12 = vld [vmem:[%s12396_s12 + $0x218] sm:$0xff] }
 0x4b6   : > { %4252 = vmatpush.msra.mxu0 %v4167_v59  ;;  %4268 = vmatpush.msrb.mxu3 %v4207_v17  ;;  %v4129_v59 = vld [vmem:[%s12396_s12 + $0x30] sm:$0xff]  ;;  %v4130_v17 = vld [vmem:[%s12396_s12 + $0x38] sm:$0xff] }
 0x4b8   : > { %4253 = vmatpush.msra.mxu0 %v4165_v25  ;;  %4269 = vmatpush.msrb.mxu3 %v4205_v31  ;;  %v4188_v25 = vld [vmem:[%s12396_s12 + $0x208] sm:$0xff]  ;;  %v4127_v31 = vld [vmem:[%s12396_s12 + $0x20] sm:$0xff] }
 0x4ba   : > { %4254 = vmatpush.msra.mxu0 %v4163_v23  ;;  %4270 = vmatpush.msrb.mxu3 %v4203_v5  ;;  %v4128_v23 = vld [vmem:[%s12396_s12 + $0x28] sm:$0xff]  ;;  %v4125_v5 = vld [vmem:[%s12396_s12 + $0x10] sm:$0xff] }
 0x4bc   : > { %4255 = vmatpush.msra.mxu0 %v4161_v14  ;;  %v3748_v42 = vpop.f32.mrf.mxu2  ;;  %4271 = vmatpush.msrb.mxu3 %v4201_v33  ;;  %v4126_v14 = vld [vmem:[%s12396_s12 + $0x18] sm:$0xff]  ;;  %v4123_v33 = vld [vmem:[%s12396_s12] sm:$0xff] }
 0x4be   : > { %4256 = vmatpush.msra.mxu0 %v4159_v63  ;;  %4272 = vmatpush.msrb.mxu3 %v4199_v32  ;;  %v4124_v63 = vld [vmem:[%s12396_s12 + $0x8] sm:$0xff]  ;;  %v4186_v32 = vld [vmem:[%s12396_s12 + $0x1f8] sm:$0xff] }
 0x4c0   : > { %4257 = vmatpush.msra.mxu0 %v4157_v1  ;;  %4273 = vmatpush.msrb.mxu3 %v4197_v16  ;;  %v4182_v1 = vld [vmem:[%s12396_s12 + $0x1d8] sm:$0xff]  ;;  %v4180_v16 = vld [vmem:[%s12396_s12 + $0x1c8] sm:$0xff] }
 0x4c2   : > { %4258 = vmatpush.msra.mxu0 %v4155_v18  ;;  %4274 = vmatpush.msrb.mxu3 %v4195_v9  ;;  %v4178_v18 = vld [vmem:[%s12396_s12 + $0x1b8] sm:$0xff] }
 0x4c3   : > { %4259 = vmatmul.f32.vlgmr.msra.gmra.mxu0 %v10478_v60  ;;  %v4174_v9 = vld [vmem:[%s12396_s12 + $0x198] sm:$0xff] }
 0x4c4   : > { %4343 = vmatpush.msrb.mxu0 %v4218_v21  ;;  %v3832_v8 = vpop.f32.mrf.mxu2  ;;  %4275 = vmatpush.msrb.mxu3 %v4193_v46  ;;  %v4172_v21 = vld [vmem:[%s12396_s12 + $0x188] sm:$0xff]  ;;  %v4170_v46 = vld [vmem:[%s12396_s12 + $0x178] sm:$0xff] }
 0x4c5   : > { %v10620_v27 = vmax.f32 %v3748_v42, %v3832_v8  ;;  %v4184_v42 = vld [vmem:[%s12396_s12 + $0x1e8] sm:$0xff] }
 0x4c6   : > { %4344 = vmatpush.msrb.mxu0 %v4216_v47  ;;  %4276 = vmatpush.msrb.mxu3 %v4191_v45  ;;  %v4168_v47 = vld [vmem:[%s12396_s12 + $0x168] sm:$0xff]  ;;  %v4166_v45 = vld [vmem:[%s12396_s12 + $0x158] sm:$0xff] }
 0x4c7   : > { %4019 = vmatmul.f32.vlgmr.msrb.gmra.mxu2 %v10620_v27  ;;  %4099 = vmatmul.f32.vlgmr.msra.gmra.mxu1 %v10620_v27  ;;  %v4164_v8 = vld [vmem:[%s12396_s12 + $0x148] sm:$0xff] }
 0x4c8   : > { %4345 = vmatpush.msrb.mxu0 %v4214_v11  ;;  %4223 = vmatpush.msrb.mxu2 %v4153_v20  ;;  %v4162_v11 = vld [vmem:[%s12396_s12 + $0x138] sm:$0xff] }
 0x4c9   : > { %4303 = vmatpush.msra.mxu1 %v4154_v35  ;;  %4277 = vmatpush.msrb.mxu3 %v4189_v29  ;;  %v4158_v20 = vld [vmem:[%s12396_s12 + $0x118] sm:$0xff]  ;;  %v4156_v35 = vld [vmem:[%s12396_s12 + $0x108] sm:$0xff]  ;;  %v6473_v29 = vld [vmem:[%s12397_s13 + $0x500] sm:$0xff] }
 0x4ca   : > { %4346 = vmatpush.msrb.mxu0 %v4212_v30  ;;  %4224 = vmatpush.msrb.mxu2 %v4151_v40  ;;  %v6469_v30 = vld [vmem:[%s12397_s13 + $0x4e0] sm:$0xff] }
 0x4cb   : > { %4304 = vmatpush.msra.mxu1 %v4152_v37  ;;  %4278 = vmatpush.msrb.mxu3 %v4187_v43  ;;  %v6465_v40 = vld [vmem:[%s12397_s13 + $0x4c0] sm:$0xff] }
 0x4cc   : > { %4347 = vmatpush.msrb.mxu0 %v4210_v19  ;;  %4225 = vmatpush.msrb.mxu2 %v4149_v44  ;;  %v6461_v37 = vld [vmem:[%s12397_s13 + $0x4a0] sm:$0xff] }
 0x4cd   : > { %4279 = vmatmul.f32.vlgmr.msrb.gmra.mxu3 %v10620_v27  ;;  %4305 = vmatpush.msra.mxu1 %v4150_v48  ;;  %v6453_v43 = vld [vmem:[%s12397_s13 + $0x460] sm:$0xff] }
 0x4ce   : > { %4348 = vmatpush.msrb.mxu0 %v4208_v49  ;;  %4226 = vmatpush.msrb.mxu2 %v4147_v50  ;;  %v6449_v19 = vld [vmem:[%s12397_s13 + $0x440] sm:$0xff]  ;;  %v6474_v49 = vld [vmem:[%s12397_s13 + $0x508] sm:$0xff] }
 0x4cf   : > { %4306 = vmatpush.msra.mxu1 %v4148_v56  ;;  %6410 = vmatmul.msk.f32.vlgmr.msra.gmra.mxu2 %vm3959_vm10, %v10493_v36  ;;  %v6445_v44 = vld [vmem:[%s12397_s13 + $0x420] sm:$0xff] }
 0x4d0   : > { %4349 = vmatpush.msrb.mxu0 %v4206_v51  ;;  %4227 = vmatpush.msrb.mxu2 %v4145_v58  ;;  %v6509_v48 = vld [vmem:[%s12397_s13 + $0x620] sm:$0xff]  ;;  %v6470_v51 = vld [vmem:[%s12397_s13 + $0x4e8] sm:$0xff] }
 0x4d1   : > { %6411 = vmatmul.msk.f32.vlgmr.msrb.gmra.mxu1 %vm3959_vm10, %v10493_v36  ;;  %4377 = vmatpush.msra.mxu3 %v4222_v62  ;;  %v6441_v50 = vld [vmem:[%s12397_s13 + $0x400] sm:$0xff] }
 0x4d2   : > { %4307 = vmatpush.msra.mxu1 %v4146_v34  ;;  %4350 = vmatpush.msrb.mxu0 %v4204_v28  ;;  %v6505_v56 = vld [vmem:[%s12397_s13 + $0x600] sm:$0xff]  ;;  %v6466_v34 = vld [vmem:[%s12397_s13 + $0x4c8] sm:$0xff] }
 0x4d3   : > { %4228 = vmatpush.msrb.mxu2 %v4143_v53  ;;  %4378 = vmatpush.msra.mxu3 %v4220_v26  ;;  %v6437_v58 = vld [vmem:[%s12397_s13 + $0x3e0] sm:$0xff]  ;;  %v6462_v26 = vld [vmem:[%s12397_s13 + $0x4a8] sm:$0xff] }
 0x4d4   : > { %4308 = vmatpush.msra.mxu1 %v4144_v55  ;;  %4351 = vmatpush.msrb.mxu0 %v4202_v38  ;;  %v6501_v62 = vld [vmem:[%s12397_s13 + $0x5e0] sm:$0xff] }
 0x4d5   : > { %4229 = vmatpush.msrb.mxu2 %v4141_v0  ;;  %6412 = vmatmul.msk.f32.vlgmr.msra.gmra.mxu3 %vm3959_vm10, %v10493_v36  ;;  %v4196_v36 = vld [vmem:[%s12396_s12 + $0x248] sm:$0xff]  ;;  %v6433_v28 = vld [vmem:[%s12397_s13 + $0x3c0] sm:$0xff] }
 0x4d6   : > { %4309 = vmatpush.msra.mxu1 %v4142_v24  ;;  %4352 = vmatpush.msrb.mxu0 %v4200_v39  ;;  %v6497_v53 = vld [vmem:[%s12397_s13 + $0x5c0] sm:$0xff]  ;;  %v6458_v0 = vld [vmem:[%s12397_s13 + $0x488] sm:$0xff] }
 0x4d7   : > { %4230 = vmatpush.msrb.mxu2 %v4139_v13  ;;  %4604 = vmatpush.msrb.mxu3 %v6473_v29  ;;  %v6429_v55 = vld [vmem:[%s12397_s13 + $0x3a0] sm:$0xff]  ;;  %v6454_v13 = vld [vmem:[%s12397_s13 + $0x468] sm:$0xff] }
 0x4d8   : > { %4310 = vmatpush.msra.mxu1 %v4140_v41  ;;  %4353 = vmatpush.msrb.mxu0 %v4198_v54  ;;  %v6493_v38 = vld [vmem:[%s12397_s13 + $0x5a0] sm:$0xff]  ;;  %v6510_v41 = vld [vmem:[%s12397_s13 + $0x628] sm:$0xff] }
 0x4d9   : > { %4231 = vmatpush.msrb.mxu2 %v4137_v7  ;;  %4605 = vmatpush.msrb.mxu3 %v6469_v30  ;;  %v6425_v24 = vld [vmem:[%s12397_s13 + $0x380] sm:$0xff]  ;;  %v6447_v30 = vld [vmem:[%s12397_s13 + $0x430] sm:$0xff] }
 0x4da   : > { %4311 = vmatpush.msra.mxu1 %v4138_v22  ;;  %4354 = vmatpush.msrb.mxu0 %v4196_v36  ;;  %v6489_v39 = vld [vmem:[%s12397_s13 + $0x580] sm:$0xff]  ;;  %v6506_v22 = vld [vmem:[%s12397_s13 + $0x608] sm:$0xff] }
 0x4db   : > { %4232 = vmatpush.msrb.mxu2 %v4135_v61  ;;  %4606 = vmatpush.msrb.mxu3 %v6465_v40  ;;  %v6421_v54 = vld [vmem:[%s12397_s13 + $0x360] sm:$0xff]  ;;  %v6450_v36 = vld [vmem:[%s12397_s13 + $0x448] sm:$0xff]  ;;  %v6511_v40 = vld [vmem:[%s12397_s13 + $0x630] sm:$0xff] }
 0x4dc   : > { %4312 = vmatpush.msra.mxu1 %v4136_v52  ;;  %4355 = vmatpush.msrb.mxu0 %v4194_v4  ;;  %v6485_v7 = vld [vmem:[%s12397_s13 + $0x560] sm:$0xff]  ;;  %v6502_v61 = vld [vmem:[%s12397_s13 + $0x5e8] sm:$0xff] }
 0x4dd   : > { %4233 = vmatpush.msrb.mxu2 %v4133_v3  ;;  %4607 = vmatpush.msrb.mxu3 %v6461_v37  ;;  %v6417_v52 = vld [vmem:[%s12397_s13 + $0x340] sm:$0xff]  ;;  %v6446_v3 = vld [vmem:[%s12397_s13 + $0x428] sm:$0xff]  ;;  %v6448_v37 = vld [vmem:[%s12397_s13 + $0x438] sm:$0xff] }
 0x4de   : > { %4313 = vmatpush.msra.mxu1 %v4134_v6  ;;  %4356 = vmatpush.msrb.mxu0 %v4192_v15  ;;  %v6481_v4 = vld [vmem:[%s12397_s13 + $0x540] sm:$0xff]  ;;  %v6498_v6 = vld [vmem:[%s12397_s13 + $0x5c8] sm:$0xff] }
 0x4df   : > { %4234 = vmatpush.msrb.mxu2 %v4131_v57  ;;  %v6413_v15 = vld [vmem:[%s12397_s13 + $0x320] sm:$0xff] }
 0x4e0   : > { %4314 = vmatpush.msra.mxu1 %v4132_v10  ;;  %4357 = vmatpush.msrb.mxu0 %v4190_v12  ;;  %v6477_v57 = vld [vmem:[%s12397_s13 + $0x520] sm:$0xff]  ;;  %v6442_v10 = vld [vmem:[%s12397_s13 + $0x408] sm:$0xff]  ;;  %v6475_v12 = vld [vmem:[%s12397_s13 + $0x510] sm:$0xff] }
 0x4e1   : > { %4235 = vmatpush.msrb.mxu2 %v4129_v59  ;;  %v6476_v59 = vld [vmem:[%s12397_s13 + $0x518] sm:$0xff] }
 0x4e2   : > { %4315 = vmatpush.msra.mxu1 %v4130_v17  ;;  %4358 = vmatpush.msrb.mxu0 %v4188_v25  ;;  %v6494_v17 = vld [vmem:[%s12397_s13 + $0x5a8] sm:$0xff] }
 0x4e3   : > { %4236 = vmatpush.msrb.mxu2 %v4127_v31  ;;  %4359 = vmatmul.f32.vlgmr.msrb.gmra.mxu0 %v10620_v27  ;;  %v4160_v27 = vld [vmem:[%s12396_s12 + $0x128] sm:$0xff]  ;;  %v6471_v31 = vld [vmem:[%s12397_s13 + $0x4f0] sm:$0xff] }
 0x4e4   : > { %4316 = vmatpush.msra.mxu1 %v4128_v23  ;;  %4671 = vmatpush.msra.mxu0 %v6510_v41  ;;  %v6438_v25 = vld [vmem:[%s12397_s13 + $0x3e8] sm:$0xff]  ;;  %v6472_v23 = vld [vmem:[%s12397_s13 + $0x4f8] sm:$0xff]  ;;  %v6491_v41 = vld [vmem:[%s12397_s13 + $0x590] sm:$0xff] }
 0x4e5   : > { %4237 = vmatpush.msrb.mxu2 %v4125_v5  ;;  %v6490_v5 = vld [vmem:[%s12397_s13 + $0x588] sm:$0xff] }
 0x4e6   : > { %4317 = vmatpush.msra.mxu1 %v4126_v14  ;;  %4672 = vmatpush.msra.mxu0 %v6506_v22  ;;  %v6434_v14 = vld [vmem:[%s12397_s13 + $0x3c8] sm:$0xff]  ;;  %v6492_v22 = vld [vmem:[%s12397_s13 + $0x598] sm:$0xff] }
 0x4e7   : > { %4238 = vmatpush.msrb.mxu2 %v4123_v33  ;;  %v6467_v33 = vld [vmem:[%s12397_s13 + $0x4d0] sm:$0xff] }
 0x4e8   : > { %4318 = vmatpush.msra.mxu1 %v4124_v63  ;;  %4239 = vmatmul.f32.vlgmr.msrb.gmra.mxu2 %v10527_v2  ;;  %v6468_v63 = vld [vmem:[%s12397_s13 + $0x4d8] sm:$0xff] }
 0x4e9   : > { %4319 = vmatmul.f32.vlgmr.msra.gmra.mxu1 %v10527_v2  ;;  %4323 = vmatpush.msra.mxu2 %v4186_v32  ;;  %v4176_v2 = vld [vmem:[%s12396_s12 + $0x1a8] sm:$0xff] }
 0x4ea   : > { %4631 = vmatpush.msrb.mxu1 %v6509_v48  ;;  %4673 = vmatpush.msra.mxu0 %v6502_v61  ;;  %v6430_v32 = vld [vmem:[%s12397_s13 + $0x3a8] sm:$0xff]  ;;  %v6507_v48 = vld [vmem:[%s12397_s13 + $0x610] sm:$0xff] }
 0x4eb   : > { %4324 = vmatpush.msra.mxu2 %v4184_v42  ;;  %v6463_v42 = vld [vmem:[%s12397_s13 + $0x4b0] sm:$0xff] }
 0x4ec   : > { %4632 = vmatpush.msrb.mxu1 %v6505_v56  ;;  %4674 = vmatpush.msra.mxu0 %v6498_v6  ;;  %v6488_v6 = vld [vmem:[%s12397_s13 + $0x578] sm:$0xff] }
 0x4ed   : > { %4325 = vmatpush.msra.mxu2 %v4182_v1  ;;  %v6464_v1 = vld [vmem:[%s12397_s13 + $0x4b8] sm:$0xff] }
 0x4ee   : > { %4633 = vmatpush.msrb.mxu1 %v6501_v62  ;;  %4675 = vmatpush.msra.mxu0 %v6494_v17  ;;  %v6440_v62 = vld [vmem:[%s12397_s13 + $0x3f8] sm:$0xff]  ;;  %v6415_v17 = vld [vmem:[%s12397_s13 + $0x330] sm:$0xff] }
 0x4ef   : > { %4326 = vmatpush.msra.mxu2 %v4180_v16  ;;  %v6426_v16 = vld [vmem:[%s12397_s13 + $0x388] sm:$0xff] }
 0x4f0   : > { %4634 = vmatpush.msrb.mxu1 %v6497_v53  ;;  %4676 = vmatpush.msra.mxu0 %v6490_v5  ;;  %v6499_v53 = vld [vmem:[%s12397_s13 + $0x5d0] sm:$0xff] }
 0x4f1   : > { %4327 = vmatpush.msra.mxu2 %v4178_v18  ;;  %v6459_v18 = vld [vmem:[%s12397_s13 + $0x490] sm:$0xff] }
 0x4f2   : > { %4635 = vmatpush.msrb.mxu1 %v6493_v38  ;;  %v6431_v38 = vld [vmem:[%s12397_s13 + $0x3b0] sm:$0xff] }
 0x4f3   : > { %4328 = vmatpush.msra.mxu2 %v4176_v2  ;;  %v6460_v2 = vld [vmem:[%s12397_s13 + $0x498] sm:$0xff] }
 0x4f4   : > { %4636 = vmatpush.msrb.mxu1 %v6489_v39  ;;  %v6496_v39 = vld [vmem:[%s12397_s13 + $0x5b8] sm:$0xff] }
 0x4f5   : > { %4329 = vmatpush.msra.mxu2 %v4174_v9  ;;  %v6422_v9 = vld [vmem:[%s12397_s13 + $0x368] sm:$0xff] }
 0x4f6   : > { %4637 = vmatpush.msrb.mxu1 %v6485_v7  ;;  %v6428_v7 = vld [vmem:[%s12397_s13 + $0x398] sm:$0xff] }
 0x4f7   : > { %4330 = vmatpush.msra.mxu2 %v4172_v21  ;;  %v6486_v21 = vld [vmem:[%s12397_s13 + $0x568] sm:$0xff] }
 0x4f8   : > { %4638 = vmatpush.msrb.mxu1 %v6481_v4  ;;  %4677 = vmatpush.msra.mxu0 %v6486_v21  ;;  %v6424_v4 = vld [vmem:[%s12397_s13 + $0x378] sm:$0xff] }
 0x4f9   : > { %4331 = vmatpush.msra.mxu2 %v4170_v46  ;;  %v6455_v46 = vld [vmem:[%s12397_s13 + $0x470] sm:$0xff] }
 0x4fa   : > { %4639 = vmatpush.msrb.mxu1 %v6477_v57  ;;  %v6483_v57 = vld [vmem:[%s12397_s13 + $0x550] sm:$0xff] }
 0x4fb   : > { %4332 = vmatpush.msra.mxu2 %v4168_v47  ;;  %v6456_v47 = vld [vmem:[%s12397_s13 + $0x478] sm:$0xff] }
 0x4fc   : > { %4684 = vmatpush.msra.mxu1 %v6475_v12 }
 0x4fd   : > { %4333 = vmatpush.msra.mxu2 %v4166_v45  ;;  %v6418_v45 = vld [vmem:[%s12397_s13 + $0x348] sm:$0xff] }
 0x4fe   : > { %4685 = vmatpush.msra.mxu1 %v6471_v31  ;;  %v6416_v31 = vld [vmem:[%s12397_s13 + $0x338] sm:$0xff] }
 0x4ff   : > { %4334 = vmatpush.msra.mxu2 %v4164_v8  ;;  %v6482_v8 = vld [vmem:[%s12397_s13 + $0x548] sm:$0xff] }
 0x500   : > { %4686 = vmatpush.msra.mxu1 %v6467_v33  ;;  %4678 = vmatpush.msra.mxu0 %v6482_v8 }
 0x501   : > { %4335 = vmatpush.msra.mxu2 %v4162_v11  ;;  %v6451_v11 = vld [vmem:[%s12397_s13 + $0x450] sm:$0xff] }
 0x502   : > { %4687 = vmatpush.msra.mxu1 %v6463_v42 }
 0x503   : > { %4336 = vmatpush.msra.mxu2 %v4160_v27  ;;  %v6452_v27 = vld [vmem:[%s12397_s13 + $0x458] sm:$0xff]  ;;  %v11022_v29 = vpop.f32.mrf.mxu1 }
 0x504   : > { %4688 = vmatpush.msra.mxu1 %v6459_v18 }
 0x505   : > { %4337 = vmatpush.msra.mxu2 %v4158_v20  ;;  %v6414_v20 = vld [vmem:[%s12397_s13 + $0x328] sm:$0xff] }
 0x506   : > { %4689 = vmatpush.msra.mxu1 %v6455_v46 }
 0x507   : > { %4338 = vmatpush.msra.mxu2 %v4156_v35  ;;  %v6478_v35 = vld [vmem:[%s12397_s13 + $0x528] sm:$0xff] }
 0x508   : > { %4339 = vmatmul.f32.vlgmr.msra.gmra.mxu2 %v10478_v60  ;;  %v6457_v60 = vld [vmem:[%s12397_s13 + $0x480] sm:$0xff]  ;;  %4690 = vmatpush.msra.mxu1 %v6451_v11 }
 0x509   : > { %4608 = vmatpush.msrb.mxu3 %v6457_v60  ;;  %4644 = vmatpush.msrb.mxu2 %v6474_v49  ;;  %v6444_v49 = vld [vmem:[%s12397_s13 + $0x418] sm:$0xff] }
 0x50a   : > { %4679 = vmatpush.msra.mxu0 %v6478_v35  ;;  %4691 = vmatpush.msra.mxu1 %v6447_v30 }
 0x50b   : > { %4609 = vmatpush.msrb.mxu3 %v6453_v43  ;;  %4645 = vmatpush.msrb.mxu2 %v6470_v51  ;;  %v6512_v43 = vld [vmem:[%s12397_s13 + $0x638] sm:$0xff]  ;;  %v6439_v51 = vld [vmem:[%s12397_s13 + $0x3f0] sm:$0xff] }
 0x50c   : > { %4711 = vmatpush.msrb.mxu0 %v6511_v40 }
 0x50d   : > { %4610 = vmatpush.msrb.mxu3 %v6449_v19  ;;  %4646 = vmatpush.msrb.mxu2 %v6466_v34  ;;  %v6504_v34 = vld [vmem:[%s12397_s13 + $0x5f8] sm:$0xff] }
 0x50e   : > { %4712 = vmatpush.msrb.mxu0 %v6507_v48  ;;  %v4454_v48 = vld [vmem:[%s12397_s13 + $0x1e0] sm:$0xff] }
 0x50f   : > { %4611 = vmatpush.msrb.mxu3 %v6445_v44  ;;  %4647 = vmatpush.msrb.mxu2 %v6462_v26  ;;  %v6443_v44 = vld [vmem:[%s12397_s13 + $0x410] sm:$0xff]  ;;  %v6436_v26 = vld [vmem:[%s12397_s13 + $0x3d8] sm:$0xff] }
 0x510   : > { %4692 = vmatpush.msra.mxu1 %v6443_v44 }
 0x511   : > { %4612 = vmatpush.msrb.mxu3 %v6441_v50  ;;  %4648 = vmatpush.msrb.mxu2 %v6458_v0  ;;  %v6508_v50 = vld [vmem:[%s12397_s13 + $0x618] sm:$0xff]  ;;  %v6495_v0 = vld [vmem:[%s12397_s13 + $0x5b0] sm:$0xff] }
 0x512   : > { %4693 = vmatpush.msra.mxu1 %v6439_v51  ;;  %v4486_v51 = vld [vmem:[%s12397_s13 + $0x2e0] sm:$0xff] }
 0x513   : > { %4613 = vmatpush.msrb.mxu3 %v6437_v58  ;;  %4649 = vmatpush.msrb.mxu2 %v6454_v13  ;;  %v6503_v58 = vld [vmem:[%s12397_s13 + $0x5f0] sm:$0xff] }
 0x514   : > { %4713 = vmatpush.msrb.mxu0 %v6503_v58  ;;  %v6427_v13 = vld [vmem:[%s12397_s13 + $0x390] sm:$0xff]  ;;  %v4451_v58 = vld [vmem:[%s12397_s13 + $0x1c8] sm:$0xff] }
 0x515   : > { %4614 = vmatpush.msrb.mxu3 %v6433_v28  ;;  %4650 = vmatpush.msrb.mxu2 %v6450_v36  ;;  %v6435_v28 = vld [vmem:[%s12397_s13 + $0x3d0] sm:$0xff] }
 0x516   : > { %4694 = vmatpush.msra.mxu1 %v6435_v28  ;;  %4714 = vmatpush.msrb.mxu0 %v6499_v53  ;;  %v6423_v36 = vld [vmem:[%s12397_s13 + $0x370] sm:$0xff]  ;;  %v4482_v28 = vld [vmem:[%s12397_s13 + $0x2c0] sm:$0xff]  ;;  %v4447_v53 = vld [vmem:[%s12397_s13 + $0x1a8] sm:$0xff] }
 0x517   : > { %4615 = vmatpush.msrb.mxu3 %v6429_v55  ;;  %4651 = vmatpush.msrb.mxu2 %v6446_v3  ;;  %v6500_v55 = vld [vmem:[%s12397_s13 + $0x5d8] sm:$0xff] }
 0x518   : > { %4695 = vmatpush.msra.mxu1 %v6431_v38  ;;  %4715 = vmatpush.msrb.mxu0 %v6495_v0  ;;  %v4478_v38 = vld [vmem:[%s12397_s13 + $0x2a0] sm:$0xff]  ;;  %v4443_v0 = vld [vmem:[%s12397_s13 + $0x188] sm:$0xff] }
 0x519   : > { %4616 = vmatpush.msrb.mxu3 %v6425_v24  ;;  %4652 = vmatpush.msrb.mxu2 %v6442_v10  ;;  %v6432_v24 = vld [vmem:[%s12397_s13 + $0x3b8] sm:$0xff] }
 0x51a   : > { %4696 = vmatpush.msra.mxu1 %v6427_v13  ;;  %4716 = vmatpush.msrb.mxu0 %v6491_v41  ;;  %v6420_v10 = vld [vmem:[%s12397_s13 + $0x358] sm:$0xff]  ;;  %v4474_v13 = vld [vmem:[%s12397_s13 + $0x280] sm:$0xff]  ;;  %v4439_v41 = vld [vmem:[%s12397_s13 + $0x168] sm:$0xff] }
 0x51b   : > { %4617 = vmatpush.msrb.mxu3 %v6421_v54  ;;  %4653 = vmatpush.msrb.mxu2 %v6438_v25  ;;  %v6479_v25 = vld [vmem:[%s12397_s13 + $0x530] sm:$0xff] }
 0x51c   : > { %4697 = vmatpush.msra.mxu1 %v6423_v36  ;;  %v4435_v36 = vld [vmem:[%s12397_s13 + $0x148] sm:$0xff] }
 0x51d   : > { %4618 = vmatpush.msrb.mxu3 %v6417_v52  ;;  %4654 = vmatpush.msrb.mxu2 %v6434_v14  ;;  %v6487_v52 = vld [vmem:[%s12397_s13 + $0x570] sm:$0xff] }
 0x51e   : > { %4717 = vmatpush.msrb.mxu0 %v6487_v52  ;;  %v4430_v52 = vld [vmem:[%s12397_s13 + $0x120] sm:$0xff] }
 0x51f   : > { %4619 = vmatpush.msrb.mxu3 %v6413_v15  ;;  %4655 = vmatpush.msrb.mxu2 %v6430_v32  ;;  %v6419_v15 = vld [vmem:[%s12397_s13 + $0x350] sm:$0xff] }
 0x520   : > { %v11033_v60 = vpop.f32.mrf.mxu0  ;;  %4698 = vmatpush.msra.mxu1 %v6419_v15  ;;  %4718 = vmatpush.msrb.mxu0 %v6483_v57  ;;  %v4426_v15 = vld [vmem:[%s12397_s13 + $0x100] sm:$0xff] }
 0x521   : > { %4724 = vmatpush.msra.mxu3 %v6476_v59  ;;  %4656 = vmatpush.msrb.mxu2 %v6426_v16  ;;  %v6484_v59 = vld [vmem:[%s12397_s13 + $0x558] sm:$0xff]  ;;  %v4462_v57 = vld [vmem:[%s12397_s13 + $0x220] sm:$0xff] }
 0x522   : > { %4699 = vmatpush.msra.mxu1 %v6415_v17  ;;  %4719 = vmatpush.msrb.mxu0 %v6479_v25  ;;  %v4458_v17 = vld [vmem:[%s12397_s13 + $0x200] sm:$0xff] }
 0x523   : > { %4725 = vmatpush.msra.mxu3 %v6472_v23  ;;  %4657 = vmatpush.msrb.mxu2 %v6422_v9  ;;  %v6480_v23 = vld [vmem:[%s12397_s13 + $0x538] sm:$0xff] }
 0x525   : > { %4726 = vmatpush.msra.mxu3 %v6468_v63  ;;  %4658 = vmatpush.msrb.mxu2 %v6418_v45 }
 0x527   : > { %4727 = vmatpush.msra.mxu3 %v6464_v1  ;;  %4659 = vmatpush.msrb.mxu2 %v6414_v20 }
 0x528   : > { %v4060_v61 = vpop.f32.mrf.mxu0 }
 0x529   : > { %4728 = vmatpush.msra.mxu3 %v6460_v2  ;;  %4751 = vmatpush.msra.mxu2 %v6512_v43 }
 0x52b   : > { %4729 = vmatpush.msra.mxu3 %v6456_v47  ;;  %4752 = vmatpush.msra.mxu2 %v6508_v50  ;;  %v4491_v50 = vld [vmem:[%s12397_s13 + $0x308] sm:$0xff] }
 0x52d   : > { %4730 = vmatpush.msra.mxu3 %v6452_v27  ;;  %4753 = vmatpush.msra.mxu2 %v6504_v34  ;;  %v4446_v34 = vld [vmem:[%s12397_s13 + $0x1a0] sm:$0xff] }
 0x52e   : > { %v11052_v56 = vpop.f32.mrf.mxu3 }
 0x52f   : > { %4731 = vmatpush.msra.mxu3 %v6448_v37  ;;  %4754 = vmatpush.msra.mxu2 %v6500_v55  ;;  %v4001_v42 = vadd.f32 %v11022_v29, %v11052_v56  ;;  %v4450_v56 = vld [vmem:[%s12397_s13 + $0x1c0] sm:$0xff] }
 0x530   : > { %v4442_v55 = vld [vmem:[%s12397_s13 + $0x180] sm:$0xff] }
 0x531   : > { %4732 = vmatpush.msra.mxu3 %v6444_v49  ;;  %4755 = vmatpush.msra.mxu2 %v6496_v39  ;;  %v4455_v49 = vld [vmem:[%s12397_s13 + $0x1e8] sm:$0xff]  ;;  %v4438_v39 = vld [vmem:[%s12397_s13 + $0x160] sm:$0xff] }
 0x533   : > { %4733 = vmatpush.msra.mxu3 %v6440_v62  ;;  %4756 = vmatpush.msra.mxu2 %v6492_v22  ;;  %v4487_v62 = vld [vmem:[%s12397_s13 + $0x2e8] sm:$0xff]  ;;  %v4470_v22 = vld [vmem:[%s12397_s13 + $0x260] sm:$0xff] }
 0x535   : > { %4734 = vmatpush.msra.mxu3 %v6436_v26  ;;  %4757 = vmatpush.msra.mxu2 %v6488_v6  ;;  %v4483_v26 = vld [vmem:[%s12397_s13 + $0x2c8] sm:$0xff] }
 0x536   : > { %v4080_v12 = vpop.f32.mrf.mxu3  ;;  %v4467_v6 = vld [vmem:[%s12397_s13 + $0x248] sm:$0xff] }
 0x537   : > { %4735 = vmatpush.msra.mxu3 %v6432_v24  ;;  %4758 = vmatpush.msra.mxu2 %v6484_v59  ;;  %v4081_v1 = vadd.f32 %v4080_v12, %v4060_v61  ;;  %v4479_v24 = vld [vmem:[%s12397_s13 + $0x2a8] sm:$0xff]  ;;  %v4422_v59 = vld [vmem:[%s12397_s13 + $0xe0] sm:$0xff] }
 0x538   : > { %v4471_v61 = vld [vmem:[%s12397_s13 + $0x268] sm:$0xff] }
 0x539   : > { %4736 = vmatpush.msra.mxu3 %v6428_v7  ;;  %4759 = vmatpush.msra.mxu2 %v6480_v23  ;;  %v4434_v7 = vld [vmem:[%s12397_s13 + $0x140] sm:$0xff]  ;;  %v4463_v12 = vld [vmem:[%s12397_s13 + $0x228] sm:$0xff] }
 0x53a   : > { %v4459_v23 = vld [vmem:[%s12397_s13 + $0x208] sm:$0xff] }
 0x53b   : > { %4737 = vmatpush.msra.mxu3 %v6424_v4  ;;  %v4466_v4 = vld [vmem:[%s12397_s13 + $0x240] sm:$0xff] }
 0x53d   : > { %4738 = vmatpush.msra.mxu3 %v6420_v10  ;;  %v4427_v10 = vld [vmem:[%s12397_s13 + $0x108] sm:$0xff] }
 0x53f   : > { %4739 = vmatpush.msra.mxu3 %v6416_v31  ;;  %v4423_v31 = vld [vmem:[%s12397_s13 + $0xe8] sm:$0xff] }
 0x540   : > { %v4260_v5 = vpop.f32.mrf.mxu0 }
 0x544   : > { %v4100_v54 = vpop.f32.mrf.mxu1 }
 0x545   : > { %v4101_v46 = vadd.f32 %v4100_v54, %v4081_v1  ;;  %v4475_v54 = vld [vmem:[%s12397_s13 + $0x288] sm:$0xff]  ;;  %v4453_v1 = vld [vmem:[%s12397_s13 + $0x1d8] sm:$0xff] }
 0x54a   : > { %v11038_v19 = vpop.f32.mrf.mxu2 }
 0x54b   : > { %v4021_v47 = vadd.f32 %v11038_v19, %v4001_v42  ;;  %v4452_v42 = vld [vmem:[%s12397_s13 + $0x1d0] sm:$0xff] }
 0x54d   : > { %v4041_v35 = vadd.f32 %v11033_v60, %v4021_v47  ;;  %v4490_v60 = vld [vmem:[%s12397_s13 + $0x300] sm:$0xff]  ;;  %v4444_v47 = vld [vmem:[%s12397_s13 + $0x190] sm:$0xff] }
 0x54e   : > { %v4300_v14 = vpop.f32.mrf.mxu1 }
 0x550   : > { %v4280_v63 = vpop.f32.mrf.mxu3 }
 0x552   : > { %v4120_v3 = vpop.f32.mrf.mxu2 }
 0x553   : > { %v4121_v11 = vadd.f32 %v4120_v3, %v4101_v46  ;;  %v4431_v3 = vld [vmem:[%s12397_s13 + $0x128] sm:$0xff] }
 0x554   : > { %v4411_v46 = vld [vmem:[%s12397_s13 + $0x88] sm:$0xff] }
 0x558   : > { %v4380_v8 = vpop.f32.mrf.mxu3 }
 0x560   : > { %v4360_v21 = vpop.f32.mrf.mxu0 }
 0x566   : > { %v4320_v16 = vpop.f32.mrf.mxu1 }
 0x56b   : > { %v4240_v33 = vpop.f32.mrf.mxu2 }
 0x56c   : > { %v4261_v32 = vadd.f32 %v4260_v5, %v4240_v33  ;;  %v4457_v33 = vld [vmem:[%s12397_s13 + $0x1f8] sm:$0xff] }
 0x56e   : > { %v4281_v2 = vadd.f32 %v4280_v63, %v4261_v32  ;;  %v4418_v63 = vld [vmem:[%s12397_s13 + $0xc0] sm:$0xff]  ;;  %v4419_v32 = vld [vmem:[%s12397_s13 + $0xc8] sm:$0xff] }
 0x570   : > { %v4301_v27 = vadd.f32 %v4300_v14, %v4281_v2  ;;  %v4456_v14 = vld [vmem:[%s12397_s13 + $0x1f0] sm:$0xff] }
 0x571   : > { %v4448_v2 = vld [vmem:[%s12397_s13 + $0x1b0] sm:$0xff] }
 0x572   : > { %v4383_v40 = vmax.f32 %v4041_v35, %v4301_v27  ;;  %v4440_v27 = vld [vmem:[%s12397_s13 + $0x170] sm:$0xff]  ;;  %v4402_v35 = vld [vmem:[%s12397_s13 + $0x40] sm:$0xff] }
 0x58b   : > { %v4340_v18 = vpop.f32.mrf.mxu2 }
 0x58c   : > { %v4341_v9 = vadd.f32 %v4340_v18, %v4320_v16  ;;  %v4414_v16 = vld [vmem:[%s12397_s13 + $0xa0] sm:$0xff]  ;;  %v4415_v18 = vld [vmem:[%s12397_s13 + $0xa8] sm:$0xff] }
 0x58e   : > { %v4361_v45 = vadd.f32 %v4360_v21, %v4341_v9  ;;  %v4449_v9 = vld [vmem:[%s12397_s13 + $0x1b8] sm:$0xff]  ;;  %v4410_v21 = vld [vmem:[%s12397_s13 + $0x80] sm:$0xff] }
 0x590   : > { %v4381_v20 = vadd.f32 %v4380_v8, %v4361_v45  ;;  %v4445_v45 = vld [vmem:[%s12397_s13 + $0x198] sm:$0xff]  ;;  %v4406_v8 = vld [vmem:[%s12397_s13 + $0x60] sm:$0xff] }
 0x592   : > { %v4384_v30 = vmax.f32 %v4121_v11, %v4381_v20  ;;  %v4407_v11 = vld [vmem:[%s12397_s13 + $0x68] sm:$0xff]  ;;  %v4441_v20 = vld [vmem:[%s12397_s13 + $0x178] sm:$0xff] }
 0x594   : > { %v4387_v29 = vrot.slane %v4384_v30, 4  ;;  %v4403_v30 = vld [vmem:[%s12397_s13 + $0x48] sm:$0xff] }
 0x596   : > { %v4388_v37 = vsel %vm595_vm0, %v4383_v40, %v4387_v29  ;;  %v4436_v40 = vld [vmem:[%s12397_s13 + $0x150] sm:$0xff]  ;;  %v4437_v29 = vld [vmem:[%s12397_s13 + $0x158] sm:$0xff] }
 0x597   : > { %4392 = vst.msk [vmem:[#allocation3] sm:$0xff] %vm4391_vm12, %v4388_v37  ;;  %v4398_v37 = vld [vmem:[%s12397_s13 + $0x20] sm:$0xff] }
 0x59e   : > { %v4495_v43 = vld [vmem:[#allocation3 + $0x1] ss:$4 sm:$0x3]  ;;  %v11250_v25 = vld [vmem:[#allocation3] ss:$4 sm:$0x3] }
 0x59f   : > { %v4598_v44 = vperm.slane %v4495_v43, 0  ;;  %v4599_v19 = vperm.slane %v4495_v43, 1  ;;  %v11259_v5 = vperm.slane %v11250_v25, 1  ;;  %v4399_v43 = vld [vmem:[%s12397_s13 + $0x28] sm:$0xff] }
 0x5a1   : > { %4620 = vmatmul.f32.vlgmr.msrb.gmra.mxu3 %v4598_v44  ;;  %6513 = vmatmul.msk.f32.vlgmr.msrb.gmra.mxu1 %vm4601_vm13, %v4599_v19 }
 0x5a2   : > { %4660 = vmatmul.f32.vlgmr.msrb.gmra.mxu2 %v4598_v44  ;;  %6514 = vmatmul.msk.f32.vlgmr.msra.gmra.mxu0 %vm4601_vm13, %v4599_v19 }
 0x5a3   : > { %4770 = vmatpush.msra.mxu0 %v4454_v48  ;;  %4797 = vmatpush.msrb.mxu1 %v4490_v60  ;;  %v4394_v48 = vld [vmem:[%s12397_s13] sm:$0xff]  ;;  %v4395_v60 = vld [vmem:[%s12397_s13 + $0x8] sm:$0xff] }
 0x5a4   : > { %4810 = vmatpush.msrb.mxu2 %v4455_v49  ;;  %4837 = vmatpush.msrb.mxu3 %v4491_v50  ;;  %v11350_v49 = vperm.slane %v11250_v25, 0  ;;  %v4428_v50 = vld [vmem:[%s12397_s13 + $0x110] sm:$0xff]  ;;  %v4465_v25 = vld [vmem:[%s12397_s13 + $0x238] sm:$0xff] }
 0x5a5   : > { %4771 = vmatpush.msra.mxu0 %v4450_v56  ;;  %4798 = vmatpush.msrb.mxu1 %v4486_v51  ;;  %v4492_v56 = vld [vmem:[%s12397_s13 + $0x310] sm:$0xff]  ;;  %v4429_v51 = vld [vmem:[%s12397_s13 + $0x118] sm:$0xff] }
 0x5a6   : > { %4811 = vmatpush.msrb.mxu2 %v4451_v58  ;;  %4838 = vmatpush.msrb.mxu3 %v4487_v62  ;;  %v4493_v58 = vld [vmem:[%s12397_s13 + $0x318] sm:$0xff]  ;;  %v4424_v62 = vld [vmem:[%s12397_s13 + $0xf0] sm:$0xff] }
 0x5a7   : > { %4772 = vmatpush.msra.mxu0 %v4446_v34  ;;  %4799 = vmatpush.msrb.mxu1 %v4482_v28  ;;  %v4488_v34 = vld [vmem:[%s12397_s13 + $0x2f0] sm:$0xff]  ;;  %v4425_v28 = vld [vmem:[%s12397_s13 + $0xf8] sm:$0xff] }
 0x5a8   : > { %4812 = vmatpush.msrb.mxu2 %v4447_v53  ;;  %4839 = vmatpush.msrb.mxu3 %v4483_v26  ;;  %v4489_v53 = vld [vmem:[%s12397_s13 + $0x2f8] sm:$0xff]  ;;  %v4420_v26 = vld [vmem:[%s12397_s13 + $0xd0] sm:$0xff] }
 0x5a9   : > { %4773 = vmatpush.msra.mxu0 %v4442_v55  ;;  %4800 = vmatpush.msrb.mxu1 %v4478_v38  ;;  %v4484_v55 = vld [vmem:[%s12397_s13 + $0x2d0] sm:$0xff]  ;;  %v4421_v38 = vld [vmem:[%s12397_s13 + $0xd8] sm:$0xff] }
 0x5aa   : > { %4813 = vmatpush.msrb.mxu2 %v4443_v0  ;;  %4840 = vmatpush.msrb.mxu3 %v4479_v24  ;;  %v4485_v0 = vld [vmem:[%s12397_s13 + $0x2d8] sm:$0xff]  ;;  %v4416_v24 = vld [vmem:[%s12397_s13 + $0xb0] sm:$0xff] }
 0x5ab   : > { %4700 = vmatmul.f32.vlgmr.msra.gmra.mxu1 %v4598_v44  ;;  %6515 = vmatmul.msk.f32.vlgmr.msrb.gmra.mxu0 %vm4601_vm13, %v4599_v19 }
 0x5ac   : > { %4740 = vmatmul.f32.vlgmr.msra.gmra.mxu3 %v4598_v44  ;;  %6516 = vmatmul.msk.f32.vlgmr.msra.gmra.mxu2 %vm4601_vm13, %v4599_v19  ;;  %v4432_v44 = vld [vmem:[%s12397_s13 + $0x130] sm:$0xff]  ;;  %v4433_v19 = vld [vmem:[%s12397_s13 + $0x138] sm:$0xff] }
 0x5ad   : > { %4774 = vmatpush.msra.mxu0 %v4438_v39  ;;  %4801 = vmatpush.msrb.mxu1 %v4474_v13  ;;  %v4480_v39 = vld [vmem:[%s12397_s13 + $0x2b0] sm:$0xff]  ;;  %v4417_v13 = vld [vmem:[%s12397_s13 + $0xb8] sm:$0xff] }
 0x5ae   : > { %4814 = vmatpush.msrb.mxu2 %v4439_v41  ;;  %4841 = vmatpush.msrb.mxu3 %v4475_v54  ;;  %v4481_v41 = vld [vmem:[%s12397_s13 + $0x2b8] sm:$0xff]  ;;  %v4412_v54 = vld [vmem:[%s12397_s13 + $0x90] sm:$0xff] }
 0x5af   : > { %4775 = vmatpush.msra.mxu0 %v4434_v7  ;;  %4802 = vmatpush.msrb.mxu1 %v4470_v22  ;;  %v4476_v7 = vld [vmem:[%s12397_s13 + $0x290] sm:$0xff]  ;;  %v4413_v22 = vld [vmem:[%s12397_s13 + $0x98] sm:$0xff] }
 0x5b0   : > { %4815 = vmatpush.msrb.mxu2 %v4435_v36  ;;  %4842 = vmatpush.msrb.mxu3 %v4471_v61  ;;  %v4477_v36 = vld [vmem:[%s12397_s13 + $0x298] sm:$0xff]  ;;  %v4408_v61 = vld [vmem:[%s12397_s13 + $0x70] sm:$0xff] }
 0x5b1   : > { %4776 = vmatpush.msra.mxu0 %v4430_v52  ;;  %4803 = vmatpush.msrb.mxu1 %v4466_v4  ;;  %v4472_v52 = vld [vmem:[%s12397_s13 + $0x270] sm:$0xff]  ;;  %v4409_v4 = vld [vmem:[%s12397_s13 + $0x78] sm:$0xff] }
 0x5b2   : > { %4816 = vmatpush.msrb.mxu2 %v4431_v3  ;;  %4843 = vmatpush.msrb.mxu3 %v4467_v6  ;;  %v4473_v3 = vld [vmem:[%s12397_s13 + $0x278] sm:$0xff]  ;;  %v4404_v6 = vld [vmem:[%s12397_s13 + $0x50] sm:$0xff] }
 0x5b3   : > { %4777 = vmatpush.msra.mxu0 %v4426_v15  ;;  %4804 = vmatpush.msrb.mxu1 %v4462_v57  ;;  %v4468_v15 = vld [vmem:[%s12397_s13 + $0x250] sm:$0xff]  ;;  %v4405_v57 = vld [vmem:[%s12397_s13 + $0x58] sm:$0xff] }
 0x5b4   : > { %4817 = vmatpush.msrb.mxu2 %v4427_v10  ;;  %4844 = vmatpush.msrb.mxu3 %v4463_v12  ;;  %v4469_v10 = vld [vmem:[%s12397_s13 + $0x258] sm:$0xff]  ;;  %v4400_v12 = vld [vmem:[%s12397_s13 + $0x30] sm:$0xff] }
 0x5b5   : > { %4778 = vmatpush.msra.mxu0 %v4422_v59  ;;  %4805 = vmatpush.msrb.mxu1 %v4458_v17  ;;  %v4464_v59 = vld [vmem:[%s12397_s13 + $0x230] sm:$0xff]  ;;  %v4401_v17 = vld [vmem:[%s12397_s13 + $0x38] sm:$0xff] }
 0x5b6   : > { %4818 = vmatpush.msrb.mxu2 %v4423_v31  ;;  %4845 = vmatpush.msrb.mxu3 %v4459_v23  ;;  %v4396_v31 = vld [vmem:[%s12397_s13 + $0x10] sm:$0xff] }
 0x5b7   : > { %6517 = vmatmul.msk.f32.vlgmr.msrb.gmra.mxu1 %vm4601_vm13, %v11259_v5  ;;  %6518 = vmatmul.msk.f32.vlgmr.msrb.gmra.mxu3 %vm4601_vm13, %v11259_v5  ;;  %v4460_v23 = vld [vmem:[%s12397_s13 + $0x210] sm:$0xff] }
 0x5b8   : > { %4850 = vmatpush.msra.mxu1 %v4456_v14  ;;  %4890 = vmatpush.msra.mxu3 %v4457_v33  ;;  %v4397_v14 = vld [vmem:[%s12397_s13 + $0x18] sm:$0xff] }
 0x5b9   : > { %4779 = vmatpush.msra.mxu0 %v4418_v63  ;;  %4819 = vmatpush.msrb.mxu2 %v4419_v32  ;;  %v4461_v33 = vld [vmem:[%s12397_s13 + $0x218] sm:$0xff]  ;;  %v6581_v63 = vld [vmem:[%s12397_s13 + $0x820] sm:$0xff] }
 0x5ba   : > { %4851 = vmatpush.msra.mxu1 %v4452_v42  ;;  %4891 = vmatpush.msra.mxu3 %v4453_v1  ;;  %v6617_v32 = vld [vmem:[%s12397_s13 + $0x940] sm:$0xff]  ;;  %v6582_v42 = vld [vmem:[%s12397_s13 + $0x828] sm:$0xff] }
 0x5bb   : > { %4780 = vmatpush.msra.mxu0 %v4414_v16  ;;  %4820 = vmatpush.msrb.mxu2 %v4415_v18  ;;  %v6618_v1 = vld [vmem:[%s12397_s13 + $0x948] sm:$0xff]  ;;  %v6577_v16 = vld [vmem:[%s12397_s13 + $0x800] sm:$0xff] }
 0x5bc   : > { %4852 = vmatpush.msra.mxu1 %v4448_v2  ;;  %4892 = vmatpush.msra.mxu3 %v4449_v9  ;;  %v6613_v18 = vld [vmem:[%s12397_s13 + $0x920] sm:$0xff]  ;;  %v6578_v2 = vld [vmem:[%s12397_s13 + $0x808] sm:$0xff] }
 0x5bd   : > { %4781 = vmatpush.msra.mxu0 %v4410_v21  ;;  %4821 = vmatpush.msrb.mxu2 %v4411_v46  ;;  %v6614_v9 = vld [vmem:[%s12397_s13 + $0x928] sm:$0xff]  ;;  %v6609_v21 = vld [vmem:[%s12397_s13 + $0x900] sm:$0xff] }
 0x5be   : > { %4853 = vmatpush.msra.mxu1 %v4444_v47  ;;  %4893 = vmatpush.msra.mxu3 %v4445_v45  ;;  %v6574_v46 = vld [vmem:[%s12397_s13 + $0x7e8] sm:$0xff]  ;;  %v6569_v45 = vld [vmem:[%s12397_s13 + $0x7c0] sm:$0xff] }
 0x5bf   : > { %4782 = vmatpush.msra.mxu0 %v4406_v8  ;;  %4822 = vmatpush.msrb.mxu2 %v4407_v11  ;;  %v6610_v47 = vld [vmem:[%s12397_s13 + $0x908] sm:$0xff]  ;;  %v6605_v8 = vld [vmem:[%s12397_s13 + $0x8e0] sm:$0xff] }
 0x5c0   : > { %4854 = vmatpush.msra.mxu1 %v4440_v27  ;;  %4894 = vmatpush.msra.mxu3 %v4441_v20  ;;  %v6570_v11 = vld [vmem:[%s12397_s13 + $0x7c8] sm:$0xff]  ;;  %v6565_v20 = vld [vmem:[%s12397_s13 + $0x7a0] sm:$0xff] }
 0x5c1   : > { %4783 = vmatpush.msra.mxu0 %v4402_v35  ;;  %4823 = vmatpush.msrb.mxu2 %v4403_v30  ;;  %v6606_v27 = vld [vmem:[%s12397_s13 + $0x8e8] sm:$0xff]  ;;  %v6601_v35 = vld [vmem:[%s12397_s13 + $0x8c0] sm:$0xff] }
 0x5c2   : > { %4855 = vmatpush.msra.mxu1 %v4436_v40  ;;  %4895 = vmatpush.msra.mxu3 %v4437_v29  ;;  %v6566_v30 = vld [vmem:[%s12397_s13 + $0x7a8] sm:$0xff]  ;;  %v6561_v29 = vld [vmem:[%s12397_s13 + $0x780] sm:$0xff] }
 0x5c3   : > { %4784 = vmatpush.msra.mxu0 %v4398_v37  ;;  %4824 = vmatpush.msrb.mxu2 %v4399_v43  ;;  %v6602_v40 = vld [vmem:[%s12397_s13 + $0x8c8] sm:$0xff]  ;;  %v6597_v37 = vld [vmem:[%s12397_s13 + $0x8a0] sm:$0xff] }
 0x5c4   : > { %4856 = vmatpush.msra.mxu1 %v4432_v44  ;;  %4896 = vmatpush.msra.mxu3 %v4433_v19  ;;  %v6562_v43 = vld [vmem:[%s12397_s13 + $0x788] sm:$0xff]  ;;  %v6557_v19 = vld [vmem:[%s12397_s13 + $0x760] sm:$0xff] }
 0x5c5   : > { %4785 = vmatpush.msra.mxu0 %v4394_v48  ;;  %4825 = vmatpush.msrb.mxu2 %v4395_v60  ;;  %v6598_v44 = vld [vmem:[%s12397_s13 + $0x8a8] sm:$0xff]  ;;  %v6593_v48 = vld [vmem:[%s12397_s13 + $0x880] sm:$0xff] }
 0x5c6   : > { %4786 = vmatmul.f32.vlgmr.msra.gmra.mxu0 %v11350_v49  ;;  %4826 = vmatmul.f32.vlgmr.msrb.gmra.mxu2 %v11350_v49  ;;  %v6558_v60 = vld [vmem:[%s12397_s13 + $0x768] sm:$0xff] }
 0x5c7   : > { %4857 = vmatpush.msra.mxu1 %v4428_v50  ;;  %4877 = vmatpush.msrb.mxu0 %v4492_v56  ;;  %v6553_v50 = vld [vmem:[%s12397_s13 + $0x740] sm:$0xff] }
 0x5c8   : > { %4897 = vmatpush.msra.mxu3 %v4429_v51  ;;  %4917 = vmatpush.msra.mxu2 %v4493_v58  ;;  %v6589_v56 = vld [vmem:[%s12397_s13 + $0x860] sm:$0xff]  ;;  %v6554_v51 = vld [vmem:[%s12397_s13 + $0x748] sm:$0xff] }
 0x5c9   : > { %4858 = vmatpush.msra.mxu1 %v4424_v62  ;;  %4878 = vmatpush.msrb.mxu0 %v4488_v34  ;;  %v6590_v58 = vld [vmem:[%s12397_s13 + $0x868] sm:$0xff]  ;;  %v6549_v62 = vld [vmem:[%s12397_s13 + $0x720] sm:$0xff] }
 0x5ca   : > { %4898 = vmatpush.msra.mxu3 %v4425_v28  ;;  %4918 = vmatpush.msra.mxu2 %v4489_v53  ;;  %v6585_v34 = vld [vmem:[%s12397_s13 + $0x840] sm:$0xff]  ;;  %v6550_v53 = vld [vmem:[%s12397_s13 + $0x728] sm:$0xff] }
 0x5cb   : > { %4859 = vmatpush.msra.mxu1 %v4420_v26  ;;  %4879 = vmatpush.msrb.mxu0 %v4484_v55  ;;  %v11570_v28 = vld [vmem:[#allocation3 + $0x2] ss:$4 sm:$0x3]  ;;  %v6586_v26 = vld [vmem:[%s12397_s13 + $0x848] sm:$0xff] }
 0x5cc   : > { %4899 = vmatpush.msra.mxu3 %v4421_v38  ;;  %4919 = vmatpush.msra.mxu2 %v4485_v0  ;;  %v11579_v55 = vperm.slane %v11570_v28, 1  ;;  %v6583_v38 = vld [vmem:[%s12397_s13 + $0x830] sm:$0xff]  ;;  %v6584_v0 = vld [vmem:[%s12397_s13 + $0x838] sm:$0xff] }
 0x5cd   : > { %4860 = vmatpush.msra.mxu1 %v4416_v24  ;;  %4880 = vmatpush.msrb.mxu0 %v4480_v39  ;;  %v6545_v24 = vld [vmem:[%s12397_s13 + $0x700] sm:$0xff]  ;;  %v6546_v39 = vld [vmem:[%s12397_s13 + $0x708] sm:$0xff] }
 0x5ce   : > { %4900 = vmatpush.msra.mxu3 %v4417_v13  ;;  %4920 = vmatpush.msra.mxu2 %v4481_v41  ;;  %v6579_v13 = vld [vmem:[%s12397_s13 + $0x810] sm:$0xff]  ;;  %v6580_v41 = vld [vmem:[%s12397_s13 + $0x818] sm:$0xff] }
 0x5cf   : > { %4861 = vmatpush.msra.mxu1 %v4412_v54  ;;  %4881 = vmatpush.msrb.mxu0 %v4476_v7  ;;  %v6541_v54 = vld [vmem:[%s12397_s13 + $0x6e0] sm:$0xff]  ;;  %v6542_v7 = vld [vmem:[%s12397_s13 + $0x6e8] sm:$0xff] }
 0x5d0   : > { %4901 = vmatpush.msra.mxu3 %v4413_v22  ;;  %4921 = vmatpush.msra.mxu2 %v4477_v36  ;;  %v6575_v22 = vld [vmem:[%s12397_s13 + $0x7f0] sm:$0xff]  ;;  %v6576_v36 = vld [vmem:[%s12397_s13 + $0x7f8] sm:$0xff] }
 0x5d1   : > { %4862 = vmatpush.msra.mxu1 %v4408_v61  ;;  %4882 = vmatpush.msrb.mxu0 %v4472_v52  ;;  %v6537_v61 = vld [vmem:[%s12397_s13 + $0x6c0] sm:$0xff]  ;;  %v6538_v52 = vld [vmem:[%s12397_s13 + $0x6c8] sm:$0xff] }
 0x5d2   : > { %4902 = vmatpush.msra.mxu3 %v4409_v4  ;;  %4922 = vmatpush.msra.mxu2 %v4473_v3  ;;  %v6571_v4 = vld [vmem:[%s12397_s13 + $0x7d0] sm:$0xff]  ;;  %v6572_v3 = vld [vmem:[%s12397_s13 + $0x7d8] sm:$0xff] }
 0x5d3   : > { %4863 = vmatpush.msra.mxu1 %v4404_v6  ;;  %4883 = vmatpush.msrb.mxu0 %v4468_v15  ;;  %v6533_v6 = vld [vmem:[%s12397_s13 + $0x6a0] sm:$0xff]  ;;  %v6534_v15 = vld [vmem:[%s12397_s13 + $0x6a8] sm:$0xff] }
 0x5d4   : > { %4903 = vmatpush.msra.mxu3 %v4405_v57  ;;  %4923 = vmatpush.msra.mxu2 %v4469_v10  ;;  %v6567_v57 = vld [vmem:[%s12397_s13 + $0x7b0] sm:$0xff]  ;;  %v6568_v10 = vld [vmem:[%s12397_s13 + $0x7b8] sm:$0xff] }
 0x5d5   : > { %4864 = vmatpush.msra.mxu1 %v4400_v12  ;;  %4884 = vmatpush.msrb.mxu0 %v4464_v59  ;;  %v6529_v12 = vld [vmem:[%s12397_s13 + $0x680] sm:$0xff]  ;;  %v6530_v59 = vld [vmem:[%s12397_s13 + $0x688] sm:$0xff] }
 0x5d6   : > { %4904 = vmatpush.msra.mxu3 %v4401_v17  ;;  %4924 = vmatpush.msra.mxu2 %v4465_v25  ;;  %v6563_v17 = vld [vmem:[%s12397_s13 + $0x790] sm:$0xff]  ;;  %v6564_v25 = vld [vmem:[%s12397_s13 + $0x798] sm:$0xff] }
 0x5d7   : > { %4865 = vmatpush.msra.mxu1 %v4396_v31  ;;  %4885 = vmatpush.msrb.mxu0 %v4460_v23  ;;  %v6525_v31 = vld [vmem:[%s12397_s13 + $0x660] sm:$0xff]  ;;  %v6526_v23 = vld [vmem:[%s12397_s13 + $0x668] sm:$0xff] }
 0x5d8   : > { %4905 = vmatpush.msra.mxu3 %v4397_v14  ;;  %4925 = vmatpush.msra.mxu2 %v4461_v33  ;;  %v6559_v14 = vld [vmem:[%s12397_s13 + $0x770] sm:$0xff]  ;;  %v6560_v33 = vld [vmem:[%s12397_s13 + $0x778] sm:$0xff] }
 0x5d9   : > { %4866 = vmatmul.f32.vlgmr.msra.gmra.mxu1 %v11350_v49  ;;  %6519 = vmatmul.msk.f32.vlgmr.msrb.gmra.mxu0 %vm4601_vm13, %v11259_v5 }
 0x5da   : > { %4906 = vmatmul.f32.vlgmr.msra.gmra.mxu3 %v11350_v49  ;;  %6520 = vmatmul.msk.f32.vlgmr.msra.gmra.mxu2 %vm4601_vm13, %v11259_v5  ;;  %v6573_v5 = vld [vmem:[%s12397_s13 + $0x7e0] sm:$0xff]  ;;  %v6594_v49 = vld [vmem:[%s12397_s13 + $0x888] sm:$0xff] }
 0x5db   : > { %5039 = vmatpush.msra.mxu0 %v6581_v63  ;;  %5066 = vmatpush.msrb.mxu1 %v6617_v32  ;;  %v6521_v63 = vld [vmem:[%s12397_s13 + $0x640] sm:$0xff]  ;;  %v6522_v32 = vld [vmem:[%s12397_s13 + $0x648] sm:$0xff] }
 0x5dc   : > { %5079 = vmatpush.msrb.mxu2 %v6582_v42  ;;  %5106 = vmatpush.msrb.mxu3 %v6618_v1  ;;  %v11670_v42 = vperm.slane %v11570_v28, 0  ;;  %v6555_v1 = vld [vmem:[%s12397_s13 + $0x750] sm:$0xff]  ;;  %v6592_v28 = vld [vmem:[%s12397_s13 + $0x878] sm:$0xff] }
 0x5dd   : > { %5040 = vmatpush.msra.mxu0 %v6577_v16  ;;  %5067 = vmatpush.msrb.mxu1 %v6613_v18  ;;  %v6619_v16 = vld [vmem:[%s12397_s13 + $0x950] sm:$0xff]  ;;  %v6556_v18 = vld [vmem:[%s12397_s13 + $0x758] sm:$0xff] }
 0x5de   : > { %5080 = vmatpush.msrb.mxu2 %v6578_v2  ;;  %5107 = vmatpush.msrb.mxu3 %v6614_v9  ;;  %v6620_v2 = vld [vmem:[%s12397_s13 + $0x958] sm:$0xff]  ;;  %v6551_v9 = vld [vmem:[%s12397_s13 + $0x730] sm:$0xff] }
 0x5df   : > { %5041 = vmatpush.msra.mxu0 %v6573_v5  ;;  %5068 = vmatpush.msrb.mxu1 %v6609_v21  ;;  %v6615_v5 = vld [vmem:[%s12397_s13 + $0x930] sm:$0xff]  ;;  %v6552_v21 = vld [vmem:[%s12397_s13 + $0x738] sm:$0xff] }
 0x5e0   : > { %5081 = vmatpush.msrb.mxu2 %v6574_v46  ;;  %5108 = vmatpush.msrb.mxu3 %v6610_v47  ;;  %v6616_v46 = vld [vmem:[%s12397_s13 + $0x938] sm:$0xff]  ;;  %v6547_v47 = vld [vmem:[%s12397_s13 + $0x710] sm:$0xff] }
 0x5e1   : > { %5042 = vmatpush.msra.mxu0 %v6569_v45  ;;  %5069 = vmatpush.msrb.mxu1 %v6605_v8  ;;  %v6611_v45 = vld [vmem:[%s12397_s13 + $0x910] sm:$0xff]  ;;  %v6548_v8 = vld [vmem:[%s12397_s13 + $0x718] sm:$0xff] }
 0x5e2   : > { %5082 = vmatpush.msrb.mxu2 %v6570_v11  ;;  %5109 = vmatpush.msrb.mxu3 %v6606_v27  ;;  %v6612_v11 = vld [vmem:[%s12397_s13 + $0x918] sm:$0xff]  ;;  %v6543_v27 = vld [vmem:[%s12397_s13 + $0x6f0] sm:$0xff] }
 0x5e3   : > { %5043 = vmatpush.msra.mxu0 %v6565_v20  ;;  %5070 = vmatpush.msrb.mxu1 %v6601_v35  ;;  %v6607_v20 = vld [vmem:[%s12397_s13 + $0x8f0] sm:$0xff]  ;;  %v6544_v35 = vld [vmem:[%s12397_s13 + $0x6f8] sm:$0xff] }
 0x5e4   : > { %5083 = vmatpush.msrb.mxu2 %v6566_v30  ;;  %5110 = vmatpush.msrb.mxu3 %v6602_v40  ;;  %v6608_v30 = vld [vmem:[%s12397_s13 + $0x8f8] sm:$0xff]  ;;  %v6539_v40 = vld [vmem:[%s12397_s13 + $0x6d0] sm:$0xff] }
 0x5e5   : > { %5044 = vmatpush.msra.mxu0 %v6561_v29  ;;  %5071 = vmatpush.msrb.mxu1 %v6597_v37  ;;  %v6603_v29 = vld [vmem:[%s12397_s13 + $0x8d0] sm:$0xff]  ;;  %v6540_v37 = vld [vmem:[%s12397_s13 + $0x6d8] sm:$0xff] }
 0x5e6   : > { %5084 = vmatpush.msrb.mxu2 %v6562_v43  ;;  %5111 = vmatpush.msrb.mxu3 %v6598_v44  ;;  %v6604_v43 = vld [vmem:[%s12397_s13 + $0x8d8] sm:$0xff]  ;;  %v6535_v44 = vld [vmem:[%s12397_s13 + $0x6b0] sm:$0xff] }
 0x5e7   : > { %5045 = vmatpush.msra.mxu0 %v6557_v19  ;;  %5072 = vmatpush.msrb.mxu1 %v6593_v48  ;;  %v6599_v19 = vld [vmem:[%s12397_s13 + $0x8b0] sm:$0xff]  ;;  %v6536_v48 = vld [vmem:[%s12397_s13 + $0x6b8] sm:$0xff] }
 0x5e8   : > { %5085 = vmatpush.msrb.mxu2 %v6558_v60  ;;  %5112 = vmatpush.msrb.mxu3 %v6594_v49  ;;  %v6600_v60 = vld [vmem:[%s12397_s13 + $0x8b8] sm:$0xff]  ;;  %v6531_v49 = vld [vmem:[%s12397_s13 + $0x690] sm:$0xff] }
 0x5e9   : > { %5046 = vmatpush.msra.mxu0 %v6553_v50  ;;  %5073 = vmatpush.msrb.mxu1 %v6589_v56  ;;  %v6595_v50 = vld [vmem:[%s12397_s13 + $0x890] sm:$0xff]  ;;  %v6532_v56 = vld [vmem:[%s12397_s13 + $0x698] sm:$0xff] }
 0x5ea   : > { %5086 = vmatpush.msrb.mxu2 %v6554_v51  ;;  %5113 = vmatpush.msrb.mxu3 %v6590_v58  ;;  %v6596_v51 = vld [vmem:[%s12397_s13 + $0x898] sm:$0xff]  ;;  %v6527_v58 = vld [vmem:[%s12397_s13 + $0x670] sm:$0xff] }
 0x5eb   : > { %5047 = vmatpush.msra.mxu0 %v6549_v62  ;;  %5074 = vmatpush.msrb.mxu1 %v6585_v34  ;;  %v6591_v62 = vld [vmem:[%s12397_s13 + $0x870] sm:$0xff]  ;;  %v6528_v34 = vld [vmem:[%s12397_s13 + $0x678] sm:$0xff] }
 0x5ec   : > { %5087 = vmatpush.msrb.mxu2 %v6550_v53  ;;  %5114 = vmatpush.msrb.mxu3 %v6586_v26  ;;  %v6523_v53 = vld [vmem:[%s12397_s13 + $0x650] sm:$0xff] }
 0x5ed   : > { %6621 = vmatmul.msk.f32.vlgmr.msrb.gmra.mxu1 %vm4601_vm13, %v11579_v55  ;;  %6622 = vmatmul.msk.f32.vlgmr.msrb.gmra.mxu3 %vm4601_vm13, %v11579_v55  ;;  %v6587_v26 = vld [vmem:[%s12397_s13 + $0x850] sm:$0xff] }
 0x5ee   : > { %5119 = vmatpush.msra.mxu1 %v6583_v38  ;;  %5159 = vmatpush.msra.mxu3 %v6584_v0  ;;  %v6524_v38 = vld [vmem:[%s12397_s13 + $0x658] sm:$0xff] }
 0x5ef   : > { %5048 = vmatpush.msra.mxu0 %v6545_v24  ;;  %5088 = vmatpush.msrb.mxu2 %v6546_v39  ;;  %v6588_v0 = vld [vmem:[%s12397_s13 + $0x858] sm:$0xff]  ;;  %v6685_v24 = vld [vmem:[%s12397_s13 + $0xb40] sm:$0xff] }
 0x5f0   : > { %5120 = vmatpush.msra.mxu1 %v6579_v13  ;;  %5160 = vmatpush.msra.mxu3 %v6580_v41  ;;  %v6721_v39 = vld [vmem:[%s12397_s13 + $0xc60] sm:$0xff]  ;;  %v6686_v13 = vld [vmem:[%s12397_s13 + $0xb48] sm:$0xff] }
 0x5f1   : > { %5049 = vmatpush.msra.mxu0 %v6541_v54  ;;  %5089 = vmatpush.msrb.mxu2 %v6542_v7  ;;  %v6722_v41 = vld [vmem:[%s12397_s13 + $0xc68] sm:$0xff]  ;;  %v6681_v54 = vld [vmem:[%s12397_s13 + $0xb20] sm:$0xff] }
 0x5f2   : > { %5121 = vmatpush.msra.mxu1 %v6575_v22  ;;  %5161 = vmatpush.msra.mxu3 %v6576_v36  ;;  %v6717_v7 = vld [vmem:[%s12397_s13 + $0xc40] sm:$0xff]  ;;  %v6682_v22 = vld [vmem:[%s12397_s13 + $0xb28] sm:$0xff] }
 0x5f3   : > { %5050 = vmatpush.msra.mxu0 %v6537_v61  ;;  %5090 = vmatpush.msrb.mxu2 %v6538_v52  ;;  %v6718_v36 = vld [vmem:[%s12397_s13 + $0xc48] sm:$0xff]  ;;  %v6713_v61 = vld [vmem:[%s12397_s13 + $0xc20] sm:$0xff] }
 0x5f4   : > { %5122 = vmatpush.msra.mxu1 %v6571_v4  ;;  %5162 = vmatpush.msra.mxu3 %v6572_v3  ;;  %v6678_v52 = vld [vmem:[%s12397_s13 + $0xb08] sm:$0xff]  ;;  %v6673_v3 = vld [vmem:[%s12397_s13 + $0xae0] sm:$0xff] }
 0x5f5   : > { %5051 = vmatpush.msra.mxu0 %v6533_v6  ;;  %5091 = vmatpush.msrb.mxu2 %v6534_v15  ;;  %v6714_v4 = vld [vmem:[%s12397_s13 + $0xc28] sm:$0xff]  ;;  %v6709_v6 = vld [vmem:[%s12397_s13 + $0xc00] sm:$0xff] }
 0x5f6   : > { %5123 = vmatpush.msra.mxu1 %v6567_v57  ;;  %5163 = vmatpush.msra.mxu3 %v6568_v10  ;;  %v6674_v15 = vld [vmem:[%s12397_s13 + $0xae8] sm:$0xff]  ;;  %v6669_v10 = vld [vmem:[%s12397_s13 + $0xac0] sm:$0xff] }
 0x5f7   : > { %5052 = vmatpush.msra.mxu0 %v6529_v12  ;;  %5092 = vmatpush.msrb.mxu2 %v6530_v59  ;;  %v6710_v57 = vld [vmem:[%s12397_s13 + $0xc08] sm:$0xff]  ;;  %v6705_v12 = vld [vmem:[%s12397_s13 + $0xbe0] sm:$0xff] }
 0x5f8   : > { %5124 = vmatpush.msra.mxu1 %v6563_v17  ;;  %5164 = vmatpush.msra.mxu3 %v6564_v25  ;;  %v6670_v59 = vld [vmem:[%s12397_s13 + $0xac8] sm:$0xff]  ;;  %v6665_v25 = vld [vmem:[%s12397_s13 + $0xaa0] sm:$0xff] }
 0x5f9   : > { %5053 = vmatpush.msra.mxu0 %v6525_v31  ;;  %5093 = vmatpush.msrb.mxu2 %v6526_v23  ;;  %v6706_v17 = vld [vmem:[%s12397_s13 + $0xbe8] sm:$0xff]  ;;  %v6701_v31 = vld [vmem:[%s12397_s13 + $0xbc0] sm:$0xff] }
 0x5fa   : > { %5125 = vmatpush.msra.mxu1 %v6559_v14  ;;  %5165 = vmatpush.msra.mxu3 %v6560_v33  ;;  %v6666_v23 = vld [vmem:[%s12397_s13 + $0xaa8] sm:$0xff]  ;;  %v6661_v33 = vld [vmem:[%s12397_s13 + $0xa80] sm:$0xff] }
 0x5fb   : > { %5054 = vmatpush.msra.mxu0 %v6521_v63  ;;  %5094 = vmatpush.msrb.mxu2 %v6522_v32  ;;  %v6702_v14 = vld [vmem:[%s12397_s13 + $0xbc8] sm:$0xff]  ;;  %v6697_v63 = vld [vmem:[%s12397_s13 + $0xba0] sm:$0xff] }
 0x5fc   : > { %5055 = vmatmul.f32.vlgmr.msra.gmra.mxu0 %v11670_v42  ;;  %5095 = vmatmul.f32.vlgmr.msrb.gmra.mxu2 %v11670_v42  ;;  %v6662_v32 = vld [vmem:[%s12397_s13 + $0xa88] sm:$0xff] }
 0x5fd   : > { %5126 = vmatpush.msra.mxu1 %v6555_v1  ;;  %5146 = vmatpush.msrb.mxu0 %v6619_v16  ;;  %v6657_v1 = vld [vmem:[%s12397_s13 + $0xa60] sm:$0xff] }
 0x5fe   : > { %5166 = vmatpush.msra.mxu3 %v6556_v18  ;;  %5186 = vmatpush.msra.mxu2 %v6620_v2  ;;  %v6693_v16 = vld [vmem:[%s12397_s13 + $0xb80] sm:$0xff]  ;;  %v6658_v18 = vld [vmem:[%s12397_s13 + $0xa68] sm:$0xff] }
 0x5ff   : > { %5127 = vmatpush.msra.mxu1 %v6551_v9  ;;  %5147 = vmatpush.msrb.mxu0 %v6615_v5  ;;  %v6694_v2 = vld [vmem:[%s12397_s13 + $0xb88] sm:$0xff]  ;;  %v6653_v9 = vld [vmem:[%s12397_s13 + $0xa40] sm:$0xff] }
 0x600   : > { %5167 = vmatpush.msra.mxu3 %v6552_v21  ;;  %5187 = vmatpush.msra.mxu2 %v6616_v46  ;;  %v6689_v5 = vld [vmem:[%s12397_s13 + $0xb60] sm:$0xff]  ;;  %v6654_v46 = vld [vmem:[%s12397_s13 + $0xa48] sm:$0xff] }
 0x601   : > { %5128 = vmatpush.msra.mxu1 %v6547_v47  ;;  %5148 = vmatpush.msrb.mxu0 %v6611_v45  ;;  %v11890_v21 = vld [vmem:[#allocation3 + $0x3] ss:$4 sm:$0x3]  ;;  %v6690_v47 = vld [vmem:[%s12397_s13 + $0xb68] sm:$0xff] }
 0x602   : > { %5168 = vmatpush.msra.mxu3 %v6548_v8  ;;  %5188 = vmatpush.msra.mxu2 %v6612_v11  ;;  %v11899_v45 = vperm.slane %v11890_v21, 1  ;;  %v6687_v8 = vld [vmem:[%s12397_s13 + $0xb50] sm:$0xff]  ;;  %v6688_v11 = vld [vmem:[%s12397_s13 + $0xb58] sm:$0xff] }
 0x603   : > { %5129 = vmatpush.msra.mxu1 %v6543_v27  ;;  %5149 = vmatpush.msrb.mxu0 %v6607_v20  ;;  %v6649_v27 = vld [vmem:[%s12397_s13 + $0xa20] sm:$0xff]  ;;  %v6650_v20 = vld [vmem:[%s12397_s13 + $0xa28] sm:$0xff] }
 0x604   : > { %5169 = vmatpush.msra.mxu3 %v6544_v35  ;;  %5189 = vmatpush.msra.mxu2 %v6608_v30  ;;  %v6683_v35 = vld [vmem:[%s12397_s13 + $0xb30] sm:$0xff]  ;;  %v6684_v30 = vld [vmem:[%s12397_s13 + $0xb38] sm:$0xff] }
 0x605   : > { %5130 = vmatpush.msra.mxu1 %v6539_v40  ;;  %5150 = vmatpush.msrb.mxu0 %v6603_v29  ;;  %v6645_v40 = vld [vmem:[%s12397_s13 + $0xa00] sm:$0xff]  ;;  %v6646_v29 = vld [vmem:[%s12397_s13 + $0xa08] sm:$0xff] }
 0x606   : > { %5170 = vmatpush.msra.mxu3 %v6540_v37  ;;  %5190 = vmatpush.msra.mxu2 %v6604_v43  ;;  %v6679_v37 = vld [vmem:[%s12397_s13 + $0xb10] sm:$0xff]  ;;  %v6680_v43 = vld [vmem:[%s12397_s13 + $0xb18] sm:$0xff] }
 0x607   : > { %5131 = vmatpush.msra.mxu1 %v6535_v44  ;;  %5151 = vmatpush.msrb.mxu0 %v6599_v19  ;;  %v6641_v44 = vld [vmem:[%s12397_s13 + $0x9e0] sm:$0xff]  ;;  %v6642_v19 = vld [vmem:[%s12397_s13 + $0x9e8] sm:$0xff] }
 0x608   : > { %5171 = vmatpush.msra.mxu3 %v6536_v48  ;;  %5191 = vmatpush.msra.mxu2 %v6600_v60  ;;  %v6675_v48 = vld [vmem:[%s12397_s13 + $0xaf0] sm:$0xff]  ;;  %v6676_v60 = vld [vmem:[%s12397_s13 + $0xaf8] sm:$0xff] }
 0x609   : > { %5132 = vmatpush.msra.mxu1 %v6531_v49  ;;  %5152 = vmatpush.msrb.mxu0 %v6595_v50  ;;  %v6637_v49 = vld [vmem:[%s12397_s13 + $0x9c0] sm:$0xff]  ;;  %v6638_v50 = vld [vmem:[%s12397_s13 + $0x9c8] sm:$0xff] }
 0x60a   : > { %5172 = vmatpush.msra.mxu3 %v6532_v56  ;;  %5192 = vmatpush.msra.mxu2 %v6596_v51  ;;  %v6671_v56 = vld [vmem:[%s12397_s13 + $0xad0] sm:$0xff]  ;;  %v6672_v51 = vld [vmem:[%s12397_s13 + $0xad8] sm:$0xff] }
 0x60b   : > { %5133 = vmatpush.msra.mxu1 %v6527_v58  ;;  %5153 = vmatpush.msrb.mxu0 %v6591_v62  ;;  %v6633_v58 = vld [vmem:[%s12397_s13 + $0x9a0] sm:$0xff]  ;;  %v6634_v62 = vld [vmem:[%s12397_s13 + $0x9a8] sm:$0xff] }
 0x60c   : > { %5173 = vmatpush.msra.mxu3 %v6528_v34  ;;  %5193 = vmatpush.msra.mxu2 %v6592_v28  ;;  %v6667_v34 = vld [vmem:[%s12397_s13 + $0xab0] sm:$0xff]  ;;  %v6668_v28 = vld [vmem:[%s12397_s13 + $0xab8] sm:$0xff] }
 0x60d   : > { %5134 = vmatpush.msra.mxu1 %v6523_v53  ;;  %5154 = vmatpush.msrb.mxu0 %v6587_v26  ;;  %v6629_v53 = vld [vmem:[%s12397_s13 + $0x980] sm:$0xff]  ;;  %v6630_v26 = vld [vmem:[%s12397_s13 + $0x988] sm:$0xff] }
 0x60e   : > { %5174 = vmatpush.msra.mxu3 %v6524_v38  ;;  %5194 = vmatpush.msra.mxu2 %v6588_v0  ;;  %v6663_v38 = vld [vmem:[%s12397_s13 + $0xa90] sm:$0xff]  ;;  %v6664_v0 = vld [vmem:[%s12397_s13 + $0xa98] sm:$0xff] }
 0x60f   : > { %5135 = vmatmul.f32.vlgmr.msra.gmra.mxu1 %v11670_v42  ;;  %6623 = vmatmul.msk.f32.vlgmr.msrb.gmra.mxu0 %vm4601_vm13, %v11579_v55 }
 0x610   : > { %5175 = vmatmul.f32.vlgmr.msra.gmra.mxu3 %v11670_v42  ;;  %6624 = vmatmul.msk.f32.vlgmr.msra.gmra.mxu2 %vm4601_vm13, %v11579_v55  ;;  %v6677_v55 = vld [vmem:[%s12397_s13 + $0xb00] sm:$0xff]  ;;  %v6698_v42 = vld [vmem:[%s12397_s13 + $0xba8] sm:$0xff] }
 0x611   : > { %5312 = vmatpush.msra.mxu0 %v6685_v24  ;;  %5339 = vmatpush.msrb.mxu1 %v6721_v39  ;;  %v6625_v24 = vld [vmem:[%s12397_s13 + $0x960] sm:$0xff]  ;;  %v6626_v39 = vld [vmem:[%s12397_s13 + $0x968] sm:$0xff] }
 0x612   : > { %5352 = vmatpush.msrb.mxu2 %v6686_v13  ;;  %5379 = vmatpush.msrb.mxu3 %v6722_v41  ;;  %v11990_v13 = vperm.slane %v11890_v21, 0  ;;  %v6659_v41 = vld [vmem:[%s12397_s13 + $0xa70] sm:$0xff]  ;;  %v6696_v21 = vld [vmem:[%s12397_s13 + $0xb98] sm:$0xff] }
 0x613   : > { %5313 = vmatpush.msra.mxu0 %v6681_v54  ;;  %5340 = vmatpush.msrb.mxu1 %v6717_v7  ;;  %v6723_v54 = vld [vmem:[%s12397_s13 + $0xc70] sm:$0xff]  ;;  %v6660_v7 = vld [vmem:[%s12397_s13 + $0xa78] sm:$0xff] }
 0x614   : > { %5353 = vmatpush.msrb.mxu2 %v6682_v22  ;;  %5380 = vmatpush.msrb.mxu3 %v6718_v36  ;;  %v6724_v22 = vld [vmem:[%s12397_s13 + $0xc78] sm:$0xff]  ;;  %v6655_v36 = vld [vmem:[%s12397_s13 + $0xa50] sm:$0xff] }
 0x615   : > { %5314 = vmatpush.msra.mxu0 %v6677_v55  ;;  %5341 = vmatpush.msrb.mxu1 %v6713_v61  ;;  %v6719_v55 = vld [vmem:[%s12397_s13 + $0xc50] sm:$0xff]  ;;  %v6656_v61 = vld [vmem:[%s12397_s13 + $0xa58] sm:$0xff] }
 0x616   : > { %5354 = vmatpush.msrb.mxu2 %v6678_v52  ;;  %5381 = vmatpush.msrb.mxu3 %v6714_v4  ;;  %v6720_v52 = vld [vmem:[%s12397_s13 + $0xc58] sm:$0xff]  ;;  %v6651_v4 = vld [vmem:[%s12397_s13 + $0xa30] sm:$0xff] }
 0x617   : > { %5315 = vmatpush.msra.mxu0 %v6673_v3  ;;  %5342 = vmatpush.msrb.mxu1 %v6709_v6  ;;  %v6715_v3 = vld [vmem:[%s12397_s13 + $0xc30] sm:$0xff]  ;;  %v6652_v6 = vld [vmem:[%s12397_s13 + $0xa38] sm:$0xff] }
 0x618   : > { %5355 = vmatpush.msrb.mxu2 %v6674_v15  ;;  %5382 = vmatpush.msrb.mxu3 %v6710_v57  ;;  %v6716_v15 = vld [vmem:[%s12397_s13 + $0xc38] sm:$0xff]  ;;  %v6647_v57 = vld [vmem:[%s12397_s13 + $0xa10] sm:$0xff] }
 0x619   : > { %5316 = vmatpush.msra.mxu0 %v6669_v10  ;;  %5343 = vmatpush.msrb.mxu1 %v6705_v12  ;;  %v6711_v10 = vld [vmem:[%s12397_s13 + $0xc10] sm:$0xff]  ;;  %v6648_v12 = vld [vmem:[%s12397_s13 + $0xa18] sm:$0xff] }
 0x61a   : > { %5356 = vmatpush.msrb.mxu2 %v6670_v59  ;;  %5383 = vmatpush.msrb.mxu3 %v6706_v17  ;;  %v6712_v59 = vld [vmem:[%s12397_s13 + $0xc18] sm:$0xff]  ;;  %v6643_v17 = vld [vmem:[%s12397_s13 + $0x9f0] sm:$0xff] }
 0x61b   : > { %5317 = vmatpush.msra.mxu0 %v6665_v25  ;;  %5344 = vmatpush.msrb.mxu1 %v6701_v31  ;;  %v6707_v25 = vld [vmem:[%s12397_s13 + $0xbf0] sm:$0xff]  ;;  %v6644_v31 = vld [vmem:[%s12397_s13 + $0x9f8] sm:$0xff] }
 0x61c   : > { %5357 = vmatpush.msrb.mxu2 %v6666_v23  ;;  %5384 = vmatpush.msrb.mxu3 %v6702_v14  ;;  %v6708_v23 = vld [vmem:[%s12397_s13 + $0xbf8] sm:$0xff]  ;;  %v6639_v14 = vld [vmem:[%s12397_s13 + $0x9d0] sm:$0xff] }
 0x61d   : > { %5318 = vmatpush.msra.mxu0 %v6661_v33  ;;  %5345 = vmatpush.msrb.mxu1 %v6697_v63  ;;  %v6703_v33 = vld [vmem:[%s12397_s13 + $0xbd0] sm:$0xff]  ;;  %v6640_v63 = vld [vmem:[%s12397_s13 + $0x9d8] sm:$0xff] }
 0x61e   : > { %5358 = vmatpush.msrb.mxu2 %v6662_v32  ;;  %5385 = vmatpush.msrb.mxu3 %v6698_v42  ;;  %v6704_v32 = vld [vmem:[%s12397_s13 + $0xbd8] sm:$0xff]  ;;  %v6635_v42 = vld [vmem:[%s12397_s13 + $0x9b0] sm:$0xff] }
 0x61f   : > { %5319 = vmatpush.msra.mxu0 %v6657_v1  ;;  %5346 = vmatpush.msrb.mxu1 %v6693_v16  ;;  %v6699_v1 = vld [vmem:[%s12397_s13 + $0xbb0] sm:$0xff]  ;;  %v6636_v16 = vld [vmem:[%s12397_s13 + $0x9b8] sm:$0xff] }
 0x620   : > { %5359 = vmatpush.msrb.mxu2 %v6658_v18  ;;  %5386 = vmatpush.msrb.mxu3 %v6694_v2  ;;  %v6700_v18 = vld [vmem:[%s12397_s13 + $0xbb8] sm:$0xff]  ;;  %v6631_v2 = vld [vmem:[%s12397_s13 + $0x990] sm:$0xff] }
 0x621   : > { %5320 = vmatpush.msra.mxu0 %v6653_v9  ;;  %5347 = vmatpush.msrb.mxu1 %v6689_v5  ;;  %v6695_v9 = vld [vmem:[%s12397_s13 + $0xb90] sm:$0xff]  ;;  %v6632_v5 = vld [vmem:[%s12397_s13 + $0x998] sm:$0xff] }
 0x622   : > { %5360 = vmatpush.msrb.mxu2 %v6654_v46  ;;  %5387 = vmatpush.msrb.mxu3 %v6690_v47  ;;  %v6627_v46 = vld [vmem:[%s12397_s13 + $0x970] sm:$0xff] }
 0x623   : > { %6725 = vmatmul.msk.f32.vlgmr.msrb.gmra.mxu1 %vm4601_vm13, %v11899_v45  ;;  %6726 = vmatmul.msk.f32.vlgmr.msrb.gmra.mxu3 %vm4601_vm13, %v11899_v45  ;;  %v6691_v47 = vld [vmem:[%s12397_s13 + $0xb70] sm:$0xff] }
 0x624   : > { %5392 = vmatpush.msra.mxu1 %v6687_v8  ;;  %5432 = vmatpush.msra.mxu3 %v6688_v11  ;;  %v6628_v8 = vld [vmem:[%s12397_s13 + $0x978] sm:$0xff] }
 0x625   : > { %5321 = vmatpush.msra.mxu0 %v6649_v27  ;;  %5361 = vmatpush.msrb.mxu2 %v6650_v20  ;;  %v6692_v11 = vld [vmem:[%s12397_s13 + $0xb78] sm:$0xff]  ;;  %v5508_v20 = vld [vmem:[%s12399_s15 + $0x70] sm:$0xff] }
 0x626   : > { %5393 = vmatpush.msra.mxu1 %v6683_v35  ;;  %5433 = vmatpush.msra.mxu3 %v6684_v30  ;;  %v5509_v27 = vld [vmem:[%s12399_s15 + $0x78] sm:$0xff]  ;;  %v5507_v30 = vld [vmem:[%s12399_s15 + $0x68] sm:$0xff] }
 0x627   : > { %5322 = vmatpush.msra.mxu0 %v6645_v40  ;;  %5362 = vmatpush.msrb.mxu2 %v6646_v29  ;;  %v5525_v35 = vld [vmem:[%s12399_s15 + $0xf8] sm:$0xff]  ;;  %v12123_v40 = vpop.f32.mrf.mxu1  ;;  %v12125_v29 = vpop.f32.mrf.mxu0 }
 0x628   : > { %5394 = vmatpush.msra.mxu1 %v6679_v37  ;;  %5434 = vmatpush.msra.mxu3 %v6680_v43  ;;  %v5505_v37 = vld [vmem:[%s12399_s15 + $0x58] sm:$0xff]  ;;  %v5524_v43 = vld [vmem:[%s12399_s15 + $0xf0] sm:$0xff] }
 0x629   : > { %5323 = vmatpush.msra.mxu0 %v6641_v44  ;;  %5363 = vmatpush.msrb.mxu2 %v6642_v19  ;;  %v5504_v44 = vld [vmem:[%s12399_s15 + $0x50] sm:$0xff]  ;;  %v12136_v19 = vpop.f32.mrf.mxu3 }
 0x62a   : > { %5395 = vmatpush.msra.mxu1 %v6675_v48  ;;  %5435 = vmatpush.msra.mxu3 %v6676_v60  ;;  %v5523_v48 = vld [vmem:[%s12399_s15 + $0xe8] sm:$0xff] }
 0x62b   : > { %5324 = vmatpush.msra.mxu0 %v6637_v49  ;;  %5364 = vmatpush.msrb.mxu2 %v6638_v50  ;;  %v5503_v60 = vld [vmem:[%s12399_s15 + $0x48] sm:$0xff]  ;;  %v5522_v49 = vld [vmem:[%s12399_s15 + $0xe0] sm:$0xff]  ;;  %v12147_v50 = vpop.f32.mrf.mxu2 }
 0x62c   : > { %5396 = vmatpush.msra.mxu1 %v6671_v56  ;;  %5436 = vmatpush.msra.mxu3 %v6672_v51  ;;  %v5502_v51 = vld [vmem:[%s12399_s15 + $0x40] sm:$0xff] }
 0x62d   : > { %5325 = vmatpush.msra.mxu0 %v6633_v58  ;;  %5365 = vmatpush.msrb.mxu2 %v6634_v62  ;;  %v5521_v58 = vld [vmem:[%s12399_s15 + $0xd8] sm:$0xff] }
 0x62e   : > { %5397 = vmatpush.msra.mxu1 %v6667_v34  ;;  %5437 = vmatpush.msra.mxu3 %v6668_v28  ;;  %v5501_v62 = vld [vmem:[%s12399_s15 + $0x38] sm:$0xff]  ;;  %v5520_v28 = vld [vmem:[%s12399_s15 + $0xd0] sm:$0xff] }
 0x62f   : > { %5326 = vmatpush.msra.mxu0 %v6629_v53  ;;  %5366 = vmatpush.msrb.mxu2 %v6630_v26  ;;  %v12149_v56 = vpop.f32.mrf.mxu1  ;;  %v12160_v34 = vpop.f32.mrf.mxu0  ;;  %v5541_v53 = vld [vmem:[%s12399_s15 + $0x178] sm:$0xff]  ;;  %v5500_v26 = vld [vmem:[%s12399_s15 + $0x30] sm:$0xff] }
 0x630   : > { %5398 = vmatpush.msra.mxu1 %v6663_v38  ;;  %5438 = vmatpush.msra.mxu3 %v6664_v0  ;;  %v5519_v38 = vld [vmem:[%s12399_s15 + $0xc8] sm:$0xff]  ;;  %v5540_v0 = vld [vmem:[%s12399_s15 + $0x170] sm:$0xff] }
 0x631   : > { %5327 = vmatpush.msra.mxu0 %v6625_v24  ;;  %5367 = vmatpush.msrb.mxu2 %v6626_v39  ;;  %v5539_v24 = vld [vmem:[%s12399_s15 + $0x168] sm:$0xff] }
 0x632   : > { %5328 = vmatmul.f32.vlgmr.msra.gmra.mxu0 %v11990_v13  ;;  %5368 = vmatmul.f32.vlgmr.msrb.gmra.mxu2 %v11990_v13  ;;  %v5499_v39 = vld [vmem:[%s12399_s15 + $0x28] sm:$0xff] }
 0x633   : > { %5399 = vmatpush.msra.mxu1 %v6659_v41  ;;  %5419 = vmatpush.msrb.mxu0 %v6723_v54  ;;  %v12186_v41 = vpop.f32.mrf.mxu3  ;;  %v12188_v54 = vpop.f32.mrf.mxu2 }
 0x634   : > { %5439 = vmatpush.msra.mxu3 %v6660_v7  ;;  %5459 = vmatpush.msra.mxu2 %v6724_v22 }
 0x635   : > { %5400 = vmatpush.msra.mxu1 %v6655_v36  ;;  %5420 = vmatpush.msrb.mxu0 %v6719_v55  ;;  %v5498_v36 = vld [vmem:[%s12399_s15 + $0x20] sm:$0xff]  ;;  %v5517_v55 = vld [vmem:[%s12399_s15 + $0xb8] sm:$0xff] }
 0x636   : > { %5440 = vmatpush.msra.mxu3 %v6656_v61  ;;  %5460 = vmatpush.msra.mxu2 %v6720_v52  ;;  %v5538_v61 = vld [vmem:[%s12399_s15 + $0x160] sm:$0xff]  ;;  %v5497_v52 = vld [vmem:[%s12399_s15 + $0x18] sm:$0xff] }
 0x637   : > { %5401 = vmatpush.msra.mxu1 %v6651_v4  ;;  %5421 = vmatpush.msrb.mxu0 %v6715_v3  ;;  %v12190_v7 = vpop.f32.mrf.mxu1  ;;  %v5516_v4 = vld [vmem:[%s12399_s15 + $0xb0] sm:$0xff]  ;;  %v5537_v3 = vld [vmem:[%s12399_s15 + $0x158] sm:$0xff] }
 0x638   : > { %5441 = vmatpush.msra.mxu3 %v6652_v6  ;;  %5461 = vmatpush.msra.mxu2 %v6716_v15  ;;  %v5556_v6 = vld [vmem:[%s12399_s15 + $0x1f0] sm:$0xf] }
 0x639   : > { %5402 = vmatpush.msra.mxu1 %v6647_v57  ;;  %5422 = vmatpush.msrb.mxu0 %v6711_v10  ;;  %v5496_v10 = vld [vmem:[%s12399_s15 + $0x10] sm:$0xff] }
 0x63a   : > { %5442 = vmatpush.msra.mxu3 %v6648_v12  ;;  %5462 = vmatpush.msra.mxu2 %v6712_v59  ;;  %v5515_v12 = vld [vmem:[%s12399_s15 + $0xa8] sm:$0xff]  ;;  %v5536_v59 = vld [vmem:[%s12399_s15 + $0x150] sm:$0xff] }
 0x63b   : > { %5403 = vmatpush.msra.mxu1 %v6643_v17  ;;  %5423 = vmatpush.msrb.mxu0 %v6707_v25  ;;  %v12215_v15 = vpop.f32.mrf.mxu3  ;;  %v5555_v17 = vld [vmem:[%s12399_s15 + $0x1e8] sm:$0xff] }
 0x63c   : > { %5443 = vmatpush.msra.mxu3 %v6644_v31  ;;  %5463 = vmatpush.msra.mxu2 %v6708_v23  ;;  %v5495_v23 = vld [vmem:[%s12399_s15 + $0x8] sm:$0xff] }
 0x63d   : > { %5404 = vmatpush.msra.mxu1 %v6639_v14  ;;  %5424 = vmatpush.msrb.mxu0 %v6703_v33  ;;  %v5514_v14 = vld [vmem:[%s12399_s15 + $0xa0] sm:$0xff]  ;;  %v5535_v33 = vld [vmem:[%s12399_s15 + $0x148] sm:$0xff] }
 0x63e   : > { %5444 = vmatpush.msra.mxu3 %v6640_v63  ;;  %5464 = vmatpush.msra.mxu2 %v6704_v32  ;;  %v5554_v63 = vld [vmem:[%s12399_s15 + $0x1e0] sm:$0xff] }
 0x63f   : > { %5405 = vmatpush.msra.mxu1 %v6635_v42  ;;  %5425 = vmatpush.msrb.mxu0 %v6699_v1  ;;  %v5494_v32 = vld [vmem:[%s12399_s15] sm:$0xff]  ;;  %v5513_v42 = vld [vmem:[%s12399_s15 + $0x98] sm:$0xff] }
 0x640   : > { %5445 = vmatpush.msra.mxu3 %v6636_v16  ;;  %5465 = vmatpush.msra.mxu2 %v6700_v18  ;;  %v5534_v1 = vld [vmem:[%s12399_s15 + $0x140] sm:$0xff]  ;;  %v5553_v16 = vld [vmem:[%s12399_s15 + $0x1d8] sm:$0xff]  ;;  %v5512_v18 = vld [vmem:[%s12399_s15 + $0x90] sm:$0xff] }
 0x641   : > { %5406 = vmatpush.msra.mxu1 %v6631_v2  ;;  %5426 = vmatpush.msrb.mxu0 %v6695_v9  ;;  %v5533_v2 = vld [vmem:[%s12399_s15 + $0x138] sm:$0xff]  ;;  %v5552_v9 = vld [vmem:[%s12399_s15 + $0x1d0] sm:$0xff] }
 0x642   : > { %5446 = vmatpush.msra.mxu3 %v6632_v5  ;;  %5466 = vmatpush.msra.mxu2 %v6696_v21  ;;  %v5511_v5 = vld [vmem:[%s12399_s15 + $0x88] sm:$0xff] }
 0x643   : > { %5407 = vmatpush.msra.mxu1 %v6627_v46  ;;  %5427 = vmatpush.msrb.mxu0 %v6691_v47  ;;  %v12192_v22 = vpop.f32.mrf.mxu0  ;;  %v5532_v47 = vld [vmem:[%s12399_s15 + $0x130] sm:$0xff] }
 0x644   : > { %5447 = vmatpush.msra.mxu3 %v6628_v8  ;;  %5467 = vmatpush.msra.mxu2 %v6692_v11  ;;  %v5551_v8 = vld [vmem:[%s12399_s15 + $0x1c8] sm:$0xff]  ;;  %v5510_v11 = vld [vmem:[%s12399_s15 + $0x80] sm:$0xff] }
 0x645   : > { %5408 = vmatmul.f32.vlgmr.msra.gmra.mxu1 %v11990_v13  ;;  %6727 = vmatmul.msk.f32.vlgmr.msrb.gmra.mxu0 %vm4601_vm13, %v11899_v45 }
 0x646   : > { %5448 = vmatmul.f32.vlgmr.msra.gmra.mxu3 %v11990_v13  ;;  %6728 = vmatmul.msk.f32.vlgmr.msra.gmra.mxu2 %vm4601_vm13, %v11899_v45  ;;  %v5506_v45 = vld [vmem:[%s12399_s15 + $0x60] sm:$0xff] }
 0x647   : > { %5565 = vmatpush.msra.mxu0 %v5509_v27  ;;  %5585 = vmatpush.msrb.mxu1 %v5525_v35  ;;  %v5518_v13 = vld [vmem:[%s12399_s15 + $0xc0] sm:$0xff]  ;;  %v5531_v27 = vld [vmem:[%s12399_s15 + $0x128] sm:$0xff] }
 0x648   : > { %5605 = vmatpush.msrb.mxu2 %v5541_v53  ;;  %6729 = vmatpush.msk.msrb.mxu3 %vm595_vm0, %v5556_v6  ;;  %v5527_v53 = vld [vmem:[%s12399_s15 + $0x108] sm:$0xff] }
 0x649   : > { %5566 = vmatpush.msra.mxu0 %v5508_v20  ;;  %5586 = vmatpush.msrb.mxu1 %v5524_v43  ;;  %v12217_v57 = vpop.f32.mrf.mxu2  ;;  %v5550_v20 = vld [vmem:[%s12399_s15 + $0x1c0] sm:$0xff]  ;;  %v5529_v43 = vld [vmem:[%s12399_s15 + $0x118] sm:$0xff] }
 0x64a   : > { %5606 = vmatpush.msrb.mxu2 %v5540_v0  ;;  %5627 = vmatpush.msrb.mxu3 %v5555_v17  ;;  %v5526_v0 = vld [vmem:[%s12399_s15 + $0x100] sm:$0xff] }
 0x64b   : > { %5567 = vmatpush.msra.mxu0 %v5507_v30  ;;  %5587 = vmatpush.msrb.mxu1 %v5523_v48 }
 0x64c   : > { %5607 = vmatpush.msrb.mxu2 %v5539_v24  ;;  %5628 = vmatpush.msrb.mxu3 %v5554_v63  ;;  %v5544_v24 = vld [vmem:[%s12399_s15 + $0x190] sm:$0xff] }
 0x64d   : > { %5568 = vmatpush.msra.mxu0 %v5506_v45  ;;  %5588 = vmatpush.msrb.mxu1 %v5522_v49  ;;  %v5530_v45 = vld [vmem:[%s12399_s15 + $0x120] sm:$0xff]  ;;  %v5528_v49 = vld [vmem:[%s12399_s15 + $0x110] sm:$0xff] }
 0x64e   : > { %5608 = vmatpush.msrb.mxu2 %v5538_v61  ;;  %5629 = vmatpush.msrb.mxu3 %v5553_v16  ;;  %v5543_v61 = vld [vmem:[%s12399_s15 + $0x188] sm:$0xff]  ;;  %v4722_v16 = vadd.f32 %v12160_v34, %v12149_v56 }
 0x64f   : > { %5569 = vmatpush.msra.mxu0 %v5505_v37  ;;  %5589 = vmatpush.msrb.mxu1 %v5521_v58  ;;  %v5549_v37 = vld [vmem:[%s12399_s15 + $0x1b8] sm:$0xff] }
 0x650   : > { %5609 = vmatpush.msrb.mxu2 %v5537_v3  ;;  %5630 = vmatpush.msrb.mxu3 %v5552_v9 }
 0x651   : > { %5570 = vmatpush.msra.mxu0 %v5504_v44  ;;  %5590 = vmatpush.msrb.mxu1 %v5520_v28  ;;  %v5548_v44 = vld [vmem:[%s12399_s15 + $0x1b0] sm:$0xff]  ;;  %v4642_v28 = vadd.f32 %v12123_v40, %v12136_v19  ;;  %v5545_v40 = vld [vmem:[%s12399_s15 + $0x198] sm:$0xff] }
 0x652   : > { %5610 = vmatpush.msrb.mxu2 %v5536_v59  ;;  %5631 = vmatpush.msrb.mxu3 %v5551_v8  ;;  %v5542_v59 = vld [vmem:[%s12399_s15 + $0x180] sm:$0xff] }
 0x653   : > { %5571 = vmatpush.msra.mxu0 %v5503_v60  ;;  %5591 = vmatpush.msrb.mxu1 %v5519_v38  ;;  %v4788_v38 = vadd.f32 %v12192_v22, %v4642_v28  ;;  %v5476_v22 = vld [vmem:[%s12398_s14] sm:$0xf] }
 0x654   : > { %5611 = vmatpush.msrb.mxu2 %v5535_v33  ;;  %5632 = vmatpush.msrb.mxu3 %v5550_v20  ;;  %v5480_v20 = vperm.slane %v5476_v22, 2 }
 0x655   : > { %5572 = vmatpush.msra.mxu0 %v5502_v51  ;;  %5592 = vmatpush.msrb.mxu1 %v5518_v13  ;;  %v5547_v51 = vld [vmem:[%s12399_s15 + $0x1a8] sm:$0xff] }
 0x656   : > { %v12232_v25 = vpop.f32.mrf.mxu1  ;;  %v12234_v31 = vpop.f32.mrf.mxu0  ;;  %5612 = vmatpush.msrb.mxu2 %v5534_v1  ;;  %5633 = vmatpush.msrb.mxu3 %v5549_v37 }
 0x657   : > { %5573 = vmatpush.msra.mxu0 %v5501_v62  ;;  %5593 = vmatpush.msrb.mxu1 %v5517_v55  ;;  %v4808_v55 = vadd.f32 %v12190_v7, %v4788_v38 }
 0x658   : > { %5613 = vmatpush.msrb.mxu2 %v5533_v2  ;;  %5634 = vmatpush.msrb.mxu3 %v5548_v44  ;;  %v4868_v2 = vadd.f32 %v12232_v25, %v4722_v16 }
 0x659   : > { %5574 = vmatpush.msra.mxu0 %v5500_v26  ;;  %5594 = vmatpush.msrb.mxu1 %v5516_v4  ;;  %v5546_v26 = vld [vmem:[%s12399_s15 + $0x1a0] sm:$0xff] }
 0x65a   : > { %5614 = vmatpush.msrb.mxu2 %v5532_v47  ;;  %5635 = vmatpush.msrb.mxu3 %v5547_v51 }
 0x65b   : > { %5575 = vmatpush.msra.mxu0 %v5499_v39  ;;  %5595 = vmatpush.msrb.mxu1 %v5515_v12  ;;  %v5478_v12 = vperm.slane %v5476_v22, 0 }
 0x65c   : > { %5615 = vmatpush.msrb.mxu2 %v5531_v27  ;;  %5636 = vmatpush.msrb.mxu3 %v5546_v26 }
 0x65d   : > { %5576 = vmatpush.msra.mxu0 %v5498_v36  ;;  %5596 = vmatpush.msrb.mxu1 %v5514_v14  ;;  %v12272_v21 = vpop.f32.mrf.mxu3  ;;  %v12274_v46 = vpop.f32.mrf.mxu2  ;;  %v4682_v36 = vadd.f32 %v12125_v29, %v12147_v50 }
 0x65e   : > { %5616 = vmatpush.msrb.mxu2 %v5530_v45  ;;  %5637 = vmatpush.msrb.mxu3 %v5545_v40 }
 0x65f   : > { %5577 = vmatpush.msra.mxu0 %v5497_v52  ;;  %5597 = vmatpush.msrb.mxu1 %v5513_v42  ;;  %v4828_v3 = vadd.f32 %v12217_v57, %v4682_v36  ;;  %v5479_v42 = vperm.slane %v5476_v22, 1 }
 0x660   : > { %5617 = vmatpush.msrb.mxu2 %v5529_v43  ;;  %5638 = vmatpush.msrb.mxu3 %v5544_v24 }
 0x661   : > { %5578 = vmatpush.msra.mxu0 %v5496_v10  ;;  %5598 = vmatpush.msrb.mxu1 %v5512_v18  ;;  %v4848_v7 = vadd.f32 %v12215_v15, %v4828_v3  ;;  %v4888_v15 = vadd.f32 %v12234_v31, %v4868_v2 }
 0x662   : > { %5618 = vmatpush.msrb.mxu2 %v5528_v49  ;;  %5639 = vmatpush.msrb.mxu3 %v5543_v61 }
 0x663   : > { %5579 = vmatpush.msra.mxu0 %v5495_v23  ;;  %5599 = vmatpush.msrb.mxu1 %v5511_v5  ;;  %v4762_v5 = vadd.f32 %v12188_v54, %v12186_v41 }
 0x664   : > { %5619 = vmatpush.msrb.mxu2 %v5527_v53  ;;  %5640 = vmatpush.msrb.mxu3 %v5542_v59 }
 0x665   : > { %5580 = vmatpush.msra.mxu0 %v5494_v32  ;;  %5600 = vmatpush.msrb.mxu1 %v5510_v11 }
 0x666   : > { %5620 = vmatpush.msrb.mxu2 %v5526_v0 }
 0x66a   : > { %v5076_v35 = vpop.f32.mrf.mxu1 }
 0x670   : > { %v5116_v48 = vpop.f32.mrf.mxu3 }
 0x679   : > { %v5056_v30 = vpop.f32.mrf.mxu0 }
 0x67a   : > { %v5077_v19 = vadd.f32 %v5076_v35, %v5056_v30  ;;  %v4908_v35 = vadd.f32 %v12272_v21, %v4762_v5  ;;  %v5557_v21 = vld [vmem:[%s12400_s16] sm:$0x1] }
 0x67c   : > { %v5199_v6 = vadd.f32 %v5077_v19, %v4808_v55  ;;  %v4928_v34 = vadd.f32 %v12274_v46, %v4908_v35 }
 0x67f   : > { %v5096_v60 = vpop.f32.mrf.mxu2 }
 0x680   : > { %v5117_v29 = vadd.f32 %v5116_v48, %v5096_v60  ;;  %v5481_v48 = vperm.slane %v5476_v22, 3 }
 0x682   : > { %v5200_v33 = vadd.f32 %v5117_v29, %v4848_v7 }
 0x68c   : > { %v5136_v58 = vpop.f32.mrf.mxu1  ;;  %v5156_v62 = vpop.f32.mrf.mxu0 }
 0x68d   : > { %v5157_v9 = vadd.f32 %v5156_v62, %v5136_v58 }
 0x68f   : > { %v5201_v11 = vadd.f32 %v5157_v9, %v4888_v15 }
 0x693   : > { %v5176_v39 = vpop.f32.mrf.mxu3  ;;  %v5196_v13 = vpop.f32.mrf.mxu2 }
 0x694   : > { %v5197_v45 = vadd.f32 %v5196_v13, %v5176_v39 }
 0x696   : > { %v5202_v44 = vadd.f32 %v5197_v45, %v4928_v34 }
 0x6a0   : > { %v5349_v52 = vpop.f32.mrf.mxu1 }
 0x6a6   : > { %v5389_v23 = vpop.f32.mrf.mxu3 }
 0x6af   : > { %v5329_v4 = vpop.f32.mrf.mxu0 }
 0x6b0   : > { %v5350_v10 = vadd.f32 %v5349_v52, %v5329_v4 }
 0x6b2   : > { %v5472_v50 = vadd.f32 %v5350_v10, %v5199_v6 }
 0x6b4   : > { %v5486_v17 = vadd.f32 %v5478_v12, %v5472_v50 }
 0x6b5   : > { %v5369_v14 = vpop.f32.mrf.mxu2 }
 0x6b6   : > { %v5490_v63 = vmax.f32 %v5486_v17, 0.0  ;;  %v5390_v32 = vadd.f32 %v5389_v23, %v5369_v14 }
 0x6b8   : > { %v5473_v57 = vadd.f32 %v5390_v32, %v5200_v33  ;;  %5581 = vmatmul.f32.vlgmr.msra.gmra.mxu0 %v5490_v63 }
 0x6ba   : > { %v5487_v1 = vadd.f32 %v5479_v42, %v5473_v57 }
 0x6bc   : > { %v5491_v18 = vmax.f32 %v5487_v1, 0.0 }
 0x6be   : > { %5601 = vmatmul.f32.vlgmr.msrb.gmra.mxu1 %v5491_v18 }
 0x6c2   : > { %v5409_v47 = vpop.f32.mrf.mxu1  ;;  %v5429_v8 = vpop.f32.mrf.mxu0 }
 0x6c3   : > { %v5430_v27 = vadd.f32 %v5429_v8, %v5409_v47 }
 0x6c5   : > { %v5474_v30 = vadd.f32 %v5430_v27, %v5201_v11 }
 0x6c7   : > { %v5488_v56 = vadd.f32 %v5480_v20, %v5474_v30 }
 0x6c9   : > { %v5492_v25 = vmax.f32 %v5488_v56, 0.0  ;;  %v5449_v37 = vpop.f32.mrf.mxu3  ;;  %v5469_v43 = vpop.f32.mrf.mxu2 }
 0x6ca   : > { %v5470_v31 = vadd.f32 %v5469_v43, %v5449_v37 }
 0x6cb   : > { %5621 = vmatmul.f32.vlgmr.msrb.gmra.mxu2 %v5492_v25 }
 0x6cc   : > { %v5475_v41 = vadd.f32 %v5470_v31, %v5202_v44 }
 0x6ce   : > { %v5489_v54 = vadd.f32 %v5481_v48, %v5475_v41 }
 0x6d0   : > { %v5493_v60 = vmax.f32 %v5489_v54, 0.0 }
 0x6d2   : > { %6730 = vmatmul.msk.f32.vlgmr.msrb.gmra.mxu3 %vm5558_vm14, %v5493_v60 }
 0x735   : > { %v5582_v49 = vpop.f32.mrf.mxu0 }
 0x736   : > { %v5583_v58 = vadd.f32 %v5582_v49, %v5557_v21 }
 0x73b   : > { %v5602_v51 = vpop.f32.mrf.mxu1 }
 0x73c   : > { %v5603_v62 = vadd.f32 %v5602_v51, %v5583_v58 }
 0x74e   : > { %v5622_v46 = vpop.f32.mrf.mxu2 }
 0x74f   : > { %v5623_v28 = vadd.f32 %v5622_v46, %v5603_v62 }
 0x755   : > { %v5642_v53 = vpop.f32.mrf.mxu3 }
 0x756   : > { %v5643_v26 = vadd.f32 %v5642_v53, %v5623_v28 }
 0x758   : > { %v5646_v38 = vsel %vm5645_vm15, %v5643_v26, -inf }
 0x759   : > { %5647 = vmax.xlane.f32.xlu0 %v5646_v38 }
 0x7cc   : > { %v5648_v0 = vpop.xlane.xlu0 %5647 }
 0x7cd   : > { %v5649_v40 = vsub.f32 %v5643_v26, %v5648_v0 }
 0x7cf   : > { %v5650_v19 = vmul.f32 1.442695, %v5649_v40 }
 0x7d1   : > { %6777 = vpow2.f32 %v5650_v19 }
 0x7d7   : > { %v6778_v24 = vpop.eup %6777 }
 0x7d8   : > { %v5652_v39 = vsel %vm5645_vm15, %v6778_v24, 0.0 }
 0x7d9   : > { %5653 = vadd.xlane.f32.xlu0 %v5652_v39 }
 0x84c   : > { %v5654_v13 = vpop.xlane.xlu0 %5653 }
 0x84d   : > { %6779 = vlog2.f32 %v5654_v13 }
 0x853   : > { %v6780_v22 = vpop.eup %6779 }
 0x854   : > { %v5656_v36 = vmul.f32 0.6931472, %v6780_v22 }
 0x856   : > { %v5657_v55 = vsub.f32 %v5649_v40, %v5656_v36 }
 0x858   : > { %5658 = vst [vmem:[%s540_s18] sm:$0x1] %v5657_v55 }
 0x859   : > { %6808 = shalt.err (!%p6805_p3)
}
 0x85a   : > { %6738 = dma.vmem_to_hbm [thread:$0]  (%p6973_p5), %s5671_s20, 16, %s5673_s24, %s5660_s22  }
 0x85b PF: > { %s12441_s30 = sld [smem:[#allocation9_spill]] }
 0x85c   : > { %s12442_s21 = sld [smem:[#allocation7_spill]] }
 0x861   : > { %p6744_p4 = scmp.ge.s32.totalorder %s12441_s30, 2 }
 0x862   : > { %s5684_s3 = sand.u32 1, %s12442_s21  }
 0x863   : > { %p6741_p7 = pnand %p6744_p4, %p6977_p6  ;;  %s5685_s19 = scalar_lea.sflag [#allocation5], %s5684_s3 }
 0x865   : > { %p6742_p8 = pneg %p6741_p7 }
 0x867   : > { %6826 = dma.done.wait (%p6742_p8), %s5685_s19, 16  }
 0x868   : > { %6828 = vsyncadd (%p6742_p8), %s5685_s19, 4294967280  ;;  %s12444_s27 = sld [smem:[#allocation10_spill]]  ;;  %s12447_s24 = smov %s6835_s25 }
 0x869   : > { %s12445_s2 = sld [smem:[#allocation8_spill]] }
 0x86a   : > { %s12446_s26 = sld [smem:[#allocation11_spill]] }
 0x86e   : > { %p27_p9 = scmp.ge.s32.totalorder %s12444_s27, 4  }
 0x86f   : > { %s12448_s25 = smov %s12445_s2 }
 0x870   :  { %29 = sbr.rel (!%p27_p9) target bundleno = 8 (0x8), region = 137 }
 0x875   :  { %5690 = vsyncpa [#allocation5], 1 }
 0x876   :  { %5692 = vsyncpa [#allocation5 + $0x1], 1 }

</bundles_post_ra>
